<compile_context>
chip_gen: v6e
topology: v6e:2x2x1
jax: 0.10.0
libtpu: 0.0.40
codegen_flags: <defaults>
</compile_context>

<pallas_src>
import jax
import jax.numpy as jnp
from jax import lax
from jax.experimental import pallas as pl
from jax.experimental.pallas import tpu as pltpu

C_MID = 32                       # bottleneck width
K1, K2, K3 = 39, 19, 9           # conv kernel sizes
P1, P2, P3 = 19, 9, 4            # "same" paddings
C_OUT = 4 * C_MID                # 128 concatenated channels
C_FUSE = 3 * C_MID               # 96 fused conv-branch channels
BN_EPS = 1e-5


def _pick_tc_taps():
    # v6e/v7x MXUs are 256 deep -> stack 8 taps (K = 8*32 = 256) per matmul;
    # v5e (and unknown chips) have 128-deep MXUs -> 4 taps (K = 128).
    # Any value is functionally correct; this only affects MXU utilisation.
    try:
        kind = jax.devices()[0].device_kind.lower()
    except Exception:
        return 4
    return 8 if ("v6" in kind or "v7" in kind) else 4


TC_TAPS = _pick_tc_taps()                     # taps stacked per matmul
KP = ((K1 + TC_TAPS - 1) // TC_TAPS) * TC_TAPS  # 39 padded up -> 40
NCHUNK = KP // TC_TAPS                        # 5 (8-tap) or 10 (4-tap) chunks
RPAD = KP - 1 - P1                            # right halo of padded scratch


# ---------------------------------------------------------------------------
# Kernel 1: merged 1x1 convs + fused 3-branch conv + maxpool branch, plus
# packed BN partial sums (per-batch per-channel [sum | sum-of-squares]).
# Each grid step handles Bt batch elements.
# ---------------------------------------------------------------------------
def inception_kernel(x_ref, wbp_ref, wf_ref, y_ref, stats_ref, pad_ref):
    Bt, C_in, L = x_ref.shape

    for b in range(Bt):                       # static unroll over batch sub-block
        x = x_ref[b]                          # (C_in, L)

        # MaxPool1d(kernel=3, stride=1, padding=1): -inf pad, max of 3 shifts.
        ninf = jnp.full((C_in, 1), -jnp.inf, jnp.float32)
        xp = jnp.concatenate([ninf, x, ninf], axis=1)              # (C_in, L+2)
        pooled = jnp.maximum(jnp.maximum(xp[:, 0:L], xp[:, 1:L + 1]),
                             xp[:, 2:L + 2])

        # Merged bottleneck + pool-branch 1x1 convs: one K=2*C_in matmul with
        # a block-diagonal lhs instead of two tiny K=C_in matmuls.
        rhs0 = jnp.concatenate([x, pooled], axis=0)                # (2*C_in, L)
        bp = jnp.dot(wbp_ref[...], rhs0,
                     preferred_element_type=jnp.float32)           # (64, L)
        bottled = bp[0:C_MID]                                      # (32, L)
        y4 = bp[C_MID:2 * C_MID]                                   # (32, L)

        # Shared zero-padded scratch: [P1 zeros | bottled | RPAD zeros].
        # Halos re-zeroed every iteration so megacore grid splitting stays
        # correct (scratch persists across grid steps).
        pad_ref[:, 0:P1] = jnp.zeros((C_MID, P1), jnp.float32)
        pad_ref[:, P1:P1 + L] = bottled
        pad_ref[:, P1 + L:L + KP - 1] = jnp.zeros((C_MID, RPAD), jnp.float32)

        # Fused conv1|conv2|conv3, fully-unrolled tap-chunk loop: each chunk
        # is one (96, TC_TAPS*32) @ (TC_TAPS*32, L) MXU matmul built from
        # TC_TAPS statically-shifted slices of the padded scratch.
        acc = None
        for c in range(NCHUNK):
            base = c * TC_TAPS                                     # static
            rhs = jnp.concatenate(
                [pad_ref[:, base + k:base + k + L] for k in range(TC_TAPS)],
                axis=0)                                            # (K, L)
            part = jnp.dot(wf_ref[c], rhs,
                           preferred_element_type=jnp.float32)     # (96, L)
            acc = part if acc is None else acc + part

        y = jnp.concatenate([acc, y4], axis=0)                     # (128, L)
        y_ref[b] = y
        # Packed BN batch statistics: one (C_OUT, 2) store per batch element.
        stats_ref[b] = jnp.concatenate(
            [jnp.sum(y, axis=1, keepdims=True),
             jnp.sum(y * y, axis=1, keepdims=True)], axis=1)


# ---------------------------------------------------------------------------
# Kernel 2: fused BatchNorm (precomputed per-channel scale/shift) + ReLU,
# multi-batch blocks, writing in-place over y (input_output_aliases).
# ---------------------------------------------------------------------------
def bn_relu_kernel(y_ref, scale_ref, shift_ref, o_ref):
    scale = scale_ref[...][None, :, :]          # (1, C_OUT, 1)
    shift = shift_ref[...][None, :, :]
    o_ref[...] = jnp.maximum(y_ref[...] * scale + shift, 0.0)


# ---------------------------------------------------------------------------
# Host-side weight fusion: (w1|w2|w3) -> (NCHUNK, 96, TC_TAPS*32)
# ---------------------------------------------------------------------------
def _fuse_conv_weights(w1, w2, w3):
    wf = jnp.zeros((KP, C_FUSE, C_MID), jnp.float32)               # (40, 96, 32)
    wf = wf.at[0:K1, 0:C_MID, :].set(jnp.transpose(w1, (2, 0, 1)))
    o2 = (K1 - K2) // 2                                            # 10
    wf = wf.at[o2:o2 + K2, C_MID:2 * C_MID, :].set(jnp.transpose(w2, (2, 0, 1)))
    o3 = (K1 - K3) // 2                                            # 15
    wf = wf.at[o3:o3 + K3, 2 * C_MID:3 * C_MID, :].set(jnp.transpose(w3, (2, 0, 1)))
    # chunk taps: [c, o, k*32 + i] = wf[c*TC_TAPS + k, o, i]
    wf = wf.reshape(NCHUNK, TC_TAPS, C_FUSE, C_MID)
    wf = jnp.transpose(wf, (0, 2, 1, 3)).reshape(NCHUNK, C_FUSE, TC_TAPS * C_MID)
    return wf


def _block_diag_1x1(wb, wcb):
    # [[wb, 0], [0, wcb]] so bottleneck and pool-branch 1x1 run as one matmul.
    C_in = wb.shape[1]
    wbp = jnp.zeros((2 * C_MID, 2 * C_in), jnp.float32)
    wbp = wbp.at[0:C_MID, 0:C_in].set(wb)
    wbp = wbp.at[C_MID:, C_in:].set(wcb)
    return wbp


def _pick_bt(B, L, target_bytes):
    # Largest divisor of B whose (Bt, C_OUT, L) f32 block stays under
    # target_bytes while leaving >= 2 grid steps for megacore when possible.
    cap = max(1, target_bytes // (C_OUT * L * 4))
    if B >= 2:
        cap = min(cap, max(1, B // 2))
    bt = 1
    for d in range(1, min(B, cap) + 1):
        if B % d == 0:
            bt = d
    return bt


# ---------------------------------------------------------------------------
# Wrapper
# ---------------------------------------------------------------------------
@jax.jit
def inception_block_1d(x, params):
    wb, w1, w2, w3, wcb, gamma, beta = params
    B, C_in, L = x.shape
    wf = _fuse_conv_weights(w1, w2, w3)
    wbp = _block_diag_1x1(wb, wcb)

    bt = _pick_bt(B, L, 2 * 1024 * 1024)
    y, stats = pl.pallas_call(
        inception_kernel,
        out_shape=(jax.ShapeDtypeStruct((B, C_OUT, L), jnp.float32),
                   jax.ShapeDtypeStruct((B, C_OUT, 2), jnp.float32)),
        grid=(B // bt,),
        in_specs=[
            pl.BlockSpec((bt, C_in, L), lambda i: (i, 0, 0)),
            pl.BlockSpec((2 * C_MID, 2 * C_in), lambda i: (0, 0)),
            pl.BlockSpec((NCHUNK, C_FUSE, TC_TAPS * C_MID), lambda i: (0, 0, 0)),
        ],
        out_specs=(
            pl.BlockSpec((bt, C_OUT, L), lambda i: (i, 0, 0)),
            pl.BlockSpec((bt, C_OUT, 2), lambda i: (i, 0, 0)),
        ),
        scratch_shapes=[pltpu.VMEM((C_MID, L + KP - 1), jnp.float32)],
        compiler_params=pltpu.CompilerParams(dimension_semantics=("parallel",)),
    )(x, wbp, wf)

    # BatchNorm1d (training-mode batch stats, biased var) from kernel-1 sums.
    # Note: E[y^2] - mean^2 in f32; fine at these scales, use a two-pass
    # reduction if B*L or activation magnitudes grow very large.
    n = B * L
    mean = jnp.sum(stats[:, :, 0], axis=0) / n                       # (128,)
    var = jnp.maximum(jnp.sum(stats[:, :, 1], axis=0) / n - mean * mean, 0.0)
    inv_std = gamma / jnp.sqrt(var + BN_EPS)
    scale = inv_std.reshape(C_OUT, 1)
    shift = (beta - mean * inv_std).reshape(C_OUT, 1)

    bt2 = _pick_bt(B, L, 4 * 1024 * 1024)
    out = pl.pallas_call(
        bn_relu_kernel,
        out_shape=jax.ShapeDtypeStruct((B, C_OUT, L), jnp.float32),
        grid=(B // bt2,),
        in_specs=[
            pl.BlockSpec((bt2, C_OUT, L), lambda i: (i, 0, 0)),
            pl.BlockSpec((C_OUT, 1), lambda i: (0, 0)),
            pl.BlockSpec((C_OUT, 1), lambda i: (0, 0)),
        ],
        out_specs=pl.BlockSpec((bt2, C_OUT, L), lambda i: (i, 0, 0)),
        input_output_aliases={0: 0},
        compiler_params=pltpu.CompilerParams(dimension_semantics=("parallel",)),
    )(y, scale, shift)
    return out


# ---------------------------------------------------------------------------
# Pure-JAX reference (lax convs) for verification
# ---------------------------------------------------------------------------
def reference(x, params):
    wb, w1, w2, w3, wcb, gamma, beta = params
    dn = ('NCH', 'OIH', 'NCH')

    def conv(inp, w, pad):
        return lax.conv_general_dilated(inp, w, window_strides=(1,),
                                        padding=[(pad, pad)],
                                        dimension_numbers=dn)

    bottled = conv(x, wb[:, :, None], 0)
    pooled = lax.reduce_window(x, -jnp.inf, lax.max, (1, 1, 3), (1, 1, 1),
                               [(0, 0), (0, 0), (1, 1)])
    y = jnp.concatenate([conv(bottled, w1, P1),
                         conv(bottled, w2, P2),
                         conv(bottled, w3, P3),
                         conv(pooled, wcb[:, :, None], 0)], axis=1)
    mean = jnp.mean(y, axis=(0, 2), keepdims=True)
    var = jnp.mean((y - mean) ** 2, axis=(0, 2), keepdims=True)
    yn = (y - mean) / jnp.sqrt(var + BN_EPS)
    yn = yn * gamma[None, :, None] + beta[None, :, None]
    return jnp.maximum(yn, 0.0)


if __name__ == "__main__":
    B, C_IN, L = 4, 4, 128        # B=4 exercises the multi-batch (Bt=2) blocks
    key = jax.random.PRNGKey(0)
    ks = jax.random.split(key, 8)

    x = jax.random.normal(ks[0], (B, C_IN, L), jnp.float32)
    wb = jax.random.normal(ks[1], (C_MID, C_IN), jnp.float32) * 0.2
    w1 = jax.random.normal(ks[2], (C_MID, C_MID, K1), jnp.float32) * 0.05
    w2 = jax.random.normal(ks[3], (C_MID, C_MID, K2), jnp.float32) * 0.08
    w3 = jax.random.normal(ks[4], (C_MID, C_MID, K3), jnp.float32) * 0.1
    wcb = jax.random.normal(ks[5], (C_MID, C_IN), jnp.float32) * 0.2
    gamma = 1.0 + 0.1 * jax.random.normal(ks[6], (C_OUT,), jnp.float32)
    beta = 0.1 * jax.random.normal(ks[7], (C_OUT,), jnp.float32)
    params = (wb, w1, w2, w3, wcb, gamma, beta)

    out = jax.block_until_ready(inception_block_1d(x, params))
    ref = jax.block_until_ready(reference(x, params))

    assert out.shape == (B, C_OUT, L)
    assert jnp.allclose(out, ref, atol=1e-3, rtol=1e-3), \
        f"max abs err {jnp.max(jnp.abs(out - ref))}"
    print("KERNEL_OK")
</pallas_src>

<mosaic_0001>
module attributes {stable_mosaic.version = 11 : i64} {
  func.func @bn_relu_kernel(%arg0: i32, %arg1: memref<2x128x128xf32, #tpu.memory_space<vmem>>, %arg2: memref<128x1xf32, #tpu.memory_space<vmem>>, %arg3: memref<128x1xf32, #tpu.memory_space<vmem>>, %arg4: memref<2x128x128xf32, #tpu.memory_space<vmem>>) attributes {dimension_semantics = [#tpu.dimension_semantics<parallel>], iteration_bounds = array<i64: 2>, scalar_prefetch = 0 : i64, scratch_operands = 0 : i64, tpu.core_type = #tpu.core_type<tc>, window_params = [{transform_indices = @transform_0, window_bounds = array<i64: 2, 128, 128>}, {pipeline_mode = #tpu.pipeline_mode<synchronous>, transform_indices = @transform_1, window_bounds = array<i64: 128, 1>}, {pipeline_mode = #tpu.pipeline_mode<synchronous>, transform_indices = @transform_2, window_bounds = array<i64: 128, 1>}, {transform_indices = @transform_3, window_bounds = array<i64: 2, 128, 128>}]} {
    %c0 = arith.constant 0 : index
    %c0_0 = arith.constant 0 : index
    %0 = vector.load %arg2[%c0, %c0_0] : memref<128x1xf32, #tpu.memory_space<vmem>>, vector<128x1xf32>
    %1 = vector.shape_cast %0 : vector<128x1xf32> to vector<1x128x1xf32>
    %c0_1 = arith.constant 0 : index
    %c0_2 = arith.constant 0 : index
    %2 = vector.load %arg3[%c0_1, %c0_2] : memref<128x1xf32, #tpu.memory_space<vmem>>, vector<128x1xf32>
    %3 = vector.shape_cast %2 : vector<128x1xf32> to vector<1x128x1xf32>
    %c0_3 = arith.constant 0 : index
    %c0_4 = arith.constant 0 : index
    %c0_5 = arith.constant 0 : index
    %4 = vector.load %arg1[%c0_3, %c0_4, %c0_5] : memref<2x128x128xf32, #tpu.memory_space<vmem>>, vector<2x128x128xf32>
    %5 = vector.broadcast %1 : vector<1x128x1xf32> to vector<2x128x128xf32>
    %6 = arith.mulf %4, %5 : vector<2x128x128xf32>
    %7 = vector.broadcast %3 : vector<1x128x1xf32> to vector<2x128x128xf32>
    %8 = arith.addf %6, %7 : vector<2x128x128xf32>
    %cst = arith.constant 0.000000e+00 : f32
    %9 = vector.broadcast %cst : f32 to vector<2x128x128xf32>
    %10 = arith.maximumf %8, %9 : vector<2x128x128xf32>
    %c0_6 = arith.constant 0 : index
    %c0_7 = arith.constant 0 : index
    %c0_8 = arith.constant 0 : index
    %11 = vector.load %arg4[%c0_6, %c0_7, %c0_8] : memref<2x128x128xf32, #tpu.memory_space<vmem>>, vector<2x128x128xf32>
    tpu.vector_store %arg4[%c0_6, %c0_7, %c0_8], %10 {strides = array<i32>} : memref<2x128x128xf32, #tpu.memory_space<vmem>>, vector<2x128x128xf32>,
    return
  }
  func.func @transform_0(%arg0: i32) -> (i32, i32, i32) {
    %c0_i32 = arith.constant 0 : i32
    %c0_i32_0 = arith.constant 0 : i32
    %c0_i32_1 = arith.constant 0 : i32
    return %arg0, %c0_i32, %c0_i32_0 : i32, i32, i32
  }
  func.func @transform_1(%arg0: i32) -> (i32, i32) {
    %c0_i32 = arith.constant 0 : i32
    %c0_i32_0 = arith.constant 0 : i32
    %c0_i32_1 = arith.constant 0 : i32
    return %c0_i32, %c0_i32_0 : i32, i32
  }
  func.func @transform_2(%arg0: i32) -> (i32, i32) {
    %c0_i32 = arith.constant 0 : i32
    %c0_i32_0 = arith.constant 0 : i32
    %c0_i32_1 = arith.constant 0 : i32
    return %c0_i32, %c0_i32_0 : i32, i32
  }
  func.func @transform_3(%arg0: i32) -> (i32, i32, i32) {
    %c0_i32 = arith.constant 0 : i32
    %c0_i32_0 = arith.constant 0 : i32
    %c0_i32_1 = arith.constant 0 : i32
    return %arg0, %c0_i32, %c0_i32_0 : i32, i32, i32
  }
}

module attributes {stable_mosaic.version = 11 : i64} {
  func.func @inception_kernel(%arg0: i32, %arg1: memref<2x4x128xf32, #tpu.memory_space<vmem>>, %arg2: memref<64x8xf32, #tpu.memory_space<vmem>>, %arg3: memref<10x96x128xf32, #tpu.memory_space<vmem>>, %arg4: memref<2x128x128xf32, #tpu.memory_space<vmem>>, %arg5: memref<2x128x2xf32, #tpu.memory_space<vmem>>, %arg6: memref<32x167xf32, #tpu.memory_space<vmem>>) attributes {dimension_semantics = [#tpu.dimension_semantics<parallel>], iteration_bounds = array<i64: 2>, scalar_prefetch = 0 : i64, scratch_operands = 1 : i64, tpu.core_type = #tpu.core_type<tc>, window_params = [{transform_indices = @transform_0, window_bounds = array<i64: 2, 4, 128>}, {pipeline_mode = #tpu.pipeline_mode<synchronous>, transform_indices = @transform_1, window_bounds = array<i64: 64, 8>}, {pipeline_mode = #tpu.pipeline_mode<synchronous>, transform_indices = @transform_2, window_bounds = array<i64: 10, 96, 128>}, {transform_indices = @transform_3, window_bounds = array<i64: 2, 128, 128>}, {transform_indices = @transform_4, window_bounds = array<i64: 2, 128, 2>}]} {
    %c0 = arith.constant 0 : index
    %c0_0 = arith.constant 0 : index
    %c0_1 = arith.constant 0 : index
    %0 = vector.load %arg1[%c0, %c0_0, %c0_1] : memref<2x4x128xf32, #tpu.memory_space<vmem>>, vector<1x4x128xf32>
    %1 = vector.shape_cast %0 : vector<1x4x128xf32> to vector<4x128xf32>
    %cst = arith.constant 0xFF800000 : f32
    %2 = vector.broadcast %cst : f32 to vector<4x1xf32>
    %3 = tpu.concatenate %2, %1, %2 in 1 : vector<4x1xf32>, vector<4x128xf32>, vector<4x1xf32> -> vector<4x130xf32>
    %4 = vector.extract_strided_slice %3 {offsets = [0, 0], sizes = [4, 128], strides = [1, 1]} : vector<4x130xf32> to vector<4x128xf32>
    %5 = vector.extract_strided_slice %3 {offsets = [0, 1], sizes = [4, 128], strides = [1, 1]} : vector<4x130xf32> to vector<4x128xf32>
    %6 = arith.maximumf %4, %5 : vector<4x128xf32>
    %7 = vector.extract_strided_slice %3 {offsets = [0, 2], sizes = [4, 128], strides = [1, 1]} : vector<4x130xf32> to vector<4x128xf32>
    %8 = arith.maximumf %6, %7 : vector<4x128xf32>
    %9 = tpu.concatenate %1, %8 in 0 : vector<4x128xf32>, vector<4x128xf32> -> vector<8x128xf32>
    %c0_2 = arith.constant 0 : index
    %c0_3 = arith.constant 0 : index
    %10 = vector.load %arg2[%c0_2, %c0_3] : memref<64x8xf32, #tpu.memory_space<vmem>>, vector<64x8xf32>
    %cst_4 = arith.constant dense<0.000000e+00> : vector<64x128xf32>
    %11 = tpu.matmul %10, %9, %cst_4 {dimension_numbers = #tpu.dot_dimension_numbers<[1], [0], [0], [1], [0, 0, 1, 1], [], []>} : vector<64x8xf32>, vector<8x128xf32>, vector<64x128xf32> -> vector<64x128xf32>
    %12 = vector.extract_strided_slice %11 {offsets = [0, 0], sizes = [32, 128], strides = [1, 1]} : vector<64x128xf32> to vector<32x128xf32>
    %13 = vector.extract_strided_slice %11 {offsets = [32, 0], sizes = [32, 128], strides = [1, 1]} : vector<64x128xf32> to vector<32x128xf32>
    %cst_5 = arith.constant 0.000000e+00 : f32
    %14 = vector.broadcast %cst_5 : f32 to vector<32x19xf32>
    %c0_6 = arith.constant 0 : index
    %c0_7 = arith.constant 0 : index
    %15 = vector.load %arg6[%c0_6, %c0_7] : memref<32x167xf32, #tpu.memory_space<vmem>>, vector<32x19xf32>
    tpu.vector_store %arg6[%c0_6, %c0_7], %14 {strides = array<i32>} : memref<32x167xf32, #tpu.memory_space<vmem>>, vector<32x19xf32>,
    %c0_8 = arith.constant 0 : index
    %c19 = arith.constant 19 : index
    %16 = vector.load %arg6[%c0_8, %c19] : memref<32x167xf32, #tpu.memory_space<vmem>>, vector<32x128xf32>
    tpu.vector_store %arg6[%c0_8, %c19], %12 {strides = array<i32>} : memref<32x167xf32, #tpu.memory_space<vmem>>, vector<32x128xf32>,
    %cst_9 = arith.constant 0.000000e+00 : f32
    %17 = vector.broadcast %cst_9 : f32 to vector<32x20xf32>
    %c0_10 = arith.constant 0 : index
    %c147 = arith.constant 147 : index
    %18 = vector.load %arg6[%c0_10, %c147] : memref<32x167xf32, #tpu.memory_space<vmem>>, vector<32x20xf32>
    tpu.vector_store %arg6[%c0_10, %c147], %17 {strides = array<i32>} : memref<32x167xf32, #tpu.memory_space<vmem>>, vector<32x20xf32>,
    %c0_11 = arith.constant 0 : index
    %c0_12 = arith.constant 0 : index
    %19 = vector.load %arg6[%c0_11, %c0_12] : memref<32x167xf32, #tpu.memory_space<vmem>>, vector<32x128xf32>
    %c0_13 = arith.constant 0 : index
    %c1 = arith.constant 1 : index
    %20 = vector.load %arg6[%c0_13, %c1] : memref<32x167xf32, #tpu.memory_space<vmem>>, vector<32x128xf32>
    %c0_14 = arith.constant 0 : index
    %c2 = arith.constant 2 : index
    %21 = vector.load %arg6[%c0_14, %c2] : memref<32x167xf32, #tpu.memory_space<vmem>>, vector<32x128xf32>
    %c0_15 = arith.constant 0 : index
    %c3 = arith.constant 3 : index
    %22 = vector.load %arg6[%c0_15, %c3] : memref<32x167xf32, #tpu.memory_space<vmem>>, vector<32x128xf32>
    %23 = tpu.concatenate %19, %20, %21, %22 in 0 : vector<32x128xf32>, vector<32x128xf32>, vector<32x128xf32>, vector<32x128xf32> -> vector<128x128xf32>
    %c0_16 = arith.constant 0 : index
    %c0_17 = arith.constant 0 : index
    %c0_18 = arith.constant 0 : index
    %24 = vector.load %arg3[%c0_16, %c0_17, %c0_18] : memref<10x96x128xf32, #tpu.memory_space<vmem>>, vector<1x96x128xf32>
    %25 = vector.shape_cast %24 : vector<1x96x128xf32> to vector<96x128xf32>
    %cst_19 = arith.constant dense<0.000000e+00> : vector<96x128xf32>
    %26 = tpu.matmul %25, %23, %cst_19 {dimension_numbers = #tpu.dot_dimension_numbers<[1], [0], [0], [1], [0, 0, 1, 1], [], []>} : vector<96x128xf32>, vector<128x128xf32>, vector<96x128xf32> -> vector<96x128xf32>
    %c0_20 = arith.constant 0 : index
    %c4 = arith.constant 4 : index
    %27 = vector.load %arg6[%c0_20, %c4] : memref<32x167xf32, #tpu.memory_space<vmem>>, vector<32x128xf32>
    %c0_21 = arith.constant 0 : index
    %c5 = arith.constant 5 : index
    %28 = vector.load %arg6[%c0_21, %c5] : memref<32x167xf32, #tpu.memory_space<vmem>>, vector<32x128xf32>
    %c0_22 = arith.constant 0 : index
    %c6 = arith.constant 6 : index
    %29 = vector.load %arg6[%c0_22, %c6] : memref<32x167xf32, #tpu.memory_space<vmem>>, vector<32x128xf32>
    %c0_23 = arith.constant 0 : index
    %c7 = arith.constant 7 : index
    %30 = vector.load %arg6[%c0_23, %c7] : memref<32x167xf32, #tpu.memory_space<vmem>>, vector<32x128xf32>
    %31 = tpu.concatenate %27, %28, %29, %30 in 0 : vector<32x128xf32>, vector<32x128xf32>, vector<32x128xf32>, vector<32x128xf32> -> vector<128x128xf32>
    %c1_24 = arith.constant 1 : index
    %c0_25 = arith.constant 0 : index
    %c0_26 = arith.constant 0 : index
    %32 = vector.load %arg3[%c1_24, %c0_25, %c0_26] : memref<10x96x128xf32, #tpu.memory_space<vmem>>, vector<1x96x128xf32>
    %33 = vector.shape_cast %32 : vector<1x96x128xf32> to vector<96x128xf32>
    %cst_27 = arith.constant dense<0.000000e+00> : vector<96x128xf32>
    %34 = tpu.matmul %33, %31, %cst_27 {dimension_numbers = #tpu.dot_dimension_numbers<[1], [0], [0], [1], [0, 0, 1, 1], [], []>} : vector<96x128xf32>, vector<128x128xf32>, vector<96x128xf32> -> vector<96x128xf32>
    %35 = arith.addf %26, %34 : vector<96x128xf32>
    %c0_28 = arith.constant 0 : index
    %c8 = arith.constant 8 : index
    %36 = vector.load %arg6[%c0_28, %c8] : memref<32x167xf32, #tpu.memory_space<vmem>>, vector<32x128xf32>
    %c0_29 = arith.constant 0 : index
    %c9 = arith.constant 9 : index
    %37 = vector.load %arg6[%c0_29, %c9] : memref<32x167xf32, #tpu.memory_space<vmem>>, vector<32x128xf32>
    %c0_30 = arith.constant 0 : index
    %c10 = arith.constant 10 : index
    %38 = vector.load %arg6[%c0_30, %c10] : memref<32x167xf32, #tpu.memory_space<vmem>>, vector<32x128xf32>
    %c0_31 = arith.constant 0 : index
    %c11 = arith.constant 11 : index
    %39 = vector.load %arg6[%c0_31, %c11] : memref<32x167xf32, #tpu.memory_space<vmem>>, vector<32x128xf32>
    %40 = tpu.concatenate %36, %37, %38, %39 in 0 : vector<32x128xf32>, vector<32x128xf32>, vector<32x128xf32>, vector<32x128xf32> -> vector<128x128xf32>
    %c2_32 = arith.constant 2 : index
    %c0_33 = arith.constant 0 : index
    %c0_34 = arith.constant 0 : index
    %41 = vector.load %arg3[%c2_32, %c0_33, %c0_34] : memref<10x96x128xf32, #tpu.memory_space<vmem>>, vector<1x96x128xf32>
    %42 = vector.shape_cast %41 : vector<1x96x128xf32> to vector<96x128xf32>
    %cst_35 = arith.constant dense<0.000000e+00> : vector<96x128xf32>
    %43 = tpu.matmul %42, %40, %cst_35 {dimension_numbers = #tpu.dot_dimension_numbers<[1], [0], [0], [1], [0, 0, 1, 1], [], []>} : vector<96x128xf32>, vector<128x128xf32>, vector<96x128xf32> -> vector<96x128xf32>
    %44 = arith.addf %35, %43 : vector<96x128xf32>
    %c0_36 = arith.constant 0 : index
    %c12 = arith.constant 12 : index
    %45 = vector.load %arg6[%c0_36, %c12] : memref<32x167xf32, #tpu.memory_space<vmem>>, vector<32x128xf32>
    %c0_37 = arith.constant 0 : index
    %c13 = arith.constant 13 : index
    %46 = vector.load %arg6[%c0_37, %c13] : memref<32x167xf32, #tpu.memory_space<vmem>>, vector<32x128xf32>
    %c0_38 = arith.constant 0 : index
    %c14 = arith.constant 14 : index
    %47 = vector.load %arg6[%c0_38, %c14] : memref<32x167xf32, #tpu.memory_space<vmem>>, vector<32x128xf32>
    %c0_39 = arith.constant 0 : index
    %c15 = arith.constant 15 : index
    %48 = vector.load %arg6[%c0_39, %c15] : memref<32x167xf32, #tpu.memory_space<vmem>>, vector<32x128xf32>
    %49 = tpu.concatenate %45, %46, %47, %48 in 0 : vector<32x128xf32>, vector<32x128xf32>, vector<32x128xf32>, vector<32x128xf32> -> vector<128x128xf32>
    %c3_40 = arith.constant 3 : index
    %c0_41 = arith.constant 0 : index
    %c0_42 = arith.constant 0 : index
    %50 = vector.load %arg3[%c3_40, %c0_41, %c0_42] : memref<10x96x128xf32, #tpu.memory_space<vmem>>, vector<1x96x128xf32>
    %51 = vector.shape_cast %50 : vector<1x96x128xf32> to vector<96x128xf32>
    %cst_43 = arith.constant dense<0.000000e+00> : vector<96x128xf32>
    %52 = tpu.matmul %51, %49, %cst_43 {dimension_numbers = #tpu.dot_dimension_numbers<[1], [0], [0], [1], [0, 0, 1, 1], [], []>} : vector<96x128xf32>, vector<128x128xf32>, vector<96x128xf32> -> vector<96x128xf32>
    %53 = arith.addf %44, %52 : vector<96x128xf32>
    %c0_44 = arith.constant 0 : index
    %c16 = arith.constant 16 : index
    %54 = vector.load %arg6[%c0_44, %c16] : memref<32x167xf32, #tpu.memory_space<vmem>>, vector<32x128xf32>
    %c0_45 = arith.constant 0 : index
    %c17 = arith.constant 17 : index
    %55 = vector.load %arg6[%c0_45, %c17] : memref<32x167xf32, #tpu.memory_space<vmem>>, vector<32x128xf32>
    %c0_46 = arith.constant 0 : index
    %c18 = arith.constant 18 : index
    %56 = vector.load %arg6[%c0_46, %c18] : memref<32x167xf32, #tpu.memory_space<vmem>>, vector<32x128xf32>
    %c0_47 = arith.constant 0 : index
    %c19_48 = arith.constant 19 : index
    %57 = vector.load %arg6[%c0_47, %c19_48] : memref<32x167xf32, #tpu.memory_space<vmem>>, vector<32x128xf32>
    %58 = tpu.concatenate %54, %55, %56, %57 in 0 : vector<32x128xf32>, vector<32x128xf32>, vector<32x128xf32>, vector<32x128xf32> -> vector<128x128xf32>
    %c4_49 = arith.constant 4 : index
    %c0_50 = arith.constant 0 : index
    %c0_51 = arith.constant 0 : index
    %59 = vector.load %arg3[%c4_49, %c0_50, %c0_51] : memref<10x96x128xf32, #tpu.memory_space<vmem>>, vector<1x96x128xf32>
    %60 = vector.shape_cast %59 : vector<1x96x128xf32> to vector<96x128xf32>
    %cst_52 = arith.constant dense<0.000000e+00> : vector<96x128xf32>
    %61 = tpu.matmul %60, %58, %cst_52 {dimension_numbers = #tpu.dot_dimension_numbers<[1], [0], [0], [1], [0, 0, 1, 1], [], []>} : vector<96x128xf32>, vector<128x128xf32>, vector<96x128xf32> -> vector<96x128xf32>
    %62 = arith.addf %53, %61 : vector<96x128xf32>
    %c0_53 = arith.constant 0 : index
    %c20 = arith.constant 20 : index
    %63 = vector.load %arg6[%c0_53, %c20] : memref<32x167xf32, #tpu.memory_space<vmem>>, vector<32x128xf32>
    %c0_54 = arith.constant 0 : index
    %c21 = arith.constant 21 : index
    %64 = vector.load %arg6[%c0_54, %c21] : memref<32x167xf32, #tpu.memory_space<vmem>>, vector<32x128xf32>
    %c0_55 = arith.constant 0 : index
    %c22 = arith.constant 22 : index
    %65 = vector.load %arg6[%c0_55, %c22] : memref<32x167xf32, #tpu.memory_space<vmem>>, vector<32x128xf32>
    %c0_56 = arith.constant 0 : index
    %c23 = arith.constant 23 : index
    %66 = vector.load %arg6[%c0_56, %c23] : memref<32x167xf32, #tpu.memory_space<vmem>>, vector<32x128xf32>
    %67 = tpu.concatenate %63, %64, %65, %66 in 0 : vector<32x128xf32>, vector<32x128xf32>, vector<32x128xf32>, vector<32x128xf32> -> vector<128x128xf32>
    %c5_57 = arith.constant 5 : index
    %c0_58 = arith.constant 0 : index
    %c0_59 = arith.constant 0 : index
    %68 = vector.load %arg3[%c5_57, %c0_58, %c0_59] : memref<10x96x128xf32, #tpu.memory_space<vmem>>, vector<1x96x128xf32>
    %69 = vector.shape_cast %68 : vector<1x96x128xf32> to vector<96x128xf32>
    %cst_60 = arith.constant dense<0.000000e+00> : vector<96x128xf32>
    %70 = tpu.matmul %69, %67, %cst_60 {dimension_numbers = #tpu.dot_dimension_numbers<[1], [0], [0], [1], [0, 0, 1, 1], [], []>} : vector<96x128xf32>, vector<128x128xf32>, vector<96x128xf32> -> vector<96x128xf32>
    %71 = arith.addf %62, %70 : vector<96x128xf32>
    %c0_61 = arith.constant 0 : index
    %c24 = arith.constant 24 : index
    %72 = vector.load %arg6[%c0_61, %c24] : memref<32x167xf32, #tpu.memory_space<vmem>>, vector<32x128xf32>
    %c0_62 = arith.constant 0 : index
    %c25 = arith.constant 25 : index
    %73 = vector.load %arg6[%c0_62, %c25] : memref<32x167xf32, #tpu.memory_space<vmem>>, vector<32x128xf32>
    %c0_63 = arith.constant 0 : index
    %c26 = arith.constant 26 : index
    %74 = vector.load %arg6[%c0_63, %c26] : memref<32x167xf32, #tpu.memory_space<vmem>>, vector<32x128xf32>
    %c0_64 = arith.constant 0 : index
    %c27 = arith.constant 27 : index
    %75 = vector.load %arg6[%c0_64, %c27] : memref<32x167xf32, #tpu.memory_space<vmem>>, vector<32x128xf32>
    %76 = tpu.concatenate %72, %73, %74, %75 in 0 : vector<32x128xf32>, vector<32x128xf32>, vector<32x128xf32>, vector<32x128xf32> -> vector<128x128xf32>
    %c6_65 = arith.constant 6 : index
    %c0_66 = arith.constant 0 : index
    %c0_67 = arith.constant 0 : index
    %77 = vector.load %arg3[%c6_65, %c0_66, %c0_67] : memref<10x96x128xf32, #tpu.memory_space<vmem>>, vector<1x96x128xf32>
    %78 = vector.shape_cast %77 : vector<1x96x128xf32> to vector<96x128xf32>
    %cst_68 = arith.constant dense<0.000000e+00> : vector<96x128xf32>
    %79 = tpu.matmul %78, %76, %cst_68 {dimension_numbers = #tpu.dot_dimension_numbers<[1], [0], [0], [1], [0, 0, 1, 1], [], []>} : vector<96x128xf32>, vector<128x128xf32>, vector<96x128xf32> -> vector<96x128xf32>
    %80 = arith.addf %71, %79 : vector<96x128xf32>
    %c0_69 = arith.constant 0 : index
    %c28 = arith.constant 28 : index
    %81 = vector.load %arg6[%c0_69, %c28] : memref<32x167xf32, #tpu.memory_space<vmem>>, vector<32x128xf32>
    %c0_70 = arith.constant 0 : index
    %c29 = arith.constant 29 : index
    %82 = vector.load %arg6[%c0_70, %c29] : memref<32x167xf32, #tpu.memory_space<vmem>>, vector<32x128xf32>
    %c0_71 = arith.constant 0 : index
    %c30 = arith.constant 30 : index
    %83 = vector.load %arg6[%c0_71, %c30] : memref<32x167xf32, #tpu.memory_space<vmem>>, vector<32x128xf32>
    %c0_72 = arith.constant 0 : index
    %c31 = arith.constant 31 : index
    %84 = vector.load %arg6[%c0_72, %c31] : memref<32x167xf32, #tpu.memory_space<vmem>>, vector<32x128xf32>
    %85 = tpu.concatenate %81, %82, %83, %84 in 0 : vector<32x128xf32>, vector<32x128xf32>, vector<32x128xf32>, vector<32x128xf32> -> vector<128x128xf32>
    %c7_73 = arith.constant 7 : index
    %c0_74 = arith.constant 0 : index
    %c0_75 = arith.constant 0 : index
    %86 = vector.load %arg3[%c7_73, %c0_74, %c0_75] : memref<10x96x128xf32, #tpu.memory_space<vmem>>, vector<1x96x128xf32>
    %87 = vector.shape_cast %86 : vector<1x96x128xf32> to vector<96x128xf32>
    %cst_76 = arith.constant dense<0.000000e+00> : vector<96x128xf32>
    %88 = tpu.matmul %87, %85, %cst_76 {dimension_numbers = #tpu.dot_dimension_numbers<[1], [0], [0], [1], [0, 0, 1, 1], [], []>} : vector<96x128xf32>, vector<128x128xf32>, vector<96x128xf32> -> vector<96x128xf32>
    %89 = arith.addf %80, %88 : vector<96x128xf32>
    %c0_77 = arith.constant 0 : index
    %c32 = arith.constant 32 : index
    %90 = vector.load %arg6[%c0_77, %c32] : memref<32x167xf32, #tpu.memory_space<vmem>>, vector<32x128xf32>
    %c0_78 = arith.constant 0 : index
    %c33 = arith.constant 33 : index
    %91 = vector.load %arg6[%c0_78, %c33] : memref<32x167xf32, #tpu.memory_space<vmem>>, vector<32x128xf32>
    %c0_79 = arith.constant 0 : index
    %c34 = arith.constant 34 : index
    %92 = vector.load %arg6[%c0_79, %c34] : memref<32x167xf32, #tpu.memory_space<vmem>>, vector<32x128xf32>
    %c0_80 = arith.constant 0 : index
    %c35 = arith.constant 35 : index
    %93 = vector.load %arg6[%c0_80, %c35] : memref<32x167xf32, #tpu.memory_space<vmem>>, vector<32x128xf32>
    %94 = tpu.concatenate %90, %91, %92, %93 in 0 : vector<32x128xf32>, vector<32x128xf32>, vector<32x128xf32>, vector<32x128xf32> -> vector<128x128xf32>
    %c8_81 = arith.constant 8 : index
    %c0_82 = arith.constant 0 : index
    %c0_83 = arith.constant 0 : index
    %95 = vector.load %arg3[%c8_81, %c0_82, %c0_83] : memref<10x96x128xf32, #tpu.memory_space<vmem>>, vector<1x96x128xf32>
    %96 = vector.shape_cast %95 : vector<1x96x128xf32> to vector<96x128xf32>
    %cst_84 = arith.constant dense<0.000000e+00> : vector<96x128xf32>
    %97 = tpu.matmul %96, %94, %cst_84 {dimension_numbers = #tpu.dot_dimension_numbers<[1], [0], [0], [1], [0, 0, 1, 1], [], []>} : vector<96x128xf32>, vector<128x128xf32>, vector<96x128xf32> -> vector<96x128xf32>
    %98 = arith.addf %89, %97 : vector<96x128xf32>
    %c0_85 = arith.constant 0 : index
    %c36 = arith.constant 36 : index
    %99 = vector.load %arg6[%c0_85, %c36] : memref<32x167xf32, #tpu.memory_space<vmem>>, vector<32x128xf32>
    %c0_86 = arith.constant 0 : index
    %c37 = arith.constant 37 : index
    %100 = vector.load %arg6[%c0_86, %c37] : memref<32x167xf32, #tpu.memory_space<vmem>>, vector<32x128xf32>
    %c0_87 = arith.constant 0 : index
    %c38 = arith.constant 38 : index
    %101 = vector.load %arg6[%c0_87, %c38] : memref<32x167xf32, #tpu.memory_space<vmem>>, vector<32x128xf32>
    %c0_88 = arith.constant 0 : index
    %c39 = arith.constant 39 : index
    %102 = vector.load %arg6[%c0_88, %c39] : memref<32x167xf32, #tpu.memory_space<vmem>>, vector<32x128xf32>
    %103 = tpu.concatenate %99, %100, %101, %102 in 0 : vector<32x128xf32>, vector<32x128xf32>, vector<32x128xf32>, vector<32x128xf32> -> vector<128x128xf32>
    %c9_89 = arith.constant 9 : index
    %c0_90 = arith.constant 0 : index
    %c0_91 = arith.constant 0 : index
    %104 = vector.load %arg3[%c9_89, %c0_90, %c0_91] : memref<10x96x128xf32, #tpu.memory_space<vmem>>, vector<1x96x128xf32>
    %105 = vector.shape_cast %104 : vector<1x96x128xf32> to vector<96x128xf32>
    %cst_92 = arith.constant dense<0.000000e+00> : vector<96x128xf32>
    %106 = tpu.matmul %105, %103, %cst_92 {dimension_numbers = #tpu.dot_dimension_numbers<[1], [0], [0], [1], [0, 0, 1, 1], [], []>} : vector<96x128xf32>, vector<128x128xf32>, vector<96x128xf32> -> vector<96x128xf32>
    %107 = arith.addf %98, %106 : vector<96x128xf32>
    %108 = tpu.concatenate %107, %13 in 0 : vector<96x128xf32>, vector<32x128xf32> -> vector<128x128xf32>
    %c0_93 = arith.constant 0 : index
    %c0_94 = arith.constant 0 : index
    %c0_95 = arith.constant 0 : index
    %109 = vector.load %arg4[%c0_93, %c0_94, %c0_95] : memref<2x128x128xf32, #tpu.memory_space<vmem>>, vector<1x128x128xf32>
    %110 = vector.shape_cast %109 : vector<1x128x128xf32> to vector<128x128xf32>
    %111 = vector.shape_cast %108 : vector<128x128xf32> to vector<1x128x128xf32>
    tpu.vector_store %arg4[%c0_93, %c0_94, %c0_95], %111 {strides = array<i32>} : memref<2x128x128xf32, #tpu.memory_space<vmem>>, vector<1x128x128xf32>,
    %cst_96 = arith.constant dense<0.000000e+00> : vector<128xf32>
    %112 = vector.multi_reduction <add>, %108, %cst_96 [1] : vector<128x128xf32> to vector<128xf32>
    %113 = vector.shape_cast %112 : vector<128xf32> to vector<128x1xf32>
    %114 = arith.mulf %108, %108 : vector<128x128xf32>
    %cst_97 = arith.constant dense<0.000000e+00> : vector<128xf32>
    %115 = vector.multi_reduction <add>, %114, %cst_97 [1] : vector<128x128xf32> to vector<128xf32>
    %116 = vector.shape_cast %115 : vector<128xf32> to vector<128x1xf32>
    %117 = tpu.concatenate %113, %116 in 1 : vector<128x1xf32>, vector<128x1xf32> -> vector<128x2xf32>
    %c0_98 = arith.constant 0 : index
    %c0_99 = arith.constant 0 : index
    %c0_100 = arith.constant 0 : index
    %118 = vector.load %arg5[%c0_98, %c0_99, %c0_100] : memref<2x128x2xf32, #tpu.memory_space<vmem>>, vector<1x128x2xf32>
    %119 = vector.shape_cast %118 : vector<1x128x2xf32> to vector<128x2xf32>
    %120 = vector.shape_cast %117 : vector<128x2xf32> to vector<1x128x2xf32>
    tpu.vector_store %arg5[%c0_98, %c0_99, %c0_100], %120 {strides = array<i32>} : memref<2x128x2xf32, #tpu.memory_space<vmem>>, vector<1x128x2xf32>,
    %c1_101 = arith.constant 1 : index
    %c0_102 = arith.constant 0 : index
    %c0_103 = arith.constant 0 : index
    %121 = vector.load %arg1[%c1_101, %c0_102, %c0_103] : memref<2x4x128xf32, #tpu.memory_space<vmem>>, vector<1x4x128xf32>
    %122 = vector.shape_cast %121 : vector<1x4x128xf32> to vector<4x128xf32>
    %cst_104 = arith.constant 0xFF800000 : f32
    %123 = vector.broadcast %cst_104 : f32 to vector<4x1xf32>
    %124 = tpu.concatenate %123, %122, %123 in 1 : vector<4x1xf32>, vector<4x128xf32>, vector<4x1xf32> -> vector<4x130xf32>
    %125 = vector.extract_strided_slice %124 {offsets = [0, 0], sizes = [4, 128], strides = [1, 1]} : vector<4x130xf32> to vector<4x128xf32>
    %126 = vector.extract_strided_slice %124 {offsets = [0, 1], sizes = [4, 128], strides = [1, 1]} : vector<4x130xf32> to vector<4x128xf32>
    %127 = arith.maximumf %125, %126 : vector<4x128xf32>
    %128 = vector.extract_strided_slice %124 {offsets = [0, 2], sizes = [4, 128], strides = [1, 1]} : vector<4x130xf32> to vector<4x128xf32>
    %129 = arith.maximumf %127, %128 : vector<4x128xf32>
    %130 = tpu.concatenate %122, %129 in 0 : vector<4x128xf32>, vector<4x128xf32> -> vector<8x128xf32>
    %c0_105 = arith.constant 0 : index
    %c0_106 = arith.constant 0 : index
    %131 = vector.load %arg2[%c0_105, %c0_106] : memref<64x8xf32, #tpu.memory_space<vmem>>, vector<64x8xf32>
    %cst_107 = arith.constant dense<0.000000e+00> : vector<64x128xf32>
    %132 = tpu.matmul %131, %130, %cst_107 {dimension_numbers = #tpu.dot_dimension_numbers<[1], [0], [0], [1], [0, 0, 1, 1], [], []>} : vector<64x8xf32>, vector<8x128xf32>, vector<64x128xf32> -> vector<64x128xf32>
    %133 = vector.extract_strided_slice %132 {offsets = [0, 0], sizes = [32, 128], strides = [1, 1]} : vector<64x128xf32> to vector<32x128xf32>
    %134 = vector.extract_strided_slice %132 {offsets = [32, 0], sizes = [32, 128], strides = [1, 1]} : vector<64x128xf32> to vector<32x128xf32>
    %cst_108 = arith.constant 0.000000e+00 : f32
    %135 = vector.broadcast %cst_108 : f32 to vector<32x19xf32>
    %c0_109 = arith.constant 0 : index
    %c0_110 = arith.constant 0 : index
    %136 = vector.load %arg6[%c0_109, %c0_110] : memref<32x167xf32, #tpu.memory_space<vmem>>, vector<32x19xf32>
    tpu.vector_store %arg6[%c0_109, %c0_110], %135 {strides = array<i32>} : memref<32x167xf32, #tpu.memory_space<vmem>>, vector<32x19xf32>,
    %c0_111 = arith.constant 0 : index
    %c19_112 = arith.constant 19 : index
    %137 = vector.load %arg6[%c0_111, %c19_112] : memref<32x167xf32, #tpu.memory_space<vmem>>, vector<32x128xf32>
    tpu.vector_store %arg6[%c0_111, %c19_112], %133 {strides = array<i32>} : memref<32x167xf32, #tpu.memory_space<vmem>>, vector<32x128xf32>,
    %cst_113 = arith.constant 0.000000e+00 : f32
    %138 = vector.broadcast %cst_113 : f32 to vector<32x20xf32>
    %c0_114 = arith.constant 0 : index
    %c147_115 = arith.constant 147 : index
    %139 = vector.load %arg6[%c0_114, %c147_115] : memref<32x167xf32, #tpu.memory_space<vmem>>, vector<32x20xf32>
    tpu.vector_store %arg6[%c0_114, %c147_115], %138 {strides = array<i32>} : memref<32x167xf32, #tpu.memory_space<vmem>>, vector<32x20xf32>,
    %c0_116 = arith.constant 0 : index
    %c0_117 = arith.constant 0 : index
    %140 = vector.load %arg6[%c0_116, %c0_117] : memref<32x167xf32, #tpu.memory_space<vmem>>, vector<32x128xf32>
    %c0_118 = arith.constant 0 : index
    %c1_119 = arith.constant 1 : index
    %141 = vector.load %arg6[%c0_118, %c1_119] : memref<32x167xf32, #tpu.memory_space<vmem>>, vector<32x128xf32>
    %c0_120 = arith.constant 0 : index
    %c2_121 = arith.constant 2 : index
    %142 = vector.load %arg6[%c0_120, %c2_121] : memref<32x167xf32, #tpu.memory_space<vmem>>, vector<32x128xf32>
    %c0_122 = arith.constant 0 : index
    %c3_123 = arith.constant 3 : index
    %143 = vector.load %arg6[%c0_122, %c3_123] : memref<32x167xf32, #tpu.memory_space<vmem>>, vector<32x128xf32>
    %144 = tpu.concatenate %140, %141, %142, %143 in 0 : vector<32x128xf32>, vector<32x128xf32>, vector<32x128xf32>, vector<32x128xf32> -> vector<128x128xf32>
    %c0_124 = arith.constant 0 : index
    %c0_125 = arith.constant 0 : index
    %c0_126 = arith.constant 0 : index
    %145 = vector.load %arg3[%c0_124, %c0_125, %c0_126] : memref<10x96x128xf32, #tpu.memory_space<vmem>>, vector<1x96x128xf32>
    %146 = vector.shape_cast %145 : vector<1x96x128xf32> to vector<96x128xf32>
    %cst_127 = arith.constant dense<0.000000e+00> : vector<96x128xf32>
    %147 = tpu.matmul %146, %144, %cst_127 {dimension_numbers = #tpu.dot_dimension_numbers<[1], [0], [0], [1], [0, 0, 1, 1], [], []>} : vector<96x128xf32>, vector<128x128xf32>, vector<96x128xf32> -> vector<96x128xf32>
    %c0_128 = arith.constant 0 : index
    %c4_129 = arith.constant 4 : index
    %148 = vector.load %arg6[%c0_128, %c4_129] : memref<32x167xf32, #tpu.memory_space<vmem>>, vector<32x128xf32>
    %c0_130 = arith.constant 0 : index
    %c5_131 = arith.constant 5 : index
    %149 = vector.load %arg6[%c0_130, %c5_131] : memref<32x167xf32, #tpu.memory_space<vmem>>, vector<32x128xf32>
    %c0_132 = arith.constant 0 : index
    %c6_133 = arith.constant 6 : index
    %150 = vector.load %arg6[%c0_132, %c6_133] : memref<32x167xf32, #tpu.memory_space<vmem>>, vector<32x128xf32>
    %c0_134 = arith.constant 0 : index
    %c7_135 = arith.constant 7 : index
    %151 = vector.load %arg6[%c0_134, %c7_135] : memref<32x167xf32, #tpu.memory_space<vmem>>, vector<32x128xf32>
    %152 = tpu.concatenate %148, %149, %150, %151 in 0 : vector<32x128xf32>, vector<32x128xf32>, vector<32x128xf32>, vector<32x128xf32> -> vector<128x128xf32>
    %c1_136 = arith.constant 1 : index
    %c0_137 = arith.constant 0 : index
    %c0_138 = arith.constant 0 : index
    %153 = vector.load %arg3[%c1_136, %c0_137, %c0_138] : memref<10x96x128xf32, #tpu.memory_space<vmem>>, vector<1x96x128xf32>
    %154 = vector.shape_cast %153 : vector<1x96x128xf32> to vector<96x128xf32>
    %cst_139 = arith.constant dense<0.000000e+00> : vector<96x128xf32>
    %155 = tpu.matmul %154, %152, %cst_139 {dimension_numbers = #tpu.dot_dimension_numbers<[1], [0], [0], [1], [0, 0, 1, 1], [], []>} : vector<96x128xf32>, vector<128x128xf32>, vector<96x128xf32> -> vector<96x128xf32>
    %156 = arith.addf %147, %155 : vector<96x128xf32>
    %c0_140 = arith.constant 0 : index
    %c8_141 = arith.constant 8 : index
    %157 = vector.load %arg6[%c0_140, %c8_141] : memref<32x167xf32, #tpu.memory_space<vmem>>, vector<32x128xf32>
    %c0_142 = arith.constant 0 : index
    %c9_143 = arith.constant 9 : index
    %158 = vector.load %arg6[%c0_142, %c9_143] : memref<32x167xf32, #tpu.memory_space<vmem>>, vector<32x128xf32>
    %c0_144 = arith.constant 0 : index
    %c10_145 = arith.constant 10 : index
    %159 = vector.load %arg6[%c0_144, %c10_145] : memref<32x167xf32, #tpu.memory_space<vmem>>, vector<32x128xf32>
    %c0_146 = arith.constant 0 : index
    %c11_147 = arith.constant 11 : index
    %160 = vector.load %arg6[%c0_146, %c11_147] : memref<32x167xf32, #tpu.memory_space<vmem>>, vector<32x128xf32>
    %161 = tpu.concatenate %157, %158, %159, %160 in 0 : vector<32x128xf32>, vector<32x128xf32>, vector<32x128xf32>, vector<32x128xf32> -> vector<128x128xf32>
    %c2_148 = arith.constant 2 : index
    %c0_149 = arith.constant 0 : index
    %c0_150 = arith.constant 0 : index
    %162 = vector.load %arg3[%c2_148, %c0_149, %c0_150] : memref<10x96x128xf32, #tpu.memory_space<vmem>>, vector<1x96x128xf32>
    %163 = vector.shape_cast %162 : vector<1x96x128xf32> to vector<96x128xf32>
    %cst_151 = arith.constant dense<0.000000e+00> : vector<96x128xf32>
    %164 = tpu.matmul %163, %161, %cst_151 {dimension_numbers = #tpu.dot_dimension_numbers<[1], [0], [0], [1], [0, 0, 1, 1], [], []>} : vector<96x128xf32>, vector<128x128xf32>, vector<96x128xf32> -> vector<96x128xf32>
    %165 = arith.addf %156, %164 : vector<96x128xf32>
    %c0_152 = arith.constant 0 : index
    %c12_153 = arith.constant 12 : index
    %166 = vector.load %arg6[%c0_152, %c12_153] : memref<32x167xf32, #tpu.memory_space<vmem>>, vector<32x128xf32>
    %c0_154 = arith.constant 0 : index
    %c13_155 = arith.constant 13 : index
    %167 = vector.load %arg6[%c0_154, %c13_155] : memref<32x167xf32, #tpu.memory_space<vmem>>, vector<32x128xf32>
    %c0_156 = arith.constant 0 : index
    %c14_157 = arith.constant 14 : index
    %168 = vector.load %arg6[%c0_156, %c14_157] : memref<32x167xf32, #tpu.memory_space<vmem>>, vector<32x128xf32>
    %c0_158 = arith.constant 0 : index
    %c15_159 = arith.constant 15 : index
    %169 = vector.load %arg6[%c0_158, %c15_159] : memref<32x167xf32, #tpu.memory_space<vmem>>, vector<32x128xf32>
    %170 = tpu.concatenate %166, %167, %168, %169 in 0 : vector<32x128xf32>, vector<32x128xf32>, vector<32x128xf32>, vector<32x128xf32> -> vector<128x128xf32>
    %c3_160 = arith.constant 3 : index
    %c0_161 = arith.constant 0 : index
    %c0_162 = arith.constant 0 : index
    %171 = vector.load %arg3[%c3_160, %c0_161, %c0_162] : memref<10x96x128xf32, #tpu.memory_space<vmem>>, vector<1x96x128xf32>
    %172 = vector.shape_cast %171 : vector<1x96x128xf32> to vector<96x128xf32>
    %cst_163 = arith.constant dense<0.000000e+00> : vector<96x128xf32>
    %173 = tpu.matmul %172, %170, %cst_163 {dimension_numbers = #tpu.dot_dimension_numbers<[1], [0], [0], [1], [0, 0, 1, 1], [], []>} : vector<96x128xf32>, vector<128x128xf32>, vector<96x128xf32> -> vector<96x128xf32>
    %174 = arith.addf %165, %173 : vector<96x128xf32>
    %c0_164 = arith.constant 0 : index
    %c16_165 = arith.constant 16 : index
    %175 = vector.load %arg6[%c0_164, %c16_165] : memref<32x167xf32, #tpu.memory_space<vmem>>, vector<32x128xf32>
    %c0_166 = arith.constant 0 : index
    %c17_167 = arith.constant 17 : index
    %176 = vector.load %arg6[%c0_166, %c17_167] : memref<32x167xf32, #tpu.memory_space<vmem>>, vector<32x128xf32>
    %c0_168 = arith.constant 0 : index
    %c18_169 = arith.constant 18 : index
    %177 = vector.load %arg6[%c0_168, %c18_169] : memref<32x167xf32, #tpu.memory_space<vmem>>, vector<32x128xf32>
    %c0_170 = arith.constant 0 : index
    %c19_171 = arith.constant 19 : index
    %178 = vector.load %arg6[%c0_170, %c19_171] : memref<32x167xf32, #tpu.memory_space<vmem>>, vector<32x128xf32>
    %179 = tpu.concatenate %175, %176, %177, %178 in 0 : vector<32x128xf32>, vector<32x128xf32>, vector<32x128xf32>, vector<32x128xf32> -> vector<128x128xf32>
    %c4_172 = arith.constant 4 : index
    %c0_173 = arith.constant 0 : index
    %c0_174 = arith.constant 0 : index
    %180 = vector.load %arg3[%c4_172, %c0_173, %c0_174] : memref<10x96x128xf32, #tpu.memory_space<vmem>>, vector<1x96x128xf32>
    %181 = vector.shape_cast %180 : vector<1x96x128xf32> to vector<96x128xf32>
    %cst_175 = arith.constant dense<0.000000e+00> : vector<96x128xf32>
    %182 = tpu.matmul %181, %179, %cst_175 {dimension_numbers = #tpu.dot_dimension_numbers<[1], [0], [0], [1], [0, 0, 1, 1], [], []>} : vector<96x128xf32>, vector<128x128xf32>, vector<96x128xf32> -> vector<96x128xf32>
    %183 = arith.addf %174, %182 : vector<96x128xf32>
    %c0_176 = arith.constant 0 : index
    %c20_177 = arith.constant 20 : index
    %184 = vector.load %arg6[%c0_176, %c20_177] : memref<32x167xf32, #tpu.memory_space<vmem>>, vector<32x128xf32>
    %c0_178 = arith.constant 0 : index
    %c21_179 = arith.constant 21 : index
    %185 = vector.load %arg6[%c0_178, %c21_179] : memref<32x167xf32, #tpu.memory_space<vmem>>, vector<32x128xf32>
    %c0_180 = arith.constant 0 : index
    %c22_181 = arith.constant 22 : index
    %186 = vector.load %arg6[%c0_180, %c22_181] : memref<32x167xf32, #tpu.memory_space<vmem>>, vector<32x128xf32>
    %c0_182 = arith.constant 0 : index
    %c23_183 = arith.constant 23 : index
    %187 = vector.load %arg6[%c0_182, %c23_183] : memref<32x167xf32, #tpu.memory_space<vmem>>, vector<32x128xf32>
    %188 = tpu.concatenate %184, %185, %186, %187 in 0 : vector<32x128xf32>, vector<32x128xf32>, vector<32x128xf32>, vector<32x128xf32> -> vector<128x128xf32>
    %c5_184 = arith.constant 5 : index
    %c0_185 = arith.constant 0 : index
    %c0_186 = arith.constant 0 : index
    %189 = vector.load %arg3[%c5_184, %c0_185, %c0_186] : memref<10x96x128xf32, #tpu.memory_space<vmem>>, vector<1x96x128xf32>
    %190 = vector.shape_cast %189 : vector<1x96x128xf32> to vector<96x128xf32>
    %cst_187 = arith.constant dense<0.000000e+00> : vector<96x128xf32>
    %191 = tpu.matmul %190, %188, %cst_187 {dimension_numbers = #tpu.dot_dimension_numbers<[1], [0], [0], [1], [0, 0, 1, 1], [], []>} : vector<96x128xf32>, vector<128x128xf32>, vector<96x128xf32> -> vector<96x128xf32>
    %192 = arith.addf %183, %191 : vector<96x128xf32>
    %c0_188 = arith.constant 0 : index
    %c24_189 = arith.constant 24 : index
    %193 = vector.load %arg6[%c0_188, %c24_189] : memref<32x167xf32, #tpu.memory_space<vmem>>, vector<32x128xf32>
    %c0_190 = arith.constant 0 : index
    %c25_191 = arith.constant 25 : index
    %194 = vector.load %arg6[%c0_190, %c25_191] : memref<32x167xf32, #tpu.memory_space<vmem>>, vector<32x128xf32>
    %c0_192 = arith.constant 0 : index
    %c26_193 = arith.constant 26 : index
    %195 = vector.load %arg6[%c0_192, %c26_193] : memref<32x167xf32, #tpu.memory_space<vmem>>, vector<32x128xf32>
    %c0_194 = arith.constant 0 : index
    %c27_195 = arith.constant 27 : index
    %196 = vector.load %arg6[%c0_194, %c27_195] : memref<32x167xf32, #tpu.memory_space<vmem>>, vector<32x128xf32>
    %197 = tpu.concatenate %193, %194, %195, %196 in 0 : vector<32x128xf32>, vector<32x128xf32>, vector<32x128xf32>, vector<32x128xf32> -> vector<128x128xf32>
    %c6_196 = arith.constant 6 : index
    %c0_197 = arith.constant 0 : index
    %c0_198 = arith.constant 0 : index
    %198 = vector.load %arg3[%c6_196, %c0_197, %c0_198] : memref<10x96x128xf32, #tpu.memory_space<vmem>>, vector<1x96x128xf32>
    %199 = vector.shape_cast %198 : vector<1x96x128xf32> to vector<96x128xf32>
    %cst_199 = arith.constant dense<0.000000e+00> : vector<96x128xf32>
    %200 = tpu.matmul %199, %197, %cst_199 {dimension_numbers = #tpu.dot_dimension_numbers<[1], [0], [0], [1], [0, 0, 1, 1], [], []>} : vector<96x128xf32>, vector<128x128xf32>, vector<96x128xf32> -> vector<96x128xf32>
    %201 = arith.addf %192, %200 : vector<96x128xf32>
    %c0_200 = arith.constant 0 : index
    %c28_201 = arith.constant 28 : index
    %202 = vector.load %arg6[%c0_200, %c28_201] : memref<32x167xf32, #tpu.memory_space<vmem>>, vector<32x128xf32>
    %c0_202 = arith.constant 0 : index
    %c29_203 = arith.constant 29 : index
    %203 = vector.load %arg6[%c0_202, %c29_203] : memref<32x167xf32, #tpu.memory_space<vmem>>, vector<32x128xf32>
    %c0_204 = arith.constant 0 : index
    %c30_205 = arith.constant 30 : index
    %204 = vector.load %arg6[%c0_204, %c30_205] : memref<32x167xf32, #tpu.memory_space<vmem>>, vector<32x128xf32>
    %c0_206 = arith.constant 0 : index
    %c31_207 = arith.constant 31 : index
    %205 = vector.load %arg6[%c0_206, %c31_207] : memref<32x167xf32, #tpu.memory_space<vmem>>, vector<32x128xf32>
    %206 = tpu.concatenate %202, %203, %204, %205 in 0 : vector<32x128xf32>, vector<32x128xf32>, vector<32x128xf32>, vector<32x128xf32> -> vector<128x128xf32>
    %c7_208 = arith.constant 7 : index
    %c0_209 = arith.constant 0 : index
    %c0_210 = arith.constant 0 : index
    %207 = vector.load %arg3[%c7_208, %c0_209, %c0_210] : memref<10x96x128xf32, #tpu.memory_space<vmem>>, vector<1x96x128xf32>
    %208 = vector.shape_cast %207 : vector<1x96x128xf32> to vector<96x128xf32>
    %cst_211 = arith.constant dense<0.000000e+00> : vector<96x128xf32>
    %209 = tpu.matmul %208, %206, %cst_211 {dimension_numbers = #tpu.dot_dimension_numbers<[1], [0], [0], [1], [0, 0, 1, 1], [], []>} : vector<96x128xf32>, vector<128x128xf32>, vector<96x128xf32> -> vector<96x128xf32>
    %210 = arith.addf %201, %209 : vector<96x128xf32>
    %c0_212 = arith.constant 0 : index
    %c32_213 = arith.constant 32 : index
    %211 = vector.load %arg6[%c0_212, %c32_213] : memref<32x167xf32, #tpu.memory_space<vmem>>, vector<32x128xf32>
    %c0_214 = arith.constant 0 : index
    %c33_215 = arith.constant 33 : index
    %212 = vector.load %arg6[%c0_214, %c33_215] : memref<32x167xf32, #tpu.memory_space<vmem>>, vector<32x128xf32>
    %c0_216 = arith.constant 0 : index
    %c34_217 = arith.constant 34 : index
    %213 = vector.load %arg6[%c0_216, %c34_217] : memref<32x167xf32, #tpu.memory_space<vmem>>, vector<32x128xf32>
    %c0_218 = arith.constant 0 : index
    %c35_219 = arith.constant 35 : index
    %214 = vector.load %arg6[%c0_218, %c35_219] : memref<32x167xf32, #tpu.memory_space<vmem>>, vector<32x128xf32>
    %215 = tpu.concatenate %211, %212, %213, %214 in 0 : vector<32x128xf32>, vector<32x128xf32>, vector<32x128xf32>, vector<32x128xf32> -> vector<128x128xf32>
    %c8_220 = arith.constant 8 : index
    %c0_221 = arith.constant 0 : index
    %c0_222 = arith.constant 0 : index
    %216 = vector.load %arg3[%c8_220, %c0_221, %c0_222] : memref<10x96x128xf32, #tpu.memory_space<vmem>>, vector<1x96x128xf32>
    %217 = vector.shape_cast %216 : vector<1x96x128xf32> to vector<96x128xf32>
    %cst_223 = arith.constant dense<0.000000e+00> : vector<96x128xf32>
    %218 = tpu.matmul %217, %215, %cst_223 {dimension_numbers = #tpu.dot_dimension_numbers<[1], [0], [0], [1], [0, 0, 1, 1], [], []>} : vector<96x128xf32>, vector<128x128xf32>, vector<96x128xf32> -> vector<96x128xf32>
    %219 = arith.addf %210, %218 : vector<96x128xf32>
    %c0_224 = arith.constant 0 : index
    %c36_225 = arith.constant 36 : index
    %220 = vector.load %arg6[%c0_224, %c36_225] : memref<32x167xf32, #tpu.memory_space<vmem>>, vector<32x128xf32>
    %c0_226 = arith.constant 0 : index
    %c37_227 = arith.constant 37 : index
    %221 = vector.load %arg6[%c0_226, %c37_227] : memref<32x167xf32, #tpu.memory_space<vmem>>, vector<32x128xf32>
    %c0_228 = arith.constant 0 : index
    %c38_229 = arith.constant 38 : index
    %222 = vector.load %arg6[%c0_228, %c38_229] : memref<32x167xf32, #tpu.memory_space<vmem>>, vector<32x128xf32>
    %c0_230 = arith.constant 0 : index
    %c39_231 = arith.constant 39 : index
    %223 = vector.load %arg6[%c0_230, %c39_231] : memref<32x167xf32, #tpu.memory_space<vmem>>, vector<32x128xf32>
    %224 = tpu.concatenate %220, %221, %222, %223 in 0 : vector<32x128xf32>, vector<32x128xf32>, vector<32x128xf32>, vector<32x128xf32> -> vector<128x128xf32>
    %c9_232 = arith.constant 9 : index
    %c0_233 = arith.constant 0 : index
    %c0_234 = arith.constant 0 : index
    %225 = vector.load %arg3[%c9_232, %c0_233, %c0_234] : memref<10x96x128xf32, #tpu.memory_space<vmem>>, vector<1x96x128xf32>
    %226 = vector.shape_cast %225 : vector<1x96x128xf32> to vector<96x128xf32>
    %cst_235 = arith.constant dense<0.000000e+00> : vector<96x128xf32>
    %227 = tpu.matmul %226, %224, %cst_235 {dimension_numbers = #tpu.dot_dimension_numbers<[1], [0], [0], [1], [0, 0, 1, 1], [], []>} : vector<96x128xf32>, vector<128x128xf32>, vector<96x128xf32> -> vector<96x128xf32>
    %228 = arith.addf %219, %227 : vector<96x128xf32>
    %229 = tpu.concatenate %228, %134 in 0 : vector<96x128xf32>, vector<32x128xf32> -> vector<128x128xf32>
    %c1_236 = arith.constant 1 : index
    %c0_237 = arith.constant 0 : index
    %c0_238 = arith.constant 0 : index
    %230 = vector.load %arg4[%c1_236, %c0_237, %c0_238] : memref<2x128x128xf32, #tpu.memory_space<vmem>>, vector<1x128x128xf32>
    %231 = vector.shape_cast %230 : vector<1x128x128xf32> to vector<128x128xf32>
    %232 = vector.shape_cast %229 : vector<128x128xf32> to vector<1x128x128xf32>
    tpu.vector_store %arg4[%c1_236, %c0_237, %c0_238], %232 {strides = array<i32>} : memref<2x128x128xf32, #tpu.memory_space<vmem>>, vector<1x128x128xf32>,
    %cst_239 = arith.constant dense<0.000000e+00> : vector<128xf32>
    %233 = vector.multi_reduction <add>, %229, %cst_239 [1] : vector<128x128xf32> to vector<128xf32>
    %234 = vector.shape_cast %233 : vector<128xf32> to vector<128x1xf32>
    %235 = arith.mulf %229, %229 : vector<128x128xf32>
    %cst_240 = arith.constant dense<0.000000e+00> : vector<128xf32>
    %236 = vector.multi_reduction <add>, %235, %cst_240 [1] : vector<128x128xf32> to vector<128xf32>
    %237 = vector.shape_cast %236 : vector<128xf32> to vector<128x1xf32>
    %238 = tpu.concatenate %234, %237 in 1 : vector<128x1xf32>, vector<128x1xf32> -> vector<128x2xf32>
    %c1_241 = arith.constant 1 : index
    %c0_242 = arith.constant 0 : index
    %c0_243 = arith.constant 0 : index
    %239 = vector.load %arg5[%c1_241, %c0_242, %c0_243] : memref<2x128x2xf32, #tpu.memory_space<vmem>>, vector<1x128x2xf32>
    %240 = vector.shape_cast %239 : vector<1x128x2xf32> to vector<128x2xf32>
    %241 = vector.shape_cast %238 : vector<128x2xf32> to vector<1x128x2xf32>
    tpu.vector_store %arg5[%c1_241, %c0_242, %c0_243], %241 {strides = array<i32>} : memref<2x128x2xf32, #tpu.memory_space<vmem>>, vector<1x128x2xf32>,
    return
  }
  func.func @transform_0(%arg0: i32) -> (i32, i32, i32) {
    %c0_i32 = arith.constant 0 : i32
    %c0_i32_0 = arith.constant 0 : i32
    %c0_i32_1 = arith.constant 0 : i32
    return %arg0, %c0_i32, %c0_i32_0 : i32, i32, i32
  }
  func.func @transform_1(%arg0: i32) -> (i32, i32) {
    %c0_i32 = arith.constant 0 : i32
    %c0_i32_0 = arith.constant 0 : i32
    %c0_i32_1 = arith.constant 0 : i32
    return %c0_i32, %c0_i32_0 : i32, i32
  }
  func.func @transform_2(%arg0: i32) -> (i32, i32, i32) {
    %c0_i32 = arith.constant 0 : i32
    %c0_i32_0 = arith.constant 0 : i32
    %c0_i32_1 = arith.constant 0 : i32
    %c0_i32_2 = arith.constant 0 : i32
    return %c0_i32, %c0_i32_0, %c0_i32_1 : i32, i32, i32
  }
  func.func @transform_3(%arg0: i32) -> (i32, i32, i32) {
    %c0_i32 = arith.constant 0 : i32
    %c0_i32_0 = arith.constant 0 : i32
    %c0_i32_1 = arith.constant 0 : i32
    return %arg0, %c0_i32, %c0_i32_0 : i32, i32, i32
  }
  func.func @transform_4(%arg0: i32) -> (i32, i32, i32) {
    %c0_i32 = arith.constant 0 : i32
    %c0_i32_0 = arith.constant 0 : i32
    %c0_i32_1 = arith.constant 0 : i32
    return %arg0, %c0_i32, %c0_i32_0 : i32, i32, i32
  }
}

</mosaic_0001>

<bundles_post_ra>
// kernel: inception_block_1d.3
= control target key start
LH: loop header
LB: loop body
LE: loop exit
PB: predicated region body
PF: predicated region fallthrough
CT: control target
= control target key end

     0   :  { %8 = vsyncpa [#allocation3], 0  ;;  %s1189_s0 = inlined_call_operand.hbm [shape: f32[4,128,128], index: 0, kind: input, shape index: {}, may-alias: {0,3}]   ;;  %s1190_s1 = inlined_call_operand.vmem [shape: f32[128,1], index: 1, kind: input, shape index: {}]   ;;  %s1191_s2 = inlined_call_operand.vmem [shape: f32[128,1], index: 2, kind: input, shape index: {}]   ;;  %s1192_s3 = inlined_call_operand.hbm [shape: f32[4,128,128], index: 3, kind: output, shape index: {}, may-alias: {0,3}]  }
   0x1   :  { %10 = vsyncpa [#allocation3 + $0x1], 0 }
   0x2   :  { %11 = vsyncpa [#allocation4], 0 }
   0x3   :  { %13 = vsyncpa [#allocation4 + $0x1], 0  ;;  %s826_s12 = smov 0   ;;  %s828_s13 = smov 0  }
   0x4   :  { %s830_s14 = smov 0   ;;  %s832_s15 = smov 0  }
   0x5 LB: > { %s847_s16 = sadd.s32 4294967295, %s797_s15   ;;  %s632_s17 = sadd.s32 4294967294, %s797_s15   ;;  %s797_s15 = sphi %s832_s15, %s1207_s15   ;;  %s793_s14 = sphi %s830_s14, %s1206_s14   ;;  %s789_s13 = sphi %s828_s13, %s1205_s13   ;;  %s785_s12 = sphi %s826_s12, %s1204_s12  }
   0x6   : > { %s851_s18 = sadd.s32 1, %s797_s15   ;;  %s26_s19 = sadd.s32 1, %s793_s14 }
   0x7   : > { %s23_s20 = ssub.s32 %s797_s15, %s851_s18  ;;  %p33_p0 = scmp.ne.s32.totalorder %s793_s14, %s789_s13 }
   0x8   : > { %p24_p1 = scmp.eq.s32.totalorder %s23_s20, 0  ;;  %p34_p2 = scmp.eq.s32.totalorder %s797_s15, 0 }
   0x9   : > { %p39_p3 = scmp.ne.s32.totalorder %s789_s13, %s785_s12  ;;  %p40_p4 = scmp.eq.s32.totalorder %s847_s16, 0 }
   0xa   : > { %s863_s21 = scalar_select %p24_p1, %s793_s14, %s26_s19  }
   0xb   : > { %p865_p5 = por %p34_p2, %p33_p0  ;;  %p869_p6 = por %p40_p4, %p39_p3 }
   0xc   : > { %p105_p7 = scmp.eq.s32.totalorder %s847_s16, 1  ;;  %p111_p8 = scmp.eq.s32.totalorder %s632_s17, 1 }
   0xd   : > { %s1196_s23 = scalar_select %p869_p6, 1, 0 }
   0xe   : > { %p664_p10 = scmp.lt.s32.totalorder %s797_s15, 2  ;;  %p876_p11 = por %p105_p7, %p33_p0 }
   0xf   : > { %p880_p12 = por %p111_p8, %p39_p3  ;;  %s137_s26 = sand.u32 1, %s793_s14  }
  0x10   : > { %s1197_s24 = scalar_select %p876_p11, 1, 0 }
  0x11   : > { %s1198_s25 = scalar_select %p880_p12, 1, 0 }
  0x12   : > { %s649_s27 = sshll.u32 %s797_s15, 12  ;;  %s635_s28 = sshll.u32 %s137_s26, 8 }
  0x13   : > { %s889_s4 = scalar_lea.hbm %s1189_s0, %s649_s27  ;;  %s141_s5 = scalar_lea.vmem [#allocation2], %s635_s28 }
  0x14   : > { %s149_s6 = sshll.u32 %s141_s5, 4  ;;  %p893_p13 = pnand %p664_p10, %p865_p5  ;;  %s897_s6 = int_to_ptr.vmem [resolvable:$true] %s149_s6 }
  0x15   : > { %s899_s8 = scalar_lea.sflag [#allocation3], %s137_s26  ;;  %s705_s9 = scalar_lea.hbm %s889_s4, 4096 }
  0x16   : > { %p706_p0 = scmp.ne.s32.totalorder %s889_s4, %s705_s9  ;;  %p707_p1 = pneg %p893_p13 }
  0x17   : > { %s710_s17 = scalar_lea.hbm %s1189_s0, 8192  ;;  %p711_p4 = scmp.lt.s32.totalorder %s889_s4, %s1189_s0 }
  0x18   : > { %p708_p2 = pnand %p707_p1, %p706_p0  ;;  %p712_p5 = scmp.lt.s32.totalorder %s710_s17, %s705_s9 }
  0x1a   : > { %p709_p3 = pneg %p708_p2  ;;  %p713_p7 = por %p712_p5, %p711_p4 }
  0x1c   : > { %p714_p8 = pnand %p713_p7, %p709_p3 }
  0x1e   : > { %717 = shalt.err (!%p714_p8)
}
  0x1f   : > { %s718_s22 = scalar_lea.vmem %s897_s6, 4096  ;;  %s799_s26 = smov [#allocation2]  }
  0x20   : > { %p719_p10 = scmp.ne.s32.totalorder %s897_s6, %s718_s22  ;;  %s723_s27 = sshll.u32 %s799_s26, 4  ;;  %s724_s27 = int_to_ptr.vmem [resolvable:$false] %s723_s27 }
  0x21   : > { %s725_s28 = scalar_lea.vmem %s724_s27, 8192  ;;  %p726_p2 = scmp.lt.s32.totalorder %s897_s6, %s724_s27 }
  0x22   : > { %p721_p9 = pnand %p719_p10, %p707_p1  ;;  %p727_p12 = scmp.lt.s32.totalorder %s725_s28, %s718_s22 }
  0x24   : > { %p722_p0 = pneg %p721_p9  ;;  %p728_p11 = por %p727_p12, %p726_p2 }
  0x26   : > { %p729_p6 = pnand %p728_p11, %p722_p0 }
  0x28   : > { %732 = shalt.err (!%p729_p6)
}
  0x29   : > { %s800_s29 = smov 128   ;;  %s801_s30 = smov 8  }
  0x2a   : > { %659 = dma.hbm_to_vmem [thread:$0]  (!%p893_p13), %s889_s4, 4096, %s897_s6, %s899_s8, %s800_s29, %s800_s29, %s801_s30  }
  0x2b   : > { %p639_p9 = scmp.ge.s32.totalorder %s797_s15, 1  ;;  %p157_p1 = scmp.lt.s32.totalorder %s797_s15, 3 }
  0x2d   : > { %p158_p3 = pnand %p639_p9, %p157_p1 }
  0x2e   : > { %s923_s5 = sand.u32 (!%p158_p3), 1, %s789_s13   ;;  %p1200_p6 = scmp.ne.s32.totalorder (!%p158_p3), %s1196_s23, 0 }
  0x2f   : > { %161 = sbr.rel (%p158_p3) target bundleno = 258 (0x102), region = 32  ;;  %s640_s9 = sshll.u32 (!%p158_p3), %s923_s5, 8 }
  0x30   : > { %s164_s10 = scalar_lea.sflag (!%p158_p3), [#allocation3], %s923_s5  ;;  %s929_s11 = scalar_lea.vmem (!%p158_p3), [#allocation2], %s640_s9 }
  0x34   : > { %776 = dma.done.wait (%p1200_p6), %s164_s10, 4096  }
  0x35   : > { %778 = vsyncadd (%p1200_p6), %s164_s10, 4294963200  ;;  %v802_v0 = vmov 0   ;;  %v194_v1 = vld [vmem:[%s1190_s1 + $0x10] sm:$0xff]  ;;  %v192_v2 = vld [vmem:[%s1190_s1] sm:$0xff]  ;;  %s1065_s17 = scalar_lea.vmem [#allocation5], %s640_s9  ;;  %s651_s9 = sshll.u32 %s847_s16, 12 }
  0x36   : > { %704 = vset.pattern.permute.xlu1 %v802_v0  ;;  %703 = vset.pattern.permute.xlu0 %v802_v0  ;;  %v195_v3 = vld [vmem:[%s1190_s1 + $0x18] sm:$0xff]  ;;  %v193_v4 = vld [vmem:[%s1190_s1 + $0x8] sm:$0xff]  ;;  %v196_v6 = vld [vmem:[%s1190_s1 + $0x20] sm:$0xff]  ;;  %s1140_s16 = scalar_lea.hbm %s1192_s3, %s651_s9  ;;  %s545_s23 = scalar_lea.sflag [#allocation4], %s923_s5 }
  0x37   : > { %268 = vperm.xlu1 %704, %v194_v1   ;;  %258 = vperm.xlu0 %703, %v192_v2   ;;  %v197_v5 = vld [vmem:[%s1190_s1 + $0x28] sm:$0xff]  ;;  %v199_v7 = vld [vmem:[%s1190_s1 + $0x38] sm:$0xff]  ;;  %v198_v8 = vld [vmem:[%s1190_s1 + $0x30] sm:$0xff]  ;;  %p1201_p12 = scmp.ne.s32.totalorder %s1197_s24, 0  ;;  %s803_s26 = smov [#allocation5]  }
  0x38   : > { %v201_v9 = vld [vmem:[%s1190_s1 + $0x48] sm:$0xff]  ;;  %v200_v10 = vld [vmem:[%s1190_s1 + $0x40] sm:$0xff]  ;;  %v203_v11 = vld [vmem:[%s1190_s1 + $0x58] sm:$0xff]  ;;  %s737_s27 = sshll.u32 %s803_s26, 4  ;;  %s738_s27 = int_to_ptr.vmem [resolvable:$false] %s737_s27 }
  0x39   : > { %v202_v12 = vld [vmem:[%s1190_s1 + $0x50] sm:$0xff]  ;;  %v205_v13 = vld [vmem:[%s1190_s1 + $0x68] sm:$0xff]  ;;  %v204_v14 = vld [vmem:[%s1190_s1 + $0x60] sm:$0xff]  ;;  %s739_s28 = scalar_lea.vmem %s738_s27, 8192 }
  0x3a   : > { %v207_v15 = vld [vmem:[%s1190_s1 + $0x78] sm:$0xff]  ;;  %v206_v16 = vld [vmem:[%s1190_s1 + $0x70] sm:$0xff]  ;;  %v209_v17 = vld [vmem:[%s1191_s2 + $0x8] sm:$0xff] }
  0x3b   : > { %273 = vperm.xlu1 %704, %v195_v3   ;;  %263 = vperm.xlu0 %703, %v193_v4   ;;  %v208_v18 = vld [vmem:[%s1191_s2] sm:$0xff]  ;;  %v211_v19 = vld [vmem:[%s1191_s2 + $0x18] sm:$0xff]  ;;  %v210_v20 = vld [vmem:[%s1191_s2 + $0x10] sm:$0xff] }
  0x3c   : > { %v213_v21 = vld [vmem:[%s1191_s2 + $0x28] sm:$0xff]  ;;  %v212_v22 = vld [vmem:[%s1191_s2 + $0x20] sm:$0xff]  ;;  %v215_v23 = vld [vmem:[%s1191_s2 + $0x38] sm:$0xff] }
  0x3d   : > { %v214_v24 = vld [vmem:[%s1191_s2 + $0x30] sm:$0xff]  ;;  %v217_v25 = vld [vmem:[%s1191_s2 + $0x48] sm:$0xff]  ;;  %v216_v26 = vld [vmem:[%s1191_s2 + $0x40] sm:$0xff] }
  0x3e   : > { %v219_v27 = vld [vmem:[%s1191_s2 + $0x58] sm:$0xff]  ;;  %v218_v28 = vld [vmem:[%s1191_s2 + $0x50] sm:$0xff]  ;;  %v221_v29 = vld [vmem:[%s1191_s2 + $0x68] sm:$0xff] }
  0x3f   : > { %283 = vperm.xlu1 %704, %v197_v5   ;;  %278 = vperm.xlu0 %703, %v196_v6   ;;  %v220_v30 = vld [vmem:[%s1191_s2 + $0x60] sm:$0xff]  ;;  %v223_v31 = vld [vmem:[%s1191_s2 + $0x78] sm:$0xff]  ;;  %v222_v32 = vld [vmem:[%s1191_s2 + $0x70] sm:$0xff] }
  0x40   : > { %v224_v47 = vld [vmem:[%s929_s11] sm:$0xff]  ;;  %v225_v49 = vld [vmem:[%s929_s11 + $0x8] sm:$0xff]  ;;  %v226_v53 = vld [vmem:[%s929_s11 + $0x10] sm:$0xff] }
  0x41   : > { %v240_v48 = vld [vmem:[%s929_s11 + $0x80] sm:$0xff]  ;;  %v241_v50 = vld [vmem:[%s929_s11 + $0x88] sm:$0xff]  ;;  %v242_v54 = vld [vmem:[%s929_s11 + $0x90] sm:$0xff] }
  0x42   : > { %v227_v57 = vld [vmem:[%s929_s11 + $0x18] sm:$0xff] }
  0x43   : > { %293 = vperm.xlu1 %704, %v199_v7   ;;  %288 = vperm.xlu0 %703, %v198_v8   ;;  %v243_v58 = vld [vmem:[%s929_s11 + $0x98] sm:$0xff]  ;;  %v229_v7 = vld [vmem:[%s929_s11 + $0x28] sm:$0xff] }
  0x44   : > { %v245_v8 = vld [vmem:[%s929_s11 + $0xa8] sm:$0xff] }
  0x47   : > { %303 = vperm.xlu1 %704, %v201_v9   ;;  %298 = vperm.xlu0 %703, %v200_v10   ;;  %v228_v9 = vld [vmem:[%s929_s11 + $0x20] sm:$0xff] }
  0x48   : > { %v244_v10 = vld [vmem:[%s929_s11 + $0xa0] sm:$0xff] }
  0x4b   : > { %313 = vperm.xlu1 %704, %v203_v11   ;;  %308 = vperm.xlu0 %703, %v202_v12  }
  0x4f   : > { %323 = vperm.xlu1 %704, %v205_v13   ;;  %318 = vperm.xlu0 %703, %v204_v14  }
  0x53   : > { %333 = vperm.xlu1 %704, %v207_v15   ;;  %328 = vperm.xlu0 %703, %v206_v16  }
  0x57   : > { %375 = vperm.xlu1 %704, %v209_v17   ;;  %370 = vperm.xlu0 %703, %v208_v18  }
  0x5b   : > { %385 = vperm.xlu1 %704, %v211_v19   ;;  %380 = vperm.xlu0 %703, %v210_v20  }
  0x5f   : > { %395 = vperm.xlu1 %704, %v213_v21   ;;  %390 = vperm.xlu0 %703, %v212_v22  }
  0x63   : > { %405 = vperm.xlu1 %704, %v215_v23   ;;  %400 = vperm.xlu0 %703, %v214_v24  }
  0x67   : > { %415 = vperm.xlu1 %704, %v217_v25   ;;  %410 = vperm.xlu0 %703, %v216_v26   ;;  %v231_v25 = vld [vmem:[%s929_s11 + $0x38] sm:$0xff] }
  0x68   : > { %v247_v26 = vld [vmem:[%s929_s11 + $0xb8] sm:$0xff] }
  0x6b   : > { %425 = vperm.xlu1 %704, %v219_v27   ;;  %420 = vperm.xlu0 %703, %v218_v28   ;;  %v230_v27 = vld [vmem:[%s929_s11 + $0x30] sm:$0xff] }
  0x6c   : > { %v246_v28 = vld [vmem:[%s929_s11 + $0xb0] sm:$0xff] }
  0x6f   : > { %435 = vperm.xlu1 %704, %v221_v29   ;;  %430 = vperm.xlu0 %703, %v220_v30  }
  0x73   : > { %445 = vperm.xlu1 %704, %v223_v31   ;;  %440 = vperm.xlu0 %703, %v222_v32  }
  0xb2   : > { %v269_v33 = vpop.permute.xlu1 %268  ;;  %v259_v34 = vpop.permute.xlu0 %258 }
  0xb3   : > { %v336_v55 = vmul.f32 %v259_v34, %v224_v47  ;;  %v352_v56 = vmul.f32 %v259_v34, %v240_v48  ;;  %v338_v3 = vmul.f32 %v269_v33, %v226_v53  ;;  %v354_v4 = vmul.f32 %v269_v33, %v242_v54  ;;  %v233_v53 = vld [vmem:[%s929_s11 + $0x48] sm:$0xff] }
  0xb4   : > { %v249_v54 = vld [vmem:[%s929_s11 + $0xc8] sm:$0xff] }
  0xb6   : > { %v274_v35 = vpop.permute.xlu1 %273  ;;  %v264_v36 = vpop.permute.xlu0 %263 }
  0xb7   : > { %v337_v59 = vmul.f32 %v264_v36, %v225_v49  ;;  %v353_v60 = vmul.f32 %v264_v36, %v241_v50  ;;  %v339_v5 = vmul.f32 %v274_v35, %v227_v57  ;;  %v355_v6 = vmul.f32 %v274_v35, %v243_v58 }
  0xba   : > { %v284_v37 = vpop.permute.xlu1 %283  ;;  %v279_v38 = vpop.permute.xlu0 %278 }
  0xbb   : > { %v341_v21 = vmul.f32 %v284_v37, %v229_v7  ;;  %v357_v22 = vmul.f32 %v284_v37, %v245_v8  ;;  %v340_v23 = vmul.f32 %v279_v38, %v228_v9  ;;  %v356_v24 = vmul.f32 %v279_v38, %v244_v10  ;;  %v234_v7 = vld [vmem:[%s929_s11 + $0x50] sm:$0xff] }
  0xbc   : > { %v250_v8 = vld [vmem:[%s929_s11 + $0xd0] sm:$0xff] }
  0xbe   : > { %v1031_v39 = vpop.permute.xlu1 %293  ;;  %v1033_v40 = vpop.permute.xlu0 %288 }
  0xbf   : > { %v343_v47 = vmul.f32 %v1031_v39, %v231_v25  ;;  %v359_v48 = vmul.f32 %v1031_v39, %v247_v26  ;;  %v342_v49 = vmul.f32 %v1033_v40, %v230_v27  ;;  %v358_v50 = vmul.f32 %v1033_v40, %v246_v28 }
  0xc2   : > { %v1035_v41 = vpop.permute.xlu1 %303  ;;  %v1037_v42 = vpop.permute.xlu0 %298 }
  0xc6   : > { %v1039_v43 = vpop.permute.xlu1 %313  ;;  %v1041_v44 = vpop.permute.xlu0 %308 }
  0xca   : > { %v1043_v45 = vpop.permute.xlu1 %323  ;;  %v1045_v46 = vpop.permute.xlu0 %318 }
  0xce   : > { %v1051_v51 = vpop.permute.xlu1 %333  ;;  %v1053_v52 = vpop.permute.xlu0 %328 }
  0xd2   : > { %v376_v61 = vpop.permute.xlu1 %375  ;;  %v371_v62 = vpop.permute.xlu0 %370 }
  0xd3   : > { %v449_v63 = vadd.f32 %v376_v61, %v337_v59  ;;  %v465_v0 = vadd.f32 %v376_v61, %v353_v60  ;;  %v448_v1 = vadd.f32 %v371_v62, %v336_v55  ;;  %v464_v2 = vadd.f32 %v371_v62, %v352_v56  ;;  %v232_v55 = vld [vmem:[%s929_s11 + $0x40] sm:$0xff] }
  0xd4   : > { %v248_v56 = vld [vmem:[%s929_s11 + $0xc0] sm:$0xff] }
  0xd5   : > { %v481_v11 = vmax.f32 %v449_v63, 0.0  ;;  %v497_v12 = vmax.f32 %v465_v0, 0.0  ;;  %v480_v13 = vmax.f32 %v448_v1, 0.0  ;;  %v496_v14 = vmax.f32 %v464_v2, 0.0 }
  0xd6   : > { %v386_v15 = vpop.permute.xlu1 %385  ;;  %v381_v16 = vpop.permute.xlu0 %380  ;;  %v345_v1 = vmul.f32 %v1035_v41, %v233_v53  ;;  %v361_v2 = vmul.f32 %v1035_v41, %v249_v54 }
  0xd7   : > { %513 = vst [vmem:[%s1065_s17 + $0x8] sm:$0xff] %v481_v11  ;;  %529 = vst [vmem:[%s1065_s17 + $0x88] sm:$0xff] %v497_v12  ;;  %v451_v17 = vadd.f32 %v386_v15, %v339_v5  ;;  %v467_v18 = vadd.f32 %v386_v15, %v355_v6  ;;  %v450_v19 = vadd.f32 %v381_v16, %v338_v3  ;;  %v235_v5 = vld [vmem:[%s929_s11 + $0x58] sm:$0xff] }
  0xd8   : > { %512 = vst [vmem:[%s1065_s17] sm:$0xff] %v480_v13  ;;  %528 = vst [vmem:[%s1065_s17 + $0x80] sm:$0xff] %v496_v14  ;;  %v466_v20 = vadd.f32 %v381_v16, %v354_v4  ;;  %v344_v3 = vmul.f32 %v1037_v42, %v232_v55  ;;  %v360_v4 = vmul.f32 %v1037_v42, %v248_v56  ;;  %v251_v6 = vld [vmem:[%s929_s11 + $0xd8] sm:$0xff] }
  0xd9   : > { %v483_v29 = vmax.f32 %v451_v17, 0.0  ;;  %v499_v30 = vmax.f32 %v467_v18, 0.0  ;;  %v482_v31 = vmax.f32 %v450_v19, 0.0  ;;  %v347_v17 = vmul.f32 %v1039_v43, %v235_v5 }
  0xda   : > { %v498_v32 = vmax.f32 %v466_v20, 0.0  ;;  %v396_v33 = vpop.permute.xlu1 %395  ;;  %v391_v34 = vpop.permute.xlu0 %390  ;;  %v363_v18 = vmul.f32 %v1039_v43, %v251_v6  ;;  %v346_v19 = vmul.f32 %v1041_v44, %v234_v7  ;;  %v362_v20 = vmul.f32 %v1041_v44, %v250_v8 }
  0xdb   : > { %515 = vst [vmem:[%s1065_s17 + $0x18] sm:$0xff] %v483_v29  ;;  %531 = vst [vmem:[%s1065_s17 + $0x98] sm:$0xff] %v499_v30  ;;  %v453_v35 = vadd.f32 %v396_v33, %v341_v21  ;;  %v469_v36 = vadd.f32 %v396_v33, %v357_v22  ;;  %v452_v37 = vadd.f32 %v391_v34, %v340_v23  ;;  %v237_v21 = vld [vmem:[%s929_s11 + $0x68] sm:$0xff]  ;;  %v236_v23 = vld [vmem:[%s929_s11 + $0x60] sm:$0xff] }
  0xdc   : > { %514 = vst [vmem:[%s1065_s17 + $0x10] sm:$0xff] %v482_v31  ;;  %530 = vst [vmem:[%s1065_s17 + $0x90] sm:$0xff] %v498_v32  ;;  %v468_v38 = vadd.f32 %v391_v34, %v356_v24  ;;  %v253_v22 = vld [vmem:[%s929_s11 + $0xe8] sm:$0xff]  ;;  %v252_v24 = vld [vmem:[%s929_s11 + $0xe0] sm:$0xff]  ;;  %v349_v33 = vmul.f32 %v1043_v45, %v237_v21 }
  0xdd   : > { %v485_v57 = vmax.f32 %v453_v35, 0.0  ;;  %v501_v58 = vmax.f32 %v469_v36, 0.0  ;;  %v484_v59 = vmax.f32 %v452_v37, 0.0  ;;  %v365_v34 = vmul.f32 %v1043_v45, %v253_v22  ;;  %v239_v37 = vld [vmem:[%s929_s11 + $0x78] sm:$0xff] }
  0xde   : > { %v500_v60 = vmax.f32 %v468_v38, 0.0  ;;  %v406_v61 = vpop.permute.xlu1 %405  ;;  %v401_v62 = vpop.permute.xlu0 %400  ;;  %v348_v35 = vmul.f32 %v1045_v46, %v236_v23  ;;  %v364_v36 = vmul.f32 %v1045_v46, %v252_v24  ;;  %v255_v38 = vld [vmem:[%s929_s11 + $0xf8] sm:$0xff] }
  0xdf   : > { %517 = vst [vmem:[%s1065_s17 + $0x28] sm:$0xff] %v485_v57  ;;  %533 = vst [vmem:[%s1065_s17 + $0xa8] sm:$0xff] %v501_v58  ;;  %v455_v39 = vadd.f32 %v406_v61, %v343_v47  ;;  %v471_v40 = vadd.f32 %v406_v61, %v359_v48  ;;  %v454_v63 = vadd.f32 %v401_v62, %v342_v49  ;;  %v238_v47 = vld [vmem:[%s929_s11 + $0x70] sm:$0xff] }
  0xe0   : > { %516 = vst [vmem:[%s1065_s17 + $0x20] sm:$0xff] %v484_v59  ;;  %532 = vst [vmem:[%s1065_s17 + $0xa0] sm:$0xff] %v500_v60  ;;  %v470_v0 = vadd.f32 %v401_v62, %v358_v50  ;;  %v254_v48 = vld [vmem:[%s929_s11 + $0xf0] sm:$0xff]  ;;  %v351_v59 = vmul.f32 %v1051_v51, %v239_v37  ;;  %v367_v60 = vmul.f32 %v1051_v51, %v255_v38  ;;  %s559_s11 = sshll.u32 %s1065_s17, 4  ;;  %s1142_s11 = int_to_ptr.vmem [resolvable:$true] %s559_s11 }
  0xe1   : > { %v487_v9 = vmax.f32 %v455_v39, 0.0  ;;  %v503_v10 = vmax.f32 %v471_v40, 0.0  ;;  %v486_v11 = vmax.f32 %v454_v63, 0.0  ;;  %v350_v61 = vmul.f32 %v1053_v52, %v238_v47  ;;  %s733_s22 = scalar_lea.vmem %s1142_s11, 4096  ;;  %p740_p5 = scmp.lt.s32.totalorder %s1142_s11, %s738_s27 }
  0xe2   : > { %v502_v12 = vmax.f32 %v470_v0, 0.0  ;;  %v416_v13 = vpop.permute.xlu1 %415  ;;  %v411_v14 = vpop.permute.xlu0 %410  ;;  %v366_v62 = vmul.f32 %v1053_v52, %v254_v48  ;;  %p734_p11 = scmp.ne.s32.totalorder %s1142_s11, %s733_s22  ;;  %p741_p7 = scmp.lt.s32.totalorder %s739_s28, %s733_s22 }
  0xe3   : > { %519 = vst [vmem:[%s1065_s17 + $0x38] sm:$0xff] %v487_v9  ;;  %535 = vst [vmem:[%s1065_s17 + $0xb8] sm:$0xff] %v503_v10  ;;  %v457_v41 = vadd.f32 %v416_v13, %v345_v1  ;;  %v473_v42 = vadd.f32 %v416_v13, %v361_v2  ;;  %v456_v15 = vadd.f32 %v411_v14, %v344_v3 }
  0xe4   : > { %518 = vst [vmem:[%s1065_s17 + $0x30] sm:$0xff] %v486_v11  ;;  %534 = vst [vmem:[%s1065_s17 + $0xb0] sm:$0xff] %v502_v12  ;;  %v472_v16 = vadd.f32 %v411_v14, %v360_v4  ;;  %p735_p13 = pnand %p734_p11, %p1201_p12  ;;  %p742_p8 = por %p741_p7, %p740_p5 }
  0xe5   : > { %v489_v25 = vmax.f32 %v457_v41, 0.0  ;;  %v505_v26 = vmax.f32 %v473_v42, 0.0  ;;  %v488_v27 = vmax.f32 %v456_v15, 0.0 }
  0xe6   : > { %v504_v28 = vmax.f32 %v472_v16, 0.0  ;;  %v426_v29 = vpop.permute.xlu1 %425  ;;  %v421_v30 = vpop.permute.xlu0 %420  ;;  %p736_p4 = pneg %p735_p13 }
  0xe7   : > { %521 = vst [vmem:[%s1065_s17 + $0x48] sm:$0xff] %v489_v25  ;;  %537 = vst [vmem:[%s1065_s17 + $0xc8] sm:$0xff] %v505_v26  ;;  %v459_v43 = vadd.f32 %v426_v29, %v347_v17  ;;  %v475_v44 = vadd.f32 %v426_v29, %v363_v18  ;;  %v458_v31 = vadd.f32 %v421_v30, %v346_v19 }
  0xe8   : > { %520 = vst [vmem:[%s1065_s17 + $0x40] sm:$0xff] %v488_v27  ;;  %536 = vst [vmem:[%s1065_s17 + $0xc0] sm:$0xff] %v504_v28  ;;  %v474_v32 = vadd.f32 %v421_v30, %v362_v20  ;;  %p743_p10 = pnand %p742_p8, %p736_p4 }
  0xe9   : > { %v491_v49 = vmax.f32 %v459_v43, 0.0  ;;  %v507_v50 = vmax.f32 %v475_v44, 0.0  ;;  %v490_v53 = vmax.f32 %v458_v31, 0.0 }
  0xea   : > { %v506_v54 = vmax.f32 %v474_v32, 0.0  ;;  %v436_v55 = vpop.permute.xlu1 %435  ;;  %v431_v56 = vpop.permute.xlu0 %430 }
  0xeb   : > { %523 = vst [vmem:[%s1065_s17 + $0x58] sm:$0xff] %v491_v49  ;;  %539 = vst [vmem:[%s1065_s17 + $0xd8] sm:$0xff] %v507_v50  ;;  %v461_v45 = vadd.f32 %v436_v55, %v349_v33  ;;  %v477_v57 = vadd.f32 %v436_v55, %v365_v34  ;;  %v460_v46 = vadd.f32 %v431_v56, %v348_v35 }
  0xec   : > { %522 = vst [vmem:[%s1065_s17 + $0x50] sm:$0xff] %v490_v53  ;;  %538 = vst [vmem:[%s1065_s17 + $0xd0] sm:$0xff] %v506_v54  ;;  %v476_v58 = vadd.f32 %v431_v56, %v364_v36 }
  0xed   : > { %v493_v39 = vmax.f32 %v461_v45, 0.0  ;;  %v509_v40 = vmax.f32 %v477_v57, 0.0  ;;  %v492_v63 = vmax.f32 %v460_v46, 0.0 }
  0xee   : > { %v508_v0 = vmax.f32 %v476_v58, 0.0  ;;  %v446_v1 = vpop.permute.xlu1 %445  ;;  %v441_v2 = vpop.permute.xlu0 %440 }
  0xef   : > { %525 = vst [vmem:[%s1065_s17 + $0x68] sm:$0xff] %v493_v39  ;;  %541 = vst [vmem:[%s1065_s17 + $0xe8] sm:$0xff] %v509_v40  ;;  %v463_v51 = vadd.f32 %v446_v1, %v351_v59  ;;  %v479_v3 = vadd.f32 %v446_v1, %v367_v60  ;;  %v462_v52 = vadd.f32 %v441_v2, %v350_v61 }
  0xf0   : > { %524 = vst [vmem:[%s1065_s17 + $0x60] sm:$0xff] %v492_v63  ;;  %540 = vst [vmem:[%s1065_s17 + $0xe0] sm:$0xff] %v508_v0  ;;  %v478_v4 = vadd.f32 %v441_v2, %v366_v62 }
  0xf1   : > { %v495_v5 = vmax.f32 %v463_v51, 0.0  ;;  %v511_v6 = vmax.f32 %v479_v3, 0.0  ;;  %v494_v7 = vmax.f32 %v462_v52, 0.0 }
  0xf2   : > { %v510_v8 = vmax.f32 %v478_v4, 0.0 }
  0xf3   : > { %527 = vst [vmem:[%s1065_s17 + $0x78] sm:$0xff] %v495_v5  ;;  %543 = vst [vmem:[%s1065_s17 + $0xf8] sm:$0xff] %v511_v6 }
  0xf4   : > { %526 = vst [vmem:[%s1065_s17 + $0x70] sm:$0xff] %v494_v7  ;;  %542 = vst [vmem:[%s1065_s17 + $0xf0] sm:$0xff] %v510_v8 }
  0xf5   : > { %746 = shalt.err (!%p743_p10)
}
  0xf6   : > { %s747_s29 = scalar_lea.hbm %s1140_s16, 4096  ;;  %s751_s4 = scalar_lea.hbm %s1192_s3, 8192 }
  0xf7   : > { %p748_p0 = scmp.ne.s32.totalorder %s1140_s16, %s747_s29  ;;  %p752_p1 = scmp.lt.s32.totalorder %s1140_s16, %s1192_s3 }
  0xf8   : > { %p753_p3 = scmp.lt.s32.totalorder %s751_s4, %s747_s29 }
  0xf9   : > { %p749_p2 = pnand %p748_p0, %p1201_p12 }
  0xfa   : > { %p754_p6 = por %p753_p3, %p752_p1 }
  0xfb   : > { %p750_p9 = pneg %p749_p2 }
  0xfd   : > { %p755_p11 = pnand %p754_p6, %p750_p9 }
  0xff   : > { %758 = shalt.err (!%p755_p11)
}
 0x100   : > { %s804_s8 = smov 128   ;;  %s805_s17 = smov 8  }
 0x101   : > { %654 = dma.vmem_to_hbm [thread:$0]  (%p1201_p12), %s1142_s11, 4096, %s1140_s16, %s545_s23, %s804_s8, %s804_s8, %s805_s17  }
 0x102 PF: > { %s574_s9 = sand.u32 1, %s785_s12   ;;  %p1202_p13 = scmp.ne.s32.totalorder %s1198_s25, 0 }
 0x103   : > { %p1203_p4 = scmp.ge.s32.totalorder %s797_s15, 2  ;;  %s575_s19 = scalar_lea.sflag [#allocation4], %s574_s9 }
 0x105   : > { %p661_p5 = pnand %p1203_p4, %p1202_p13 }
 0x107   : > { %p662_p7 = pneg %p661_p5 }
 0x109   : > { %780 = dma.done.wait (%p662_p7), %s575_s19, 4096  }
 0x10a   : > { %782 = vsyncadd (%p662_p7), %s575_s19, 4294963200  ;;  %p16_p8 = scmp.ge.s32.totalorder %s851_s18, 4   ;;  %s1204_s12 = smov %s789_s13 }
 0x10b   : > { %s1205_s13 = smov %s793_s14  ;;  %s1206_s14 = smov %s863_s21 }
 0x10c   : > { %s1207_s15 = smov %s851_s18  ;;  %18 = sbr.rel (!%p16_p8) target bundleno = 5 (0x5), region = 77 }
 0x111   :  { %580 = vsyncpa [#allocation3], 1 }
 0x112   :  { %582 = vsyncpa [#allocation3 + $0x1], 1 }
 0x113   :  { %583 = vsyncpa [#allocation4], 1 }
 0x114   :  { %585 = vsyncpa [#allocation4 + $0x1], 1 }

// kernel: inception_block_1d.2
= control target key start
LH: loop header
LB: loop body
LE: loop exit
PB: predicated region body
PF: predicated region fallthrough
CT: control target
= control target key end

     0   :  { %10 = vsyncpa [#allocation4], 0  ;;  %s13036_s0 = inlined_call_operand.vmem [shape: f32[4,4,128], index: 0, kind: input, shape index: {}]   ;;  %s13037_s1 = inlined_call_operand.vmem [shape: f32[64,8], index: 1, kind: input, shape index: {}]   ;;  %s13038_s2 = inlined_call_operand.vmem [shape: f32[10,96,128], index: 2, kind: input, shape index: {}]   ;;  %s13039_s3 = inlined_call_operand.hbm [shape: f32[4,128,128], index: 3, kind: output, shape index: {0}]   ;;  %s13040_s4 = inlined_call_operand.vmem [shape: f32[4,128,2], index: 4, kind: output, shape index: {1}]  }
   0x1   :  { %12 = vsyncpa [#allocation4 + $0x1], 0  ;;  %s7937_s15 = smov 0   ;;  %s7939_s16 = smov 0  }
   0x2   :  { %s7941_s17 = smov 0   ;;  %s7943_s18 = smov 0  }
   0x3 LB: > { %s7958_s19 = sadd.s32 4294967295, %s7892_s18   ;;  %s5843_s20 = sadd.s32 4294967294, %s7892_s18   ;;  %s7892_s18 = sphi %s7943_s18, %s13966_s18   ;;  %s7888_s17 = sphi %s7941_s17, %s13965_s17   ;;  %s7884_s16 = sphi %s7939_s16, %s13964_s16   ;;  %s7880_s15 = sphi %s7937_s15, %s13963_s15  }
   0x4   : > { %s7962_s21 = sadd.s32 1, %s7892_s18   ;;  %s93_s22 = sadd.s32 1, %s7888_s17 }
   0x5   : > { %s90_s23 = ssub.s32 %s7892_s18, %s7962_s21  ;;  %p103_p0 = scmp.ne.s32.totalorder %s7888_s17, %s7884_s16 }
   0x6   : > { %p91_p1 = scmp.eq.s32.totalorder %s90_s23, 0  ;;  %p104_p2 = scmp.eq.s32.totalorder %s7958_s19, 1 }
   0x7   : > { %p109_p3 = scmp.ne.s32.totalorder %s7884_s16, %s7880_s15  ;;  %p110_p4 = scmp.eq.s32.totalorder %s5843_s20, 1 }
   0x8   : > { %s7973_s24 = scalar_select %p91_p1, %s7888_s17, %s93_s22  }
   0x9   : > { %p7975_p5 = por %p104_p2, %p103_p0  ;;  %p7979_p6 = por %p110_p4, %p109_p3 }
   0xa   : > { %p5846_p7 = scmp.ge.s32.totalorder %s7892_s18, 1  ;;  %p169_p8 = scmp.lt.s32.totalorder %s7892_s18, 3 }
   0xc   : > { %p170_p9 = pnand %p5846_p7, %p169_p8 }
   0xe   : > { %173 = sbr.rel (%p170_p9) target bundleno = 3008 (0xbc0), region = 32 }
  0x13   : > { %s5848_s27 = sshll.u32 %s7958_s19, 1  ;;  %s7894_s6 = smov 1   ;;  %vm220_vm0 = vcmask 7168   ;;  %v246_v2 = vld [vmem:[%s13037_s1] sm:$0xff]  ;;  %vm254_vm1 = vcmask 64512   ;;  %vm229_vm2 = vcmask 1039360  }
  0x14   : > { %p202_p10 = scmp.lt.s32.totalorder %s5848_s27, 3  ;;  %6707 = vmatprep.mubr.msk.f32.mxu0 %vm254_vm1, %v246_v2  ;;  %s7895_s9 = smov 127   ;;  %vm237_vm3 = vcmask 1031168   ;;  %vm244_vm4 = vcmask 1043456   ;;  %v247_v19 = vld [vmem:[%s13037_s1 + $0x8] sm:$0xff]  ;;  %v248_v20 = vld [vmem:[%s13037_s1 + $0x10] sm:$0xff] }
  0x15   : > { %s13053_s10 = smov 126   ;;  %v249_v21 = vld [vmem:[%s13037_s1 + $0x18] sm:$0xff]  ;;  %v250_v22 = vld [vmem:[%s13037_s1 + $0x20] sm:$0xff]  ;;  %v251_v23 = vld [vmem:[%s13037_s1 + $0x28] sm:$0xff]  ;;  %vm384_vm5 = vcmask 154624   ;;  %v13048_v26 = vmov 0.0  }
  0x16   : > { %s13968_s27 = smov (!%p202_p10, %s5848_s27), 3  ;;  %v252_v24 = vld [vmem:[%s13037_s1 + $0x30] sm:$0xff]  ;;  %v253_v25 = vld [vmem:[%s13037_s1 + $0x38] sm:$0xff]  ;;  %386 = vst.msk [vmem:[#allocation2 + $0x10] sm:$0xff] %vm384_vm5, %v13048_v26  ;;  %385 = vst.msk [vmem:[#allocation2] sm:$0xff] %vm384_vm5, %v13048_v26  ;;  %s13041_s12 = sand.u32 1, %s7884_s16  }
  0x17   : > { %s5849_s28 = sshll.u32 %s13968_s27, 2  ;;  %387 = vst.msk [vmem:[#allocation2 + $0x20] sm:$0xff] %vm384_vm5, %v13048_v26  ;;  %388 = vst.msk [vmem:[#allocation2 + $0x30] sm:$0xff] %vm384_vm5, %v13048_v26  ;;  %s13042_s13 = smov 19   ;;  %vm405_vm6 = vcmask 1047704   ;;  %vm414_vm7 = vcmask 318616  }
  0x18   : > { %s7992_s5 = scalar_lea.vmem %s13036_s0, %s5849_s28  ;;  %s5847_s14 = sshll.u32 %s13041_s12, 8  ;;  %vm2968_vm8 = vcmask 15360   ;;  %vm499_vm9 = vcmask 1022976   ;;  %vm597_vm10 = vcmask 1014784   ;;  %vm1204_vm11 = vcmask 949248  }
  0x19   : > { %v215_v0 = vld [vmem:[%s7992_s5] sm:$0xf]  ;;  %v5969_v1 = vld [vmem:[%s7992_s5 + $0x4] sm:$0xf]  ;;  %s8062_s20 = scalar_lea.vmem [#allocation3], %s5847_s14  ;;  %s13062_s22 = smov 92  }
  0x1a   : > { %217 = vrot.lane.b32.xlu0 %v215_v0, %s7894_s6  ;;  %2988 = vrot.lane.b32.xlu1 %v5969_v1, %s7894_s6  ;;  %s13051_s23 = smov 125   ;;  %s13057_s28 = smov 124   ;;  %vm957_vm12 = vcmask 982016   ;;  %vm13059_vm13 = vcmask 883712   ;;  %vm13060_vm14 = vcmask 916480   ;;  %vm13061_vm15 = vcmask 818176  }
  0x1b   : > { %s13055_s29 = smov 120   ;;  %s7903_s30 = smov 116  }
  0x1c   : > { %s7904_s6 = smov 112   ;;  %s13066_s7 = smov 108  }
  0x1d   : > { %s13044_s8 = smov 104   ;;  %s13046_s11 = smov 100  }
  0x1e   : > { %s13064_s14 = smov 96   ;;  %s6124_s12 = sshll.u32 %s13968_s27, 7 }
  0x1f   : > { %s13077_s27 = smov 104  }
  0x8c   : > { %v218_v3 = vpop.permute.xlu0 %217  ;;  %v2989_v6 = vpop.permute.xlu1 %2988 }
  0x8d   : > { %v222_v4 = vsel %vm220_vm0, %v218_v3, -inf  ;;  %v221_v5 = vsel %vm220_vm0, -inf, %v218_v3  ;;  %v8007_v7 = vsel %vm220_vm0, -inf, %v2989_v6  ;;  %v2992_v8 = vsel %vm220_vm0, %v2989_v6, -inf }
  0x8e   : > { %227 = vrot.lane.b32.xlu1 %v222_v4, %s7895_s9  ;;  %225 = vrot.lane.b32.xlu0 %v221_v5, %s7895_s9  ;;  %13072 = vst [vmem:[#allocation6_spill] sm:$0xff] %v8007_v7 }
  0x92   : > { %233 = vrot.lane.b32.xlu1 %v221_v5, %s13053_s10  ;;  %235 = vrot.lane.b32.xlu0 %v222_v4, %s13053_s10 }
  0x96   : > { %2995 = vrot.lane.b32.xlu1 %v8007_v7, %s7895_s9  ;;  %2997 = vrot.lane.b32.xlu0 %v2992_v8, %s7895_s9 }
  0x9a   : > { %3002 = vrot.lane.b32.xlu1 %v8007_v7, %s13053_s10  ;;  %3004 = vrot.lane.b32.xlu0 %v2992_v8, %s13053_s10 }
 0x100   : > { %v228_v9 = vpop.permute.xlu1 %227  ;;  %v226_v10 = vpop.permute.xlu0 %225 }
 0x101   : > { %v230_v11 = vsel %vm229_vm2, %v226_v10, %v228_v9 }
 0x102   : > { %v232_v12 = vmax.f32 %v221_v5, %v230_v11 }
 0x104   : > { %v234_v13 = vpop.permute.xlu1 %233  ;;  %v236_v14 = vpop.permute.xlu0 %235 }
 0x105   : > { %v238_v15 = vsel %vm237_vm3, %v234_v13, %v236_v14 }
 0x106   : > { %v240_v16 = vmax.f32 %v232_v12, %v238_v15 }
 0x108   : > { %v242_v17 = vrot.slane %v240_v16, 4  ;;  %v8068_v39 = vpop.permute.xlu0 %2997  ;;  %v8070_v40 = vpop.permute.xlu1 %2995 }
 0x109   : > { %13073 = vst [vmem:[#allocation7_spill] sm:$0xff] %v8068_v39  ;;  %13074 = vst [vmem:[#allocation8_spill] sm:$0xff] %v8070_v40 }
 0x10a   : > { %v245_v18 = vsel %vm244_vm4, %v215_v0, %v242_v17 }
 0x10b   : > { %6705 = vmatprep.subr.mxu0 %v245_v18 }
 0x10c   : > { %6706 = vmatpush3.msra.mxu0 %v245_v18  ;;  %v8072_v41 = vpop.permute.xlu0 %3004  ;;  %v8074_v42 = vpop.permute.xlu1 %3002 }
 0x10d   : > { %6708 = vmatmul.mubr.msk.f32.vlgmr.msra.gmra.mxu0 %vm254_vm1, %v247_v19  ;;  %13075 = vst [vmem:[#allocation9_spill] sm:$0xff] %v8072_v41  ;;  %13076 = vst [vmem:[#allocation10_spill] sm:$0xff] %v8074_v42 }
 0x10e   : > { %6710 = vmatprep.mubr.msk.f32.mxu0 %vm254_vm1, %v248_v20 }
 0x111   : > { %6711 = vmatmul.mubr.msk.f32.gmra.mxu0 %vm254_vm1, %v249_v21 }
 0x112   : > { %6713 = vmatprep.mubr.msk.f32.mxu0 %vm254_vm1, %v250_v22 }
 0x115   : > { %6714 = vmatmul.mubr.msk.f32.gmra.mxu0 %vm254_vm1, %v251_v23 }
 0x116   : > { %6716 = vmatprep.mubr.msk.f32.mxu0 %vm254_vm1, %v252_v24 }
 0x119   : > { %6717 = vmatmul.mubr.msk.f32.gmra.mxu0 %vm254_vm1, %v253_v25 }
 0x1cd   : > { %v6709_v27 = vpop.f32.mrf.mxu0 }
 0x1ce   : > { %395 = vrot.lane.b32.xlu0 %v6709_v27, %s13042_s13 }
 0x1cf   : > { %v345_v28 = vpop.f32.mrf.mxu0 }
 0x1d0   : > { %393 = vrot.lane.b32.xlu1 %v345_v28, %s13042_s13 }
 0x1d1   : > { %v6712_v29 = vpop.f32.mrf.mxu0 }
 0x1d2   : > { %399 = vrot.lane.b32.xlu0 %v6712_v29, %s13042_s13 }
 0x1d3   : > { %v355_v30 = vpop.f32.mrf.mxu0 }
 0x1d4   : > { %397 = vrot.lane.b32.xlu1 %v355_v30, %s13042_s13 }
 0x1d5   : > { %v6715_v31 = vpop.f32.mrf.mxu0 }
 0x1d6   : > { %2869 = vst [vmem:[%s8062_s20 + $0x68] sm:$0xff] %v6715_v31  ;;  %v2917_v35 = vmul.f32 %v6715_v31, %v6715_v31 }
 0x1d7   : > { %v365_v32 = vpop.f32.mrf.mxu0 }
 0x1d8   : > { %2868 = vst [vmem:[%s8062_s20 + $0x60] sm:$0xff] %v365_v32  ;;  %v2916_v36 = vmul.f32 %v365_v32, %v365_v32 }
 0x1d9   : > { %v6718_v33 = vpop.f32.mrf.mxu0 }
 0x1da   : > { %2871 = vst [vmem:[%s8062_s20 + $0x78] sm:$0xff] %v6718_v33  ;;  %v2919_v37 = vmul.f32 %v6718_v33, %v6718_v33 }
 0x1db   : > { %v375_v34 = vpop.f32.mrf.mxu0 }
 0x1dc   : > { %2870 = vst [vmem:[%s8062_s20 + $0x70] sm:$0xff] %v375_v34  ;;  %v2918_v38 = vmul.f32 %v375_v34, %v375_v34 }
 0x1f1   : > { %2898 = vadd.xlane.f32.xlu0 %v6715_v31 }
 0x1f5   : > { %2946 = vadd.xlane.f32.xlu0 %v2917_v35 }
 0x1f8   : > { %2896 = vadd.xlane.f32.xlu1 %v365_v32 }
 0x1f9   : > { %2902 = vadd.xlane.f32.xlu0 %v6718_v33 }
 0x1fc   : > { %2944 = vadd.xlane.f32.xlu1 %v2916_v36 }
 0x1fd   : > { %2950 = vadd.xlane.f32.xlu0 %v2919_v37 }
 0x200   : > { %2900 = vadd.xlane.f32.xlu1 %v375_v34 }
 0x204   : > { %2948 = vadd.xlane.f32.xlu1 %v2918_v38 }
 0x240   : > { %v396_v43 = vpop.permute.xlu0 %395 }
 0x241   : > { %408 = vst.msk [vmem:[#allocation2 + $0x10] sm:$0xff] %vm405_vm6, %v396_v43 }
 0x242   : > { %409 = vst.msk [vmem:[#allocation2 + $0x18] sm:$0xff] %vm384_vm5, %v396_v43  ;;  %v394_v44 = vpop.permute.xlu1 %393 }
 0x243   : > { %416 = vst.msk [vmem:[#allocation2 + $0x18] sm:$0xff] %vm414_vm7, %v13048_v26 }
 0x244   : > { %406 = vst.msk [vmem:[#allocation2] sm:$0xff] %vm405_vm6, %v394_v44  ;;  %v400_v45 = vpop.permute.xlu0 %399 }
 0x245   : > { %407 = vst.msk [vmem:[#allocation2 + $0x8] sm:$0xff] %vm384_vm5, %v394_v44  ;;  %413 = vst.msk [vmem:[#allocation2 + $0x38] sm:$0xff] %vm384_vm5, %v400_v45 }
 0x246   : > { %415 = vst.msk [vmem:[#allocation2 + $0x8] sm:$0xff] %vm414_vm7, %v13048_v26  ;;  %v398_v46 = vpop.permute.xlu1 %397  ;;  %418 = vst.msk [vmem:[#allocation2 + $0x38] sm:$0xff] %vm414_vm7, %v13048_v26 }
 0x247   : > { %412 = vst.msk [vmem:[#allocation2 + $0x30] sm:$0xff] %vm405_vm6, %v400_v45  ;;  %410 = vst.msk [vmem:[#allocation2 + $0x20] sm:$0xff] %vm405_vm6, %v398_v46 }
 0x248   : > { %411 = vst.msk [vmem:[#allocation2 + $0x28] sm:$0xff] %vm384_vm5, %v398_v46  ;;  %v8090_v47 = vld [vmem:[#allocation2 + $0x10] sm:$0xff] }
 0x249   : > { %417 = vst.msk [vmem:[#allocation2 + $0x28] sm:$0xff] %vm414_vm7, %v13048_v26  ;;  %2626 = vrot.lane.b32.xlu0 %v8090_v47, %s13062_s22  ;;  %439 = vrot.lane.b32.xlu1 %v8090_v47, %s7895_s9 }
 0x24a   : > { %3151 = vst.msk [vmem:[#allocation2 + $0x10] sm:$0xff] %vm384_vm5, %v13048_v26  ;;  %v424_v48 = vld [vmem:[#allocation2 + $0x18] sm:$0xff] }
 0x24b   : > { %v8100_v49 = vld [vmem:[#allocation2] sm:$0xff] }
 0x24c   : > { %3150 = vst.msk [vmem:[#allocation2] sm:$0xff] %vm384_vm5, %v13048_v26 }
 0x24d   : > { %441 = vrot.lane.b32.xlu0 %v424_v48, %s7895_s9  ;;  %463 = vrot.lane.b32.xlu1 %v8090_v47, %s13053_s10  ;;  %v423_v52 = vld [vmem:[#allocation2 + $0x8] sm:$0xff]  ;;  %v426_v1 = vld [vmem:[#allocation2 + $0x38] sm:$0xff] }
 0x24e   : > { %v8104_v50 = vld [vmem:[#allocation2 + $0x30] sm:$0xff]  ;;  %v8111_v51 = vld [vmem:[#allocation2 + $0x20] sm:$0xff] }
 0x24f   : > { %3153 = vst.msk [vmem:[#allocation2 + $0x30] sm:$0xff] %vm384_vm5, %v13048_v26  ;;  %3152 = vst.msk [vmem:[#allocation2 + $0x20] sm:$0xff] %vm384_vm5, %v13048_v26 }
 0x250   : > { %v425_v19 = vld [vmem:[#allocation2 + $0x28] sm:$0xff] }
 0x251   : > { %465 = vrot.lane.b32.xlu0 %v424_v48, %s13053_s10  ;;  %487 = vrot.lane.b32.xlu1 %v8090_v47, %s13051_s23 }
 0x255   : > { %489 = vrot.lane.b32.xlu0 %v424_v48, %s13051_s23  ;;  %537 = vrot.lane.b32.xlu1 %v8090_v47, %s13057_s28 }
 0x259   : > { %539 = vrot.lane.b32.xlu0 %v424_v48, %s13057_s28  ;;  %897 = vrot.lane.b32.xlu1 %v8090_v47, %s13055_s29 }
 0x25d   : > { %899 = vrot.lane.b32.xlu0 %v424_v48, %s13055_s29  ;;  %1144 = vrot.lane.b32.xlu1 %v8090_v47, %s7903_s30 }
 0x261   : > { %1146 = vrot.lane.b32.xlu0 %v424_v48, %s7903_s30  ;;  %1391 = vrot.lane.b32.xlu1 %v8090_v47, %s7904_s6 }
 0x265   : > { %1393 = vrot.lane.b32.xlu0 %v424_v48, %s7904_s6  ;;  %1638 = vrot.lane.b32.xlu1 %v8090_v47, %s13066_s7 }
 0x269   : > { %1640 = vrot.lane.b32.xlu0 %v424_v48, %s13066_s7  ;;  %1885 = vrot.lane.b32.xlu1 %v8090_v47, %s13044_s8 }
 0x26d   : > { %1887 = vrot.lane.b32.xlu0 %v424_v48, %s13044_s8  ;;  %2132 = vrot.lane.b32.xlu1 %v8090_v47, %s13046_s11 }
 0x271   : > { %2134 = vrot.lane.b32.xlu0 %v424_v48, %s13046_s11  ;;  %2379 = vrot.lane.b32.xlu1 %v8090_v47, %s13064_s14  ;;  %s8152_s11 = scalar_lea.vmem %s13040_s4, %s6124_s12  ;;  %s13078_s12 = smov 100  }
 0x275   : > { %2381 = vrot.lane.b32.xlu0 %v424_v48, %s13064_s14  ;;  %2628 = vrot.lane.b32.xlu1 %v424_v48, %s13062_s22 }
 0x279   : > { %2622 = vrot.lane.b32.xlu0 %v8100_v49, %s13062_s22  ;;  %435 = vrot.lane.b32.xlu1 %v8100_v49, %s7895_s9 }
 0x27a   : > { %v2899_v53 = vpop.xlane.xlu0 %2898 }
 0x27d   : > { %437 = vrot.lane.b32.xlu0 %v423_v52, %s7895_s9  ;;  %459 = vrot.lane.b32.xlu1 %v8100_v49, %s13053_s10 }
 0x27e   : > { %v2947_v54 = vpop.xlane.xlu0 %2946 }
 0x27f   : > { %v2965_v55 = vsel %vm220_vm0, %v2899_v53, %v2947_v54 }
 0x280   : > { %2982 = vst.msk [vmem:[%s8152_s11 + $0x68] sm:$0xff] %vm2968_vm8, %v2965_v55 }
 0x281   : > { %461 = vrot.lane.b32.xlu0 %v423_v52, %s13053_s10  ;;  %483 = vrot.lane.b32.xlu1 %v8100_v49, %s13051_s23  ;;  %v2897_v56 = vpop.xlane.xlu1 %2896 }
 0x282   : > { %v2903_v57 = vpop.xlane.xlu0 %2902 }
 0x285   : > { %485 = vrot.lane.b32.xlu0 %v423_v52, %s13051_s23  ;;  %533 = vrot.lane.b32.xlu1 %v8100_v49, %s13057_s28  ;;  %v2945_v58 = vpop.xlane.xlu1 %2944 }
 0x286   : > { %v2964_v59 = vsel %vm220_vm0, %v2897_v56, %v2945_v58  ;;  %v2951_v60 = vpop.xlane.xlu0 %2950 }
 0x287   : > { %2981 = vst.msk [vmem:[%s8152_s11 + $0x60] sm:$0xff] %vm2968_vm8, %v2964_v59  ;;  %v2967_v61 = vsel %vm220_vm0, %v2903_v57, %v2951_v60 }
 0x288   : > { %2984 = vst.msk [vmem:[%s8152_s11 + $0x78] sm:$0xff] %vm2968_vm8, %v2967_v61 }
 0x289   : > { %535 = vrot.lane.b32.xlu0 %v423_v52, %s13057_s28  ;;  %893 = vrot.lane.b32.xlu1 %v8100_v49, %s13055_s29  ;;  %v2901_v62 = vpop.xlane.xlu1 %2900 }
 0x28d   : > { %895 = vrot.lane.b32.xlu0 %v423_v52, %s13055_s29  ;;  %1140 = vrot.lane.b32.xlu1 %v8100_v49, %s7903_s30  ;;  %v2949_v63 = vpop.xlane.xlu1 %2948 }
 0x28e   : > { %v2966_v0 = vsel %vm220_vm0, %v2901_v62, %v2949_v63 }
 0x28f   : > { %2983 = vst.msk [vmem:[%s8152_s11 + $0x70] sm:$0xff] %vm2968_vm8, %v2966_v0 }
 0x291   : > { %1142 = vrot.lane.b32.xlu0 %v423_v52, %s7903_s30  ;;  %1387 = vrot.lane.b32.xlu1 %v8100_v49, %s7904_s6 }
 0x295   : > { %1389 = vrot.lane.b32.xlu0 %v423_v52, %s7904_s6  ;;  %1634 = vrot.lane.b32.xlu1 %v8100_v49, %s13066_s7 }
 0x299   : > { %1636 = vrot.lane.b32.xlu0 %v423_v52, %s13066_s7  ;;  %1881 = vrot.lane.b32.xlu1 %v8100_v49, %s13077_s27 }
 0x29d   : > { %1883 = vrot.lane.b32.xlu0 %v423_v52, %s13077_s27  ;;  %2128 = vrot.lane.b32.xlu1 %v8100_v49, %s13078_s12 }
 0x2a1   : > { %2130 = vrot.lane.b32.xlu0 %v423_v52, %s13078_s12  ;;  %2375 = vrot.lane.b32.xlu1 %v8100_v49, %s13064_s14 }
 0x2a5   : > { %2377 = vrot.lane.b32.xlu0 %v423_v52, %s13064_s14  ;;  %2624 = vrot.lane.b32.xlu1 %v423_v52, %s13062_s22 }
 0x2a9   : > { %2634 = vrot.lane.b32.xlu0 %v8104_v50, %s13062_s22  ;;  %447 = vrot.lane.b32.xlu1 %v8104_v50, %s7895_s9 }
 0x2ad   : > { %449 = vrot.lane.b32.xlu0 %v426_v1, %s7895_s9  ;;  %471 = vrot.lane.b32.xlu1 %v8104_v50, %s13053_s10 }
 0x2b1   : > { %473 = vrot.lane.b32.xlu0 %v426_v1, %s13053_s10  ;;  %495 = vrot.lane.b32.xlu1 %v8104_v50, %s13051_s23 }
 0x2b5   : > { %497 = vrot.lane.b32.xlu0 %v426_v1, %s13051_s23  ;;  %545 = vrot.lane.b32.xlu1 %v8104_v50, %s13057_s28 }
 0x2b9   : > { %547 = vrot.lane.b32.xlu0 %v426_v1, %s13057_s28  ;;  %905 = vrot.lane.b32.xlu1 %v8104_v50, %s13055_s29 }
 0x2bb   : > { %v8214_v2 = vpop.permute.xlu1 %439  ;;  %v8216_v3 = vpop.permute.xlu0 %2626 }
 0x2bc   : > { %13079 = vst [vmem:[#allocation11_spill] sm:$0xff] %v8216_v3 }
 0x2bd   : > { %907 = vrot.lane.b32.xlu0 %v426_v1, %s13055_s29  ;;  %1152 = vrot.lane.b32.xlu1 %v8104_v50, %s7903_s30 }
 0x2bf   : > { %v8221_v4 = vpop.permute.xlu1 %463  ;;  %v8223_v5 = vpop.permute.xlu0 %441 }
 0x2c0   : > { %v8393_v63 = vsel %vm229_vm2, %v8214_v2, %v8223_v5 }
 0x2c1   : > { %1154 = vrot.lane.b32.xlu0 %v426_v1, %s7903_s30  ;;  %1399 = vrot.lane.b32.xlu1 %v8104_v50, %s7904_s6 }
 0x2c3   : > { %v8228_v6 = vpop.permute.xlu1 %487  ;;  %v8230_v8 = vpop.permute.xlu0 %465 }
 0x2c5   : > { %1401 = vrot.lane.b32.xlu0 %v426_v1, %s7904_s6  ;;  %1646 = vrot.lane.b32.xlu1 %v8104_v50, %s13066_s7 }
 0x2c7   : > { %v8235_v9 = vpop.permute.xlu1 %537  ;;  %v8237_v10 = vpop.permute.xlu0 %489 }
 0x2c9   : > { %1648 = vrot.lane.b32.xlu0 %v426_v1, %s13066_s7  ;;  %1893 = vrot.lane.b32.xlu1 %v8104_v50, %s13077_s27 }
 0x2cb   : > { %v8242_v11 = vpop.permute.xlu1 %897  ;;  %v8244_v12 = vpop.permute.xlu0 %539 }
 0x2cc   : > { %13080 = vst [vmem:[#allocation12_spill] sm:$0xff] %v8242_v11 }
 0x2cd   : > { %1895 = vrot.lane.b32.xlu0 %v426_v1, %s13077_s27  ;;  %2140 = vrot.lane.b32.xlu1 %v8104_v50, %s13078_s12 }
 0x2cf   : > { %v8249_v13 = vpop.permute.xlu1 %1144  ;;  %v8251_v14 = vpop.permute.xlu0 %899 }
 0x2d0   : > { %13081 = vst [vmem:[#allocation13_spill] sm:$0xff] %v8249_v13  ;;  %13082 = vst [vmem:[#allocation14_spill] sm:$0xff] %v8251_v14 }
 0x2d1   : > { %2142 = vrot.lane.b32.xlu0 %v426_v1, %s13078_s12  ;;  %2387 = vrot.lane.b32.xlu1 %v8104_v50, %s13064_s14 }
 0x2d3   : > { %v8256_v15 = vpop.permute.xlu1 %1391  ;;  %v8258_v16 = vpop.permute.xlu0 %1146 }
 0x2d4   : > { %13083 = vst [vmem:[#allocation15_spill] sm:$0xff] %v8256_v15  ;;  %13084 = vst [vmem:[#allocation16_spill] sm:$0xff] %v8258_v16 }
 0x2d5   : > { %2389 = vrot.lane.b32.xlu0 %v426_v1, %s13064_s14  ;;  %2636 = vrot.lane.b32.xlu1 %v426_v1, %s13062_s22 }
 0x2d7   : > { %v8262_v17 = vpop.permute.xlu1 %1638  ;;  %v8264_v18 = vpop.permute.xlu0 %1393 }
 0x2d8   : > { %13085 = vst [vmem:[#allocation17_spill] sm:$0xff] %v8262_v17  ;;  %13086 = vst [vmem:[#allocation18_spill] sm:$0xff] %v8264_v18 }
 0x2d9   : > { %2630 = vrot.lane.b32.xlu0 %v8111_v51, %s13062_s22  ;;  %443 = vrot.lane.b32.xlu1 %v8111_v51, %s7895_s9 }
 0x2db   : > { %v8270_v20 = vpop.permute.xlu1 %1885  ;;  %v8272_v21 = vpop.permute.xlu0 %1640 }
 0x2dc   : > { %13087 = vst [vmem:[#allocation19_spill] sm:$0xff] %v8270_v20  ;;  %13088 = vst [vmem:[#allocation20_spill] sm:$0xff] %v8272_v21 }
 0x2dd   : > { %445 = vrot.lane.b32.xlu0 %v425_v19, %s7895_s9  ;;  %467 = vrot.lane.b32.xlu1 %v8111_v51, %s13053_s10 }
 0x2df   : > { %v8277_v22 = vpop.permute.xlu1 %2132  ;;  %v8279_v23 = vpop.permute.xlu0 %1887 }
 0x2e0   : > { %13089 = vst [vmem:[#allocation21_spill] sm:$0xff] %v8277_v22  ;;  %13090 = vst [vmem:[#allocation22_spill] sm:$0xff] %v8279_v23 }
 0x2e1   : > { %469 = vrot.lane.b32.xlu0 %v425_v19, %s13053_s10  ;;  %491 = vrot.lane.b32.xlu1 %v8111_v51, %s13051_s23  ;;  %s13520_s10 = smov 126  }
 0x2e3   : > { %v8284_v24 = vpop.permute.xlu1 %2379  ;;  %v8286_v25 = vpop.permute.xlu0 %2134 }
 0x2e4   : > { %13091 = vst [vmem:[#allocation23_spill] sm:$0xff] %v8284_v24  ;;  %13092 = vst [vmem:[#allocation24_spill] sm:$0xff] %v8286_v25 }
 0x2e5   : > { %493 = vrot.lane.b32.xlu0 %v425_v19, %s13051_s23  ;;  %541 = vrot.lane.b32.xlu1 %v8111_v51, %s13057_s28  ;;  %s13522_s23 = smov 124  }
 0x2e7   : > { %v8291_v27 = vpop.permute.xlu1 %2628  ;;  %v8293_v28 = vpop.permute.xlu0 %2381 }
 0x2e8   : > { %13093 = vst [vmem:[#allocation25_spill] sm:$0xff] %v8291_v27  ;;  %13094 = vst [vmem:[#allocation26_spill] sm:$0xff] %v8293_v28 }
 0x2e9   : > { %543 = vrot.lane.b32.xlu0 %v425_v19, %s13057_s28  ;;  %901 = vrot.lane.b32.xlu1 %v8111_v51, %s13055_s29 }
 0x2eb   : > { %v8298_v29 = vpop.permute.xlu1 %435  ;;  %v8300_v30 = vpop.permute.xlu0 %2622 }
 0x2ec   : > { %13095 = vst [vmem:[#allocation27_spill] sm:$0xff] %v8300_v30 }
 0x2ed   : > { %903 = vrot.lane.b32.xlu0 %v425_v19, %s13055_s29  ;;  %1148 = vrot.lane.b32.xlu1 %v8111_v51, %s7903_s30 }
 0x2ef   : > { %v8305_v31 = vpop.permute.xlu1 %459  ;;  %v8307_v32 = vpop.permute.xlu0 %437 }
 0x2f1   : > { %1150 = vrot.lane.b32.xlu0 %v425_v19, %s7903_s30  ;;  %1395 = vrot.lane.b32.xlu1 %v8111_v51, %s7904_s6 }
 0x2f3   : > { %v8312_v33 = vpop.permute.xlu1 %483  ;;  %v8314_v34 = vpop.permute.xlu0 %461 }
 0x2f5   : > { %1397 = vrot.lane.b32.xlu0 %v425_v19, %s7904_s6  ;;  %1642 = vrot.lane.b32.xlu1 %v8111_v51, %s13066_s7 }
 0x2f7   : > { %v8319_v35 = vpop.permute.xlu1 %533  ;;  %v8321_v36 = vpop.permute.xlu0 %485 }
 0x2f9   : > { %1644 = vrot.lane.b32.xlu0 %v425_v19, %s13066_s7  ;;  %1889 = vrot.lane.b32.xlu1 %v8111_v51, %s13077_s27 }
 0x2fb   : > { %v8326_v37 = vpop.permute.xlu1 %893  ;;  %v8328_v38 = vpop.permute.xlu0 %535 }
 0x2fc   : > { %13096 = vst [vmem:[#allocation28_spill] sm:$0xff] %v8326_v37 }
 0x2fd   : > { %2136 = vrot.lane.b32.xlu1 %v8111_v51, %s13078_s12  ;;  %1891 = vrot.lane.b32.xlu0 %v425_v19, %s13077_s27 }
 0x2ff   : > { %v8333_v43 = vpop.permute.xlu1 %1140  ;;  %v8335_v44 = vpop.permute.xlu0 %895 }
 0x300   : > { %13097 = vst [vmem:[#allocation29_spill] sm:$0xff] %v8333_v43  ;;  %13098 = vst [vmem:[#allocation30_spill] sm:$0xff] %v8335_v44 }
 0x301   : > { %2383 = vrot.lane.b32.xlu1 %v8111_v51, %s13064_s14  ;;  %2138 = vrot.lane.b32.xlu0 %v425_v19, %s13078_s12 }
 0x303   : > { %v8340_v45 = vpop.permute.xlu1 %1387  ;;  %v8342_v46 = vpop.permute.xlu0 %1142 }
 0x304   : > { %13099 = vst [vmem:[#allocation31_spill] sm:$0xff] %v8340_v45  ;;  %13100 = vst [vmem:[#allocation32_spill] sm:$0xff] %v8342_v46 }
 0x305   : > { %2632 = vrot.lane.b32.xlu1 %v425_v19, %s13062_s22  ;;  %2385 = vrot.lane.b32.xlu0 %v425_v19, %s13064_s14  ;;  %v8406_v19 = vsel %vm237_vm3, %v8221_v4, %v8230_v8 }
 0x307   : > { %v8346_v48 = vpop.permute.xlu1 %1634  ;;  %v8348_v52 = vpop.permute.xlu0 %1389 }
 0x308   : > { %13101 = vst [vmem:[#allocation33_spill] sm:$0xff] %v8346_v48  ;;  %13102 = vst [vmem:[#allocation34_spill] sm:$0xff] %v8348_v52 }
 0x309   : > { %555 = vrot.lane.b32.xlu0 %v8223_v5, %s13057_s28  ;;  %2166 = vrot.lane.b32.xlu1 %v8230_v8, %s13078_s12 }
 0x30b   : > { %v8354_v53 = vpop.permute.xlu1 %1881  ;;  %v8356_v54 = vpop.permute.xlu0 %1636 }
 0x30c   : > { %13103 = vst [vmem:[#allocation35_spill] sm:$0xff] %v8354_v53  ;;  %13104 = vst [vmem:[#allocation36_spill] sm:$0xff] %v8356_v54 }
 0x30d   : > { %571 = vrot.lane.b32.xlu0 %v8230_v8, %s13057_s28  ;;  %2182 = vrot.lane.b32.xlu1 %v8237_v10, %s13078_s12 }
 0x30f   : > { %v8362_v55 = vpop.permute.xlu1 %2128  ;;  %v8364_v56 = vpop.permute.xlu0 %1883 }
 0x310   : > { %13105 = vst [vmem:[#allocation37_spill] sm:$0xff] %v8362_v55  ;;  %13106 = vst [vmem:[#allocation38_spill] sm:$0xff] %v8364_v56 }
 0x311   : > { %2644 = vrot.lane.b32.xlu1 %v8223_v5, %s13062_s22  ;;  %587 = vrot.lane.b32.xlu0 %v8237_v10, %s13057_s28 }
 0x313   : > { %v8370_v57 = vpop.permute.xlu1 %2375  ;;  %v8372_v58 = vpop.permute.xlu0 %2130 }
 0x314   : > { %13107 = vst [vmem:[#allocation39_spill] sm:$0xff] %v8370_v57  ;;  %13108 = vst [vmem:[#allocation40_spill] sm:$0xff] %v8372_v58  ;;  %v8417_v57 = vsel %vm499_vm9, %v8228_v6, %v8237_v10 }
 0x315   : > { %2660 = vrot.lane.b32.xlu1 %v8230_v8, %s13062_s22  ;;  %915 = vrot.lane.b32.xlu0 %v8223_v5, %s13055_s29 }
 0x317   : > { %v8378_v59 = vpop.permute.xlu1 %2624  ;;  %v8380_v60 = vpop.permute.xlu0 %2377 }
 0x318   : > { %13109 = vst [vmem:[#allocation41_spill] sm:$0xff] %v8378_v59  ;;  %13110 = vst [vmem:[#allocation42_spill] sm:$0xff] %v8380_v60 }
 0x319   : > { %2676 = vrot.lane.b32.xlu1 %v8237_v10, %s13062_s22  ;;  %931 = vrot.lane.b32.xlu0 %v8230_v8, %s13055_s29 }
 0x31b   : > { %v8386_v61 = vpop.permute.xlu1 %447  ;;  %v8388_v62 = vpop.permute.xlu0 %2634 }
 0x31c   : > { %13111 = vst [vmem:[#allocation43_spill] sm:$0xff] %v8388_v62 }
 0x31d   : > { %553 = vrot.lane.b32.xlu1 %v8393_v63, %s13057_s28  ;;  %947 = vrot.lane.b32.xlu0 %v8237_v10, %s13055_s29 }
 0x31f   : > { %v8399_v0 = vpop.permute.xlu1 %471  ;;  %v8401_v1 = vpop.permute.xlu0 %449 }
 0x320   : > { %v8593_v45 = vsel %vm229_vm2, %v8386_v61, %v8401_v1 }
 0x321   : > { %569 = vrot.lane.b32.xlu1 %v8406_v19, %s13057_s28  ;;  %1162 = vrot.lane.b32.xlu0 %v8223_v5, %s7903_s30 }
 0x323   : > { %v496_v2 = vpop.permute.xlu1 %495  ;;  %v8412_v26 = vpop.permute.xlu0 %473 }
 0x324   : > { %v8555_v25 = vsel %vm237_vm3, %v8399_v0, %v8412_v26 }
 0x325   : > { %585 = vrot.lane.b32.xlu1 %v8417_v57, %s13057_s28  ;;  %1178 = vrot.lane.b32.xlu0 %v8230_v8, %s7903_s30 }
 0x327   : > { %v8423_v4 = vpop.permute.xlu1 %545  ;;  %v8425_v60 = vpop.permute.xlu0 %497 }
 0x328   : > { %v8429_v24 = vsel %vm499_vm9, %v496_v2, %v8425_v60 }
 0x329   : > { %913 = vrot.lane.b32.xlu1 %v8393_v63, %s13055_s29  ;;  %1194 = vrot.lane.b32.xlu0 %v8237_v10, %s7903_s30 }
 0x32a   : > { %6769 = vmatprep.subr.mxu0 %v8429_v24 }
 0x32b   : > { %6770 = vmatpush3.msra.mxu0 %v8429_v24  ;;  %v8437_v6 = vpop.permute.xlu1 %905  ;;  %v8439_v28 = vpop.permute.xlu0 %547 }
 0x32c   : > { %13112 = vst [vmem:[#allocation44_spill] sm:$0xff] %v8437_v6  ;;  %v509_v6 = vld [vmem:[%s13038_s2 + $0x8] sm:$0xff] }
 0x32d   : > { %929 = vrot.lane.b32.xlu1 %v8406_v19, %s13055_s29  ;;  %1409 = vrot.lane.b32.xlu0 %v8223_v5, %s7904_s6 }
 0x32f   : > { %v8445_v2 = vpop.permute.xlu1 %1152  ;;  %v8447_v30 = vpop.permute.xlu0 %907 }
 0x330   : > { %13113 = vst [vmem:[#allocation45_spill] sm:$0xff] %v8445_v2  ;;  %13114 = vst [vmem:[#allocation46_spill] sm:$0xff] %v8447_v30 }
 0x331   : > { %945 = vrot.lane.b32.xlu1 %v8417_v57, %s13055_s29  ;;  %1425 = vrot.lane.b32.xlu0 %v8230_v8, %s7904_s6 }
 0x333   : > { %v8453_v59 = vpop.permute.xlu1 %1399  ;;  %v8455_v7 = vpop.permute.xlu0 %1154 }
 0x334   : > { %13115 = vst [vmem:[#allocation47_spill] sm:$0xff] %v8453_v59  ;;  %13116 = vst [vmem:[#allocation48_spill] sm:$0xff] %v8455_v7 }
 0x335   : > { %1160 = vrot.lane.b32.xlu1 %v8393_v63, %s7903_s30  ;;  %1441 = vrot.lane.b32.xlu0 %v8237_v10, %s7904_s6 }
 0x337   : > { %v8461_v42 = vpop.permute.xlu1 %1646  ;;  %v8463_v41 = vpop.permute.xlu0 %1401 }
 0x338   : > { %13117 = vst [vmem:[#allocation49_spill] sm:$0xff] %v8461_v42  ;;  %13118 = vst [vmem:[#allocation50_spill] sm:$0xff] %v8463_v41 }
 0x339   : > { %1176 = vrot.lane.b32.xlu1 %v8406_v19, %s7903_s30  ;;  %1656 = vrot.lane.b32.xlu0 %v8223_v5, %s13066_s7 }
 0x33b   : > { %v8469_v3 = vpop.permute.xlu1 %1893  ;;  %v8471_v27 = vpop.permute.xlu0 %1648 }
 0x33c   : > { %13119 = vst [vmem:[#allocation51_spill] sm:$0xff] %v8469_v3  ;;  %13120 = vst [vmem:[#allocation52_spill] sm:$0xff] %v8471_v27 }
 0x33d   : > { %1192 = vrot.lane.b32.xlu1 %v8417_v57, %s7903_s30  ;;  %1672 = vrot.lane.b32.xlu0 %v8230_v8, %s13066_s7 }
 0x33f   : > { %v8477_v40 = vpop.permute.xlu1 %2140  ;;  %v8479_v39 = vpop.permute.xlu0 %1895 }
 0x340   : > { %13121 = vst [vmem:[#allocation53_spill] sm:$0xff] %v8477_v40  ;;  %13122 = vst [vmem:[#allocation54_spill] sm:$0xff] %v8479_v39 }
 0x341   : > { %1407 = vrot.lane.b32.xlu1 %v8393_v63, %s7904_s6  ;;  %1688 = vrot.lane.b32.xlu0 %v8237_v10, %s13066_s7 }
 0x343   : > { %v8485_v62 = vpop.permute.xlu1 %2387  ;;  %v8487_v53 = vpop.permute.xlu0 %2142 }
 0x344   : > { %13123 = vst [vmem:[#allocation55_spill] sm:$0xff] %v8485_v62  ;;  %13124 = vst [vmem:[#allocation56_spill] sm:$0xff] %v8487_v53 }
 0x345   : > { %1423 = vrot.lane.b32.xlu1 %v8406_v19, %s7904_s6  ;;  %1903 = vrot.lane.b32.xlu0 %v8223_v5, %s13077_s27 }
 0x347   : > { %v8493_v56 = vpop.permute.xlu1 %2636  ;;  %v8495_v20 = vpop.permute.xlu0 %2389 }
 0x348   : > { %13125 = vst [vmem:[#allocation57_spill] sm:$0xff] %v8493_v56  ;;  %13126 = vst [vmem:[#allocation58_spill] sm:$0xff] %v8495_v20 }
 0x349   : > { %1439 = vrot.lane.b32.xlu1 %v8417_v57, %s7904_s6  ;;  %1919 = vrot.lane.b32.xlu0 %v8230_v8, %s13077_s27 }
 0x34b   : > { %v444_v23 = vpop.permute.xlu1 %443  ;;  %v8501_v62 = vpop.permute.xlu0 %2630 }
 0x34c   : > { %13127 = vst [vmem:[#allocation59_spill] sm:$0xff] %v8501_v62 }
 0x34d   : > { %1654 = vrot.lane.b32.xlu1 %v8393_v63, %s13066_s7  ;;  %1935 = vrot.lane.b32.xlu0 %v8237_v10, %s13077_s27 }
 0x34f   : > { %v468_v3 = vpop.permute.xlu1 %467  ;;  %v8507_v39 = vpop.permute.xlu0 %445 }
 0x351   : > { %1670 = vrot.lane.b32.xlu1 %v8406_v19, %s13066_s7  ;;  %2150 = vrot.lane.b32.xlu0 %v8223_v5, %s13078_s12 }
 0x353   : > { %v492_v20 = vpop.permute.xlu1 %491  ;;  %v8513_v56 = vpop.permute.xlu0 %469 }
 0x355   : > { %1686 = vrot.lane.b32.xlu1 %v8417_v57, %s13066_s7  ;;  %2429 = vrot.lane.b32.xlu0 %v8237_v10, %s13064_s14 }
 0x357   : > { %v8519_v62 = vpop.permute.xlu1 %541  ;;  %v8521_v55 = vpop.permute.xlu0 %493 }
 0x358   : > { %v8525_v58 = vsel %vm499_vm9, %v492_v20, %v8521_v55  ;;  %v8544_v20 = vsel %vm499_vm9, %v8312_v33, %v8321_v36 }
 0x359   : > { %1901 = vrot.lane.b32.xlu1 %v8393_v63, %s13077_s27  ;;  %2413 = vrot.lane.b32.xlu0 %v8230_v8, %s13064_s14 }
 0x35a   : > { %6771 = vmatprep.subr.mxu0 %v8525_v58 }
 0x35b   : > { %6772 = vmatpush3.msra.mxu0 %v8525_v58  ;;  %v8533_v22 = vpop.permute.xlu1 %901  ;;  %v8535_v10 = vpop.permute.xlu0 %543 }
 0x35c   : > { %13128 = vst [vmem:[#allocation60_spill] sm:$0xff] %v8533_v22  ;;  %6773 = vmatprep.subr.mxu0 %v8417_v57 }
 0x35d   : > { %6774 = vmatpush3.msra.mxu0 %v8417_v57  ;;  %1917 = vrot.lane.b32.xlu1 %v8406_v19, %s13077_s27 }
 0x35e   : > { %2397 = vrot.lane.b32.xlu0 %v8223_v5, %s13064_s14  ;;  %6775 = vmatprep.subr.mxu0 %v8544_v20  ;;  %v8565_v5 = vsel %vm237_vm3, %v468_v3, %v8513_v56  ;;  %v8582_v3 = vsel %vm237_vm3, %v8305_v31, %v8314_v34  ;;  %v8603_v31 = vsel %vm229_vm2, %v444_v23, %v8507_v39 }
 0x35f   : > { %6776 = vmatpush3.msra.mxu0 %v8544_v20  ;;  %v8550_v8 = vpop.permute.xlu1 %1148  ;;  %v8557_v40 = vpop.permute.xlu0 %903  ;;  %v8620_v23 = vsel %vm229_vm2, %v8298_v29, %v8307_v32 }
 0x360   : > { %13129 = vst [vmem:[#allocation61_spill] sm:$0xff] %v8550_v8  ;;  %13130 = vst [vmem:[#allocation62_spill] sm:$0xff] %v8557_v40  ;;  %6777 = vmatprep.subr.mxu0 %v8555_v25  ;;  %v508_v40 = vld [vmem:[%s13038_s2] sm:$0xff] }
 0x361   : > { %6778 = vmatpush3.msra.mxu0 %v8555_v25  ;;  %1933 = vrot.lane.b32.xlu1 %v8417_v57, %s13077_s27 }
 0x362   : > { %2164 = vrot.lane.b32.xlu0 %v8406_v19, %s13078_s12  ;;  %6779 = vmatprep.subr.mxu0 %v8565_v5 }
 0x363   : > { %6780 = vmatpush3.msra.mxu0 %v8565_v5  ;;  %v8571_v33 = vpop.permute.xlu1 %1395  ;;  %v8573_v0 = vpop.permute.xlu0 %1150  ;;  %6801 = vmatprep.mubr.f32.mxu0 %v508_v40 }
 0x364   : > { %13131 = vst [vmem:[#allocation63_spill] sm:$0xff] %v8571_v33  ;;  %13132 = vst [vmem:[#allocation64_spill] sm:$0xff] %v8573_v0  ;;  %6781 = vmatprep.subr.mxu0 %v8406_v19 }
 0x365   : > { %6782 = vmatpush3.msra.mxu0 %v8406_v19  ;;  %2148 = vrot.lane.b32.xlu1 %v8393_v63, %s13078_s12 }
 0x366   : > { %2180 = vrot.lane.b32.xlu0 %v8417_v57, %s13078_s12  ;;  %6783 = vmatprep.subr.mxu0 %v8582_v3 }
 0x367   : > { %6784 = vmatpush3.msra.mxu0 %v8582_v3  ;;  %v8588_v53 = vpop.permute.xlu1 %1642  ;;  %v8595_v52 = vpop.permute.xlu0 %1397 }
 0x368   : > { %13133 = vst [vmem:[#allocation65_spill] sm:$0xff] %v8588_v53  ;;  %13134 = vst [vmem:[#allocation66_spill] sm:$0xff] %v8595_v52  ;;  %6785 = vmatprep.subr.mxu0 %v8593_v45 }
 0x369   : > { %6786 = vmatpush3.msra.mxu0 %v8593_v45  ;;  %2427 = vrot.lane.b32.xlu1 %v8417_v57, %s13064_s14 }
 0x36a   : > { %2642 = vrot.lane.b32.xlu0 %v8393_v63, %s13062_s22  ;;  %6787 = vmatprep.subr.mxu0 %v8603_v31 }
 0x36b   : > { %6788 = vmatpush3.msra.mxu0 %v8603_v31  ;;  %v8609_v61 = vpop.permute.xlu1 %1889  ;;  %v8611_v15 = vpop.permute.xlu0 %1644 }
 0x36c   : > { %13135 = vst [vmem:[#allocation67_spill] sm:$0xff] %v8609_v61  ;;  %13136 = vst [vmem:[#allocation68_spill] sm:$0xff] %v8611_v15  ;;  %6789 = vmatprep.subr.mxu0 %v8393_v63 }
 0x36d   : > { %6790 = vmatpush3.msra.mxu0 %v8393_v63  ;;  %2411 = vrot.lane.b32.xlu1 %v8406_v19, %s13064_s14 }
 0x36e   : > { %2658 = vrot.lane.b32.xlu0 %v8406_v19, %s13062_s22  ;;  %6791 = vmatprep.subr.mxu0 %v8620_v23 }
 0x36f   : > { %6792 = vmatpush3.msra.mxu0 %v8620_v23  ;;  %v8626_v61 = vpop.permute.xlu1 %2136  ;;  %v8628_v18 = vpop.permute.xlu0 %1891 }
 0x370   : > { %13137 = vst [vmem:[#allocation69_spill] sm:$0xff] %v8626_v61  ;;  %13138 = vst [vmem:[#allocation70_spill] sm:$0xff] %v8628_v18  ;;  %6793 = vmatprep.subr.mxu0 %v8104_v50 }
 0x371   : > { %6794 = vmatpush3.msra.mxu0 %v8104_v50  ;;  %2395 = vrot.lane.b32.xlu1 %v8393_v63, %s13064_s14 }
 0x372   : > { %2674 = vrot.lane.b32.xlu0 %v8417_v57, %s13062_s22  ;;  %6795 = vmatprep.subr.mxu0 %v8111_v51 }
 0x373   : > { %6796 = vmatpush3.msra.mxu0 %v8111_v51  ;;  %v8638_v29 = vpop.permute.xlu1 %2383  ;;  %v8640_v19 = vpop.permute.xlu0 %2138 }
 0x374   : > { %13139 = vst [vmem:[#allocation71_spill] sm:$0xff] %v8638_v29  ;;  %13140 = vst [vmem:[#allocation72_spill] sm:$0xff] %v8640_v19  ;;  %6797 = vmatprep.subr.mxu0 %v8090_v47 }
 0x375   : > { %6798 = vmatpush3.msra.mxu0 %v8090_v47  ;;  %2162 = vrot.lane.b32.xlu1 %v8314_v34, %s13078_s12 }
 0x376   : > { %551 = vrot.lane.b32.xlu0 %v8307_v32, %s13057_s28  ;;  %6799 = vmatprep.subr.mxu0 %v8100_v49 }
 0x377   : > { %6800 = vmatpush3.msra.mxu0 %v8100_v49  ;;  %v8650_v50 = vpop.permute.xlu1 %2632  ;;  %v8652_v51 = vpop.permute.xlu0 %2385 }
 0x378   : > { %13141 = vst [vmem:[#allocation73_spill] sm:$0xff] %v8650_v50  ;;  %13142 = vst [vmem:[#allocation74_spill] sm:$0xff] %v8652_v51  ;;  %6802 = vmatmul.mubr.f32.vlgmr.msra.gmra.mxu0 %v509_v6 }
 0x379   : > { %2178 = vrot.lane.b32.xlu1 %v8321_v36, %s13078_s12 }
 0x37a   : > { %567 = vrot.lane.b32.xlu0 %v8314_v34, %s13057_s28 }
 0x37b   : > { %v8658_v47 = vpop.permute.xlu1 %2166  ;;  %v8660_v57 = vpop.permute.xlu0 %555 }
 0x37c   : > { %13143 = vst [vmem:[#allocation75_spill] sm:$0xff] %v8658_v47 }
 0x37d   : > { %2640 = vrot.lane.b32.xlu1 %v8307_v32, %s13062_s22 }
 0x37e   : > { %583 = vrot.lane.b32.xlu0 %v8321_v36, %s13057_s28 }
 0x37f   : > { %v8666_v49 = vpop.permute.xlu1 %2182  ;;  %v8668_v63 = vpop.permute.xlu0 %571 }
 0x380   : > { %13144 = vst [vmem:[#allocation76_spill] sm:$0xff] %v8666_v49 }
 0x381   : > { %2656 = vrot.lane.b32.xlu1 %v8314_v34, %s13062_s22 }
 0x382   : > { %911 = vrot.lane.b32.xlu0 %v8307_v32, %s13055_s29 }
 0x383   : > { %v8674_v29 = vpop.permute.xlu1 %2644  ;;  %v8676_v51 = vpop.permute.xlu0 %587 }
 0x384   : > { %13145 = vst [vmem:[#allocation77_spill] sm:$0xff] %v8674_v29 }
 0x385   : > { %2672 = vrot.lane.b32.xlu1 %v8321_v36, %s13062_s22 }
 0x386   : > { %927 = vrot.lane.b32.xlu0 %v8314_v34, %s13055_s29 }
 0x387   : > { %v8682_v50 = vpop.permute.xlu1 %2660  ;;  %v8684_v18 = vpop.permute.xlu0 %915 }
 0x388   : > { %13146 = vst [vmem:[#allocation78_spill] sm:$0xff] %v8682_v50  ;;  %13147 = vst [vmem:[#allocation79_spill] sm:$0xff] %v8684_v18 }
 0x389   : > { %549 = vrot.lane.b32.xlu1 %v8620_v23, %s13057_s28 }
 0x38a   : > { %943 = vrot.lane.b32.xlu0 %v8321_v36, %s13055_s29 }
 0x38b   : > { %v8690_v61 = vpop.permute.xlu1 %2676  ;;  %v8692_v29 = vpop.permute.xlu0 %931 }
 0x38c   : > { %13148 = vst [vmem:[#allocation80_spill] sm:$0xff] %v8690_v61 }
 0x38d   : > { %565 = vrot.lane.b32.xlu1 %v8582_v3, %s13057_s28 }
 0x38e   : > { %1158 = vrot.lane.b32.xlu0 %v8307_v32, %s7903_s30 }
 0x38f   : > { %v8698_v19 = vpop.permute.xlu1 %553  ;;  %v8700_v50 = vpop.permute.xlu0 %947 }
 0x391   : > { %581 = vrot.lane.b32.xlu1 %v8544_v20, %s13057_s28 }
 0x392   : > { %1174 = vrot.lane.b32.xlu0 %v8314_v34, %s7903_s30 }
 0x393   : > { %v8706_v47 = vpop.permute.xlu1 %569  ;;  %v8708_v61 = vpop.permute.xlu0 %1162 }
 0x395   : > { %909 = vrot.lane.b32.xlu1 %v8620_v23, %s13055_s29 }
 0x396   : > { %1190 = vrot.lane.b32.xlu0 %v8321_v36, %s7903_s30 }
 0x397   : > { %v8714_v49 = vpop.permute.xlu1 %585  ;;  %v8716_v33 = vpop.permute.xlu0 %1178 }
 0x399   : > { %925 = vrot.lane.b32.xlu1 %v8582_v3, %s13055_s29 }
 0x39a   : > { %1405 = vrot.lane.b32.xlu0 %v8307_v32, %s7904_s6 }
 0x39b   : > { %v8722_v52 = vpop.permute.xlu1 %913  ;;  %v8724_v59 = vpop.permute.xlu0 %1194 }
 0x39c   : > { %13149 = vst [vmem:[#allocation81_spill] sm:$0xff] %v8722_v52 }
 0x39d   : > { %941 = vrot.lane.b32.xlu1 %v8544_v20, %s13055_s29 }
 0x39e   : > { %1421 = vrot.lane.b32.xlu0 %v8314_v34, %s7904_s6 }
 0x39f   : > { %v8730_v41 = vpop.permute.xlu1 %929  ;;  %v8732_v48 = vpop.permute.xlu0 %1409 }
 0x3a0   : > { %13150 = vst [vmem:[#allocation82_spill] sm:$0xff] %v8732_v48 }
 0x3a1   : > { %1156 = vrot.lane.b32.xlu1 %v8620_v23, %s7903_s30 }
 0x3a2   : > { %1437 = vrot.lane.b32.xlu0 %v8321_v36, %s7904_s6 }
 0x3a3   : > { %v8738_v54 = vpop.permute.xlu1 %945  ;;  %v8740_v17 = vpop.permute.xlu0 %1425 }
 0x3a4   : > { %13151 = vst [vmem:[#allocation83_spill] sm:$0xff] %v8740_v17 }
 0x3a5   : > { %1172 = vrot.lane.b32.xlu1 %v8582_v3, %s7903_s30 }
 0x3a6   : > { %1652 = vrot.lane.b32.xlu0 %v8307_v32, %s13066_s7 }
 0x3a7   : > { %v8746_v21 = vpop.permute.xlu1 %1160  ;;  %v8748_v53 = vpop.permute.xlu0 %1441 }
 0x3a8   : > { %13152 = vst [vmem:[#allocation84_spill] sm:$0xff] %v8748_v53 }
 0x3a9   : > { %1188 = vrot.lane.b32.xlu1 %v8544_v20, %s7903_s30 }
 0x3aa   : > { %1668 = vrot.lane.b32.xlu0 %v8314_v34, %s13066_s7 }
 0x3ab   : > { %v8754_v48 = vpop.permute.xlu1 %1176  ;;  %v8756_v15 = vpop.permute.xlu0 %1656 }
 0x3ac   : > { %13153 = vst [vmem:[#allocation85_spill] sm:$0xff] %v8756_v15 }
 0x3ad   : > { %1403 = vrot.lane.b32.xlu1 %v8620_v23, %s7904_s6 }
 0x3ae   : > { %1684 = vrot.lane.b32.xlu0 %v8321_v36, %s13066_s7 }
 0x3af   : > { %v8762_v42 = vpop.permute.xlu1 %1192  ;;  %v8764_v27 = vpop.permute.xlu0 %1672 }
 0x3b0   : > { %13154 = vst [vmem:[#allocation86_spill] sm:$0xff] %v8764_v27 }
 0x3b1   : > { %1419 = vrot.lane.b32.xlu1 %v8582_v3, %s7904_s6 }
 0x3b2   : > { %1899 = vrot.lane.b32.xlu0 %v8307_v32, %s13077_s27 }
 0x3b3   : > { %v8770_v17 = vpop.permute.xlu1 %1407  ;;  %v8772_v53 = vpop.permute.xlu0 %1688 }
 0x3b4   : > { %13155 = vst [vmem:[#allocation87_spill] sm:$0xff] %v8770_v17  ;;  %13156 = vst [vmem:[#allocation88_spill] sm:$0xff] %v8772_v53 }
 0x3b5   : > { %1435 = vrot.lane.b32.xlu1 %v8544_v20, %s7904_s6 }
 0x3b6   : > { %1915 = vrot.lane.b32.xlu0 %v8314_v34, %s13077_s27 }
 0x3b7   : > { %v8778_v15 = vpop.permute.xlu1 %1423  ;;  %v8780_v37 = vpop.permute.xlu0 %1903 }
 0x3b8   : > { %13157 = vst [vmem:[#allocation89_spill] sm:$0xff] %v8778_v15  ;;  %13158 = vst [vmem:[#allocation90_spill] sm:$0xff] %v8780_v37 }
 0x3b9   : > { %1650 = vrot.lane.b32.xlu1 %v8620_v23, %s13066_s7 }
 0x3ba   : > { %1931 = vrot.lane.b32.xlu0 %v8321_v36, %s13077_s27 }
 0x3bb   : > { %v8786_v27 = vpop.permute.xlu1 %1439  ;;  %v8788_v17 = vpop.permute.xlu0 %1919 }
 0x3bc   : > { %13159 = vst [vmem:[#allocation91_spill] sm:$0xff] %v8786_v27  ;;  %13160 = vst [vmem:[#allocation92_spill] sm:$0xff] %v8788_v17 }
 0x3bd   : > { %1666 = vrot.lane.b32.xlu1 %v8582_v3, %s13066_s7 }
 0x3be   : > { %2146 = vrot.lane.b32.xlu0 %v8307_v32, %s13078_s12 }
 0x3bf   : > { %v8794_v44 = vpop.permute.xlu1 %1654  ;;  %v8796_v15 = vpop.permute.xlu0 %1935 }
 0x3c0   : > { %13161 = vst [vmem:[#allocation93_spill] sm:$0xff] %v8794_v44  ;;  %13162 = vst [vmem:[#allocation94_spill] sm:$0xff] %v8796_v15 }
 0x3c1   : > { %1682 = vrot.lane.b32.xlu1 %v8544_v20, %s13066_s7 }
 0x3c2   : > { %2425 = vrot.lane.b32.xlu0 %v8321_v36, %s13064_s14 }
 0x3c3   : > { %v8802_v37 = vpop.permute.xlu1 %1670  ;;  %v8804_v27 = vpop.permute.xlu0 %2150 }
 0x3c4   : > { %13163 = vst [vmem:[#allocation95_spill] sm:$0xff] %v8802_v37  ;;  %13164 = vst [vmem:[#allocation96_spill] sm:$0xff] %v8804_v27 }
 0x3c5   : > { %1897 = vrot.lane.b32.xlu1 %v8620_v23, %s13077_s27 }
 0x3c6   : > { %2409 = vrot.lane.b32.xlu0 %v8314_v34, %s13064_s14 }
 0x3c7   : > { %v8810_v17 = vpop.permute.xlu1 %1686  ;;  %v8812_v44 = vpop.permute.xlu0 %2429 }
 0x3c8   : > { %13165 = vst [vmem:[#allocation97_spill] sm:$0xff] %v8810_v17  ;;  %13166 = vst [vmem:[#allocation98_spill] sm:$0xff] %v8812_v44 }
 0x3c9   : > { %1913 = vrot.lane.b32.xlu1 %v8582_v3, %s13077_s27 }
 0x3ca   : > { %2393 = vrot.lane.b32.xlu0 %v8307_v32, %s13064_s14 }
 0x3cb   : > { %v8818_v36 = vpop.permute.xlu1 %1901  ;;  %v8820_v15 = vpop.permute.xlu0 %2413 }
 0x3cc   : > { %13167 = vst [vmem:[#allocation99_spill] sm:$0xff] %v8818_v36  ;;  %13168 = vst [vmem:[#allocation100_spill] sm:$0xff] %v8820_v15 }
 0x3cd   : > { %1929 = vrot.lane.b32.xlu1 %v8544_v20, %s13077_s27 }
 0x3ce   : > { %2160 = vrot.lane.b32.xlu0 %v8582_v3, %s13078_s12 }
 0x3cf   : > { %v8826_v34 = vpop.permute.xlu1 %1917 }
 0x3d0   : > { %13169 = vst [vmem:[#allocation101_spill] sm:$0xff] %v8826_v34  ;;  %v8828_v27 = vpop.permute.xlu0 %2397 }
 0x3d1   : > { %13170 = vst [vmem:[#allocation102_spill] sm:$0xff] %v8828_v27  ;;  %2144 = vrot.lane.b32.xlu1 %v8620_v23, %s13078_s12 }
 0x3d2   : > { %2176 = vrot.lane.b32.xlu0 %v8544_v20, %s13078_s12 }
 0x3d3   : > { %v8834_v32 = vpop.permute.xlu1 %1933 }
 0x3d4   : > { %13171 = vst [vmem:[#allocation103_spill] sm:$0xff] %v8834_v32  ;;  %v8836_v44 = vpop.permute.xlu0 %2164 }
 0x3d5   : > { %13172 = vst [vmem:[#allocation104_spill] sm:$0xff] %v8836_v44  ;;  %2423 = vrot.lane.b32.xlu1 %v8544_v20, %s13064_s14 }
 0x3d6   : > { %2638 = vrot.lane.b32.xlu0 %v8620_v23, %s13062_s22 }
 0x3d7   : > { %v8842_v15 = vpop.permute.xlu1 %2148 }
 0x3d8   : > { %13173 = vst [vmem:[#allocation105_spill] sm:$0xff] %v8842_v15  ;;  %v8844_v36 = vpop.permute.xlu0 %2180 }
 0x3d9   : > { %13174 = vst [vmem:[#allocation106_spill] sm:$0xff] %v8844_v36  ;;  %2407 = vrot.lane.b32.xlu1 %v8582_v3, %s13064_s14 }
 0x3da   : > { %2654 = vrot.lane.b32.xlu0 %v8582_v3, %s13062_s22 }
 0x3db   : > { %v8850_v27 = vpop.permute.xlu1 %2427 }
 0x3dc   : > { %13175 = vst [vmem:[#allocation107_spill] sm:$0xff] %v8850_v27  ;;  %v8852_v34 = vpop.permute.xlu0 %2642 }
 0x3dd   : > { %13176 = vst [vmem:[#allocation108_spill] sm:$0xff] %v8852_v34  ;;  %2391 = vrot.lane.b32.xlu1 %v8620_v23, %s13064_s14 }
 0x3de   : > { %2670 = vrot.lane.b32.xlu0 %v8544_v20, %s13062_s22 }
 0x3df   : > { %v8858_v44 = vpop.permute.xlu1 %2411 }
 0x3e0   : > { %13177 = vst [vmem:[#allocation109_spill] sm:$0xff] %v8858_v44  ;;  %v8860_v15 = vpop.permute.xlu0 %2658 }
 0x3e1   : > { %13178 = vst [vmem:[#allocation110_spill] sm:$0xff] %v8860_v15  ;;  %2158 = vrot.lane.b32.xlu1 %v8401_v1, %s13078_s12 }
 0x3e2   : > { %563 = vrot.lane.b32.xlu0 %v8401_v1, %s13057_s28 }
 0x3e3   : > { %v8866_v3 = vpop.permute.xlu1 %2395 }
 0x3e4   : > { %13179 = vst [vmem:[#allocation111_spill] sm:$0xff] %v8866_v3  ;;  %v8868_v27 = vpop.permute.xlu0 %2674 }
 0x3e5   : > { %13180 = vst [vmem:[#allocation112_spill] sm:$0xff] %v8868_v27  ;;  %2174 = vrot.lane.b32.xlu1 %v8412_v26, %s13078_s12 }
 0x3e6   : > { %579 = vrot.lane.b32.xlu0 %v8412_v26, %s13057_s28 }
 0x3e7   : > { %v8874_v20 = vpop.permute.xlu1 %2162 }
 0x3e8   : > { %13181 = vst [vmem:[#allocation113_spill] sm:$0xff] %v8874_v20  ;;  %v8876_v23 = vpop.permute.xlu0 %551 }
 0x3e9   : > { %2190 = vrot.lane.b32.xlu1 %v8425_v60, %s13078_s12 }
 0x3ea   : > { %595 = vrot.lane.b32.xlu0 %v8425_v60, %s13057_s28 }
 0x3eb   : > { %v8882_v34 = vpop.permute.xlu1 %2178 }
 0x3ec   : > { %13182 = vst [vmem:[#allocation114_spill] sm:$0xff] %v8882_v34  ;;  %v8884_v3 = vpop.permute.xlu0 %567 }
 0x3ed   : > { %2652 = vrot.lane.b32.xlu1 %v8401_v1, %s13062_s22 }
 0x3ee   : > { %923 = vrot.lane.b32.xlu0 %v8401_v1, %s13055_s29 }
 0x3ef   : > { %v8890_v44 = vpop.permute.xlu1 %2640 }
 0x3f0   : > { %13183 = vst [vmem:[#allocation115_spill] sm:$0xff] %v8890_v44  ;;  %v8892_v15 = vpop.permute.xlu0 %583 }
 0x3f1   : > { %2668 = vrot.lane.b32.xlu1 %v8412_v26, %s13062_s22 }
 0x3f2   : > { %939 = vrot.lane.b32.xlu0 %v8412_v26, %s13055_s29 }
 0x3f3   : > { %v8898_v27 = vpop.permute.xlu1 %2656 }
 0x3f4   : > { %13184 = vst [vmem:[#allocation116_spill] sm:$0xff] %v8898_v27  ;;  %v8900_v20 = vpop.permute.xlu0 %911 }
 0x3f5   : > { %13185 = vst [vmem:[#allocation117_spill] sm:$0xff] %v8900_v20  ;;  %2684 = vrot.lane.b32.xlu1 %v8425_v60, %s13062_s22 }
 0x3f6   : > { %955 = vrot.lane.b32.xlu0 %v8425_v60, %s13055_s29 }
 0x3f7   : > { %v8906_v32 = vpop.permute.xlu1 %2672 }
 0x3f8   : > { %13186 = vst [vmem:[#allocation118_spill] sm:$0xff] %v8906_v32  ;;  %v8908_v44 = vpop.permute.xlu0 %927 }
 0x3f9   : > { %561 = vrot.lane.b32.xlu1 %v8593_v45, %s13057_s28 }
 0x3fa   : > { %1170 = vrot.lane.b32.xlu0 %v8401_v1, %s7903_s30 }
 0x3fb   : > { %v8914_v34 = vpop.permute.xlu1 %549 }
 0x3fc   : > { %v8916_v27 = vpop.permute.xlu0 %943 }
 0x3fd   : > { %577 = vrot.lane.b32.xlu1 %v8555_v25, %s13057_s28 }
 0x3fe   : > { %1186 = vrot.lane.b32.xlu0 %v8412_v26, %s7903_s30 }
 0x3ff   : > { %v8922_v36 = vpop.permute.xlu1 %565 }
 0x400   : > { %v8924_v32 = vpop.permute.xlu0 %1158 }
 0x401   : > { %13187 = vst [vmem:[#allocation119_spill] sm:$0xff] %v8924_v32  ;;  %593 = vrot.lane.b32.xlu1 %v8429_v24, %s13057_s28 }
 0x402   : > { %1202 = vrot.lane.b32.xlu0 %v8425_v60, %s7903_s30 }
 0x403   : > { %v8930_v37 = vpop.permute.xlu1 %581 }
 0x404   : > { %v8932_v17 = vpop.permute.xlu0 %1174 }
 0x405   : > { %921 = vrot.lane.b32.xlu1 %v8593_v45, %s13055_s29 }
 0x406   : > { %1417 = vrot.lane.b32.xlu0 %v8401_v1, %s7904_s6 }
 0x407   : > { %v8938_v53 = vpop.permute.xlu1 %909 }
 0x408   : > { %13188 = vst [vmem:[#allocation120_spill] sm:$0xff] %v8938_v53  ;;  %v8940_v11 = vpop.permute.xlu0 %1190 }
 0x409   : > { %937 = vrot.lane.b32.xlu1 %v8555_v25, %s13055_s29 }
 0x40a   : > { %1433 = vrot.lane.b32.xlu0 %v8412_v26, %s7904_s6 }
 0x40b   : > { %v8946_v14 = vpop.permute.xlu1 %925 }
 0x40c   : > { %v8948_v22 = vpop.permute.xlu0 %1405 }
 0x40d   : > { %13189 = vst [vmem:[#allocation121_spill] sm:$0xff] %v8948_v22  ;;  %953 = vrot.lane.b32.xlu1 %v8429_v24, %s13055_s29 }
 0x40e   : > { %1449 = vrot.lane.b32.xlu0 %v8425_v60, %s7904_s6 }
 0x40f   : > { %v8960_v30 = vpop.permute.xlu1 %941 }
 0x410   : > { %v8962_v43 = vpop.permute.xlu0 %1421 }
 0x411   : > { %13190 = vst [vmem:[#allocation122_spill] sm:$0xff] %v8962_v43  ;;  %1168 = vrot.lane.b32.xlu1 %v8593_v45, %s7903_s30 }
 0x412   : > { %1664 = vrot.lane.b32.xlu0 %v8401_v1, %s13066_s7 }
 0x413   : > { %v8968_v22 = vpop.permute.xlu1 %1156 }
 0x414   : > { %13191 = vst [vmem:[#allocation123_spill] sm:$0xff] %v8968_v22  ;;  %v8970_v40 = vpop.permute.xlu0 %1437 }
 0x415   : > { %13192 = vst [vmem:[#allocation124_spill] sm:$0xff] %v8970_v40  ;;  %1184 = vrot.lane.b32.xlu1 %v8555_v25, %s7903_s30 }
 0x416   : > { %1680 = vrot.lane.b32.xlu0 %v8412_v26, %s13066_s7 }
 0x417   : > { %v8976_v46 = vpop.permute.xlu1 %1172 }
 0x418   : > { %v8978_v6 = vpop.permute.xlu0 %1652 }
 0x419   : > { %13193 = vst [vmem:[#allocation125_spill] sm:$0xff] %v8978_v6  ;;  %1200 = vrot.lane.b32.xlu1 %v8429_v24, %s7903_s30 }
 0x41a   : > { %1696 = vrot.lane.b32.xlu0 %v8425_v60, %s13066_s7 }
 0x41b   : > { %v8984_v43 = vpop.permute.xlu1 %1188 }
 0x41c   : > { %v8986_v53 = vpop.permute.xlu0 %1668 }
 0x41d   : > { %13194 = vst [vmem:[#allocation126_spill] sm:$0xff] %v8986_v53  ;;  %1415 = vrot.lane.b32.xlu1 %v8593_v45, %s7904_s6 }
 0x41e   : > { %1911 = vrot.lane.b32.xlu0 %v8401_v1, %s13077_s27 }
 0x41f   : > { %v8992_v40 = vpop.permute.xlu1 %1403 }
 0x420   : > { %13195 = vst [vmem:[#allocation127_spill] sm:$0xff] %v8992_v40  ;;  %v8994_v20 = vpop.permute.xlu0 %1684 }
 0x421   : > { %13196 = vst [vmem:[#allocation128_spill] sm:$0xff] %v8994_v20  ;;  %1431 = vrot.lane.b32.xlu1 %v8555_v25, %s7904_s6 }
 0x422   : > { %1927 = vrot.lane.b32.xlu0 %v8412_v26, %s13077_s27 }
 0x423   : > { %v9000_v6 = vpop.permute.xlu1 %1419 }
 0x424   : > { %13197 = vst [vmem:[#allocation129_spill] sm:$0xff] %v9000_v6  ;;  %v9002_v52 = vpop.permute.xlu0 %1899 }
 0x425   : > { %13198 = vst [vmem:[#allocation130_spill] sm:$0xff] %v9002_v52  ;;  %1447 = vrot.lane.b32.xlu1 %v8429_v24, %s7904_s6 }
 0x426   : > { %1943 = vrot.lane.b32.xlu0 %v8425_v60, %s13077_s27 }
 0x427   : > { %v9008_v53 = vpop.permute.xlu1 %1435 }
 0x428   : > { %13199 = vst [vmem:[#allocation131_spill] sm:$0xff] %v9008_v53  ;;  %v9010_v40 = vpop.permute.xlu0 %1915 }
 0x429   : > { %13200 = vst [vmem:[#allocation132_spill] sm:$0xff] %v9010_v40  ;;  %1662 = vrot.lane.b32.xlu1 %v8593_v45, %s13066_s7 }
 0x42a   : > { %2437 = vrot.lane.b32.xlu0 %v8425_v60, %s13064_s14 }
 0x42b   : > { %v9016_v20 = vpop.permute.xlu1 %1650 }
 0x42c   : > { %13201 = vst [vmem:[#allocation133_spill] sm:$0xff] %v9016_v20  ;;  %v9018_v6 = vpop.permute.xlu0 %1931 }
 0x42d   : > { %13202 = vst [vmem:[#allocation134_spill] sm:$0xff] %v9018_v6  ;;  %1678 = vrot.lane.b32.xlu1 %v8555_v25, %s13066_s7 }
 0x42e   : > { %2421 = vrot.lane.b32.xlu0 %v8412_v26, %s13064_s14 }
 0x42f   : > { %v9024_v52 = vpop.permute.xlu1 %1666 }
 0x430   : > { %13203 = vst [vmem:[#allocation135_spill] sm:$0xff] %v9024_v52  ;;  %v9026_v53 = vpop.permute.xlu0 %2146 }
 0x431   : > { %13204 = vst [vmem:[#allocation136_spill] sm:$0xff] %v9026_v53  ;;  %1694 = vrot.lane.b32.xlu1 %v8429_v24, %s13066_s7 }
 0x432   : > { %2405 = vrot.lane.b32.xlu0 %v8401_v1, %s13064_s14 }
 0x433   : > { %v9032_v60 = vpop.permute.xlu1 %1682 }
 0x434   : > { %13205 = vst [vmem:[#allocation137_spill] sm:$0xff] %v9032_v60  ;;  %v9034_v40 = vpop.permute.xlu0 %2425 }
 0x435   : > { %13206 = vst [vmem:[#allocation138_spill] sm:$0xff] %v9034_v40  ;;  %1909 = vrot.lane.b32.xlu1 %v8593_v45, %s13077_s27 }
 0x436   : > { %2156 = vrot.lane.b32.xlu0 %v8593_v45, %s13078_s12 }
 0x437   : > { %v9040_v26 = vpop.permute.xlu1 %1897 }
 0x438   : > { %13207 = vst [vmem:[#allocation139_spill] sm:$0xff] %v9040_v26  ;;  %v9042_v6 = vpop.permute.xlu0 %2409 }
 0x439   : > { %13208 = vst [vmem:[#allocation140_spill] sm:$0xff] %v9042_v6  ;;  %1925 = vrot.lane.b32.xlu1 %v8555_v25, %s13077_s27 }
 0x43a   : > { %2172 = vrot.lane.b32.xlu0 %v8555_v25, %s13078_s12 }
 0x43b   : > { %v9048_v1 = vpop.permute.xlu1 %1913 }
 0x43c   : > { %13209 = vst [vmem:[#allocation141_spill] sm:$0xff] %v9048_v1  ;;  %v9050_v53 = vpop.permute.xlu0 %2393 }
 0x43d   : > { %13210 = vst [vmem:[#allocation142_spill] sm:$0xff] %v9050_v53  ;;  %1941 = vrot.lane.b32.xlu1 %v8429_v24, %s13077_s27 }
 0x43e   : > { %2188 = vrot.lane.b32.xlu0 %v8429_v24, %s13078_s12 }
 0x43f   : > { %v9056_v40 = vpop.permute.xlu1 %1929 }
 0x440   : > { %13211 = vst [vmem:[#allocation143_spill] sm:$0xff] %v9056_v40  ;;  %v9058_v26 = vpop.permute.xlu0 %2160 }
 0x441   : > { %13212 = vst [vmem:[#allocation144_spill] sm:$0xff] %v9058_v26  ;;  %2435 = vrot.lane.b32.xlu1 %v8429_v24, %s13064_s14 }
 0x442   : > { %2650 = vrot.lane.b32.xlu0 %v8593_v45, %s13062_s22 }
 0x443   : > { %v9064_v6 = vpop.permute.xlu1 %2144 }
 0x444   : > { %13213 = vst [vmem:[#allocation145_spill] sm:$0xff] %v9064_v6  ;;  %v9066_v1 = vpop.permute.xlu0 %2176 }
 0x445   : > { %13214 = vst [vmem:[#allocation146_spill] sm:$0xff] %v9066_v1  ;;  %2419 = vrot.lane.b32.xlu1 %v8555_v25, %s13064_s14 }
 0x446   : > { %2666 = vrot.lane.b32.xlu0 %v8555_v25, %s13062_s22 }
 0x447   : > { %v9072_v53 = vpop.permute.xlu1 %2423 }
 0x448   : > { %13215 = vst [vmem:[#allocation147_spill] sm:$0xff] %v9072_v53  ;;  %v9074_v40 = vpop.permute.xlu0 %2638 }
 0x449   : > { %13216 = vst [vmem:[#allocation148_spill] sm:$0xff] %v9074_v40  ;;  %2403 = vrot.lane.b32.xlu1 %v8593_v45, %s13064_s14 }
 0x44a   : > { %2682 = vrot.lane.b32.xlu0 %v8429_v24, %s13062_s22 }
 0x44b   : > { %v9080_v26 = vpop.permute.xlu1 %2407 }
 0x44c   : > { %13217 = vst [vmem:[#allocation149_spill] sm:$0xff] %v9080_v26  ;;  %v9082_v6 = vpop.permute.xlu0 %2654 }
 0x44d   : > { %13218 = vst [vmem:[#allocation150_spill] sm:$0xff] %v9082_v6  ;;  %2170 = vrot.lane.b32.xlu1 %v8513_v56, %s13078_s12 }
 0x44e   : > { %559 = vrot.lane.b32.xlu0 %v8507_v39, %s13057_s28 }
 0x44f   : > { %v9088_v25 = vpop.permute.xlu1 %2391 }
 0x450   : > { %13219 = vst [vmem:[#allocation151_spill] sm:$0xff] %v9088_v25  ;;  %v9090_v53 = vpop.permute.xlu0 %2670 }
 0x451   : > { %13220 = vst [vmem:[#allocation152_spill] sm:$0xff] %v9090_v53  ;;  %2186 = vrot.lane.b32.xlu1 %v8521_v55, %s13078_s12 }
 0x452   : > { %575 = vrot.lane.b32.xlu0 %v8513_v56, %s13057_s28 }
 0x453   : > { %v9096_v24 = vpop.permute.xlu1 %2158 }
 0x454   : > { %13221 = vst [vmem:[#allocation153_spill] sm:$0xff] %v9096_v24  ;;  %v9098_v45 = vpop.permute.xlu0 %563 }
 0x455   : > { %2648 = vrot.lane.b32.xlu1 %v8507_v39, %s13062_s22 }
 0x456   : > { %591 = vrot.lane.b32.xlu0 %v8521_v55, %s13057_s28 }
 0x457   : > { %v9104_v40 = vpop.permute.xlu1 %2174 }
 0x458   : > { %13222 = vst [vmem:[#allocation154_spill] sm:$0xff] %v9104_v40  ;;  %v9106_v25 = vpop.permute.xlu0 %579 }
 0x459   : > { %2664 = vrot.lane.b32.xlu1 %v8513_v56, %s13062_s22 }
 0x45a   : > { %919 = vrot.lane.b32.xlu0 %v8507_v39, %s13055_s29 }
 0x45b   : > { %v9112_v26 = vpop.permute.xlu1 %2190 }
 0x45c   : > { %13223 = vst [vmem:[#allocation155_spill] sm:$0xff] %v9112_v26  ;;  %v596_v6 = vpop.permute.xlu0 %595 }
 0x45d   : > { %2680 = vrot.lane.b32.xlu1 %v8521_v55, %s13062_s22 }
 0x45e   : > { %935 = vrot.lane.b32.xlu0 %v8513_v56, %s13055_s29 }
 0x45f   : > { %v9118_v53 = vpop.permute.xlu1 %2652 }
 0x460   : > { %13224 = vst [vmem:[#allocation156_spill] sm:$0xff] %v9118_v53  ;;  %v9120_v24 = vpop.permute.xlu0 %923 }
 0x461   : > { %13225 = vst [vmem:[#allocation157_spill] sm:$0xff] %v9120_v24  ;;  %557 = vrot.lane.b32.xlu1 %v8603_v31, %s13057_s28  ;;  %v512_v24 = vld [vmem:[%s13038_s2 + $0x20] sm:$0xff] }
 0x462   : > { %951 = vrot.lane.b32.xlu0 %v8521_v55, %s13055_s29 }
 0x463   : > { %v9126_v40 = vpop.permute.xlu1 %2668 }
 0x464   : > { %13226 = vst [vmem:[#allocation158_spill] sm:$0xff] %v9126_v40  ;;  %v9128_v1 = vpop.permute.xlu0 %939 }
 0x465   : > { %573 = vrot.lane.b32.xlu1 %v8565_v5, %s13057_s28 }
 0x466   : > { %1166 = vrot.lane.b32.xlu0 %v8507_v39, %s7903_s30 }
 0x467   : > { %v9134_v26 = vpop.permute.xlu1 %2684 }
 0x468   : > { %13227 = vst [vmem:[#allocation159_spill] sm:$0xff] %v9134_v26  ;;  %v9136_v53 = vpop.permute.xlu0 %955 }
 0x469   : > { %589 = vrot.lane.b32.xlu1 %v8525_v58, %s13057_s28 }
 0x46a   : > { %1182 = vrot.lane.b32.xlu0 %v8513_v56, %s7903_s30 }
 0x46b   : > { %v9142_v20 = vpop.permute.xlu1 %561 }
 0x46c   : > { %v9144_v40 = vpop.permute.xlu0 %1170 }
 0x46d   : > { %917 = vrot.lane.b32.xlu1 %v8603_v31, %s13055_s29 }
 0x46e   : > { %1198 = vrot.lane.b32.xlu0 %v8521_v55, %s7903_s30 }
 0x46f   : > { %v9150_v52 = vpop.permute.xlu1 %577 }
 0x470   : > { %v9152_v26 = vpop.permute.xlu0 %1186 }
 0x471   : > { %933 = vrot.lane.b32.xlu1 %v8565_v5, %s13055_s29 }
 0x472   : > { %1413 = vrot.lane.b32.xlu0 %v8507_v39, %s7904_s6 }
 0x473   : > { %v594_v60 = vpop.permute.xlu1 %593 }
 0x474   : > { %v1203_v18 = vpop.permute.xlu0 %1202  ;;  %v613_v13 = vsel %vm597_vm10, %v594_v60, %v596_v6  ;;  %v5861_v6 = vld [vmem:[%s13038_s2 + $0x60] sm:$0xff] }
 0x475   : > { %949 = vrot.lane.b32.xlu1 %v8525_v58, %s13055_s29  ;;  %6719 = vmatprep.subr.mxu1 %v613_v13  ;;  %s13518_s29 = smov 19  }
 0x476   : > { %1429 = vrot.lane.b32.xlu0 %v8513_v56, %s7904_s6  ;;  %6720 = vmatpush3.msra.mxu1 %v613_v13 }
 0x477   : > { %v9163_v16 = vpop.permute.xlu1 %921  ;;  %6751 = vmatprep.mubr.f32.mxu1 %v5861_v6  ;;  %v511_v6 = vld [vmem:[%s13038_s2 + $0x18] sm:$0xff] }
 0x478   : > { %13228 = vst [vmem:[#allocation160_spill] sm:$0xff] %v9163_v16  ;;  %v9165_v8 = vpop.permute.xlu0 %1417 }
 0x479   : > { %13229 = vst [vmem:[#allocation161_spill] sm:$0xff] %v9165_v8  ;;  %1164 = vrot.lane.b32.xlu1 %v8603_v31, %s7903_s30  ;;  %v510_v8 = vld [vmem:[%s13038_s2 + $0x10] sm:$0xff] }
 0x47a   : > { %1445 = vrot.lane.b32.xlu0 %v8521_v55, %s7904_s6  ;;  %6804 = vmatprep.mubr.f32.mxu0 %v510_v8  ;;  %v513_v8 = vld [vmem:[%s13038_s2 + $0x28] sm:$0xff] }
 0x47b   : > { %v9174_v60 = vpop.permute.xlu1 %937  ;;  %6805 = vmatmul.mubr.f32.gmra.mxu0 %v511_v6 }
 0x47c   : > { %v9176_v0 = vpop.permute.xlu0 %1433  ;;  %6807 = vmatprep.mubr.f32.mxu0 %v512_v24  ;;  %v515_v24 = vld [vmem:[%s13038_s2 + $0x38] sm:$0xff] }
 0x47d   : > { %13230 = vst [vmem:[#allocation162_spill] sm:$0xff] %v9176_v0  ;;  %1180 = vrot.lane.b32.xlu1 %v8565_v5, %s7903_s30 }
 0x47e   : > { %1660 = vrot.lane.b32.xlu0 %v8507_v39, %s13066_s7 }
 0x47f   : > { %v9182_v13 = vpop.permute.xlu1 %953  ;;  %6808 = vmatmul.mubr.f32.gmra.mxu0 %v513_v8 }
 0x480   : > { %v9187_v16 = vpop.permute.xlu0 %1449 }
 0x481   : > { %13231 = vst [vmem:[#allocation163_spill] sm:$0xff] %v9187_v16  ;;  %1196 = vrot.lane.b32.xlu1 %v8525_v58, %s7903_s30 }
 0x482   : > { %1676 = vrot.lane.b32.xlu0 %v8513_v56, %s13066_s7 }
 0x483   : > { %v9196_v0 = vpop.permute.xlu1 %1168 }
 0x484   : > { %v9201_v2 = vpop.permute.xlu0 %1664 }
 0x485   : > { %13232 = vst [vmem:[#allocation164_spill] sm:$0xff] %v9201_v2  ;;  %1411 = vrot.lane.b32.xlu1 %v8603_v31, %s7904_s6  ;;  %v514_v2 = vld [vmem:[%s13038_s2 + $0x30] sm:$0xff] }
 0x486   : > { %1692 = vrot.lane.b32.xlu0 %v8521_v55, %s13066_s7  ;;  %6810 = vmatprep.mubr.f32.mxu0 %v514_v2  ;;  %v516_v2 = vld [vmem:[%s13038_s2 + $0x40] sm:$0xff] }
 0x487   : > { %v9210_v6 = vpop.permute.xlu1 %1184  ;;  %6811 = vmatmul.mubr.f32.gmra.mxu0 %v515_v24  ;;  %v517_v24 = vld [vmem:[%s13038_s2 + $0x48] sm:$0xff] }
 0x488   : > { %v9212_v16 = vpop.permute.xlu0 %1680  ;;  %6813 = vmatprep.mubr.f32.mxu0 %v516_v2  ;;  %v519_v2 = vld [vmem:[%s13038_s2 + $0x58] sm:$0xff] }
 0x489   : > { %13233 = vst [vmem:[#allocation165_spill] sm:$0xff] %v9212_v16  ;;  %1427 = vrot.lane.b32.xlu1 %v8565_v5, %s7904_s6 }
 0x48a   : > { %1907 = vrot.lane.b32.xlu0 %v8507_v39, %s13077_s27 }
 0x48b   : > { %v1201_v8 = vpop.permute.xlu1 %1200  ;;  %6814 = vmatmul.mubr.f32.gmra.mxu0 %v517_v24 }
 0x48c   : > { %v9224_v7 = vpop.permute.xlu0 %1696  ;;  %v1220_v16 = vsel %vm1204_vm11, %v1201_v8, %v1203_v18 }
 0x48d   : > { %13234 = vst [vmem:[#allocation166_spill] sm:$0xff] %v9224_v7  ;;  %1443 = vrot.lane.b32.xlu1 %v8525_v58, %s7904_s6  ;;  %6869 = vmatprep.subr.mxu0 %v1220_v16 }
 0x48e   : > { %1923 = vrot.lane.b32.xlu0 %v8513_v56, %s13077_s27  ;;  %6870 = vmatpush3.msra.mxu0 %v1220_v16  ;;  %v518_v16 = vld [vmem:[%s13038_s2 + $0x50] sm:$0xff] }
 0x48f   : > { %v9237_v22 = vpop.permute.xlu1 %1415  ;;  %6816 = vmatprep.mubr.f32.mxu0 %v518_v16 }
 0x490   : > { %13235 = vst [vmem:[#allocation167_spill] sm:$0xff] %v9237_v22  ;;  %v9239_v18 = vpop.permute.xlu0 %1911  ;;  %6817 = vmatmul.mubr.f32.gmra.mxu0 %v519_v2 }
 0x491   : > { %13236 = vst [vmem:[#allocation168_spill] sm:$0xff] %v9239_v18  ;;  %1658 = vrot.lane.b32.xlu1 %v8603_v31, %s13066_s7  ;;  %v5885_v18 = vld [vmem:[%s13038_s2 + $0x120] sm:$0xff] }
 0x492   : > { %1939 = vrot.lane.b32.xlu0 %v8521_v55, %s13077_s27  ;;  %6901 = vmatprep.mubr.f32.mxu0 %v5885_v18 }
 0x493   : > { %v9248_v8 = vpop.permute.xlu1 %1431 }
 0x494   : > { %13237 = vst [vmem:[#allocation169_spill] sm:$0xff] %v9248_v8  ;;  %v9253_v22 = vpop.permute.xlu0 %1927 }
 0x495   : > { %13238 = vst [vmem:[#allocation170_spill] sm:$0xff] %v9253_v22  ;;  %1674 = vrot.lane.b32.xlu1 %v8565_v5, %s13066_s7 }
 0x496   : > { %2154 = vrot.lane.b32.xlu0 %v8507_v39, %s13078_s12 }
 0x497   : > { %v9259_v24 = vpop.permute.xlu1 %1447 }
 0x498   : > { %13239 = vst [vmem:[#allocation171_spill] sm:$0xff] %v9259_v24  ;;  %v9264_v16 = vpop.permute.xlu0 %1943 }
 0x499   : > { %13240 = vst [vmem:[#allocation172_spill] sm:$0xff] %v9264_v16  ;;  %1690 = vrot.lane.b32.xlu1 %v8525_v58, %s13066_s7  ;;  %s13521_s7 = smov 125  }
 0x49a   : > { %2433 = vrot.lane.b32.xlu0 %v8521_v55, %s13064_s14 }
 0x49b   : > { %v9270_v2 = vpop.permute.xlu1 %1662 }
 0x49c   : > { %13241 = vst [vmem:[#allocation173_spill] sm:$0xff] %v9270_v2  ;;  %v9272_v22 = vpop.permute.xlu0 %2437 }
 0x49d   : > { %13242 = vst [vmem:[#allocation174_spill] sm:$0xff] %v9272_v22  ;;  %1905 = vrot.lane.b32.xlu1 %v8603_v31, %s13077_s27 }
 0x49e   : > { %2417 = vrot.lane.b32.xlu0 %v8513_v56, %s13064_s14 }
 0x49f   : > { %v9278_v8 = vpop.permute.xlu1 %1678 }
 0x4a0   : > { %13243 = vst [vmem:[#allocation175_spill] sm:$0xff] %v9278_v8  ;;  %v9280_v16 = vpop.permute.xlu0 %2421 }
 0x4a1   : > { %13244 = vst [vmem:[#allocation176_spill] sm:$0xff] %v9280_v16  ;;  %1921 = vrot.lane.b32.xlu1 %v8565_v5, %s13077_s27 }
 0x4a2   : > { %2401 = vrot.lane.b32.xlu0 %v8507_v39, %s13064_s14 }
 0x4a3   : > { %v9286_v55 = vpop.permute.xlu1 %1694 }
 0x4a4   : > { %13245 = vst [vmem:[#allocation177_spill] sm:$0xff] %v9286_v55  ;;  %v9288_v18 = vpop.permute.xlu0 %2405 }
 0x4a5   : > { %13246 = vst [vmem:[#allocation178_spill] sm:$0xff] %v9288_v18  ;;  %1937 = vrot.lane.b32.xlu1 %v8525_v58, %s13077_s27 }
 0x4a6   : > { %2168 = vrot.lane.b32.xlu0 %v8565_v5, %s13078_s12 }
 0x4a7   : > { %v9294_v56 = vpop.permute.xlu1 %1909 }
 0x4a8   : > { %13247 = vst [vmem:[#allocation179_spill] sm:$0xff] %v9294_v56  ;;  %v9296_v22 = vpop.permute.xlu0 %2156 }
 0x4a9   : > { %13248 = vst [vmem:[#allocation180_spill] sm:$0xff] %v9296_v22  ;;  %2152 = vrot.lane.b32.xlu1 %v8603_v31, %s13078_s12 }
 0x4aa   : > { %2184 = vrot.lane.b32.xlu0 %v8525_v58, %s13078_s12 }
 0x4ab   : > { %v9302_v39 = vpop.permute.xlu1 %1925 }
 0x4ac   : > { %13249 = vst [vmem:[#allocation181_spill] sm:$0xff] %v9302_v39  ;;  %v9304_v16 = vpop.permute.xlu0 %2172 }
 0x4ad   : > { %13250 = vst [vmem:[#allocation182_spill] sm:$0xff] %v9304_v16  ;;  %2431 = vrot.lane.b32.xlu1 %v8525_v58, %s13064_s14 }
 0x4ae   : > { %2646 = vrot.lane.b32.xlu0 %v8603_v31, %s13062_s22 }
 0x4af   : > { %v9310_v18 = vpop.permute.xlu1 %1941 }
 0x4b0   : > { %13251 = vst [vmem:[#allocation183_spill] sm:$0xff] %v9310_v18  ;;  %v9312_v56 = vpop.permute.xlu0 %2188 }
 0x4b1   : > { %13252 = vst [vmem:[#allocation184_spill] sm:$0xff] %v9312_v56  ;;  %2415 = vrot.lane.b32.xlu1 %v8565_v5, %s13064_s14 }
 0x4b2   : > { %2662 = vrot.lane.b32.xlu0 %v8565_v5, %s13062_s22 }
 0x4b3   : > { %v9318_v22 = vpop.permute.xlu1 %2435 }
 0x4b4   : > { %13253 = vst [vmem:[#allocation185_spill] sm:$0xff] %v9318_v22  ;;  %v9320_v39 = vpop.permute.xlu0 %2650 }
 0x4b5   : > { %13254 = vst [vmem:[#allocation186_spill] sm:$0xff] %v9320_v39  ;;  %2399 = vrot.lane.b32.xlu1 %v8603_v31, %s13064_s14  ;;  %s13524_s14 = smov 108  }
 0x4b6   : > { %2678 = vrot.lane.b32.xlu0 %v8525_v58, %s13062_s22  ;;  %s13523_s22 = smov 120  }
 0x4b7   : > { %v9326_v16 = vpop.permute.xlu1 %2419 }
 0x4b8   : > { %13255 = vst [vmem:[#allocation187_spill] sm:$0xff] %v9326_v16  ;;  %v9328_v18 = vpop.permute.xlu0 %2666 }
 0x4b9   : > { %13256 = vst [vmem:[#allocation188_spill] sm:$0xff] %v9328_v18 }
 0x4bb   : > { %v9330_v56 = vpop.permute.xlu1 %2403 }
 0x4bc   : > { %13257 = vst [vmem:[#allocation189_spill] sm:$0xff] %v9330_v56  ;;  %v9332_v2 = vpop.permute.xlu0 %2682 }
 0x4bd   : > { %13258 = vst [vmem:[#allocation190_spill] sm:$0xff] %v9332_v2 }
 0x4bf   : > { %v9334_v8 = vpop.permute.xlu1 %2170 }
 0x4c0   : > { %13259 = vst [vmem:[#allocation191_spill] sm:$0xff] %v9334_v8  ;;  %v560_v5 = vpop.permute.xlu0 %559 }
 0x4c3   : > { %v9336_v22 = vpop.permute.xlu1 %2186 }
 0x4c4   : > { %13260 = vst [vmem:[#allocation192_spill] sm:$0xff] %v9336_v22  ;;  %v576_v39 = vpop.permute.xlu0 %575 }
 0x4c7   : > { %v9338_v24 = vpop.permute.xlu1 %2648 }
 0x4c8   : > { %13261 = vst [vmem:[#allocation193_spill] sm:$0xff] %v9338_v24  ;;  %v592_v31 = vpop.permute.xlu0 %591  ;;  %v611_v24 = vsel %vm597_vm10, %v8714_v49, %v8676_v51 }
 0x4cb   : > { %v9340_v55 = vpop.permute.xlu1 %2664 }
 0x4cc   : > { %13262 = vst [vmem:[#allocation194_spill] sm:$0xff] %v9340_v55  ;;  %v9342_v58 = vpop.permute.xlu0 %919 }
 0x4cf   : > { %v9344_v16 = vpop.permute.xlu1 %2680 }
 0x4d0   : > { %13263 = vst [vmem:[#allocation195_spill] sm:$0xff] %v9344_v16  ;;  %v9346_v18 = vpop.permute.xlu0 %935  ;;  %v610_v16 = vsel %vm597_vm10, %v8930_v37, %v8892_v15  ;;  %v607_v15 = vsel %vm597_vm10, %v8706_v47, %v8668_v63  ;;  %v603_v63 = vsel %vm597_vm10, %v8698_v19, %v8660_v57  ;;  %v600_v19 = vsel %vm597_vm10, %v8519_v62, %v8535_v10 }
 0x4d1   : > { %v598_v62 = vsel %vm597_vm10, %v8319_v35, %v8328_v38  ;;  %v1214_v10 = vsel %vm1204_vm11, %v8754_v48, %v8716_v33  ;;  %v969_v48 = vsel %vm957_vm12, %v9174_v60, %v9128_v1  ;;  %v5863_v33 = vld [vmem:[%s13038_s2 + $0x70] sm:$0xff]  ;;  %v967_v60 = vsel %vm957_vm12, %v8730_v41, %v8692_v29  ;;  %v13267_v29 = vld [vmem:[#allocation45_spill] sm:$0xff] }
 0x4d2   : > { %v13266_v41 = vld [vmem:[#allocation48_spill] sm:$0xff] }
 0x4d3   : > { %v558_v56 = vpop.permute.xlu1 %557 }
 0x4d4   : > { %v9348_v2 = vpop.permute.xlu0 %951  ;;  %v604_v47 = vsel %vm597_vm10, %v558_v56, %v560_v5  ;;  %v5867_v56 = vld [vmem:[%s13038_s2 + $0x90] sm:$0xff] }
 0x4d7   : > { %v574_v7 = vpop.permute.xlu1 %573 }
 0x4d8   : > { %v9351_v22 = vpop.permute.xlu0 %1166  ;;  %v608_v51 = vsel %vm597_vm10, %v574_v7, %v576_v39  ;;  %v605_v7 = vsel %vm597_vm10, %v9142_v20, %v9098_v45  ;;  %v602_v20 = vsel %vm597_vm10, %v8914_v34, %v8876_v23  ;;  %v601_v45 = vsel %vm597_vm10, %v8423_v4, %v8439_v28 }
 0x4d9   : > { %v599_v34 = vsel %vm597_vm10, %v8235_v9, %v8244_v12  ;;  %v1218_v28 = vsel %vm1204_vm11, %v8762_v42, %v8724_v59  ;;  %v1217_v4 = vsel %vm1204_vm11, %v8984_v43, %v8940_v11  ;;  %v5862_v9 = vld [vmem:[%s13038_s2 + $0x68] sm:$0xff]  ;;  %v973_v42 = vsel %vm957_vm12, %v9182_v13, %v9136_v53 }
 0x4da   : > { %v1216_v11 = vsel %vm1204_vm11, %v9210_v6, %v9152_v26  ;;  %v971_v53 = vsel %vm957_vm12, %v8738_v54, %v8700_v50  ;;  %v970_v23 = vsel %vm957_vm12, %v8960_v30, %v8916_v27  ;;  %v1213_v54 = vsel %vm1204_vm11, %v8976_v46, %v8932_v17  ;;  %v5864_v17 = vld [vmem:[%s13038_s2 + $0x78] sm:$0xff]  ;;  %v13265_v13 = vld [vmem:[#allocation123_spill] sm:$0xff] }
 0x4db   : > { %v590_v8 = vpop.permute.xlu1 %589  ;;  %v1212_v27 = vsel %vm1204_vm11, %v9196_v0, %v9144_v40  ;;  %v1210_v0 = vsel %vm1204_vm11, %v8746_v21, %v8708_v61  ;;  %v5865_v40 = vld [vmem:[%s13038_s2 + $0x80] sm:$0xff]  ;;  %v966_v21 = vsel %vm957_vm12, %v8946_v14, %v8908_v44  ;;  %v13264_v61 = vld [vmem:[#allocation119_spill] sm:$0xff]  ;;  %v13268_v14 = vld [vmem:[#allocation157_spill] sm:$0xff] }
 0x4dc   : > { %v612_v32 = vsel %vm597_vm10, %v590_v8, %v592_v31  ;;  %v609_v8 = vsel %vm597_vm10, %v9150_v52, %v9106_v25  ;;  %v606_v52 = vsel %vm597_vm10, %v8922_v36, %v8884_v3  ;;  %v1209_v6 = vsel %vm1204_vm11, %v13265_v13, %v13264_v61  ;;  %v13269_v44 = vld [vmem:[#allocation160_spill] sm:$0xff] }
 0x4dd   : > { %6721 = vmatprep.subr.mxu1 %v612_v32  ;;  %v965_v39 = vsel %vm957_vm12, %v13269_v44, %v13268_v14  ;;  %v13291_v61 = vld [vmem:[#allocation28_spill] sm:$0xff]  ;;  %v13294_v14 = vld [vmem:[#allocation163_spill] sm:$0xff] }
 0x4de   : > { %6722 = vmatpush3.msra.mxu1 %v612_v32  ;;  %v9366_v32 = vpop.permute.xlu0 %1182  ;;  %v13295_v44 = vld [vmem:[#allocation171_spill] sm:$0xff] }
 0x4df   : > { %v9356_v55 = vpop.permute.xlu1 %917  ;;  %6723 = vmatprep.subr.mxu1 %v611_v24 }
 0x4e0   : > { %6724 = vmatpush3.msra.mxu1 %v611_v24 }
 0x4e1   : > { %6725 = vmatprep.subr.mxu1 %v610_v16 }
 0x4e2   : > { %6726 = vmatpush3.msra.mxu1 %v610_v16  ;;  %v1199_v49 = vpop.permute.xlu0 %1198 }
 0x4e3   : > { %v9364_v31 = vpop.permute.xlu1 %933  ;;  %6727 = vmatprep.subr.mxu1 %v609_v8 }
 0x4e4   : > { %6728 = vmatpush3.msra.mxu1 %v609_v8  ;;  %v968_v46 = vsel %vm957_vm12, %v9364_v31, %v9346_v18  ;;  %v1208_v18 = vsel %vm1204_vm11, %v13267_v29, %v13266_v41  ;;  %v5868_v8 = vld [vmem:[%s13038_s2 + $0x98] sm:$0xff]  ;;  %v964_v31 = vsel %vm957_vm12, %v9356_v55, %v9342_v58  ;;  %v13274_v55 = vld [vmem:[#allocation79_spill] sm:$0xff] }
 0x4e5   : > { %6729 = vmatprep.subr.mxu1 %v608_v51  ;;  %v13275_v58 = vld [vmem:[#allocation81_spill] sm:$0xff] }
 0x4e6   : > { %6730 = vmatpush3.msra.mxu1 %v608_v51  ;;  %v9384_v3 = vpop.permute.xlu0 %1413  ;;  %v13271_v51 = vld [vmem:[#allocation61_spill] sm:$0xff] }
 0x4e7   : > { %v950_v37 = vpop.permute.xlu1 %949  ;;  %6731 = vmatprep.subr.mxu1 %v607_v15  ;;  %v13293_v41 = vld [vmem:[#allocation137_spill] sm:$0xff] }
 0x4e8   : > { %6732 = vmatpush3.msra.mxu1 %v607_v15  ;;  %v972_v38 = vsel %vm957_vm12, %v950_v37, %v9348_v2 }
 0x4e9   : > { %6733 = vmatprep.subr.mxu1 %v606_v52 }
 0x4ea   : > { %6734 = vmatpush3.msra.mxu1 %v606_v52  ;;  %v9396_v16 = vpop.permute.xlu0 %1429  ;;  %v13272_v52 = vld [vmem:[#allocation16_spill] sm:$0xff] }
 0x4eb   : > { %v9378_v25 = vpop.permute.xlu1 %1164  ;;  %6735 = vmatprep.subr.mxu1 %v605_v7 }
 0x4ec   : > { %6736 = vmatpush3.msra.mxu1 %v605_v7  ;;  %v1211_v26 = vsel %vm1204_vm11, %v9378_v25, %v9351_v22  ;;  %v5866_v22 = vld [vmem:[%s13038_s2 + $0x88] sm:$0xff]  ;;  %v5869_v25 = vld [vmem:[%s13038_s2 + $0xa0] sm:$0xff] }
 0x4ed   : > { %6737 = vmatprep.subr.mxu1 %v604_v47 }
 0x4ee   : > { %6738 = vmatpush3.msra.mxu1 %v604_v47  ;;  %v9421_v35 = vpop.permute.xlu0 %1445  ;;  %v963_v47 = vsel %vm957_vm12, %v13275_v58, %v13274_v55  ;;  %v13301_v55 = vld [vmem:[#allocation95_spill] sm:$0xff] }
 0x4ef   : > { %v1181_v36 = vpop.permute.xlu1 %1180  ;;  %6739 = vmatprep.subr.mxu1 %v603_v63 }
 0x4f0   : > { %6740 = vmatpush3.msra.mxu1 %v603_v63  ;;  %v1215_v43 = vsel %vm1204_vm11, %v1181_v36, %v9366_v32  ;;  %v13270_v32 = vld [vmem:[#allocation64_spill] sm:$0xff]  ;;  %v5870_v63 = vld [vmem:[%s13038_s2 + $0xa8] sm:$0xff] }
 0x4f1   : > { %6741 = vmatprep.subr.mxu1 %v602_v20  ;;  %v1207_v15 = vsel %vm1204_vm11, %v13271_v51, %v13270_v32  ;;  %v5875_v32 = vld [vmem:[%s13038_s2 + $0xd0] sm:$0xff] }
 0x4f2   : > { %6742 = vmatpush3.msra.mxu1 %v602_v20  ;;  %v9441_v50 = vpop.permute.xlu0 %1660  ;;  %v13276_v20 = vld [vmem:[#allocation117_spill] sm:$0xff] }
 0x4f3   : > { %v1197_v24 = vpop.permute.xlu1 %1196  ;;  %6743 = vmatprep.subr.mxu1 %v601_v45 }
 0x4f4   : > { %6744 = vmatpush3.msra.mxu1 %v601_v45  ;;  %v1219_v57 = vsel %vm1204_vm11, %v1197_v24, %v1199_v49  ;;  %v13273_v49 = vld [vmem:[#allocation13_spill] sm:$0xff]  ;;  %v13277_v45 = vld [vmem:[#allocation120_spill] sm:$0xff] }
 0x4f5   : > { %6745 = vmatprep.subr.mxu1 %v600_v19  ;;  %6871 = vmatprep.subr.mxu0 %v1219_v57  ;;  %v1206_v7 = vsel %vm1204_vm11, %v13273_v49, %v13272_v52  ;;  %v962_v24 = vsel %vm957_vm12, %v13277_v45, %v13276_v20  ;;  %v5876_v52 = vld [vmem:[%s13038_s2 + $0xd8] sm:$0xff]  ;;  %v5887_v49 = vld [vmem:[%s13038_s2 + $0x130] sm:$0xff]  ;;  %v13303_v20 = vld [vmem:[#allocation131_spill] sm:$0xff] }
 0x4f6   : > { %6746 = vmatpush3.msra.mxu1 %v600_v19  ;;  %6872 = vmatpush3.msra.mxu0 %v1219_v57  ;;  %v9469_v1 = vpop.permute.xlu0 %1676  ;;  %v13278_v19 = vld [vmem:[#allocation32_spill] sm:$0xff]  ;;  %v13279_v57 = vld [vmem:[#allocation29_spill] sm:$0xff] }
 0x4f7   : > { %6747 = vmatprep.subr.mxu1 %v599_v34  ;;  %6873 = vmatprep.subr.mxu0 %v1218_v28  ;;  %v9413_v12 = vpop.permute.xlu1 %1411 }
 0x4f8   : > { %6748 = vmatpush3.msra.mxu1 %v599_v34  ;;  %6874 = vmatpush3.msra.mxu0 %v1218_v28  ;;  %v1205_v34 = vsel %vm1204_vm11, %v13279_v57, %v13278_v19  ;;  %v5886_v28 = vld [vmem:[%s13038_s2 + $0x128] sm:$0xff] }
 0x4f9   : > { %6749 = vmatprep.subr.mxu1 %v598_v62  ;;  %6875 = vmatprep.subr.mxu0 %v1217_v4  ;;  %v13305_v19 = vld [vmem:[#allocation135_spill] sm:$0xff] }
 0x4fa   : > { %6750 = vmatpush3.msra.mxu1 %v598_v62  ;;  %6876 = vmatpush3.msra.mxu0 %v1217_v4  ;;  %v1693_v5 = vpop.permute.xlu0 %1692  ;;  %v13280_v62 = vld [vmem:[#allocation166_spill] sm:$0xff]  ;;  %v13281_v4 = vld [vmem:[#allocation177_spill] sm:$0xff] }
 0x4fb   : > { %6752 = vmatmul.mubr.f32.vlgmr.msra.gmra.mxu1 %v5862_v9  ;;  %6819 = vmatprep.subr.mxu1 %v973_v42  ;;  %v9430_v59 = vpop.permute.xlu1 %1427  ;;  %v1714_v9 = vsel %vm13059_vm13, %v13281_v4, %v13280_v62  ;;  %v5890_v62 = vld [vmem:[%s13038_s2 + $0x148] sm:$0xff] }
 0x4fc   : > { %6877 = vmatprep.subr.mxu0 %v1216_v11  ;;  %6820 = vmatpush3.msra.mxu1 %v973_v42 }
 0x4fd   : > { %6878 = vmatpush3.msra.mxu0 %v1216_v11  ;;  %6821 = vmatprep.subr.mxu1 %v972_v38  ;;  %v13282_v11 = vld [vmem:[#allocation46_spill] sm:$0xff] }
 0x4fe   : > { %6879 = vmatprep.subr.mxu0 %v1215_v43  ;;  %6822 = vmatpush3.msra.mxu1 %v972_v38  ;;  %v9517_v36 = vpop.permute.xlu0 %1907  ;;  %v13283_v38 = vld [vmem:[#allocation44_spill] sm:$0xff] }
 0x4ff   : > { %6880 = vmatpush3.msra.mxu0 %v1215_v43  ;;  %6823 = vmatprep.subr.mxu1 %v971_v53  ;;  %v9455_v30 = vpop.permute.xlu1 %1443  ;;  %v961_v43 = vsel %vm957_vm12, %v13283_v38, %v13282_v11  ;;  %v13308_v38 = vld [vmem:[#allocation164_spill] sm:$0xff] }
 0x500   : > { %6881 = vmatprep.subr.mxu0 %v1214_v10  ;;  %6824 = vmatpush3.msra.mxu1 %v971_v53  ;;  %v5871_v53 = vld [vmem:[%s13038_s2 + $0xb0] sm:$0xff]  ;;  %v1466_v51 = vsel %vm13060_vm14, %v9455_v30, %v9421_v35  ;;  %v5888_v35 = vld [vmem:[%s13038_s2 + $0x138] sm:$0xff] }
 0x501   : > { %6882 = vmatpush3.msra.mxu0 %v1214_v10  ;;  %6825 = vmatprep.subr.mxu1 %v970_v23  ;;  %v5872_v10 = vld [vmem:[%s13038_s2 + $0xb8] sm:$0xff] }
 0x502   : > { %6883 = vmatprep.subr.mxu0 %v1213_v54  ;;  %6826 = vmatpush3.msra.mxu1 %v970_v23  ;;  %v13284_v23 = vld [vmem:[#allocation62_spill] sm:$0xff] }
 0x503   : > { %6884 = vmatpush3.msra.mxu0 %v1213_v54  ;;  %6827 = vmatprep.subr.mxu1 %v969_v48  ;;  %v9483_v2 = vpop.permute.xlu1 %1658  ;;  %v13285_v54 = vld [vmem:[#allocation60_spill] sm:$0xff] }
 0x504   : > { %6885 = vmatprep.subr.mxu0 %v1212_v27  ;;  %6828 = vmatpush3.msra.mxu1 %v969_v48  ;;  %v960_v48 = vsel %vm957_vm12, %v13285_v54, %v13284_v23  ;;  %v1462_v23 = vsel %vm13060_vm14, %v9430_v59, %v9396_v16  ;;  %v1705_v54 = vsel %vm13059_vm13, %v9483_v2, %v9441_v50  ;;  %v5892_v16 = vld [vmem:[%s13038_s2 + $0x158] sm:$0xff]  ;;  %v13310_v50 = vld [vmem:[#allocation83_spill] sm:$0xff] }
 0x505   : > { %6886 = vmatpush3.msra.mxu0 %v1212_v27  ;;  %6754 = vmatprep.mubr.f32.mxu1 %v5863_v33  ;;  %v9543_v33 = vpop.permute.xlu0 %1923  ;;  %v13311_v2 = vld [vmem:[#allocation89_spill] sm:$0xff] }
 0x506   : > { %6829 = vmatprep.subr.mxu1 %v968_v46  ;;  %6887 = vmatprep.subr.mxu0 %v1211_v26 }
 0x507   : > { %6755 = vmatmul.mubr.f32.gmra.mxu1 %v5864_v17  ;;  %6888 = vmatpush3.msra.mxu0 %v1211_v26  ;;  %v9503_v37 = vpop.permute.xlu1 %1674  ;;  %v13286_v17 = vld [vmem:[#allocation14_spill] sm:$0xff] }
 0x508   : > { %6830 = vmatpush3.msra.mxu1 %v968_v46  ;;  %6889 = vmatprep.subr.mxu0 %v1210_v0  ;;  %v13287_v46 = vld [vmem:[#allocation12_spill] sm:$0xff] }
 0x509   : > { %6831 = vmatprep.subr.mxu1 %v967_v60  ;;  %6890 = vmatpush3.msra.mxu0 %v1210_v0  ;;  %v959_v26 = vsel %vm957_vm12, %v13287_v46, %v13286_v17  ;;  %v13288_v0 = vld [vmem:[#allocation88_spill] sm:$0xff]  ;;  %v1461_v17 = vsel %vm13060_vm14, %v13311_v2, %v13310_v50  ;;  %v13312_v46 = vld [vmem:[#allocation85_spill] sm:$0xff] }
 0x50a   : > { %6832 = vmatpush3.msra.mxu1 %v967_v60  ;;  %6757 = vmatprep.mubr.f32.mxu1 %v5865_v40  ;;  %v13289_v40 = vld [vmem:[#allocation97_spill] sm:$0xff]  ;;  %v13338_v50 = vld [vmem:[#allocation192_spill] sm:$0xff] }
 0x50b   : > { %6833 = vmatprep.subr.mxu1 %v966_v21  ;;  %6891 = vmatprep.subr.mxu0 %v1209_v6  ;;  %v1691_v42 = vpop.permute.xlu1 %1690  ;;  %v1712_v60 = vsel %vm13059_vm13, %v13289_v40, %v13288_v0  ;;  %v5881_v40 = vld [vmem:[%s13038_s2 + $0x100] sm:$0xff] }
 0x50c   : > { %6758 = vmatmul.mubr.f32.gmra.mxu1 %v5866_v22  ;;  %6892 = vmatpush3.msra.mxu0 %v1209_v6  ;;  %v1713_v27 = vsel %vm13059_vm13, %v1691_v42, %v1693_v5  ;;  %v5873_v22 = vld [vmem:[%s13038_s2 + $0xc0] sm:$0xff]  ;;  %v13292_v6 = vld [vmem:[#allocation128_spill] sm:$0xff]  ;;  %v13296_v5 = vld [vmem:[#allocation165_spill] sm:$0xff] }
 0x50d   : > { %6834 = vmatpush3.msra.mxu1 %v966_v21  ;;  %6893 = vmatprep.subr.mxu0 %v1208_v18  ;;  %v13290_v21 = vld [vmem:[#allocation30_spill] sm:$0xff]  ;;  %v1711_v29 = vsel %vm13059_vm13, %v13293_v41, %v13292_v6  ;;  %v13307_v42 = vld [vmem:[#allocation169_spill] sm:$0xff]  ;;  %v5882_v41 = vld [vmem:[%s13038_s2 + $0x108] sm:$0xff] }
 0x50e   : > { %6835 = vmatprep.subr.mxu1 %v965_v39  ;;  %6894 = vmatpush3.msra.mxu0 %v1208_v18  ;;  %v958_v13 = vsel %vm957_vm12, %v13291_v61, %v13290_v21  ;;  %v5874_v18 = vld [vmem:[%s13038_s2 + $0xc8] sm:$0xff]  ;;  %v13316_v61 = vld [vmem:[#allocation125_spill] sm:$0xff] }
 0x50f   : > { %6836 = vmatpush3.msra.mxu1 %v965_v39  ;;  %6760 = vmatprep.mubr.f32.mxu1 %v5867_v56  ;;  %v9564_v56 = vpop.permute.xlu0 %1939  ;;  %v1467_v39 = vsel %vm13060_vm14, %v13295_v44, %v13294_v14  ;;  %v13318_v44 = vld [vmem:[#allocation161_spill] sm:$0xff] }
 0x510   : > { %6837 = vmatprep.subr.mxu1 %v964_v31  ;;  %6895 = vmatprep.subr.mxu0 %v1207_v15 }
 0x511   : > { %6761 = vmatmul.mubr.f32.gmra.mxu1 %v5868_v8  ;;  %6896 = vmatpush3.msra.mxu0 %v1207_v15  ;;  %v13297_v8 = vld [vmem:[#allocation175_spill] sm:$0xff]  ;;  %v1709_v15 = vsel %vm13059_vm13, %v9503_v37, %v9469_v1  ;;  %v13298_v1 = vld [vmem:[#allocation84_spill] sm:$0xff] }
 0x512   : > { %6838 = vmatpush3.msra.mxu1 %v964_v31  ;;  %6897 = vmatprep.subr.mxu0 %v1206_v7  ;;  %v1710_v31 = vsel %vm13059_vm13, %v13297_v8, %v13296_v5  ;;  %v13299_v37 = vld [vmem:[#allocation91_spill] sm:$0xff]  ;;  %v13320_v8 = vld [vmem:[#allocation52_spill] sm:$0xff] }
 0x513   : > { %6839 = vmatprep.subr.mxu1 %v963_v47  ;;  %6898 = vmatpush3.msra.mxu0 %v1206_v7  ;;  %v9590_v30 = vpop.permute.xlu0 %2154  ;;  %v1465_v7 = vsel %vm13060_vm14, %v13299_v37, %v13298_v1  ;;  %v5884_v1 = vld [vmem:[%s13038_s2 + $0x118] sm:$0xff]  ;;  %v5895_v37 = vld [vmem:[%s13038_s2 + $0x170] sm:$0xff] }
 0x514   : > { %6840 = vmatpush3.msra.mxu1 %v963_v47  ;;  %6763 = vmatprep.mubr.f32.mxu1 %v5869_v25  ;;  %v13300_v25 = vld [vmem:[#allocation86_spill] sm:$0xff] }
 0x515   : > { %6841 = vmatprep.subr.mxu1 %v962_v24  ;;  %6899 = vmatprep.subr.mxu0 %v1205_v34  ;;  %v1708_v58 = vsel %vm13059_vm13, %v13301_v55, %v13300_v25  ;;  %v5877_v47 = vld [vmem:[%s13038_s2 + $0xe0] sm:$0xff]  ;;  %v13325_v25 = vld [vmem:[#allocation87_spill] sm:$0xff] }
 0x516   : > { %6764 = vmatmul.mubr.f32.gmra.mxu1 %v5870_v63  ;;  %6900 = vmatpush3.msra.mxu0 %v1205_v34  ;;  %v13302_v63 = vld [vmem:[#allocation124_spill] sm:$0xff]  ;;  %v5878_v34 = vld [vmem:[%s13038_s2 + $0xe8] sm:$0xff] }
 0x517   : > { %6842 = vmatpush3.msra.mxu1 %v962_v24  ;;  %6969 = vmatprep.subr.mxu0 %v1714_v9  ;;  %v1464_v45 = vsel %vm13060_vm14, %v13303_v20, %v13302_v63  ;;  %v13304_v24 = vld [vmem:[#allocation126_spill] sm:$0xff]  ;;  %v9616_v4 = vpop.permute.xlu0 %2433  ;;  %v9702_v20 = vpop.permute.xlu1 %1905 }
 0x518   : > { %6843 = vmatprep.subr.mxu1 %v961_v43  ;;  %6902 = vmatmul.mubr.f32.vlgmr.msra.gmra.mxu0 %v5886_v28  ;;  %v1707_v57 = vsel %vm13059_vm13, %v13305_v19, %v13304_v24  ;;  %v5889_v28 = vld [vmem:[%s13038_s2 + $0x140] sm:$0xff]  ;;  %v13329_v24 = vld [vmem:[#allocation127_spill] sm:$0xff] }
 0x519   : > { %6844 = vmatpush3.msra.mxu1 %v961_v43  ;;  %6970 = vmatpush3.msra.mxu0 %v1714_v9  ;;  %v13306_v9 = vld [vmem:[#allocation162_spill] sm:$0xff]  ;;  %v13309_v43 = vld [vmem:[#allocation173_spill] sm:$0xff] }
 0x51a   : > { %6766 = vmatprep.mubr.f32.mxu1 %v5871_v53  ;;  %6845 = vmatprep.subr.mxu1 %v960_v48  ;;  %v1463_v11 = vsel %vm13060_vm14, %v13307_v42, %v13306_v9  ;;  %v1706_v53 = vsel %vm13059_vm13, %v13309_v43, %v13308_v38  ;;  %v13332_v9 = vld [vmem:[#allocation50_spill] sm:$0xff]  ;;  %v13333_v42 = vld [vmem:[#allocation47_spill] sm:$0xff] }
 0x51b   : > { %6971 = vmatprep.subr.mxu0 %v1713_v27  ;;  %6767 = vmatmul.mubr.f32.gmra.mxu1 %v5872_v10  ;;  %v5879_v10 = vld [vmem:[%s13038_s2 + $0xf0] sm:$0xff]  ;;  %v9642_v59 = vpop.permute.xlu0 %2417  ;;  %v5910_v38 = vld [vmem:[%s13038_s2 + $0x1e8] sm:$0xff] }
 0x51c   : > { %6846 = vmatpush3.msra.mxu1 %v960_v48  ;;  %6972 = vmatpush3.msra.mxu0 %v1713_v27  ;;  %v5880_v48 = vld [vmem:[%s13038_s2 + $0xf8] sm:$0xff]  ;;  %v5891_v27 = vld [vmem:[%s13038_s2 + $0x150] sm:$0xff] }
 0x51d   : > { %6847 = vmatprep.subr.mxu1 %v959_v26  ;;  %6973 = vmatprep.subr.mxu0 %v1712_v60 }
 0x51e   : > { %6848 = vmatpush3.msra.mxu1 %v959_v26  ;;  %6974 = vmatpush3.msra.mxu0 %v1712_v60  ;;  %v13313_v26 = vld [vmem:[#allocation93_spill] sm:$0xff]  ;;  %v13314_v60 = vld [vmem:[#allocation122_spill] sm:$0xff] }
 0x51f   : > { %6849 = vmatprep.subr.mxu1 %v958_v13  ;;  %6975 = vmatprep.subr.mxu0 %v1711_v29  ;;  %v1704_v0 = vsel %vm13059_vm13, %v13313_v26, %v13312_v46  ;;  %v9668_v14 = vpop.permute.xlu0 %2401  ;;  %v13340_v46 = vld [vmem:[#allocation15_spill] sm:$0xff] }
 0x520   : > { %6850 = vmatpush3.msra.mxu1 %v958_v13  ;;  %6851 = vmatprep.mubr.f32.mxu1 %v5873_v22  ;;  %v13315_v22 = vld [vmem:[#allocation129_spill] sm:$0xff] }
 0x521   : > { %6976 = vmatpush3.msra.mxu0 %v1711_v29  ;;  %6852 = vmatmul.mubr.f32.vlgmr.msra.gmra.mxu1 %v5874_v18  ;;  %v1460_v21 = vsel %vm13060_vm14, %v13315_v22, %v13314_v60  ;;  %v13317_v13 = vld [vmem:[#allocation133_spill] sm:$0xff]  ;;  %v5893_v29 = vld [vmem:[%s13038_s2 + $0x160] sm:$0xff]  ;;  %v5894_v18 = vld [vmem:[%s13038_s2 + $0x168] sm:$0xff] }
 0x522   : > { %6919 = vmatprep.subr.mxu1 %v1467_v39  ;;  %6977 = vmatprep.subr.mxu0 %v1710_v31  ;;  %v1703_v6 = vsel %vm13059_vm13, %v13317_v13, %v13316_v61  ;;  %v13343_v22 = vld [vmem:[#allocation34_spill] sm:$0xff] }
 0x523   : > { %6920 = vmatpush3.msra.mxu1 %v1467_v39  ;;  %6978 = vmatpush3.msra.mxu0 %v1710_v31  ;;  %v13319_v39 = vld [vmem:[#allocation167_spill] sm:$0xff]  ;;  %v13321_v31 = vld [vmem:[#allocation49_spill] sm:$0xff]  ;;  %v5897_v13 = vld [vmem:[%s13038_s2 + $0x180] sm:$0xff] }
 0x524   : > { %6921 = vmatprep.subr.mxu1 %v1466_v51  ;;  %6979 = vmatprep.subr.mxu0 %v1709_v15  ;;  %v1459_v5 = vsel %vm13060_vm14, %v13319_v39, %v13318_v44  ;;  %v13347_v39 = vld [vmem:[#allocation172_spill] sm:$0xff] }
 0x525   : > { %6854 = vmatprep.mubr.f32.mxu1 %v5875_v32  ;;  %6922 = vmatpush3.msra.mxu1 %v1466_v51  ;;  %v1702_v32 = vsel %vm13059_vm13, %v13321_v31, %v13320_v8  ;;  %v5883_v51 = vld [vmem:[%s13038_s2 + $0x110] sm:$0xff]  ;;  %v13349_v31 = vld [vmem:[#allocation154_spill] sm:$0xff] }
 0x526   : > { %6980 = vmatpush3.msra.mxu0 %v1709_v15  ;;  %6855 = vmatmul.mubr.f32.gmra.mxu1 %v5876_v52  ;;  %v1458_v15 = vsel %vm13060_vm14, %v9413_v12, %v9384_v3  ;;  %v13322_v52 = vld [vmem:[#allocation68_spill] sm:$0xff]  ;;  %v5896_v3 = vld [vmem:[%s13038_s2 + $0x178] sm:$0xff]  ;;  %v9694_v12 = vpop.permute.xlu0 %2168 }
 0x527   : > { %6904 = vmatprep.mubr.f32.mxu0 %v5887_v49  ;;  %6923 = vmatprep.subr.mxu1 %v1465_v7  ;;  %v13323_v49 = vld [vmem:[#allocation65_spill] sm:$0xff] }
 0x528   : > { %6981 = vmatprep.subr.mxu0 %v1708_v58  ;;  %6905 = vmatmul.mubr.f32.gmra.mxu0 %v5888_v35  ;;  %v1701_v35 = vsel %vm13059_vm13, %v13323_v49, %v13322_v52  ;;  %v13351_v49 = vld [vmem:[#allocation191_spill] sm:$0xff] }
 0x529   : > { %6924 = vmatpush3.msra.mxu1 %v1465_v7  ;;  %6982 = vmatpush3.msra.mxu0 %v1708_v58  ;;  %v13324_v7 = vld [vmem:[#allocation82_spill] sm:$0xff]  ;;  %v13326_v58 = vld [vmem:[#allocation20_spill] sm:$0xff] }
 0x52a   : > { %6925 = vmatprep.subr.mxu1 %v1464_v45  ;;  %6983 = vmatprep.subr.mxu0 %v1707_v57  ;;  %v1457_v55 = vsel %vm13060_vm14, %v13325_v25, %v13324_v7  ;;  %v2185_v43 = vpop.permute.xlu0 %2184  ;;  %v13354_v25 = vld [vmem:[#allocation75_spill] sm:$0xff] }
 0x52b   : > { %6857 = vmatprep.mubr.f32.mxu1 %v5877_v47  ;;  %6926 = vmatpush3.msra.mxu1 %v1464_v45  ;;  %v13327_v47 = vld [vmem:[#allocation17_spill] sm:$0xff]  ;;  %v2207_v2 = vsel %vm13061_vm15, %v2185_v43, %v13338_v50 }
 0x52c   : > { %6984 = vmatpush3.msra.mxu0 %v1707_v57  ;;  %6858 = vmatmul.mubr.f32.gmra.mxu1 %v5878_v34  ;;  %v1700_v63 = vsel %vm13059_vm13, %v13327_v47, %v13326_v58  ;;  %v13328_v45 = vld [vmem:[#allocation121_spill] sm:$0xff]  ;;  %v13330_v57 = vld [vmem:[#allocation36_spill] sm:$0xff]  ;;  %v5901_v47 = vld [vmem:[%s13038_s2 + $0x1a0] sm:$0xff] }
 0x52d   : > { %6907 = vmatprep.mubr.f32.mxu0 %v5889_v28  ;;  %6927 = vmatprep.subr.mxu1 %v1463_v11  ;;  %v1456_v19 = vsel %vm13060_vm14, %v13329_v24, %v13328_v45  ;;  %v13331_v34 = vld [vmem:[#allocation33_spill] sm:$0xff]  ;;  %v13357_v45 = vld [vmem:[#allocation143_spill] sm:$0xff] }
 0x52e   : > { %6985 = vmatprep.subr.mxu0 %v1706_v53  ;;  %6908 = vmatmul.mubr.f32.gmra.mxu0 %v5890_v62  ;;  %v1699_v28 = vsel %vm13059_vm13, %v13331_v34, %v13330_v57  ;;  %v5909_v62 = vld [vmem:[%s13038_s2 + $0x1e0] sm:$0xff]  ;;  %vm1945_vm13 = vcmask 850944   ;;  %v13359_v57 = vld [vmem:[#allocation144_spill] sm:$0xff]  ;;  %v5904_v50 = vld [vmem:[%s13038_s2 + $0x1b8] sm:$0xff] }
 0x52f   : > { %6928 = vmatpush3.msra.mxu1 %v1463_v11  ;;  %6986 = vmatpush3.msra.mxu0 %v1706_v53  ;;  %v1455_v11 = vsel %vm13060_vm14, %v13333_v42, %v13332_v9  ;;  %v13334_v53 = vld [vmem:[#allocation155_spill] sm:$0xff] }
 0x530   : > { %6929 = vmatprep.subr.mxu1 %v1462_v23  ;;  %6987 = vmatprep.subr.mxu0 %v1705_v54  ;;  %v5914_v9 = vld [vmem:[%s13038_s2 + $0x208] sm:$0xff] }
 0x531   : > { %6860 = vmatprep.mubr.f32.mxu1 %v5879_v10  ;;  %6930 = vmatpush3.msra.mxu1 %v1462_v23  ;;  %v13335_v10 = vld [vmem:[#allocation184_spill] sm:$0xff] }
 0x532   : > { %6988 = vmatpush3.msra.mxu0 %v1705_v54  ;;  %6861 = vmatmul.mubr.f32.gmra.mxu1 %v5880_v48  ;;  %v2208_v23 = vsel %vm13061_vm15, %v13335_v10, %v13334_v53  ;;  %v13336_v54 = vld [vmem:[#allocation66_spill] sm:$0xff]  ;;  %v13337_v48 = vld [vmem:[#allocation63_spill] sm:$0xff]  ;;  %v13362_v53 = vld [vmem:[#allocation153_spill] sm:$0xff] }
 0x533   : > { %6910 = vmatprep.mubr.f32.mxu0 %v5891_v27  ;;  %6931 = vmatprep.subr.mxu1 %v1461_v17  ;;  %v1454_v27 = vsel %vm13060_vm14, %v13337_v48, %v13336_v54  ;;  %v13363_v10 = vld [vmem:[#allocation180_spill] sm:$0xff] }
 0x534   : > { %6989 = vmatprep.subr.mxu0 %v1704_v0  ;;  %6911 = vmatmul.mubr.f32.gmra.mxu0 %v5892_v16  ;;  %v9725_v16 = vpop.permute.xlu1 %1921  ;;  %v5903_v54 = vld [vmem:[%s13038_s2 + $0x1b0] sm:$0xff] }
 0x535   : > { %6932 = vmatpush3.msra.mxu1 %v1461_v17  ;;  %6990 = vmatpush3.msra.mxu0 %v1704_v0  ;;  %v13339_v17 = vld [vmem:[#allocation18_spill] sm:$0xff]  ;;  %v13341_v0 = vld [vmem:[#allocation76_spill] sm:$0xff]  ;;  %v1956_v48 = vsel %vm1945_vm13, %v9725_v16, %v9543_v33 }
 0x536   : > { %6933 = vmatprep.subr.mxu1 %v1460_v21  ;;  %6991 = vmatprep.subr.mxu0 %v1703_v6  ;;  %v1453_v26 = vsel %vm13060_vm14, %v13340_v46, %v13339_v17  ;;  %v5916_v17 = vld [vmem:[%s13038_s2 + $0x218] sm:$0xff]  ;;  %v13364_v33 = vld [vmem:[#allocation92_spill] sm:$0xff] }
 0x537   : > { %6863 = vmatprep.mubr.f32.mxu1 %v5881_v40  ;;  %6934 = vmatpush3.msra.mxu1 %v1460_v21  ;;  %v13342_v40 = vld [vmem:[#allocation106_spill] sm:$0xff]  ;;  %v13344_v21 = vld [vmem:[#allocation31_spill] sm:$0xff]  ;;  %v13366_v46 = vld [vmem:[#allocation96_spill] sm:$0xff] }
 0x538   : > { %6992 = vmatpush3.msra.mxu0 %v1703_v6  ;;  %6864 = vmatmul.mubr.f32.gmra.mxu1 %v5882_v41  ;;  %v2206_v60 = vsel %vm13061_vm15, %v13342_v40, %v13341_v0  ;;  %v1452_v61 = vsel %vm13060_vm14, %v13344_v21, %v13343_v22  ;;  %v5898_v6 = vld [vmem:[%s13038_s2 + $0x188] sm:$0xff]  ;;  %v13345_v41 = vld [vmem:[#allocation114_spill] sm:$0xff]  ;;  %v1938_v44 = vpop.permute.xlu1 %1937  ;;  %v13369_v22 = vld [vmem:[#allocation141_spill] sm:$0xff]  ;;  %vm2686_vm14 = vcmask 752640  }
 0x539   : > { %6913 = vmatprep.mubr.f32.mxu0 %v5893_v29  ;;  %6935 = vmatprep.subr.mxu1 %v1459_v5  ;;  %v13346_v29 = vld [vmem:[#allocation146_spill] sm:$0xff]  ;;  %v1960_v52 = vsel %vm1945_vm13, %v1938_v44, %v9564_v56  ;;  %v5912_v56 = vld [vmem:[%s13038_s2 + $0x1f8] sm:$0xff]  ;;  %v9841_v44 = vpop.permute.xlu0 %2646 }
 0x53a   : > { %6993 = vmatprep.subr.mxu0 %v1702_v32  ;;  %6914 = vmatmul.mubr.f32.gmra.mxu0 %v5894_v18  ;;  %v2205_v18 = vsel %vm13061_vm15, %v13346_v29, %v13345_v41  ;;  %v5905_v40 = vld [vmem:[%s13038_s2 + $0x1c0] sm:$0xff]  ;;  %v5906_v41 = vld [vmem:[%s13038_s2 + $0x1c8] sm:$0xff] }
 0x53b   : > { %6936 = vmatpush3.msra.mxu1 %v1459_v5  ;;  %6994 = vmatpush3.msra.mxu0 %v1702_v32  ;;  %v13348_v5 = vld [vmem:[#allocation183_spill] sm:$0xff]  ;;  %v13350_v32 = vld [vmem:[#allocation182_spill] sm:$0xff] }
 0x53c   : > { %6937 = vmatprep.subr.mxu1 %v1458_v15  ;;  %6995 = vmatprep.subr.mxu0 %v1701_v35  ;;  %v1961_v8 = vsel %vm1945_vm13, %v13348_v5, %v13347_v39  ;;  %v2153_v42 = vpop.permute.xlu1 %2152  ;;  %v5917_v29 = vld [vmem:[%s13038_s2 + $0x220] sm:$0xff]  ;;  %v13372_v39 = vld [vmem:[#allocation168_spill] sm:$0xff]  ;;  %v13373_v5 = vld [vmem:[#allocation179_spill] sm:$0xff] }
 0x53d   : > { %6866 = vmatprep.mubr.f32.mxu1 %v5883_v51  ;;  %6938 = vmatpush3.msra.mxu1 %v1458_v15  ;;  %v2204_v51 = vsel %vm13061_vm15, %v13350_v32, %v13349_v31  ;;  %v5899_v15 = vld [vmem:[%s13038_s2 + $0x190] sm:$0xff]  ;;  %v13375_v32 = vld [vmem:[#allocation53_spill] sm:$0xff] }
 0x53e   : > { %6996 = vmatpush3.msra.mxu0 %v1701_v35  ;;  %6867 = vmatmul.mubr.f32.gmra.mxu1 %v5884_v1  ;;  %v2203_v35 = vsel %vm13061_vm15, %v9694_v12, %v13351_v49  ;;  %v5900_v1 = vld [vmem:[%s13038_s2 + $0x198] sm:$0xff]  ;;  %v13353_v12 = vld [vmem:[#allocation103_spill] sm:$0xff]  ;;  %v13374_v31 = vld [vmem:[#allocation56_spill] sm:$0xff] }
 0x53f   : > { %6916 = vmatprep.mubr.f32.mxu0 %v5895_v37  ;;  %6939 = vmatprep.subr.mxu1 %v1457_v55  ;;  %v5911_v37 = vld [vmem:[%s13038_s2 + $0x1f0] sm:$0xff] }
 0x540   : > { %6997 = vmatprep.subr.mxu0 %v1700_v63  ;;  %6917 = vmatmul.mubr.f32.gmra.mxu0 %v5896_v3  ;;  %v13352_v3 = vld [vmem:[#allocation94_spill] sm:$0xff]  ;;  %v13376_v49 = vld [vmem:[#allocation72_spill] sm:$0xff] }
 0x541   : > { %6940 = vmatpush3.msra.mxu1 %v1457_v55  ;;  %6998 = vmatpush3.msra.mxu0 %v1700_v63  ;;  %v1959_v7 = vsel %vm1945_vm13, %v13353_v12, %v13352_v3  ;;  %v13355_v55 = vld [vmem:[#allocation104_spill] sm:$0xff]  ;;  %v13356_v63 = vld [vmem:[#allocation134_spill] sm:$0xff]  ;;  %v13379_v12 = vld [vmem:[#allocation99_spill] sm:$0xff] }
 0x542   : > { %6941 = vmatprep.subr.mxu1 %v1456_v19  ;;  %6999 = vmatprep.subr.mxu0 %v1699_v28  ;;  %v2202_v58 = vsel %vm13061_vm15, %v13355_v55, %v13354_v25  ;;  %v1958_v24 = vsel %vm1945_vm13, %v13357_v45, %v13356_v63  ;;  %v13378_v3 = vld [vmem:[#allocation90_spill] sm:$0xff]  ;;  %v13380_v25 = vld [vmem:[#allocation24_spill] sm:$0xff]  ;;  %v13381_v55 = vld [vmem:[#allocation21_spill] sm:$0xff] }
 0x543   : > { %6942 = vmatpush3.msra.mxu1 %v1456_v19  ;;  %7000 = vmatpush3.msra.mxu0 %v1699_v28  ;;  %v13358_v19 = vld [vmem:[#allocation113_spill] sm:$0xff]  ;;  %v5902_v28 = vld [vmem:[%s13038_s2 + $0x1a8] sm:$0xff] }
 0x544   : > { %6943 = vmatprep.subr.mxu1 %v1455_v11  ;;  %7001 = vmatprep.mubr.f32.mxu0 %v5909_v62  ;;  %v2201_v34 = vsel %vm13061_vm15, %v13359_v57, %v13358_v19  ;;  %v5913_v62 = vld [vmem:[%s13038_s2 + $0x200] sm:$0xff]  ;;  %v13383_v63 = vld [vmem:[#allocation139_spill] sm:$0xff]  ;;  %v13385_v19 = vld [vmem:[#allocation37_spill] sm:$0xff] }
 0x545   : > { %7069 = vmatprep.subr.mxu0 %v2208_v23  ;;  %6944 = vmatpush3.msra.mxu1 %v1455_v11  ;;  %v13360_v11 = vld [vmem:[#allocation170_spill] sm:$0xff] }
 0x546   : > { %7002 = vmatmul.mubr.f32.vlgmr.msra.gmra.mxu0 %v5910_v38  ;;  %6945 = vmatprep.subr.mxu1 %v1454_v27  ;;  %v13361_v38 = vld [vmem:[#allocation181_spill] sm:$0xff] }
 0x547   : > { %7070 = vmatpush3.msra.mxu0 %v2208_v23  ;;  %6946 = vmatpush3.msra.mxu1 %v1454_v27  ;;  %v1957_v43 = vsel %vm1945_vm13, %v13361_v38, %v13360_v11  ;;  %v2200_v23 = vsel %vm13061_vm15, %v13363_v10, %v13362_v53  ;;  %v2199_v27 = vsel %vm13061_vm15, %v2153_v42, %v9590_v30  ;;  %v13365_v30 = vld [vmem:[#allocation101_spill] sm:$0xff]  ;;  %v5934_v42 = vld [vmem:[%s13038_s2 + $0x2a8] sm:$0xff]  ;;  %v13390_v10 = vld [vmem:[#allocation70_spill] sm:$0xff] }
 0x548   : > { %7071 = vmatprep.subr.mxu0 %v2207_v2  ;;  %6947 = vmatprep.subr.mxu1 %v1453_v26  ;;  %v1955_v16 = vsel %vm1945_vm13, %v13365_v30, %v13364_v33  ;;  %v13388_v38 = vld [vmem:[#allocation159_spill] sm:$0xff]  ;;  %v13395_v33 = vld [vmem:[#allocation80_spill] sm:$0xff] }
 0x549   : > { %7072 = vmatpush3.msra.mxu0 %v2207_v2  ;;  %6948 = vmatpush3.msra.mxu1 %v1453_v26  ;;  %v5915_v2 = vld [vmem:[%s13038_s2 + $0x210] sm:$0xff]  ;;  %v13367_v26 = vld [vmem:[#allocation105_spill] sm:$0xff] }
 0x54a   : > { %7073 = vmatprep.subr.mxu0 %v2206_v60  ;;  %6949 = vmatprep.subr.mxu1 %v1452_v61  ;;  %v2198_v0 = vsel %vm13061_vm15, %v13367_v26, %v13366_v46  ;;  %v13396_v30 = vld [vmem:[#allocation112_spill] sm:$0xff]  ;;  %v13397_v46 = vld [vmem:[#allocation38_spill] sm:$0xff]  ;;  %v13398_v26 = vld [vmem:[#allocation35_spill] sm:$0xff] }
 0x54b   : > { %7074 = vmatpush3.msra.mxu0 %v2206_v60  ;;  %6950 = vmatpush3.msra.mxu1 %v1452_v61  ;;  %v13368_v60 = vld [vmem:[#allocation132_spill] sm:$0xff] }
 0x54c   : > { %7075 = vmatprep.subr.mxu0 %v2205_v18  ;;  %6951 = vmatprep.mubr.f32.mxu1 %v5897_v13  ;;  %v1954_v21 = vsel %vm1945_vm13, %v13369_v22, %v13368_v60  ;;  %v13370_v61 = vld [vmem:[#allocation136_spill] sm:$0xff]  ;;  %v13371_v13 = vld [vmem:[#allocation145_spill] sm:$0xff]  ;;  %v5922_v60 = vld [vmem:[%s13038_s2 + $0x248] sm:$0xff] }
 0x54d   : > { %7076 = vmatpush3.msra.mxu0 %v2205_v18  ;;  %6952 = vmatmul.mubr.f32.vlgmr.msra.gmra.mxu1 %v5898_v6  ;;  %v2197_v6 = vsel %vm13061_vm15, %v13371_v13, %v13370_v61  ;;  %v5918_v18 = vld [vmem:[%s13038_s2 + $0x228] sm:$0xff]  ;;  %v13399_v22 = vld [vmem:[#allocation118_spill] sm:$0xff]  ;;  %v2432_v13 = vpop.permute.xlu1 %2431 }
 0x54e   : > { %7019 = vmatprep.subr.mxu1 %v1961_v8  ;;  %7077 = vmatprep.subr.mxu0 %v2204_v51 }
 0x54f   : > { %7020 = vmatpush3.msra.mxu1 %v1961_v8  ;;  %7078 = vmatpush3.msra.mxu0 %v2204_v51  ;;  %v1953_v8 = vsel %vm1945_vm13, %v13373_v5, %v13372_v39  ;;  %v2196_v51 = vsel %vm13061_vm15, %v13375_v32, %v13374_v31  ;;  %v13404_v39 = vld [vmem:[#allocation188_spill] sm:$0xff]  ;;  %v13405_v32 = vld [vmem:[#allocation194_spill] sm:$0xff] }
 0x550   : > { %7021 = vmatprep.subr.mxu1 %v1960_v52  ;;  %7079 = vmatprep.subr.mxu0 %v2203_v35 }
 0x551   : > { %6954 = vmatprep.mubr.f32.mxu1 %v5899_v15  ;;  %7022 = vmatpush3.msra.mxu1 %v1960_v52  ;;  %v5907_v15 = vld [vmem:[%s13038_s2 + $0x1d0] sm:$0xff]  ;;  %v1952_v52 = vsel %vm1945_vm13, %v9702_v20, %v9517_v36  ;;  %v5920_v36 = vld [vmem:[%s13038_s2 + $0x238] sm:$0xff]  ;;  %v2663_v20 = vpop.permute.xlu0 %2662 }
 0x552   : > { %7080 = vmatpush3.msra.mxu0 %v2203_v35  ;;  %6955 = vmatmul.mubr.f32.gmra.mxu1 %v5900_v1  ;;  %v13377_v35 = vld [vmem:[#allocation69_spill] sm:$0xff] }
 0x553   : > { %7004 = vmatprep.mubr.f32.mxu0 %v5911_v37  ;;  %7023 = vmatprep.subr.mxu1 %v1959_v7  ;;  %v2195_v1 = vsel %vm13061_vm15, %v13377_v35, %v13376_v49  ;;  %v5908_v37 = vld [vmem:[%s13038_s2 + $0x1d8] sm:$0xff]  ;;  %v13406_v49 = vld [vmem:[#allocation98_spill] sm:$0xff]  ;;  %v13407_v35 = vld [vmem:[#allocation107_spill] sm:$0xff] }
 0x554   : > { %7081 = vmatprep.subr.mxu0 %v2202_v58  ;;  %7005 = vmatmul.mubr.f32.gmra.mxu0 %v5912_v56  ;;  %v5919_v56 = vld [vmem:[%s13038_s2 + $0x230] sm:$0xff] }
 0x555   : > { %7024 = vmatpush3.msra.mxu1 %v1959_v7  ;;  %7082 = vmatpush3.msra.mxu0 %v2202_v58  ;;  %v1951_v7 = vsel %vm1945_vm13, %v13379_v12, %v13378_v3  ;;  %v2194_v58 = vsel %vm13061_vm15, %v13381_v55, %v13380_v25  ;;  %v2679_v11 = vpop.permute.xlu0 %2678  ;;  %v13411_v3 = vld [vmem:[#allocation147_spill] sm:$0xff]  ;;  %v13412_v25 = vld [vmem:[#allocation116_spill] sm:$0xff]  ;;  %v13413_v55 = vld [vmem:[#allocation150_spill] sm:$0xff] }
 0x556   : > { %7025 = vmatprep.subr.mxu1 %v1958_v24  ;;  %7083 = vmatprep.subr.mxu0 %v2201_v34 }
 0x557   : > { %6957 = vmatprep.mubr.f32.mxu1 %v5901_v47  ;;  %7026 = vmatpush3.msra.mxu1 %v1958_v24  ;;  %v13382_v47 = vld [vmem:[#allocation130_spill] sm:$0xff]  ;;  %v13384_v24 = vld [vmem:[#allocation40_spill] sm:$0xff] }
 0x558   : > { %7084 = vmatpush3.msra.mxu0 %v2201_v34  ;;  %6958 = vmatmul.mubr.f32.gmra.mxu1 %v5902_v28  ;;  %v1950_v45 = vsel %vm1945_vm13, %v13383_v63, %v13382_v47  ;;  %v2193_v57 = vsel %vm13061_vm15, %v13385_v19, %v13384_v24  ;;  %v5933_v34 = vld [vmem:[%s13038_s2 + $0x2a0] sm:$0xff]  ;;  %vm2439_vm15 = vcmask 785408   ;;  %v5926_v47 = vld [vmem:[%s13038_s2 + $0x268] sm:$0xff]  ;;  %v2416_v63 = vpop.permute.xlu1 %2415  ;;  %v13414_v24 = vld [vmem:[#allocation176_spill] sm:$0xff] }
 0x559   : > { %7007 = vmatprep.mubr.f32.mxu0 %v5913_v62  ;;  %7027 = vmatprep.subr.mxu1 %v1957_v43  ;;  %v13386_v28 = vld [vmem:[#allocation54_spill] sm:$0xff]  ;;  %v13387_v62 = vld [vmem:[#allocation51_spill] sm:$0xff]  ;;  %v2454_v31 = vsel %vm2439_vm15, %v2432_v13, %v9616_v4  ;;  %v2453_v4 = vsel %vm2439_vm15, %v13407_v35, %v13406_v49  ;;  %v13429_v13 = vld [vmem:[#allocation57_spill] sm:$0xff] }
 0x55a   : > { %7085 = vmatprep.subr.mxu0 %v2200_v23  ;;  %7008 = vmatmul.mubr.f32.gmra.mxu0 %v5914_v9  ;;  %v1949_v9 = vsel %vm1945_vm13, %v13387_v62, %v13386_v28  ;;  %v13415_v19 = vld [vmem:[#allocation187_spill] sm:$0xff]  ;;  %v13417_v28 = vld [vmem:[#allocation186_spill] sm:$0xff] }
 0x55b   : > { %7028 = vmatpush3.msra.mxu1 %v1957_v43  ;;  %7086 = vmatpush3.msra.mxu0 %v2200_v23  ;;  %v13389_v43 = vld [vmem:[#allocation190_spill] sm:$0xff]  ;;  %v13391_v23 = vld [vmem:[#allocation67_spill] sm:$0xff] }
 0x55c   : > { %7029 = vmatprep.subr.mxu1 %v1956_v48  ;;  %7087 = vmatprep.subr.mxu0 %v2199_v27  ;;  %v2702_v53 = vsel %vm2686_vm14, %v13389_v43, %v13388_v38  ;;  %v13418_v38 = vld [vmem:[#allocation193_spill] sm:$0xff]  ;;  %v13435_v49 = vld [vmem:[#allocation102_spill] sm:$0xff]  ;;  %v13436_v35 = vld [vmem:[#allocation111_spill] sm:$0xff] }
 0x55d   : > { %6960 = vmatprep.mubr.f32.mxu1 %v5903_v54  ;;  %7030 = vmatpush3.msra.mxu1 %v1956_v48  ;;  %v1948_v54 = vsel %vm1945_vm13, %v13391_v23, %v13390_v10  ;;  %v13392_v48 = vld [vmem:[#allocation195_spill] sm:$0xff]  ;;  %v2693_v43 = vsel %vm2686_vm14, %v9841_v44, %v13418_v38  ;;  %v13419_v10 = vld [vmem:[#allocation100_spill] sm:$0xff]  ;;  %v13420_v23 = vld [vmem:[#allocation109_spill] sm:$0xff] }
 0x55e   : > { %7088 = vmatpush3.msra.mxu0 %v2199_v27  ;;  %6961 = vmatmul.mubr.f32.gmra.mxu1 %v5904_v50  ;;  %v2701_v27 = vsel %vm2686_vm14, %v2679_v11, %v13392_v48  ;;  %v13393_v50 = vld [vmem:[#allocation22_spill] sm:$0xff]  ;;  %v5927_v11 = vld [vmem:[%s13038_s2 + $0x270] sm:$0xff]  ;;  %v13421_v48 = vld [vmem:[#allocation77_spill] sm:$0xff] }
 0x55f   : > { %7010 = vmatprep.mubr.f32.mxu0 %v5915_v2  ;;  %7031 = vmatprep.subr.mxu1 %v1955_v16  ;;  %v13394_v2 = vld [vmem:[#allocation19_spill] sm:$0xff]  ;;  %v13422_v44 = vld [vmem:[#allocation108_spill] sm:$0xff]  ;;  %v13448_v38 = vld [vmem:[#allocation74_spill] sm:$0xff] }
 0x560   : > { %7089 = vmatprep.subr.mxu0 %v2198_v0  ;;  %7011 = vmatmul.mubr.f32.gmra.mxu0 %v5916_v17  ;;  %v1947_v17 = vsel %vm1945_vm13, %v13394_v2, %v13393_v50  ;;  %v5940_v50 = vld [vmem:[%s13038_s2 + $0x2d8] sm:$0xff]  ;;  %v13423_v2 = vld [vmem:[#allocation140_spill] sm:$0xff] }
 0x561   : > { %7032 = vmatpush3.msra.mxu1 %v1955_v16  ;;  %7090 = vmatpush3.msra.mxu0 %v2198_v0  ;;  %v2700_v16 = vsel %vm2686_vm14, %v13396_v30, %v13395_v33  ;;  %v1946_v0 = vsel %vm1945_vm13, %v13398_v26, %v13397_v46  ;;  %v5929_v30 = vld [vmem:[%s13038_s2 + $0x280] sm:$0xff]  ;;  %v13426_v46 = vld [vmem:[#allocation148_spill] sm:$0xff] }
 0x562   : > { %7033 = vmatprep.subr.mxu1 %v1954_v21  ;;  %7091 = vmatprep.subr.mxu0 %v2197_v6 }
 0x563   : > { %6963 = vmatprep.mubr.f32.mxu1 %v5905_v40  ;;  %7034 = vmatpush3.msra.mxu1 %v1954_v21  ;;  %v5921_v40 = vld [vmem:[%s13038_s2 + $0x240] sm:$0xff]  ;;  %v13400_v21 = vld [vmem:[#allocation152_spill] sm:$0xff] }
 0x564   : > { %7092 = vmatpush3.msra.mxu0 %v2197_v6  ;;  %6964 = vmatmul.mubr.f32.gmra.mxu1 %v5906_v41  ;;  %v2699_v61 = vsel %vm2686_vm14, %v13400_v21, %v13399_v22  ;;  %v13401_v6 = vld [vmem:[#allocation174_spill] sm:$0xff]  ;;  %v13402_v41 = vld [vmem:[#allocation185_spill] sm:$0xff] }
 0x565   : > { %7013 = vmatprep.mubr.f32.mxu0 %v5917_v29  ;;  %7035 = vmatprep.subr.mxu1 %v1953_v8  ;;  %v2455_v29 = vsel %vm2439_vm15, %v13402_v41, %v13401_v6  ;;  %v13427_v22 = vld [vmem:[#allocation178_spill] sm:$0xff]  ;;  %v13428_v21 = vld [vmem:[#allocation189_spill] sm:$0xff]  ;;  %v13430_v6 = vld [vmem:[#allocation43_spill] sm:$0xff] }
 0x566   : > { %7093 = vmatprep.subr.mxu0 %v2196_v51  ;;  %7014 = vmatmul.mubr.f32.gmra.mxu0 %v5918_v18  ;;  %v13403_v18 = vld [vmem:[#allocation158_spill] sm:$0xff]  ;;  %v2690_v41 = vsel %vm2686_vm14, %v13430_v6, %v13429_v13  ;;  %v5966_v13 = vld [vmem:[%s13038_s2 + $0x3a8] sm:$0xff]  ;;  %v5967_v6 = vld [vmem:[%s13038_s2 + $0x3b0] sm:$0xff] }
 0x567   : > { %7036 = vmatpush3.msra.mxu1 %v1953_v8  ;;  %7094 = vmatpush3.msra.mxu0 %v2196_v51  ;;  %v2698_v5 = vsel %vm2686_vm14, %v13404_v39, %v13403_v18  ;;  %v5923_v8 = vld [vmem:[%s13038_s2 + $0x250] sm:$0xff]  ;;  %v2697_v51 = vsel %vm2686_vm14, %v2663_v20, %v13405_v32  ;;  %v13410_v20 = vld [vmem:[#allocation138_spill] sm:$0xff]  ;;  %v5932_v32 = vld [vmem:[%s13038_s2 + $0x298] sm:$0xff] }
 0x568   : > { %7037 = vmatprep.subr.mxu1 %v1952_v52  ;;  %7095 = vmatprep.subr.mxu0 %v2195_v1  ;;  %v2452_v12 = vsel %vm2439_vm15, %v13411_v3, %v13410_v20  ;;  %v5931_v39 = vld [vmem:[%s13038_s2 + $0x290] sm:$0xff]  ;;  %v13439_v20 = vld [vmem:[#allocation9_spill] sm:$0xff]  ;;  %v13440_v3 = vld [vmem:[#allocation10_spill] sm:$0xff] }
 0x569   : > { %6966 = vmatprep.mubr.f32.mxu1 %v5907_v15  ;;  %7038 = vmatpush3.msra.mxu1 %v1952_v52  ;;  %v5924_v15 = vld [vmem:[%s13038_s2 + $0x258] sm:$0xff]  ;;  %v5935_v52 = vld [vmem:[%s13038_s2 + $0x2b0] sm:$0xff] }
 0x56a   : > { %7096 = vmatpush3.msra.mxu0 %v2195_v1  ;;  %6967 = vmatmul.mubr.f32.gmra.mxu1 %v5908_v37  ;;  %v13408_v1 = vld [vmem:[#allocation78_spill] sm:$0xff] }
 0x56b   : > { %7016 = vmatprep.mubr.f32.mxu0 %v5919_v56  ;;  %7039 = vmatprep.subr.mxu1 %v1951_v7  ;;  %v13409_v37 = vld [vmem:[#allocation110_spill] sm:$0xff] }
 0x56c   : > { %7097 = vmatprep.subr.mxu0 %v2194_v58  ;;  %7017 = vmatmul.mubr.f32.gmra.mxu0 %v5920_v36  ;;  %v2696_v56 = vsel %vm2686_vm14, %v13409_v37, %v13408_v1  ;;  %v5936_v36 = vld [vmem:[%s13038_s2 + $0x2b8] sm:$0xff]  ;;  %v13438_v37 = vld [vmem:[#allocation11_spill] sm:$0xff] }
 0x56d   : > { %7040 = vmatpush3.msra.mxu1 %v1951_v7  ;;  %7098 = vmatpush3.msra.mxu0 %v2194_v58  ;;  %v5925_v7 = vld [vmem:[%s13038_s2 + $0x260] sm:$0xff]  ;;  %v2695_v58 = vsel %vm2686_vm14, %v13413_v55, %v13412_v25  ;;  %v13437_v1 = vld [vmem:[#allocation25_spill] sm:$0xff]  ;;  %v13442_v25 = vld [vmem:[#allocation151_spill] sm:$0xff] }
 0x56e   : > { %7041 = vmatprep.subr.mxu1 %v1950_v45  ;;  %7099 = vmatprep.subr.mxu0 %v2193_v57 }
 0x56f   : > { %7042 = vmatpush3.msra.mxu1 %v1950_v45  ;;  %7100 = vmatpush3.msra.mxu0 %v2193_v57  ;;  %v5937_v45 = vld [vmem:[%s13038_s2 + $0x2c0] sm:$0xff]  ;;  %v2451_v57 = vsel %vm2439_vm15, %v13415_v19, %v13414_v24 }
 0x570   : > { %7043 = vmatprep.subr.mxu1 %v1949_v9  ;;  %7101 = vmatprep.mubr.f32.mxu0 %v5933_v34  ;;  %v13416_v34 = vld [vmem:[#allocation156_spill] sm:$0xff]  ;;  %v5945_v19 = vld [vmem:[%s13038_s2 + $0x300] sm:$0xff] }
 0x571   : > { %7169 = vmatprep.subr.mxu0 %v2702_v53  ;;  %7044 = vmatpush3.msra.mxu1 %v1949_v9  ;;  %v2694_v62 = vsel %vm2686_vm14, %v13417_v28, %v13416_v34  ;;  %v5938_v9 = vld [vmem:[%s13038_s2 + $0x2c8] sm:$0xff]  ;;  %v13446_v28 = vld [vmem:[#allocation58_spill] sm:$0xff] }
 0x572   : > { %7102 = vmatmul.mubr.f32.vlgmr.msra.gmra.mxu0 %v5934_v42  ;;  %7045 = vmatprep.subr.mxu1 %v1948_v54  ;;  %v2450_v42 = vsel %vm2439_vm15, %v2416_v63, %v9642_v59  ;;  %v5939_v59 = vld [vmem:[%s13038_s2 + $0x2d0] sm:$0xff]  ;;  %v13444_v63 = vld [vmem:[#allocation41_spill] sm:$0xff] }
 0x573   : > { %7170 = vmatpush3.msra.mxu0 %v2702_v53  ;;  %7046 = vmatpush3.msra.mxu1 %v1948_v54  ;;  %v5928_v53 = vld [vmem:[%s13038_s2 + $0x278] sm:$0xff]  ;;  %v2449_v54 = vsel %vm2439_vm15, %v13420_v23, %v13419_v10  ;;  %v13450_v10 = vld [vmem:[#allocation26_spill] sm:$0xff]  ;;  %v13451_v23 = vld [vmem:[#allocation23_spill] sm:$0xff] }
 0x574   : > { %7171 = vmatprep.subr.mxu0 %v2701_v27  ;;  %7047 = vmatprep.subr.mxu1 %v1947_v17 }
 0x575   : > { %7172 = vmatpush3.msra.mxu0 %v2701_v27  ;;  %7048 = vmatpush3.msra.mxu1 %v1947_v17  ;;  %v2692_v27 = vsel %vm2686_vm14, %v13422_v44, %v13421_v48  ;;  %v13424_v17 = vld [vmem:[#allocation149_spill] sm:$0xff]  ;;  %v5961_v44 = vld [vmem:[%s13038_s2 + $0x380] sm:$0xff] }
 0x576   : > { %7173 = vmatprep.subr.mxu0 %v2700_v16  ;;  %7049 = vmatprep.subr.mxu1 %v1946_v0  ;;  %v2448_v33 = vsel %vm2439_vm15, %v13424_v17, %v13423_v2  ;;  %v5960_v48 = vld [vmem:[%s13038_s2 + $0x378] sm:$0xff]  ;;  %v5946_v17 = vld [vmem:[%s13038_s2 + $0x308] sm:$0xff] }
 0x577   : > { %7174 = vmatpush3.msra.mxu0 %v2700_v16  ;;  %7050 = vmatpush3.msra.mxu1 %v1946_v0  ;;  %v13425_v16 = vld [vmem:[#allocation115_spill] sm:$0xff] }
 0x578   : > { %7175 = vmatprep.subr.mxu0 %v2699_v61  ;;  %7051 = vmatprep.mubr.f32.mxu1 %v5921_v40  ;;  %v2691_v26 = vsel %vm2686_vm14, %v13426_v46, %v13425_v16  ;;  %v5930_v0 = vld [vmem:[%s13038_s2 + $0x288] sm:$0xff]  ;;  %v2400_v40 = vpop.permute.xlu1 %2399 }
 0x579   : > { %7176 = vmatpush3.msra.mxu0 %v2699_v61  ;;  %7052 = vmatmul.mubr.f32.vlgmr.msra.gmra.mxu1 %v5922_v60  ;;  %v5941_v60 = vld [vmem:[%s13038_s2 + $0x2e0] sm:$0xff]  ;;  %v2447_v61 = vsel %vm2439_vm15, %v13428_v21, %v13427_v22  ;;  %v2446_v18 = vsel %vm2439_vm15, %v2400_v40, %v9668_v14  ;;  %v5943_v14 = vld [vmem:[%s13038_s2 + $0x2f0] sm:$0xff]  ;;  %v5962_v46 = vld [vmem:[%s13038_s2 + $0x388] sm:$0xff] }
 0x57a   : > { %7119 = vmatprep.subr.mxu1 %v2455_v29  ;;  %7177 = vmatprep.subr.mxu0 %v2698_v5  ;;  %v5949_v40 = vld [vmem:[%s13038_s2 + $0x320] sm:$0xff]  ;;  %v5950_v21 = vld [vmem:[%s13038_s2 + $0x328] sm:$0xff] }
 0x57b   : > { %7120 = vmatpush3.msra.mxu1 %v2455_v29  ;;  %7178 = vmatpush3.msra.mxu0 %v2698_v5  ;;  %v5942_v29 = vld [vmem:[%s13038_s2 + $0x2e8] sm:$0xff]  ;;  %v13431_v5 = vld [vmem:[#allocation73_spill] sm:$0xff]  ;;  %v5965_v22 = vld [vmem:[%s13038_s2 + $0x3a0] sm:$0xff] }
 0x57c   : > { %7121 = vmatprep.subr.mxu1 %v2454_v31  ;;  %7179 = vmatprep.subr.mxu0 %v2697_v51 }
 0x57d   : > { %7054 = vmatprep.mubr.f32.mxu1 %v5923_v8  ;;  %7122 = vmatpush3.msra.mxu1 %v2454_v31  ;;  %v13432_v8 = vld [vmem:[#allocation59_spill] sm:$0xff] }
 0x57e   : > { %7180 = vmatpush3.msra.mxu0 %v2697_v51  ;;  %7055 = vmatmul.mubr.f32.gmra.mxu1 %v5924_v15  ;;  %v2689_v31 = vsel %vm2686_vm14, %v13432_v8, %v13431_v5  ;;  %v13433_v51 = vld [vmem:[#allocation7_spill] sm:$0xff]  ;;  %v13434_v15 = vld [vmem:[#allocation8_spill] sm:$0xff]  ;;  %v10132_v8 = vpop.f32.mrf.mxu0 }
 0x57f   : > { %7123 = vmatprep.subr.mxu1 %v2453_v4  ;;  %7181 = vmatprep.subr.mxu0 %v2696_v56  ;;  %v5955_v5 = vld [vmem:[%s13038_s2 + $0x350] sm:$0xff] }
 0x580   : > { %7104 = vmatprep.mubr.f32.mxu0 %v5935_v52  ;;  %7124 = vmatpush3.msra.mxu1 %v2453_v4  ;;  %v2999_v52 = vsel %vm229_vm2, %v13434_v15, %v13433_v51  ;;  %v2445_v4 = vsel %vm2439_vm15, %v13436_v35, %v13435_v49  ;;  %v3014_v51 = vld [vmem:[%s13037_s1 + $0x8] sm:$0xff]  ;;  %v3016_v49 = vld [vmem:[%s13037_s1 + $0x18] sm:$0xff] }
 0x581   : > { %7182 = vmatpush3.msra.mxu0 %v2696_v56  ;;  %7125 = vmatprep.subr.mxu1 %v2452_v12  ;;  %v2688_v56 = vsel %vm2686_vm14, %v13438_v37, %v13437_v1 }
 0x582   : > { %7105 = vmatmul.mubr.f32.gmra.mxu0 %v5936_v36  ;;  %7183 = vmatprep.subr.mxu0 %v2695_v58  ;;  %v5944_v36 = vld [vmem:[%s13038_s2 + $0x2f8] sm:$0xff] }
 0x583   : > { %7057 = vmatprep.mubr.f32.mxu1 %v5925_v7  ;;  %7126 = vmatpush3.msra.mxu1 %v2452_v12  ;;  %v3006_v12 = vsel %vm237_vm3, %v13440_v3, %v13439_v20  ;;  %v13441_v7 = vld [vmem:[#allocation142_spill] sm:$0xff] }
 0x584   : > { %7184 = vmatpush3.msra.mxu0 %v2695_v58  ;;  %7058 = vmatmul.mubr.f32.gmra.mxu1 %v5926_v47  ;;  %v2444_v55 = vsel %vm2439_vm15, %v13442_v25, %v13441_v7  ;;  %v13443_v58 = vld [vmem:[#allocation6_spill] sm:$0xff] }
 0x585   : > { %7127 = vmatprep.subr.mxu1 %v2451_v57  ;;  %7185 = vmatprep.subr.mxu0 %v2694_v62  ;;  %v3001_v47 = vmax.f32 %v13443_v58, %v2999_v52  ;;  %v3015_v52 = vld [vmem:[%s13037_s1 + $0x10] sm:$0xff] }
 0x586   : > { %7107 = vmatprep.mubr.f32.mxu0 %v5937_v45  ;;  %7128 = vmatpush3.msra.mxu1 %v2451_v57  ;;  %v13445_v45 = vld [vmem:[#allocation27_spill] sm:$0xff]  ;;  %v5957_v57 = vld [vmem:[%s13038_s2 + $0x360] sm:$0xff] }
 0x587   : > { %7186 = vmatpush3.msra.mxu0 %v2694_v62  ;;  %7129 = vmatprep.subr.mxu1 %v2450_v42  ;;  %v2687_v24 = vsel %vm2686_vm14, %v13445_v45, %v13444_v63  ;;  %v3008_v34 = vmax.f32 %v3001_v47, %v3006_v12  ;;  %v13447_v62 = vld [vmem:[#allocation55_spill] sm:$0xff] }
 0x588   : > { %7108 = vmatmul.mubr.f32.gmra.mxu0 %v5938_v9  ;;  %7187 = vmatprep.subr.mxu0 %v2693_v43  ;;  %v2443_v9 = vsel %vm2439_vm15, %v13447_v62, %v13446_v28 }
 0x589   : > { %7060 = vmatprep.mubr.f32.mxu1 %v5927_v11  ;;  %7130 = vmatpush3.msra.mxu1 %v2450_v42  ;;  %v5958_v42 = vld [vmem:[%s13038_s2 + $0x368] sm:$0xff]  ;;  %v5959_v11 = vld [vmem:[%s13038_s2 + $0x370] sm:$0xff] }
 0x58a   : > { %7188 = vmatpush3.msra.mxu0 %v2693_v43  ;;  %7061 = vmatmul.mubr.f32.gmra.mxu1 %v5928_v53  ;;  %v13449_v43 = vld [vmem:[#allocation71_spill] sm:$0xff] }
 0x58b   : > { %7131 = vmatprep.subr.mxu1 %v2449_v54  ;;  %7189 = vmatprep.subr.mxu0 %v2692_v27  ;;  %v2442_v53 = vsel %vm2439_vm15, %v13449_v43, %v13448_v38 }
 0x58c   : > { %7110 = vmatprep.mubr.f32.mxu0 %v5939_v59  ;;  %7132 = vmatpush3.msra.mxu1 %v2449_v54  ;;  %v3010_v59 = vrot.slane %v3008_v34, 4  ;;  %v2441_v54 = vsel %vm2439_vm15, %v13451_v23, %v13450_v10 }
 0x58d   : > { %7190 = vmatpush3.msra.mxu0 %v2692_v27  ;;  %7133 = vmatprep.subr.mxu1 %v2448_v33  ;;  %v13452_v27 = vld [vmem:[#allocation42_spill] sm:$0xff] }
 0x58e   : > { %7111 = vmatmul.mubr.f32.gmra.mxu0 %v5940_v50  ;;  %7191 = vmatprep.subr.mxu0 %v2691_v26  ;;  %v13453_v50 = vld [vmem:[#allocation39_spill] sm:$0xff] }
 0x58f   : > { %7063 = vmatprep.mubr.f32.mxu1 %v5929_v30  ;;  %7134 = vmatpush3.msra.mxu1 %v2448_v33  ;;  %v2440_v2 = vsel %vm2439_vm15, %v13453_v50, %v13452_v27  ;;  %v5947_v33 = vld [vmem:[%s13038_s2 + $0x310] sm:$0xff]  ;;  %v7821_v30 = vld [vmem:[%s7992_s5 + $0x4] sm:$0xf] }
 0x590   : > { %7192 = vmatpush3.msra.mxu0 %v2691_v26  ;;  %7064 = vmatmul.mubr.f32.gmra.mxu1 %v5930_v0  ;;  %v3012_v16 = vsel %vm244_vm4, %v7821_v30, %v3010_v59  ;;  %v5963_v26 = vld [vmem:[%s13038_s2 + $0x390] sm:$0xff]  ;;  %v5948_v0 = vld [vmem:[%s13038_s2 + $0x318] sm:$0xff] }
 0x591   : > { %7135 = vmatprep.subr.mxu1 %v2447_v61  ;;  %7193 = vmatprep.subr.mxu0 %v2690_v41 }
 0x592   : > { %7113 = vmatprep.mubr.f32.mxu0 %v5941_v60  ;;  %7136 = vmatpush3.msra.mxu1 %v2447_v61  ;;  %v5964_v60 = vld [vmem:[%s13038_s2 + $0x398] sm:$0xff]  ;;  %v5951_v61 = vld [vmem:[%s13038_s2 + $0x330] sm:$0xff] }
 0x593   : > { %7194 = vmatpush3.msra.mxu0 %v2690_v41  ;;  %7137 = vmatprep.subr.mxu1 %v2446_v18  ;;  %v5952_v41 = vld [vmem:[%s13038_s2 + $0x338] sm:$0xff] }
 0x594   : > { %7114 = vmatmul.mubr.f32.gmra.mxu0 %v5942_v29  ;;  %7195 = vmatprep.subr.mxu0 %v2689_v31  ;;  %v5953_v29 = vld [vmem:[%s13038_s2 + $0x340] sm:$0xff] }
 0x595   : > { %7066 = vmatprep.mubr.f32.mxu1 %v5931_v39  ;;  %7138 = vmatpush3.msra.mxu1 %v2446_v18  ;;  %v5968_v18 = vld [vmem:[%s13038_s2 + $0x3b8] sm:$0xff]  ;;  %v5954_v39 = vld [vmem:[%s13038_s2 + $0x348] sm:$0xff] }
 0x596   : > { %7196 = vmatpush3.msra.mxu0 %v2689_v31  ;;  %7067 = vmatmul.mubr.f32.gmra.mxu1 %v5932_v32  ;;  %v5956_v31 = vld [vmem:[%s13038_s2 + $0x358] sm:$0xff]  ;;  %v3013_v32 = vld [vmem:[%s13037_s1] sm:$0xff] }
 0x597   : > { %7139 = vmatprep.subr.mxu1 %v2445_v4  ;;  %7197 = vmatprep.subr.mxu0 %v2688_v56 }
 0x598   : > { %7116 = vmatprep.mubr.f32.mxu0 %v5943_v14  ;;  %7140 = vmatpush3.msra.mxu1 %v2445_v4  ;;  %v10140_v14 = vpop.f32.mrf.mxu0 }
 0x599   : > { %7198 = vmatpush3.msra.mxu0 %v2688_v56  ;;  %7141 = vmatprep.subr.mxu1 %v2444_v55 }
 0x59a   : > { %7117 = vmatmul.mubr.f32.gmra.mxu0 %v5944_v36  ;;  %7199 = vmatprep.subr.mxu0 %v2687_v24  ;;  %v10146_v15 = vpop.f32.mrf.mxu0 }
 0x59b   : > { %7142 = vmatpush3.msra.mxu1 %v2444_v55  ;;  %7200 = vmatpush3.msra.mxu0 %v2687_v24 }
 0x59c   : > { %7143 = vmatprep.subr.mxu1 %v2443_v9  ;;  %7151 = vmatprep.mubr.f32.mxu1 %v5945_v19  ;;  %v10156_v35 = vpop.f32.mrf.mxu0 }
 0x59d   : > { %7144 = vmatpush3.msra.mxu1 %v2443_v9  ;;  %7201 = vmatprep.mubr.f32.mxu0 %v5957_v57 }
 0x59e   : > { %7145 = vmatprep.subr.mxu1 %v2442_v53  ;;  %7202 = vmatmul.mubr.f32.vlgmr.msra.gmra.mxu0 %v5958_v42  ;;  %v10161_v1 = vpop.f32.mrf.mxu0 }
 0x59f   : > { %7146 = vmatpush3.msra.mxu1 %v2442_v53  ;;  %7204 = vmatprep.mubr.f32.mxu0 %v5959_v11 }
 0x5a0   : > { %7147 = vmatprep.subr.mxu1 %v2441_v54  ;;  %v10165_v56 = vpop.f32.mrf.mxu0 }
 0x5a1   : > { %7148 = vmatpush3.msra.mxu1 %v2441_v54 }
 0x5a2   : > { %7149 = vmatprep.subr.mxu1 %v2440_v2  ;;  %7205 = vmatmul.mubr.f32.gmra.mxu0 %v5960_v48  ;;  %v10171_v3 = vpop.f32.mrf.mxu0 }
 0x5a3   : > { %7150 = vmatpush3.msra.mxu1 %v2440_v2  ;;  %7207 = vmatprep.mubr.f32.mxu0 %v5961_v44 }
 0x5a4   : > { %7152 = vmatmul.mubr.f32.vlgmr.msra.gmra.mxu1 %v5946_v17  ;;  %7219 = vmatprep.subr.mxu1 %v3012_v16  ;;  %v10177_v25 = vpop.f32.mrf.mxu0 }
 0x5a5   : > { %7220 = vmatpush3.msra.mxu1 %v3012_v16  ;;  %7154 = vmatprep.mubr.f32.mxu1 %v5947_v33 }
 0x5a6   : > { %7208 = vmatmul.mubr.f32.gmra.mxu0 %v5962_v46  ;;  %v10181_v58 = vpop.f32.mrf.mxu0 }
 0x5a7   : > { %7210 = vmatprep.mubr.f32.mxu0 %v5963_v26 }
 0x5a8   : > { %7155 = vmatmul.mubr.f32.gmra.mxu1 %v5948_v0  ;;  %v10187_v45 = vpop.f32.mrf.mxu0 }
 0x5a9   : > { %7157 = vmatprep.mubr.f32.mxu1 %v5949_v40 }
 0x5aa   : > { %7211 = vmatmul.mubr.f32.gmra.mxu0 %v5964_v60  ;;  %v10191_v19 = vpop.f32.mrf.mxu0 }
 0x5ab   : > { %7213 = vmatprep.mubr.f32.mxu0 %v5965_v22 }
 0x5ac   : > { %7158 = vmatmul.mubr.f32.gmra.mxu1 %v5950_v21  ;;  %v10197_v28 = vpop.f32.mrf.mxu0 }
 0x5ad   : > { %7160 = vmatprep.mubr.f32.mxu1 %v5951_v61  ;;  %13454 = vst [vmem:[#allocation119_spill] sm:$0xff] %v10197_v28 }
 0x5ae   : > { %7214 = vmatmul.mubr.f32.gmra.mxu0 %v5966_v13 }
 0x5af   : > { %7216 = vmatprep.mubr.f32.mxu0 %v5967_v6 }
 0x5b0   : > { %7161 = vmatmul.mubr.f32.gmra.mxu1 %v5952_v41 }
 0x5b1   : > { %7163 = vmatprep.mubr.f32.mxu1 %v5953_v29 }
 0x5b2   : > { %7217 = vmatmul.mubr.f32.gmra.mxu0 %v5968_v18 }
 0x5b4   : > { %7164 = vmatmul.mubr.f32.gmra.mxu1 %v5954_v39 }
 0x5b5   : > { %7166 = vmatprep.mubr.f32.mxu1 %v5955_v5 }
 0x5b8   : > { %7167 = vmatmul.mubr.f32.gmra.mxu1 %v5956_v31 }
 0x5b9   : > { %7221 = vmatprep.mubr.msk.f32.mxu1 %vm254_vm1, %v3013_v32 }
 0x5bb   : > { %v10159_v4 = vpop.f32.mrf.mxu1 }
 0x5bc   : > { %7222 = vmatmul.mubr.msk.f32.vlgmr.msra.gmra.mxu1 %vm254_vm1, %v3014_v51 }
 0x5bd   : > { %7224 = vmatprep.mubr.msk.f32.mxu1 %vm254_vm1, %v3015_v52  ;;  %v10163_v37 = vpop.f32.mrf.mxu1 }
 0x5c0   : > { %7225 = vmatmul.mubr.msk.f32.gmra.mxu1 %vm254_vm1, %v3016_v49 }
 0x5c7   : > { %v10167_v36 = vpop.f32.mrf.mxu1 }
 0x5c9   : > { %v10169_v20 = vpop.f32.mrf.mxu1 }
 0x5cc   : > { %v10173_v12 = vpop.f32.mrf.mxu1 }
 0x5ce   : > { %v10175_v7 = vpop.f32.mrf.mxu1 }
 0x5d1   : > { %v10179_v55 = vpop.f32.mrf.mxu1 }
 0x5d3   : > { %v10183_v47 = vpop.f32.mrf.mxu1 }
 0x5d6   : > { %v10185_v63 = vpop.f32.mrf.mxu1 }
 0x5d8   : > { %v10189_v24 = vpop.f32.mrf.mxu1  ;;  %v10199_v62 = vpop.f32.mrf.mxu0 }
 0x5da   : > { %v10205_v11 = vpop.f32.mrf.mxu0 }
 0x5db   : > { %v10193_v57 = vpop.f32.mrf.mxu1 }
 0x5dd   : > { %v10195_v34 = vpop.f32.mrf.mxu1 }
 0x5e1   : > { %v10201_v9 = vpop.f32.mrf.mxu1 }
 0x5e3   : > { %v10203_v42 = vpop.f32.mrf.mxu1 }
 0x5e6   : > { %v10207_v38 = vpop.f32.mrf.mxu1 }
 0x5e8   : > { %v10209_v43 = vpop.f32.mrf.mxu0  ;;  %v10213_v59 = vpop.f32.mrf.mxu1 }
 0x5ea   : > { %v10211_v53 = vpop.f32.mrf.mxu0 }
 0x5ec   : > { %v10217_v23 = vpop.f32.mrf.mxu1 }
 0x5ee   : > { %v10215_v10 = vpop.f32.mrf.mxu0  ;;  %v10221_v48 = vpop.f32.mrf.mxu1 }
 0x5f0   : > { %v10219_v54 = vpop.f32.mrf.mxu0 }
 0x5f2   : > { %v10225_v27 = vpop.f32.mrf.mxu1 }
 0x5f4   : > { %v10223_v44 = vpop.f32.mrf.mxu0  ;;  %v10229_v2 = vpop.f32.mrf.mxu1 }
 0x5f6   : > { %v10227_v50 = vpop.f32.mrf.mxu0 }
 0x5f7   : > { %13455 = vst [vmem:[#allocation123_spill] sm:$0xff] %v10227_v50 }
 0x5f8   : > { %v10233_v33 = vpop.f32.mrf.mxu1 }
 0x5fa   : > { %v10231_v17 = vpop.f32.mrf.mxu0  ;;  %v10237_v16 = vpop.f32.mrf.mxu1 }
 0x5fb   : > { %13456 = vst [vmem:[#allocation48_spill] sm:$0xff] %v10231_v17 }
 0x5fc   : > { %v10235_v30 = vpop.f32.mrf.mxu0 }
 0x5fd   : > { %13457 = vst [vmem:[#allocation45_spill] sm:$0xff] %v10235_v30 }
 0x5fe   : > { %v10241_v26 = vpop.f32.mrf.mxu1 }
 0x5ff   : > { %13459 = vst [vmem:[#allocation160_spill] sm:$0xff] %v10241_v26 }
 0x600   : > { %v10239_v46 = vpop.f32.mrf.mxu0  ;;  %v10245_v40 = vpop.f32.mrf.mxu1 }
 0x601   : > { %13458 = vst [vmem:[#allocation157_spill] sm:$0xff] %v10239_v46  ;;  %13461 = vst [vmem:[#allocation61_spill] sm:$0xff] %v10245_v40 }
 0x602   : > { %v10243_v0 = vpop.f32.mrf.mxu0 }
 0x603   : > { %13460 = vst [vmem:[#allocation64_spill] sm:$0xff] %v10243_v0 }
 0x606   : > { %v10247_v60 = vpop.f32.mrf.mxu0 }
 0x608   : > { %v10249_v61 = vpop.f32.mrf.mxu0 }
 0x60d   : > { %v6953_v22 = vpop.f32.mrf.mxu1 }
 0x60f   : > { %v1550_v21 = vpop.f32.mrf.mxu1 }
 0x612   : > { %v6956_v13 = vpop.f32.mrf.mxu1 }
 0x614   : > { %v10251_v6 = vpop.f32.mrf.mxu0  ;;  %v10253_v41 = vpop.f32.mrf.mxu1 }
 0x616   : > { %v10255_v29 = vpop.f32.mrf.mxu0 }
 0x618   : > { %v10257_v18 = vpop.f32.mrf.mxu1 }
 0x61a   : > { %v10259_v39 = vpop.f32.mrf.mxu0  ;;  %v10261_v5 = vpop.f32.mrf.mxu1 }
 0x61b   : > { %13462 = vst [vmem:[#allocation16_spill] sm:$0xff] %v10259_v39 }
 0x61c   : > { %v10263_v31 = vpop.f32.mrf.mxu0 }
 0x61d   : > { %13463 = vst [vmem:[#allocation13_spill] sm:$0xff] %v10263_v31 }
 0x61e   : > { %v10265_v32 = vpop.f32.mrf.mxu1 }
 0x61f   : > { %13464 = vst [vmem:[#allocation79_spill] sm:$0xff] %v10265_v32 }
 0x620   : > { %v10267_v51 = vpop.f32.mrf.mxu0  ;;  %v10269_v52 = vpop.f32.mrf.mxu1 }
 0x621   : > { %13465 = vst [vmem:[#allocation81_spill] sm:$0xff] %v10267_v51  ;;  %13466 = vst [vmem:[#allocation117_spill] sm:$0xff] %v10269_v52 }
 0x622   : > { %v10271_v49 = vpop.f32.mrf.mxu0 }
 0x623   : > { %13467 = vst [vmem:[#allocation120_spill] sm:$0xff] %v10271_v49 }
 0x624   : > { %v10273_v0 = vpop.f32.mrf.mxu1 }
 0x625   : > { %13468 = vst [vmem:[#allocation32_spill] sm:$0xff] %v10273_v0 }
 0x626   : > { %v10275_v46 = vpop.f32.mrf.mxu0  ;;  %v10277_v40 = vpop.f32.mrf.mxu1 }
 0x627   : > { %13469 = vst [vmem:[#allocation29_spill] sm:$0xff] %v10275_v46  ;;  %13470 = vst [vmem:[#allocation166_spill] sm:$0xff] %v10277_v40 }
 0x628   : > { %v10279_v30 = vpop.f32.mrf.mxu0 }
 0x629   : > { %13471 = vst [vmem:[#allocation177_spill] sm:$0xff] %v10279_v30 }
 0x62a   : > { %v10281_v26 = vpop.f32.mrf.mxu1 }
 0x62b   : > { %13472 = vst [vmem:[#allocation46_spill] sm:$0xff] %v10281_v26 }
 0x62c   : > { %v10283_v39 = vpop.f32.mrf.mxu0  ;;  %v10285_v31 = vpop.f32.mrf.mxu1 }
 0x62d   : > { %13473 = vst [vmem:[#allocation44_spill] sm:$0xff] %v10283_v39  ;;  %13474 = vst [vmem:[#allocation62_spill] sm:$0xff] %v10285_v31 }
 0x62e   : > { %v10287_v32 = vpop.f32.mrf.mxu0 }
 0x62f   : > { %13475 = vst [vmem:[#allocation60_spill] sm:$0xff] %v10287_v32 }
 0x632   : > { %v10289_v52 = vpop.f32.mrf.mxu0 }
 0x634   : > { %v10291_v17 = vpop.f32.mrf.mxu0 }
 0x635   : > { %13476 = vst [vmem:[#allocation14_spill] sm:$0xff] %v10291_v17 }
 0x639   : > { %v7053_v51 = vpop.f32.mrf.mxu1 }
 0x63b   : > { %v2044_v49 = vpop.f32.mrf.mxu1 }
 0x63e   : > { %v10293_v0 = vpop.f32.mrf.mxu1 }
 0x640   : > { %v10295_v46 = vpop.f32.mrf.mxu1 }
 0x641   : > { %13477 = vst [vmem:[#allocation12_spill] sm:$0xff] %v10295_v46  ;;  %v827_v46 = vadd.f32 %v10132_v8, %v10159_v4  ;;  %v832_v8 = vadd.f32 %v10156_v35, %v10169_v20 }
 0x642   : > { %v10297_v40 = vpop.f32.mrf.mxu0 }
 0x643   : > { %13478 = vst [vmem:[#allocation88_spill] sm:$0xff] %v10297_v40 }
 0x644   : > { %v10299_v30 = vpop.f32.mrf.mxu0  ;;  %v10301_v26 = vpop.f32.mrf.mxu1 }
 0x645   : > { %13479 = vst [vmem:[#allocation97_spill] sm:$0xff] %v10299_v30  ;;  %13480 = vst [vmem:[#allocation30_spill] sm:$0xff] %v10301_v26  ;;  %v822_v30 = vadd.f32 %v10140_v14, %v10163_v37  ;;  %v847_v37 = vadd.f32 %v10161_v1, %v10173_v12  ;;  %v857_v1 = vadd.f32 %v10171_v3, %v10179_v55 }
 0x646   : > { %v10305_v31 = vpop.f32.mrf.mxu1 }
 0x647   : > { %v1120_v20 = vadd.f32 %v10217_v23, %v847_v37  ;;  %v1122_v23 = vadd.f32 %v10225_v27, %v857_v1 }
 0x648   : > { %v10303_v39 = vpop.f32.mrf.mxu0 }
 0x649   : > { %13481 = vst [vmem:[#allocation28_spill] sm:$0xff] %v10303_v39  ;;  %v1116_v39 = vadd.f32 %v10201_v9, %v827_v46  ;;  %v1367_v55 = vadd.f32 %v10215_v10, %v1120_v20  ;;  %v13496_v20 = vld [vmem:[#allocation117_spill] sm:$0xff] }
 0x64a   : > { %v10307_v32 = vpop.f32.mrf.mxu0  ;;  %v10309_v50 = vpop.f32.mrf.mxu1 }
 0x64b   : > { %13482 = vst [vmem:[#allocation128_spill] sm:$0xff] %v10307_v32  ;;  %13483 = vst [vmem:[#allocation137_spill] sm:$0xff] %v10309_v50  ;;  %v837_v32 = vadd.f32 %v10146_v15, %v10167_v36  ;;  %v1115_v50 = vadd.f32 %v10203_v42, %v822_v30  ;;  %v1363_v4 = vadd.f32 %v10199_v62, %v1116_v39 }
 0x64c   : > { %v10317_v40 = vpop.f32.mrf.mxu1  ;;  %v1117_v15 = vadd.f32 %v10213_v59, %v832_v8  ;;  %v842_v42 = vadd.f32 %v10165_v56, %v10175_v7  ;;  %v852_v59 = vadd.f32 %v10177_v25, %v10183_v47 }
 0x64d   : > { %v1118_v14 = vadd.f32 %v10207_v38, %v837_v32  ;;  %v1362_v9 = vadd.f32 %v10205_v11, %v1115_v50  ;;  %v1610_v36 = vadd.f32 %v6953_v22, %v1363_v4 }
 0x64e   : > { %v10311_v28 = vpop.f32.mrf.mxu0  ;;  %v1119_v12 = vadd.f32 %v10221_v48, %v842_v42  ;;  %v1364_v38 = vadd.f32 %v10211_v53, %v1117_v15  ;;  %v1121_v47 = vadd.f32 %v10229_v2, %v852_v59  ;;  %v13493_v15 = vld [vmem:[#allocation160_spill] sm:$0xff] }
 0x64f   : > { %13484 = vst [vmem:[#allocation163_spill] sm:$0xff] %v10311_v28  ;;  %v1365_v35 = vadd.f32 %v10209_v43, %v1118_v14  ;;  %v1609_v62 = vadd.f32 %v1550_v21, %v1362_v9  ;;  %v1857_v56 = vadd.f32 %v10247_v60, %v1610_v36  ;;  %v867_v43 = vadd.f32 %v10181_v58, %v10185_v63  ;;  %v13490_v14 = vld [vmem:[#allocation16_spill] sm:$0xff]  ;;  %v13494_v36 = vld [vmem:[#allocation45_spill] sm:$0xff] }
 0x650   : > { %v10313_v17 = vpop.f32.mrf.mxu0  ;;  %v10327_v28 = vpop.f32.mrf.mxu1  ;;  %v1611_v53 = vadd.f32 %v10253_v41, %v1364_v38  ;;  %v862_v60 = vadd.f32 %v10187_v45, %v10189_v24  ;;  %v1366_v25 = vadd.f32 %v10219_v54, %v1119_v12  ;;  %v1614_v21 = vadd.f32 %v10257_v18, %v1367_v55  ;;  %v13497_v38 = vld [vmem:[#allocation88_spill] sm:$0xff]  ;;  %v13499_v55 = vld [vmem:[#allocation61_spill] sm:$0xff] }
 0x651   : > { %13485 = vst [vmem:[#allocation171_spill] sm:$0xff] %v10313_v17  ;;  %v1612_v7 = vadd.f32 %v6956_v13, %v1365_v35  ;;  %v1856_v48 = vadd.f32 %v10249_v61, %v1609_v62  ;;  %v2104_v22 = vadd.f32 %v7053_v51, %v1857_v56  ;;  %v1124_v58 = vadd.f32 %v10233_v33, %v867_v43 }
 0x652   : > { %v10341_v30 = vpop.f32.mrf.mxu1  ;;  %v1369_v61 = vadd.f32 %v10223_v44, %v1122_v23  ;;  %v1123_v13 = vadd.f32 %v10237_v16, %v862_v60  ;;  %v1613_v41 = vadd.f32 %v10261_v5, %v1366_v25  ;;  %v877_v24 = vadd.f32 %v10191_v19, %v10193_v57  ;;  %v13487_v44 = vld [vmem:[#allocation123_spill] sm:$0xff]  ;;  %v13488_v16 = vld [vmem:[#allocation48_spill] sm:$0xff]  ;;  %v13491_v19 = vld [vmem:[#allocation14_spill] sm:$0xff] }
 0x653   : > { %v1859_v27 = vadd.f32 %v10251_v6, %v1612_v7  ;;  %v2103_v10 = vadd.f32 %v2044_v49, %v1856_v48  ;;  %v1858_v54 = vadd.f32 %v10255_v29, %v1611_v53  ;;  %v2351_v2 = vadd.f32 %v10289_v52, %v2104_v22  ;;  %v13486_v6 = vld [vmem:[#allocation119_spill] sm:$0xff]  ;;  %v13492_v29 = vld [vmem:[#allocation12_spill] sm:$0xff]  ;;  %v13498_v7 = vld [vmem:[#allocation30_spill] sm:$0xff] }
 0x654   : > { %v10322_v26 = vpop.f32.mrf.mxu0  ;;  %v872_v18 = vadd.f32 %v13486_v6, %v10195_v34  ;;  %v1368_v32 = vadd.f32 %v13487_v44, %v1121_v47  ;;  %v1371_v51 = vadd.f32 %v13488_v16, %v1124_v58  ;;  %v13489_v5 = vld [vmem:[#allocation79_spill] sm:$0xff]  ;;  %v1861_v37 = vadd.f32 %v13490_v14, %v1614_v21  ;;  %v13495_v34 = vld [vmem:[#allocation13_spill] sm:$0xff]  ;;  %v13501_v60 = vld [vmem:[#allocation32_spill] sm:$0xff] }
 0x655   : > { %v2106_v33 = vadd.f32 %v10293_v0, %v1859_v27  ;;  %v1616_v49 = vadd.f32 %v13489_v5, %v1369_v61  ;;  %v2350_v57 = vadd.f32 %v13491_v19, %v2103_v10  ;;  %v2105_v9 = vadd.f32 %v13492_v29, %v1858_v54  ;;  %v13500_v53 = vld [vmem:[#allocation81_spill] sm:$0xff]  ;;  %v13510_v19 = vld [vmem:[#allocation46_spill] sm:$0xff]  ;;  %v13511_v29 = vld [vmem:[#allocation128_spill] sm:$0xff] }
 0x656   : > { %v10329_v17 = vpop.f32.mrf.mxu0  ;;  %v10359_v50 = vpop.f32.mrf.mxu1  ;;  %v1126_v0 = vadd.f32 %v13493_v15, %v877_v24  ;;  %v1370_v42 = vadd.f32 %v13494_v36, %v1123_v13  ;;  %v1860_v35 = vadd.f32 %v13495_v34, %v1613_v41  ;;  %v1615_v62 = vadd.f32 %v13496_v20, %v1368_v32  ;;  %v13502_v21 = vld [vmem:[#allocation97_spill] sm:$0xff]  ;;  %v13504_v24 = vld [vmem:[#allocation120_spill] sm:$0xff]  ;;  %v13513_v20 = vld [vmem:[#allocation62_spill] sm:$0xff] }
 0x657   : > { %v2353_v56 = vadd.f32 %v13497_v38, %v2106_v33  ;;  %v2108_v59 = vadd.f32 %v13498_v7, %v1861_v37  ;;  %v1125_v48 = vadd.f32 %v13499_v55, %v872_v18  ;;  %v1863_v22 = vadd.f32 %v13500_v53, %v1616_v49  ;;  %v13503_v41 = vld [vmem:[#allocation157_spill] sm:$0xff]  ;;  %v13508_v49 = vld [vmem:[#allocation64_spill] sm:$0xff] }
 0x658   : > { %v10374_v39 = vpop.f32.mrf.mxu1  ;;  %v1618_v25 = vadd.f32 %v13501_v60, %v1371_v51  ;;  %v2107_v47 = vadd.f32 %v10305_v31, %v1860_v35  ;;  %v2352_v10 = vadd.f32 %v13502_v21, %v2105_v9  ;;  %v1862_v54 = vadd.f32 %v13504_v24, %v1615_v62  ;;  %v13506_v6 = vld [vmem:[#allocation137_spill] sm:$0xff]  ;;  %v13507_v31 = vld [vmem:[#allocation28_spill] sm:$0xff]  ;;  %v13516_v53 = vld [vmem:[#allocation171_spill] sm:$0xff] }
 0x659   : > { %v2110_v18 = vadd.f32 %v13506_v6, %v1863_v22  ;;  %v2355_v16 = vadd.f32 %v13507_v31, %v2108_v59  ;;  %v13509_v14 = vld [vmem:[#allocation29_spill] sm:$0xff] }
 0x65a   : > { %v10343_v46 = vpop.f32.mrf.mxu0  ;;  %v1865_v37 = vadd.f32 %v13509_v14, %v1618_v25  ;;  %v2354_v9 = vadd.f32 %v13511_v29, %v2107_v47  ;;  %v13512_v34 = vld [vmem:[#allocation177_spill] sm:$0xff] }
 0x65c   : > { %v10350_v11 = vpop.f32.mrf.mxu0  ;;  %v2112_v59 = vadd.f32 %v10327_v28, %v1865_v37 }
 0x65e   : > { %v7203_v3 = vpop.f32.mrf.mxu0 }
 0x660   : > { %v2785_v63 = vpop.f32.mrf.mxu0 }
 0x662   : > { %v7206_v45 = vpop.f32.mrf.mxu0 }
 0x664   : > { %v7153_v8 = vpop.f32.mrf.mxu1  ;;  %v2795_v4 = vpop.f32.mrf.mxu0 }
 0x665   : > { %v2598_v52 = vadd.f32 %v7153_v8, %v2351_v2  ;;  %v13505_v2 = vld [vmem:[#allocation166_spill] sm:$0xff]  ;;  %v1372_v8 = vadd.f32 %v13508_v49, %v1125_v48 }
 0x666   : > { %v2538_v1 = vpop.f32.mrf.mxu1  ;;  %v7209_v12 = vpop.f32.mrf.mxu0  ;;  %v1617_v33 = vadd.f32 %v13505_v2, %v1370_v42 }
 0x667   : > { %v2845_v43 = vadd.f32 %v7203_v3, %v2598_v52  ;;  %v2597_v23 = vadd.f32 %v2538_v1, %v2350_v57  ;;  %v1373_v3 = vadd.f32 %v13503_v41, %v1126_v0  ;;  %v2109_v0 = vadd.f32 %v10317_v40, %v1862_v54  ;;  %v13514_v1 = vld [vmem:[#allocation163_spill] sm:$0xff] }
 0x668   : > { %v7156_v58 = vpop.f32.mrf.mxu1  ;;  %v2805_v27 = vpop.f32.mrf.mxu0  ;;  %v1864_v35 = vadd.f32 %v13512_v34, %v1617_v33  ;;  %v1619_v62 = vadd.f32 %v13513_v20, %v1372_v8  ;;  %v2357_v38 = vadd.f32 %v13514_v1, %v2110_v18 }
 0x669   : > { %2857 = vst [vmem:[%s8062_s20 + $0x8] sm:$0xff] %v2845_v43  ;;  %v2844_v61 = vadd.f32 %v2785_v63, %v2597_v23  ;;  %v2600_v13 = vadd.f32 %v7156_v58, %v2353_v56  ;;  %2874 = vadd.xlane.f32.xlu1 %v2845_v43  ;;  %v1620_v57 = vadd.f32 %v13510_v19, %v1373_v3  ;;  %v13517_v58 = vld [vmem:[#allocation60_spill] sm:$0xff] }
 0x66a   : > { %v2548_v44 = vpop.f32.mrf.mxu1  ;;  %v7212_v32 = vpop.f32.mrf.mxu0  ;;  %v2905_v42 = vmul.f32 %v2845_v43, %v2845_v43  ;;  %v2356_v22 = vadd.f32 %v13516_v53, %v2109_v0  ;;  %v2111_v60 = vadd.f32 %v10341_v30, %v1864_v35  ;;  %v1866_v28 = vadd.f32 %v13517_v58, %v1619_v62 }
 0x66b   : > { %2856 = vst [vmem:[%s8062_s20] sm:$0xff] %v2844_v61  ;;  %v2599_v51 = vadd.f32 %v2548_v44, %v2352_v10  ;;  %v10407_v5 = vadd.f32 %v7206_v45, %v2600_v13  ;;  %2872 = vadd.xlane.f32.xlu0 %v2844_v61  ;;  %v2904_v63 = vmul.f32 %v2844_v61, %v2844_v61 }
 0x66c   : > { %v7159_v52 = vpop.f32.mrf.mxu1  ;;  %v2815_v15 = vpop.f32.mrf.mxu0  ;;  %v2358_v3 = vadd.f32 %v10329_v17, %v2111_v60 }
 0x66d   : > { %2859 = vst [vmem:[%s8062_s20 + $0x18] sm:$0xff] %v10407_v5  ;;  %v2602_v36 = vadd.f32 %v7159_v52, %v2355_v16  ;;  %v2846_v45 = vadd.f32 %v2795_v4, %v2599_v51  ;;  %2920 = vadd.xlane.f32.xlu1 %v2904_v63  ;;  %v13515_v4 = vld [vmem:[#allocation44_spill] sm:$0xff]  ;;  %v2907_v31 = vmul.f32 %v10407_v5, %v10407_v5 }
 0x66e   : > { %v2558_v56 = vpop.f32.mrf.mxu1  ;;  %v7215_v7 = vpop.f32.mrf.mxu0  ;;  %v1867_v48 = vadd.f32 %v13515_v4, %v1620_v57 }
 0x66f   : > { %2858 = vst [vmem:[%s8062_s20 + $0x10] sm:$0xff] %v2846_v45  ;;  %v2601_v23 = vadd.f32 %v2558_v56, %v2354_v9  ;;  %v2849_v40 = vadd.f32 %v7209_v12, %v2602_v36  ;;  %2922 = vadd.xlane.f32.xlu0 %v2905_v42  ;;  %v2906_v55 = vmul.f32 %v2846_v45, %v2846_v45 }
 0x670   : > { %v7162_v43 = vpop.f32.mrf.mxu1  ;;  %v2825_v10 = vpop.f32.mrf.mxu0  ;;  %v2359_v12 = vadd.f32 %v10322_v26, %v2112_v59  ;;  %v2114_v61 = vadd.f32 %v10359_v50, %v1867_v48 }
 0x671   : > { %2861 = vst [vmem:[%s8062_s20 + $0x28] sm:$0xff] %v2849_v40  ;;  %v2604_v25 = vadd.f32 %v7162_v43, %v2357_v38  ;;  %v2848_v47 = vadd.f32 %v2805_v27, %v2601_v23  ;;  %2924 = vadd.xlane.f32.xlu1 %v2906_v55  ;;  %v2113_v27 = vadd.f32 %v10374_v39, %v1866_v28 }
 0x672   : > { %v2568_v21 = vpop.f32.mrf.mxu1  ;;  %v7218_v26 = vpop.f32.mrf.mxu0  ;;  %v2361_v50 = vadd.f32 %v10343_v46, %v2114_v61 }
 0x673   : > { %2860 = vst [vmem:[%s8062_s20 + $0x20] sm:$0xff] %v2848_v47  ;;  %v2603_v13 = vadd.f32 %v2568_v21, %v2356_v22  ;;  %v2851_v41 = vadd.f32 %v7212_v32, %v2604_v25  ;;  %2878 = vadd.xlane.f32.xlu0 %v10407_v5  ;;  %v2908_v18 = vmul.f32 %v2848_v47, %v2848_v47 }
 0x674   : > { %v7165_v30 = vpop.f32.mrf.mxu1  ;;  %v2360_v17 = vadd.f32 %v10350_v11, %v2113_v27  ;;  %v2835_v51 = vpop.f32.mrf.mxu0  ;;  %v2909_v11 = vmul.f32 %v2849_v40, %v2849_v40 }
 0x675   : > { %2863 = vst [vmem:[%s8062_s20 + $0x38] sm:$0xff] %v2851_v41  ;;  %v2606_v24 = vadd.f32 %v7165_v30, %v2359_v12  ;;  %v2850_v54 = vadd.f32 %v2815_v15, %v2603_v13  ;;  %2880 = vadd.xlane.f32.xlu1 %v2848_v47  ;;  %v2911_v5 = vmul.f32 %v2851_v41, %v2851_v41 }
 0x676   : > { %v2578_v2 = vpop.f32.mrf.mxu1 }
 0x677   : > { %2862 = vst [vmem:[%s8062_s20 + $0x30] sm:$0xff] %v2850_v54  ;;  %v2605_v33 = vadd.f32 %v2578_v2, %v2358_v3  ;;  %v2853_v6 = vadd.f32 %v7215_v7, %v2606_v24  ;;  %2876 = vadd.xlane.f32.xlu0 %v2846_v45  ;;  %v2910_v8 = vmul.f32 %v2850_v54, %v2850_v54 }
 0x678   : > { %v7168_v44 = vpop.f32.mrf.mxu1 }
 0x679   : > { %2865 = vst [vmem:[%s8062_s20 + $0x48] sm:$0xff] %v2853_v6  ;;  %v2608_v39 = vadd.f32 %v7168_v44, %v2361_v50  ;;  %v2852_v32 = vadd.f32 %v2825_v10, %v2605_v33  ;;  %2928 = vadd.xlane.f32.xlu1 %v2908_v18  ;;  %v2913_v37 = vmul.f32 %v2853_v6, %v2853_v6 }
 0x67a   : > { %v2588_v16 = vpop.f32.mrf.mxu1 }
 0x67b   : > { %2864 = vst [vmem:[%s8062_s20 + $0x40] sm:$0xff] %v2852_v32  ;;  %v2607_v46 = vadd.f32 %v2588_v16, %v2360_v17  ;;  %v2855_v63 = vadd.f32 %v7218_v26, %v2608_v39  ;;  %2926 = vadd.xlane.f32.xlu0 %v2907_v31  ;;  %v2912_v14 = vmul.f32 %v2852_v32, %v2852_v32 }
 0x67c   : > { %v7223_v19 = vpop.f32.mrf.mxu1 }
 0x67d   : > { %2867 = vst [vmem:[%s8062_s20 + $0x58] sm:$0xff] %v2855_v63  ;;  %v2854_v49 = vadd.f32 %v2835_v51, %v2607_v46  ;;  %2884 = vadd.xlane.f32.xlu1 %v2850_v54  ;;  %v2915_v9 = vmul.f32 %v2855_v63, %v2855_v63 }
 0x67e   : > { %v3111_v57 = vpop.f32.mrf.mxu1 }
 0x67f   : > { %2866 = vst [vmem:[%s8062_s20 + $0x50] sm:$0xff] %v2854_v49  ;;  %2882 = vadd.xlane.f32.xlu0 %v2849_v40  ;;  %v2914_v29 = vmul.f32 %v2854_v49, %v2854_v49 }
 0x680   : > { %v7226_v52 = vpop.f32.mrf.mxu1 }
 0x681   : > { %2932 = vadd.xlane.f32.xlu1 %v2910_v8 }
 0x682   : > { %v3121_v15 = vpop.f32.mrf.mxu1 }
 0x683   : > { %2930 = vadd.xlane.f32.xlu0 %v2909_v11 }
 0x685   : > { %2888 = vadd.xlane.f32.xlu1 %v2852_v32 }
 0x687   : > { %2886 = vadd.xlane.f32.xlu0 %v2851_v41  ;;  %v13519_v41 = vmov 0.0  }
 0x689   : > { %2936 = vadd.xlane.f32.xlu1 %v2912_v14 }
 0x68b   : > { %2934 = vadd.xlane.f32.xlu0 %v2911_v5 }
 0x68d   : > { %2892 = vadd.xlane.f32.xlu1 %v2854_v49 }
 0x68f   : > { %2890 = vadd.xlane.f32.xlu0 %v2853_v6 }
 0x693   : > { %2938 = vadd.xlane.f32.xlu0 %v2913_v37 }
 0x697   : > { %2894 = vadd.xlane.f32.xlu0 %v2855_v63 }
 0x69e   : > { %3158 = vrot.lane.b32.xlu1 %v3111_v57, %s13518_s29 }
 0x6ad   : > { %3160 = vrot.lane.b32.xlu0 %v7223_v19, %s13518_s29 }
 0x6c2   : > { %2940 = vadd.xlane.f32.xlu1 %v2914_v29 }
 0x6cc   : > { %2942 = vadd.xlane.f32.xlu0 %v2915_v9 }
 0x6d3   : > { %3164 = vrot.lane.b32.xlu1 %v7226_v52, %s13518_s29 }
 0x6d7   : > { %3162 = vrot.lane.b32.xlu1 %v3121_v15, %s13518_s29 }
 0x6f2   : > { %v2875_v0 = vpop.xlane.xlu1 %2874 }
 0x6f4   : > { %v2873_v36 = vpop.xlane.xlu0 %2872 }
 0x6f6   : > { %v2921_v45 = vpop.xlane.xlu1 %2920 }
 0x6f7   : > { %v2952_v42 = vsel %vm220_vm0, %v2873_v36, %v2921_v45 }
 0x6f8   : > { %2969 = vst.msk [vmem:[%s8152_s11] sm:$0xff] %vm2968_vm8, %v2952_v42  ;;  %v2923_v34 = vpop.xlane.xlu0 %2922 }
 0x6f9   : > { %v2953_v35 = vsel %vm220_vm0, %v2875_v0, %v2923_v34 }
 0x6fa   : > { %2970 = vst.msk [vmem:[%s8152_s11 + $0x8] sm:$0xff] %vm2968_vm8, %v2953_v35  ;;  %v2925_v20 = vpop.xlane.xlu1 %2924 }
 0x6fc   : > { %v2879_v62 = vpop.xlane.xlu0 %2878 }
 0x6fe   : > { %v2881_v1 = vpop.xlane.xlu1 %2880 }
 0x700   : > { %v2877_v38 = vpop.xlane.xlu0 %2876 }
 0x701   : > { %v2954_v56 = vsel %vm220_vm0, %v2877_v38, %v2925_v20 }
 0x702   : > { %2971 = vst.msk [vmem:[%s8152_s11 + $0x10] sm:$0xff] %vm2968_vm8, %v2954_v56  ;;  %v2929_v7 = vpop.xlane.xlu1 %2928 }
 0x703   : > { %v2956_v59 = vsel %vm220_vm0, %v2881_v1, %v2929_v7 }
 0x704   : > { %2973 = vst.msk [vmem:[%s8152_s11 + $0x20] sm:$0xff] %vm2968_vm8, %v2956_v59  ;;  %v2927_v23 = vpop.xlane.xlu0 %2926 }
 0x705   : > { %v2955_v40 = vsel %vm220_vm0, %v2879_v62, %v2927_v23 }
 0x706   : > { %2972 = vst.msk [vmem:[%s8152_s11 + $0x18] sm:$0xff] %vm2968_vm8, %v2955_v40  ;;  %v2885_v55 = vpop.xlane.xlu1 %2884 }
 0x708   : > { %v2883_v4 = vpop.xlane.xlu0 %2882 }
 0x70a   : > { %v2933_v48 = vpop.xlane.xlu1 %2932 }
 0x70b   : > { %v2958_v43 = vsel %vm220_vm0, %v2885_v55, %v2933_v48 }
 0x70c   : > { %2975 = vst.msk [vmem:[%s8152_s11 + $0x30] sm:$0xff] %vm2968_vm8, %v2958_v43  ;;  %v2931_v53 = vpop.xlane.xlu0 %2930 }
 0x70d   : > { %v2957_v22 = vsel %vm220_vm0, %v2883_v4, %v2931_v53 }
 0x70e   : > { %2974 = vst.msk [vmem:[%s8152_s11 + $0x28] sm:$0xff] %vm2968_vm8, %v2957_v22  ;;  %v2889_v60 = vpop.xlane.xlu1 %2888 }
 0x710   : > { %v2887_v25 = vpop.xlane.xlu0 %2886 }
 0x712   : > { %v2937_v47 = vpop.xlane.xlu1 %2936 }
 0x713   : > { %v2960_v58 = vsel %vm220_vm0, %v2889_v60, %v2937_v47 }
 0x714   : > { %2977 = vst.msk [vmem:[%s8152_s11 + $0x40] sm:$0xff] %vm2968_vm8, %v2960_v58  ;;  %v2935_v28 = vpop.xlane.xlu0 %2934 }
 0x715   : > { %v2959_v21 = vsel %vm220_vm0, %v2887_v25, %v2935_v28 }
 0x716   : > { %2976 = vst.msk [vmem:[%s8152_s11 + $0x38] sm:$0xff] %vm2968_vm8, %v2959_v21  ;;  %v2893_v10 = vpop.xlane.xlu1 %2892 }
 0x718   : > { %v2891_v12 = vpop.xlane.xlu0 %2890 }
 0x71a   : > { %v3159_v61 = vpop.permute.xlu1 %3158 }
 0x71b   : > { %3170 = vst.msk [vmem:[#allocation2] sm:$0xff] %vm405_vm6, %v3159_v61 }
 0x71c   : > { %3171 = vst.msk [vmem:[#allocation2 + $0x8] sm:$0xff] %vm384_vm5, %v3159_v61  ;;  %v2939_v13 = vpop.xlane.xlu0 %2938 }
 0x71d   : > { %3178 = vst.msk [vmem:[#allocation2 + $0x8] sm:$0xff] %vm414_vm7, %v13519_v41  ;;  %v2961_v30 = vsel %vm220_vm0, %v2891_v12, %v2939_v13 }
 0x71e   : > { %2978 = vst.msk [vmem:[%s8152_s11 + $0x48] sm:$0xff] %vm2968_vm8, %v2961_v30 }
 0x720   : > { %v2895_v3 = vpop.xlane.xlu0 %2894 }
 0x722   : > { %v10516_v6 = vld [vmem:[#allocation2] sm:$0xff] }
 0x724   : > { %v3161_v27 = vpop.permute.xlu0 %3160  ;;  %v3186_v50 = vld [vmem:[#allocation2 + $0x8] sm:$0xff] }
 0x725   : > { %3172 = vst.msk [vmem:[#allocation2 + $0x10] sm:$0xff] %vm405_vm6, %v3161_v27 }
 0x726   : > { %3173 = vst.msk [vmem:[#allocation2 + $0x18] sm:$0xff] %vm384_vm5, %v3161_v27 }
 0x727   : > { %3179 = vst.msk [vmem:[#allocation2 + $0x18] sm:$0xff] %vm414_vm7, %v13519_v41 }
 0x72c   : > { %v10484_v24 = vld [vmem:[#allocation2 + $0x10] sm:$0xff] }
 0x72d   : > { %3202 = vrot.lane.b32.xlu0 %v10484_v24, %s7895_s9 }
 0x72e   : > { %v3187_v54 = vld [vmem:[#allocation2 + $0x18] sm:$0xff] }
 0x72f   : > { %3204 = vrot.lane.b32.xlu1 %v3187_v54, %s7895_s9 }
 0x731   : > { %3226 = vrot.lane.b32.xlu0 %v10484_v24, %s13520_s10 }
 0x733   : > { %3228 = vrot.lane.b32.xlu1 %v3187_v54, %s13520_s10 }
 0x735   : > { %3250 = vrot.lane.b32.xlu0 %v10484_v24, %s13521_s7 }
 0x737   : > { %3252 = vrot.lane.b32.xlu1 %v3187_v54, %s13521_s7 }
 0x739   : > { %3298 = vrot.lane.b32.xlu0 %v10484_v24, %s13522_s23 }
 0x73b   : > { %3300 = vrot.lane.b32.xlu1 %v3187_v54, %s13522_s23 }
 0x73d   : > { %3656 = vrot.lane.b32.xlu0 %v10484_v24, %s13523_s22 }
 0x73f   : > { %3658 = vrot.lane.b32.xlu1 %v3187_v54, %s13523_s22 }
 0x741   : > { %3901 = vrot.lane.b32.xlu0 %v10484_v24, %s7903_s30 }
 0x743   : > { %3903 = vrot.lane.b32.xlu1 %v3187_v54, %s7903_s30 }
 0x745   : > { %4146 = vrot.lane.b32.xlu0 %v10484_v24, %s7904_s6 }
 0x747   : > { %4148 = vrot.lane.b32.xlu1 %v3187_v54, %s7904_s6 }
 0x749   : > { %4391 = vrot.lane.b32.xlu0 %v10484_v24, %s13524_s14 }
 0x74b   : > { %4393 = vrot.lane.b32.xlu1 %v3187_v54, %s13524_s14  ;;  %v2941_v2 = vpop.xlane.xlu1 %2940 }
 0x74c   : > { %v2962_v26 = vsel %vm220_vm0, %v2893_v10, %v2941_v2 }
 0x74d   : > { %2979 = vst.msk [vmem:[%s8152_s11 + $0x50] sm:$0xff] %vm2968_vm8, %v2962_v26  ;;  %4636 = vrot.lane.b32.xlu0 %v10484_v24, %s13077_s27 }
 0x74f   : > { %4638 = vrot.lane.b32.xlu1 %v3187_v54, %s13077_s27  ;;  %v3165_v33 = vpop.permute.xlu1 %3164 }
 0x750   : > { %3176 = vst.msk [vmem:[#allocation2 + $0x30] sm:$0xff] %vm405_vm6, %v3165_v33 }
 0x751   : > { %3177 = vst.msk [vmem:[#allocation2 + $0x38] sm:$0xff] %vm384_vm5, %v3165_v33  ;;  %3198 = vrot.lane.b32.xlu0 %v10516_v6, %s7895_s9 }
 0x752   : > { %3181 = vst.msk [vmem:[#allocation2 + $0x38] sm:$0xff] %vm414_vm7, %v13519_v41 }
 0x753   : > { %3200 = vrot.lane.b32.xlu1 %v3186_v50, %s7895_s9  ;;  %v3163_v18 = vpop.permute.xlu1 %3162 }
 0x754   : > { %3174 = vst.msk [vmem:[#allocation2 + $0x20] sm:$0xff] %vm405_vm6, %v3163_v18 }
 0x755   : > { %3175 = vst.msk [vmem:[#allocation2 + $0x28] sm:$0xff] %vm384_vm5, %v3163_v18  ;;  %v2943_v44 = vpop.xlane.xlu0 %2942  ;;  %3222 = vrot.lane.b32.xlu0 %v10516_v6, %s13520_s10 }
 0x756   : > { %3180 = vst.msk [vmem:[#allocation2 + $0x28] sm:$0xff] %vm414_vm7, %v13519_v41  ;;  %v2963_v17 = vsel %vm220_vm0, %v2895_v3, %v2943_v44 }
 0x757   : > { %3224 = vrot.lane.b32.xlu1 %v3186_v50, %s13520_s10  ;;  %2980 = vst.msk [vmem:[%s8152_s11 + $0x58] sm:$0xff] %vm2968_vm8, %v2963_v17  ;;  %v10555_v39 = vld [vmem:[#allocation2 + $0x30] sm:$0xff] }
 0x759   : > { %3246 = vrot.lane.b32.xlu0 %v10516_v6, %s13521_s7  ;;  %v3189_v32 = vld [vmem:[#allocation2 + $0x38] sm:$0xff] }
 0x75b   : > { %3248 = vrot.lane.b32.xlu1 %v3186_v50, %s13521_s7  ;;  %v10588_v31 = vld [vmem:[#allocation2 + $0x20] sm:$0xff] }
 0x75d   : > { %3294 = vrot.lane.b32.xlu0 %v10516_v6, %s13522_s23  ;;  %v10594_v51 = vld [vmem:[#allocation2 + $0x28] sm:$0xff] }
 0x75f   : > { %3296 = vrot.lane.b32.xlu1 %v3186_v50, %s13522_s23 }
 0x761   : > { %3652 = vrot.lane.b32.xlu0 %v10516_v6, %s13523_s22 }
 0x763   : > { %3654 = vrot.lane.b32.xlu1 %v3186_v50, %s13523_s22 }
 0x765   : > { %3897 = vrot.lane.b32.xlu0 %v10516_v6, %s7903_s30 }
 0x767   : > { %3899 = vrot.lane.b32.xlu1 %v3186_v50, %s7903_s30 }
 0x769   : > { %4142 = vrot.lane.b32.xlu0 %v10516_v6, %s7904_s6 }
 0x76b   : > { %4144 = vrot.lane.b32.xlu1 %v3186_v50, %s7904_s6 }
 0x76d   : > { %4387 = vrot.lane.b32.xlu0 %v10516_v6, %s13524_s14 }
 0x76f   : > { %4389 = vrot.lane.b32.xlu1 %v3186_v50, %s13524_s14 }
 0x771   : > { %4632 = vrot.lane.b32.xlu0 %v10516_v6, %s13077_s27 }
 0x773   : > { %4634 = vrot.lane.b32.xlu1 %v3186_v50, %s13077_s27 }
 0x775   : > { %3210 = vrot.lane.b32.xlu0 %v10555_v39, %s7895_s9 }
 0x777   : > { %4154 = vrot.lane.b32.xlu1 %v10555_v39, %s7904_s6 }
 0x779   : > { %3234 = vrot.lane.b32.xlu0 %v10555_v39, %s13520_s10 }
 0x77b   : > { %3212 = vrot.lane.b32.xlu1 %v3189_v32, %s7895_s9 }
 0x77d   : > { %3258 = vrot.lane.b32.xlu0 %v10555_v39, %s13521_s7 }
 0x77f   : > { %3236 = vrot.lane.b32.xlu1 %v3189_v32, %s13520_s10 }
 0x781   : > { %3306 = vrot.lane.b32.xlu0 %v10555_v39, %s13522_s23 }
 0x783   : > { %3260 = vrot.lane.b32.xlu1 %v3189_v32, %s13521_s7 }
 0x785   : > { %3664 = vrot.lane.b32.xlu0 %v10555_v39, %s13523_s22 }
 0x787   : > { %3308 = vrot.lane.b32.xlu1 %v3189_v32, %s13522_s23 }
 0x789   : > { %3909 = vrot.lane.b32.xlu0 %v10555_v39, %s7903_s30 }
 0x78b   : > { %3666 = vrot.lane.b32.xlu1 %v3189_v32, %s13523_s22 }
 0x78d   : > { %4399 = vrot.lane.b32.xlu0 %v10555_v39, %s13524_s14 }
 0x78f   : > { %3911 = vrot.lane.b32.xlu1 %v3189_v32, %s7903_s30 }
 0x791   : > { %4644 = vrot.lane.b32.xlu0 %v10555_v39, %s13077_s27 }
 0x793   : > { %4401 = vrot.lane.b32.xlu1 %v3189_v32, %s13524_s14 }
 0x795   : > { %4889 = vrot.lane.b32.xlu0 %v10555_v39, %s13078_s12 }
 0x797   : > { %4646 = vrot.lane.b32.xlu1 %v3189_v32, %s13077_s27 }
 0x799   : > { %4156 = vrot.lane.b32.xlu0 %v3189_v32, %s7904_s6 }
 0x79b   : > { %4891 = vrot.lane.b32.xlu1 %v3189_v32, %s13078_s12 }
 0x79d   : > { %3206 = vrot.lane.b32.xlu0 %v10588_v31, %s7895_s9 }
 0x79f   : > { %4150 = vrot.lane.b32.xlu1 %v10588_v31, %s7904_s6  ;;  %v3203_v16 = vpop.permute.xlu0 %3202 }
 0x7a1   : > { %v10596_v46 = vpop.permute.xlu1 %3204  ;;  %3230 = vrot.lane.b32.xlu0 %v10588_v31, %s13520_s10 }
 0x7a2   : > { %v10692_v7 = vsel %vm229_vm2, %v3203_v16, %v10596_v46 }
 0x7a3   : > { %3208 = vrot.lane.b32.xlu1 %v10594_v51, %s7895_s9  ;;  %v3227_v63 = vpop.permute.xlu0 %3226  ;;  %s13553_s9 = smov 96  }
 0x7a5   : > { %v10602_v49 = vpop.permute.xlu1 %3228  ;;  %3254 = vrot.lane.b32.xlu0 %v10588_v31, %s13521_s7 }
 0x7a6   : > { %v10704_v40 = vsel %vm237_vm3, %v3227_v63, %v10602_v49 }
 0x7a7   : > { %3232 = vrot.lane.b32.xlu1 %v10594_v51, %s13520_s10  ;;  %v3251_v8 = vpop.permute.xlu0 %3250  ;;  %s13660_s10 = smov 92  }
 0x7a9   : > { %v10608_v11 = vpop.permute.xlu1 %3252  ;;  %3302 = vrot.lane.b32.xlu0 %v10588_v31, %s13522_s23 }
 0x7aa   : > { %v10716_v48 = vsel %vm499_vm9, %v3251_v8, %v10608_v11 }
 0x7ab   : > { %3256 = vrot.lane.b32.xlu1 %v10594_v51, %s13521_s7  ;;  %v10614_v14 = vpop.permute.xlu0 %3298 }
 0x7ad   : > { %v10616_v5 = vpop.permute.xlu1 %3300  ;;  %3660 = vrot.lane.b32.xlu0 %v10588_v31, %s13523_s22 }
 0x7af   : > { %3304 = vrot.lane.b32.xlu1 %v10594_v51, %s13522_s23  ;;  %v10622_v37 = vpop.permute.xlu0 %3656 }
 0x7b0   : > { %13525 = vst [vmem:[#allocation165_spill] sm:$0xff] %v10622_v37  ;;  %v3017_v37 = vld [vmem:[%s13037_s1 + $0x20] sm:$0xff] }
 0x7b1   : > { %v10624_v19 = vpop.permute.xlu1 %3658  ;;  %3905 = vrot.lane.b32.xlu0 %v10588_v31, %s7903_s30  ;;  %7227 = vmatprep.mubr.msk.f32.mxu1 %vm254_vm1, %v3017_v37  ;;  %v3020_v37 = vld [vmem:[%s13037_s1 + $0x38] sm:$0xff] }
 0x7b2   : > { %13526 = vst [vmem:[#allocation175_spill] sm:$0xff] %v10624_v19  ;;  %v3018_v19 = vld [vmem:[%s13037_s1 + $0x28] sm:$0xff] }
 0x7b3   : > { %3662 = vrot.lane.b32.xlu1 %v10594_v51, %s13523_s22  ;;  %v10630_v57 = vpop.permute.xlu0 %3901  ;;  %7228 = vmatmul.mubr.msk.f32.gmra.mxu1 %vm254_vm1, %v3018_v19 }
 0x7b4   : > { %13527 = vst [vmem:[#allocation84_spill] sm:$0xff] %v10630_v57 }
 0x7b5   : > { %v10632_v29 = vpop.permute.xlu1 %3903  ;;  %4395 = vrot.lane.b32.xlu0 %v10588_v31, %s13524_s14 }
 0x7b6   : > { %13528 = vst [vmem:[#allocation91_spill] sm:$0xff] %v10632_v29 }
 0x7b7   : > { %3907 = vrot.lane.b32.xlu1 %v10594_v51, %s7903_s30  ;;  %v10638_v9 = vpop.permute.xlu0 %4146 }
 0x7b8   : > { %13529 = vst [vmem:[#allocation86_spill] sm:$0xff] %v10638_v9 }
 0x7b9   : > { %v10640_v52 = vpop.permute.xlu1 %4148  ;;  %4640 = vrot.lane.b32.xlu0 %v10588_v31, %s13077_s27 }
 0x7ba   : > { %13530 = vst [vmem:[#allocation95_spill] sm:$0xff] %v10640_v52 }
 0x7bb   : > { %4397 = vrot.lane.b32.xlu1 %v10594_v51, %s13524_s14  ;;  %v10646_v15 = vpop.permute.xlu0 %4391 }
 0x7bc   : > { %13531 = vst [vmem:[#allocation124_spill] sm:$0xff] %v10646_v15 }
 0x7bd   : > { %v10648_v0 = vpop.permute.xlu1 %4393  ;;  %4152 = vrot.lane.b32.xlu0 %v10594_v51, %s7904_s6 }
 0x7be   : > { %13532 = vst [vmem:[#allocation131_spill] sm:$0xff] %v10648_v0 }
 0x7bf   : > { %4642 = vrot.lane.b32.xlu1 %v10594_v51, %s13077_s27  ;;  %v10654_v36 = vpop.permute.xlu0 %4636 }
 0x7c0   : > { %13533 = vst [vmem:[#allocation126_spill] sm:$0xff] %v10654_v36 }
 0x7c1   : > { %v10656_v45 = vpop.permute.xlu1 %4638  ;;  %4196 = vrot.lane.b32.xlu0 %v10608_v11, %s7904_s6 }
 0x7c2   : > { %13534 = vst [vmem:[#allocation135_spill] sm:$0xff] %v10656_v45 }
 0x7c3   : > { %3316 = vrot.lane.b32.xlu1 %v10596_v46, %s13522_s23  ;;  %v10662_v42 = vpop.permute.xlu0 %3198 }
 0x7c5   : > { %v10664_v34 = vpop.permute.xlu1 %3200  ;;  %4180 = vrot.lane.b32.xlu0 %v10602_v49, %s7904_s6 }
 0x7c7   : > { %3332 = vrot.lane.b32.xlu1 %v10602_v49, %s13522_s23  ;;  %v10670_v35 = vpop.permute.xlu0 %3222 }
 0x7c9   : > { %v10672_v20 = vpop.permute.xlu1 %3224  ;;  %4164 = vrot.lane.b32.xlu0 %v10596_v46, %s7904_s6 }
 0x7cb   : > { %3348 = vrot.lane.b32.xlu1 %v10608_v11, %s13522_s23  ;;  %v10678_v62 = vpop.permute.xlu0 %3246 }
 0x7cd   : > { %v10680_v1 = vpop.permute.xlu1 %3248  ;;  %4441 = vrot.lane.b32.xlu0 %v10608_v11, %s13524_s14 }
 0x7cf   : > { %3674 = vrot.lane.b32.xlu1 %v10596_v46, %s13523_s22  ;;  %v10686_v38 = vpop.permute.xlu0 %3294 }
 0x7d1   : > { %v10688_v56 = vpop.permute.xlu1 %3296  ;;  %3314 = vrot.lane.b32.xlu0 %v10692_v7, %s13522_s23 }
 0x7d3   : > { %3690 = vrot.lane.b32.xlu1 %v10602_v49, %s13523_s22  ;;  %v10698_v59 = vpop.permute.xlu0 %3652 }
 0x7d4   : > { %13535 = vst [vmem:[#allocation162_spill] sm:$0xff] %v10698_v59 }
 0x7d5   : > { %v10700_v23 = vpop.permute.xlu1 %3654  ;;  %3330 = vrot.lane.b32.xlu0 %v10704_v40, %s13522_s23 }
 0x7d6   : > { %13536 = vst [vmem:[#allocation169_spill] sm:$0xff] %v10700_v23 }
 0x7d7   : > { %3706 = vrot.lane.b32.xlu1 %v10608_v11, %s13523_s22  ;;  %v10710_v55 = vpop.permute.xlu0 %3897 }
 0x7d8   : > { %13537 = vst [vmem:[#allocation164_spill] sm:$0xff] %v10710_v55 }
 0x7d9   : > { %v10712_v4 = vpop.permute.xlu1 %3899  ;;  %3346 = vrot.lane.b32.xlu0 %v10716_v48, %s13522_s23 }
 0x7da   : > { %13538 = vst [vmem:[#allocation173_spill] sm:$0xff] %v10712_v4 }
 0x7db   : > { %3919 = vrot.lane.b32.xlu1 %v10596_v46, %s7903_s30  ;;  %v10722_v43 = vpop.permute.xlu0 %4142 }
 0x7dc   : > { %13539 = vst [vmem:[#allocation83_spill] sm:$0xff] %v10722_v43 }
 0x7dd   : > { %v10724_v53 = vpop.permute.xlu1 %4144  ;;  %3672 = vrot.lane.b32.xlu0 %v10692_v7, %s13523_s22 }
 0x7de   : > { %13540 = vst [vmem:[#allocation89_spill] sm:$0xff] %v10724_v53 }
 0x7df   : > { %3935 = vrot.lane.b32.xlu1 %v10602_v49, %s7903_s30  ;;  %v10730_v22 = vpop.permute.xlu0 %4387 }
 0x7e0   : > { %13541 = vst [vmem:[#allocation85_spill] sm:$0xff] %v10730_v22 }
 0x7e1   : > { %v10732_v60 = vpop.permute.xlu1 %4389  ;;  %3688 = vrot.lane.b32.xlu0 %v10704_v40, %s13523_s22 }
 0x7e2   : > { %13542 = vst [vmem:[#allocation93_spill] sm:$0xff] %v10732_v60 }
 0x7e3   : > { %3951 = vrot.lane.b32.xlu1 %v10608_v11, %s7903_s30  ;;  %v10738_v25 = vpop.permute.xlu0 %4632 }
 0x7e4   : > { %13543 = vst [vmem:[#allocation122_spill] sm:$0xff] %v10738_v25 }
 0x7e5   : > { %v10740_v47 = vpop.permute.xlu1 %4634  ;;  %3704 = vrot.lane.b32.xlu0 %v10716_v48, %s13523_s22 }
 0x7e6   : > { %13544 = vst [vmem:[#allocation129_spill] sm:$0xff] %v10740_v47 }
 0x7e7   : > { %4425 = vrot.lane.b32.xlu1 %v10602_v49, %s13524_s14  ;;  %v10746_v58 = vpop.permute.xlu0 %3210 }
 0x7e9   : > { %v10748_v28 = vpop.permute.xlu1 %4154  ;;  %3917 = vrot.lane.b32.xlu0 %v10692_v7, %s7903_s30 }
 0x7ea   : > { %13545 = vst [vmem:[#allocation125_spill] sm:$0xff] %v10748_v28 }
 0x7eb   : > { %4409 = vrot.lane.b32.xlu1 %v10596_v46, %s13524_s14  ;;  %v10754_v21 = vpop.permute.xlu0 %3234 }
 0x7ed   : > { %v10756_v10 = vpop.permute.xlu1 %3212  ;;  %3933 = vrot.lane.b32.xlu0 %v10704_v40, %s7903_s30 }
 0x7ef   : > { %4686 = vrot.lane.b32.xlu1 %v10608_v11, %s13077_s27  ;;  %v3259_v12 = vpop.permute.xlu0 %3258 }
 0x7f1   : > { %v10762_v61 = vpop.permute.xlu1 %3236  ;;  %3949 = vrot.lane.b32.xlu0 %v10716_v48, %s7903_s30 }
 0x7f2   : > { %v10884_v60 = vsel %vm237_vm3, %v10754_v21, %v10762_v61 }
 0x7f3   : > { %4670 = vrot.lane.b32.xlu1 %v10602_v49, %s13077_s27  ;;  %v10768_v13 = vpop.permute.xlu0 %3306 }
 0x7f5   : > { %v10770_v41 = vpop.permute.xlu1 %3260  ;;  %4423 = vrot.lane.b32.xlu0 %v10704_v40, %s13524_s14 }
 0x7f6   : > { %v10776_v30 = vsel %vm499_vm9, %v3259_v12, %v10770_v41 }
 0x7f7   : > { %4654 = vrot.lane.b32.xlu1 %v10596_v46, %s13077_s27  ;;  %7283 = vmatprep.subr.mxu1 %v10776_v30  ;;  %v10781_v3 = vpop.permute.xlu0 %3664 }
 0x7f8   : > { %13546 = vst [vmem:[#allocation133_spill] sm:$0xff] %v10781_v3  ;;  %7284 = vmatpush3.msra.mxu1 %v10776_v30  ;;  %v3019_v3 = vld [vmem:[%s13037_s1 + $0x30] sm:$0xff] }
 0x7f9   : > { %v10784_v27 = vpop.permute.xlu1 %3308  ;;  %4407 = vrot.lane.b32.xlu0 %v10692_v7, %s13524_s14  ;;  %7230 = vmatprep.mubr.msk.f32.mxu1 %vm254_vm1, %v3019_v3  ;;  %v3271_v3 = vld [vmem:[%s13038_s2 + $0x8] sm:$0xff] }
 0x7fa   : > { %7231 = vmatmul.mubr.msk.f32.gmra.mxu1 %vm254_vm1, %v3020_v37  ;;  %vm13719_vm1 = vcmask 916480  }
 0x7fb   : > { %4931 = vrot.lane.b32.xlu1 %v10608_v11, %s13078_s12  ;;  %v10790_v54 = vpop.permute.xlu0 %3909  ;;  %vm13734_vm4 = vmmov %vm13719_vm1 }
 0x7fc   : > { %13547 = vst [vmem:[#allocation161_spill] sm:$0xff] %v10790_v54  ;;  %vm13739_vm5 = vmmov %vm13719_vm1 }
 0x7fd   : > { %v10792_v2 = vpop.permute.xlu1 %3666  ;;  %4684 = vrot.lane.b32.xlu0 %v10716_v48, %s13077_s27  ;;  %vm13741_vm6 = vmmov %vm13719_vm1 }
 0x7fe   : > { %13548 = vst [vmem:[#allocation167_spill] sm:$0xff] %v10792_v2  ;;  %vm13748_vm7 = vmmov %vm13719_vm1 }
 0x7ff   : > { %4915 = vrot.lane.b32.xlu1 %v10602_v49, %s13078_s12  ;;  %v10798_v26 = vpop.permute.xlu0 %4399 }
 0x800   : > { %13549 = vst [vmem:[#allocation52_spill] sm:$0xff] %v10798_v26  ;;  %v10908_v26 = vsel %vm229_vm2, %v10662_v42, %v10664_v34  ;;  %v10927_v42 = vsel %vm229_vm2, %v10746_v58, %v10756_v10 }
 0x801   : > { %v10800_v50 = vpop.permute.xlu1 %3911  ;;  %4668 = vrot.lane.b32.xlu0 %v10704_v40, %s13077_s27 }
 0x802   : > { %13550 = vst [vmem:[#allocation49_spill] sm:$0xff] %v10800_v50 }
 0x803   : > { %4899 = vrot.lane.b32.xlu1 %v10596_v46, %s13078_s12  ;;  %v10806_v33 = vpop.permute.xlu0 %4644 }
 0x804   : > { %13551 = vst [vmem:[#allocation68_spill] sm:$0xff] %v10806_v33 }
 0x805   : > { %v10808_v18 = vpop.permute.xlu1 %4401  ;;  %4652 = vrot.lane.b32.xlu0 %v10692_v7, %s13077_s27 }
 0x806   : > { %13552 = vst [vmem:[#allocation65_spill] sm:$0xff] %v10808_v18 }
 0x807   : > { %5176 = vrot.lane.b32.xlu1 %v10608_v11, %s13553_s9  ;;  %v10814_v44 = vpop.permute.xlu0 %4889 }
 0x808   : > { %13554 = vst [vmem:[#allocation82_spill] sm:$0xff] %v10814_v44 }
 0x809   : > { %v10816_v17 = vpop.permute.xlu1 %4646  ;;  %4929 = vrot.lane.b32.xlu0 %v10716_v48, %s13078_s12 }
 0x80a   : > { %13555 = vst [vmem:[#allocation87_spill] sm:$0xff] %v10816_v17 }
 0x80b   : > { %4194 = vrot.lane.b32.xlu1 %v10716_v48, %s7904_s6  ;;  %v10822_v32 = vpop.permute.xlu0 %4156 }
 0x80c   : > { %13556 = vst [vmem:[#allocation20_spill] sm:$0xff] %v10822_v32 }
 0x80d   : > { %v10824_v16 = vpop.permute.xlu1 %4891  ;;  %4913 = vrot.lane.b32.xlu0 %v10704_v40, %s13078_s12 }
 0x80e   : > { %13557 = vst [vmem:[#allocation17_spill] sm:$0xff] %v10824_v16 }
 0x80f   : > { %4178 = vrot.lane.b32.xlu1 %v10704_v40, %s7904_s6  ;;  %v3207_v63 = vpop.permute.xlu0 %3206 }
 0x811   : > { %v10830_v8 = vpop.permute.xlu1 %4150  ;;  %4897 = vrot.lane.b32.xlu0 %v10692_v7, %s13078_s12 }
 0x812   : > { %13558 = vst [vmem:[#allocation121_spill] sm:$0xff] %v10830_v8 }
 0x813   : > { %4162 = vrot.lane.b32.xlu1 %v10692_v7, %s7904_s6  ;;  %v3231_v12 = vpop.permute.xlu0 %3230 }
 0x815   : > { %v10836_v44 = vpop.permute.xlu1 %3208  ;;  %5174 = vrot.lane.b32.xlu0 %v10716_v48, %s13553_s9 }
 0x817   : > { %4439 = vrot.lane.b32.xlu1 %v10716_v48, %s13524_s14  ;;  %v3255_v16 = vpop.permute.xlu0 %3254 }
 0x819   : > { %v10842_v25 = vpop.permute.xlu1 %3232  ;;  %4192 = vrot.lane.b32.xlu0 %v10680_v1, %s7904_s6 }
 0x81b   : > { %3312 = vrot.lane.b32.xlu1 %v10664_v34, %s13522_s23  ;;  %v10848_v47 = vpop.permute.xlu0 %3302 }
 0x81d   : > { %v10850_v36 = vpop.permute.xlu1 %3256  ;;  %4176 = vrot.lane.b32.xlu0 %v10672_v20, %s7904_s6 }
 0x81e   : > { %v10856_v45 = vsel %vm499_vm9, %v3255_v16, %v10850_v36  ;;  %v10873_v16 = vsel %vm499_vm9, %v10678_v62, %v10680_v1  ;;  %v10894_v62 = vsel %vm237_vm3, %v3231_v12, %v10842_v25  ;;  %v10916_v12 = vsel %vm237_vm3, %v10670_v35, %v10672_v20  ;;  %vm13729_vm3 = vmmov %vm13719_vm1 }
 0x81f   : > { %3328 = vrot.lane.b32.xlu1 %v10672_v20, %s13522_s23  ;;  %7285 = vmatprep.subr.mxu1 %v10856_v45  ;;  %v10861_v33 = vpop.permute.xlu0 %3660  ;;  %v10937_v35 = vsel %vm229_vm2, %v3207_v63, %v10836_v44  ;;  %vm13723_vm2 = vmmov %vm13719_vm1 }
 0x820   : > { %13559 = vst [vmem:[#allocation127_spill] sm:$0xff] %v10861_v33  ;;  %7286 = vmatpush3.msra.mxu1 %v10856_v45  ;;  %vm13753_vm9 = vmmov %vm13719_vm1 }
 0x821   : > { %7287 = vmatprep.subr.mxu1 %v10716_v48  ;;  %v10865_v17 = vpop.permute.xlu1 %3304  ;;  %4160 = vrot.lane.b32.xlu0 %v10664_v34, %s7904_s6 }
 0x822   : > { %7288 = vmatpush3.msra.mxu1 %v10716_v48 }
 0x823   : > { %3344 = vrot.lane.b32.xlu1 %v10680_v1, %s13522_s23  ;;  %7289 = vmatprep.subr.mxu1 %v10873_v16  ;;  %v10878_v22 = vpop.permute.xlu0 %3905 }
 0x824   : > { %13560 = vst [vmem:[#allocation36_spill] sm:$0xff] %v10878_v22  ;;  %7290 = vmatpush3.msra.mxu1 %v10873_v16 }
 0x825   : > { %7291 = vmatprep.subr.mxu1 %v10884_v60  ;;  %v10887_v15 = vpop.permute.xlu1 %3662  ;;  %4437 = vrot.lane.b32.xlu0 %v10680_v1, %s13524_s14 }
 0x826   : > { %13561 = vst [vmem:[#allocation33_spill] sm:$0xff] %v10887_v15  ;;  %7292 = vmatpush3.msra.mxu1 %v10884_v60 }
 0x827   : > { %3670 = vrot.lane.b32.xlu1 %v10664_v34, %s13523_s22  ;;  %7293 = vmatprep.subr.mxu1 %v10894_v62  ;;  %v10899_v21 = vpop.permute.xlu0 %4395 }
 0x828   : > { %13562 = vst [vmem:[#allocation50_spill] sm:$0xff] %v10899_v21  ;;  %7294 = vmatpush3.msra.mxu1 %v10894_v62 }
 0x829   : > { %7295 = vmatprep.subr.mxu1 %v10704_v40  ;;  %v10903_v0 = vpop.permute.xlu1 %3907  ;;  %3310 = vrot.lane.b32.xlu0 %v10908_v26, %s13522_s23 }
 0x82a   : > { %13563 = vst [vmem:[#allocation47_spill] sm:$0xff] %v10903_v0  ;;  %7296 = vmatpush3.msra.mxu1 %v10704_v40 }
 0x82b   : > { %3686 = vrot.lane.b32.xlu1 %v10672_v20, %s13523_s22  ;;  %7297 = vmatprep.subr.mxu1 %v10916_v12  ;;  %v10921_v21 = vpop.permute.xlu0 %4640 }
 0x82c   : > { %13564 = vst [vmem:[#allocation155_spill] sm:$0xff] %v10921_v21  ;;  %7298 = vmatpush3.msra.mxu1 %v10916_v12 }
 0x82d   : > { %7299 = vmatprep.subr.mxu1 %v10927_v42  ;;  %v10930_v18 = vpop.permute.xlu1 %4397  ;;  %3326 = vrot.lane.b32.xlu0 %v10916_v12, %s13522_s23 }
 0x82e   : > { %13565 = vst [vmem:[#allocation184_spill] sm:$0xff] %v10930_v18  ;;  %7300 = vmatpush3.msra.mxu1 %v10927_v42 }
 0x82f   : > { %3702 = vrot.lane.b32.xlu1 %v10680_v1, %s13523_s22  ;;  %7301 = vmatprep.subr.mxu1 %v10937_v35  ;;  %v10942_v58 = vpop.permute.xlu0 %4152 }
 0x830   : > { %13566 = vst [vmem:[#allocation66_spill] sm:$0xff] %v10942_v58  ;;  %7302 = vmatpush3.msra.mxu1 %v10937_v35 }
 0x831   : > { %7303 = vmatprep.subr.mxu1 %v10692_v7  ;;  %v10946_v21 = vpop.permute.xlu1 %4642  ;;  %3342 = vrot.lane.b32.xlu0 %v10873_v16, %s13522_s23 }
 0x832   : > { %13567 = vst [vmem:[#allocation63_spill] sm:$0xff] %v10946_v21  ;;  %7304 = vmatpush3.msra.mxu1 %v10692_v7 }
 0x833   : > { %3915 = vrot.lane.b32.xlu1 %v10664_v34, %s7903_s30  ;;  %7305 = vmatprep.subr.mxu1 %v10908_v26  ;;  %v10954_v63 = vpop.permute.xlu0 %4196 }
 0x834   : > { %13568 = vst [vmem:[#allocation192_spill] sm:$0xff] %v10954_v63  ;;  %7306 = vmatpush3.msra.mxu1 %v10908_v26 }
 0x835   : > { %7307 = vmatprep.subr.mxu1 %v10555_v39  ;;  %v10958_v18 = vpop.permute.xlu1 %3316  ;;  %3668 = vrot.lane.b32.xlu0 %v10908_v26, %s13523_s22 }
 0x836   : > { %7308 = vmatpush3.msra.mxu1 %v10555_v39 }
 0x837   : > { %3931 = vrot.lane.b32.xlu1 %v10672_v20, %s7903_s30  ;;  %7309 = vmatprep.subr.mxu1 %v10588_v31  ;;  %v10966_v21 = vpop.permute.xlu0 %4180 }
 0x838   : > { %13569 = vst [vmem:[#allocation18_spill] sm:$0xff] %v10966_v21  ;;  %7310 = vmatpush3.msra.mxu1 %v10588_v31 }
 0x839   : > { %7311 = vmatprep.subr.mxu1 %v10484_v24  ;;  %v10970_v43 = vpop.permute.xlu1 %3332  ;;  %3684 = vrot.lane.b32.xlu0 %v10916_v12, %s13523_s22 }
 0x83a   : > { %7312 = vmatpush3.msra.mxu1 %v10484_v24 }
 0x83b   : > { %3947 = vrot.lane.b32.xlu1 %v10680_v1, %s7903_s30  ;;  %7313 = vmatprep.subr.mxu1 %v10516_v6  ;;  %v10978_v39 = vpop.permute.xlu0 %4164 }
 0x83c   : > { %13570 = vst [vmem:[#allocation15_spill] sm:$0xff] %v10978_v39  ;;  %7314 = vmatpush3.msra.mxu1 %v10516_v6 }
 0x83d   : > { %v10981_v53 = vpop.permute.xlu1 %3348  ;;  %3700 = vrot.lane.b32.xlu0 %v10873_v16, %s13523_s22 }
 0x83f   : > { %4421 = vrot.lane.b32.xlu1 %v10672_v20, %s13524_s14  ;;  %v10987_v9 = vpop.permute.xlu0 %4441 }
 0x840   : > { %13571 = vst [vmem:[#allocation76_spill] sm:$0xff] %v10987_v9 }
 0x841   : > { %v10989_v52 = vpop.permute.xlu1 %3674  ;;  %3913 = vrot.lane.b32.xlu0 %v10908_v26, %s7903_s30 }
 0x842   : > { %13572 = vst [vmem:[#allocation106_spill] sm:$0xff] %v10989_v52 }
 0x843   : > { %4405 = vrot.lane.b32.xlu1 %v10664_v34, %s13524_s14  ;;  %v10995_v8 = vpop.permute.xlu0 %3314 }
 0x845   : > { %v10997_v58 = vpop.permute.xlu1 %3690  ;;  %3929 = vrot.lane.b32.xlu0 %v10916_v12, %s7903_s30 }
 0x846   : > { %13573 = vst [vmem:[#allocation34_spill] sm:$0xff] %v10997_v58  ;;  %v3275_v58 = vld [vmem:[%s13038_s2 + $0x28] sm:$0xff] }
 0x847   : > { %4682 = vrot.lane.b32.xlu1 %v10680_v1, %s13077_s27  ;;  %v11003_v28 = vpop.permute.xlu0 %3330 }
 0x849   : > { %v11005_v32 = vpop.permute.xlu1 %3706  ;;  %3945 = vrot.lane.b32.xlu0 %v10873_v16, %s7903_s30 }
 0x84b   : > { %4666 = vrot.lane.b32.xlu1 %v10672_v20, %s13077_s27  ;;  %v11011_v9 = vpop.permute.xlu0 %3346 }
 0x84d   : > { %v11013_v39 = vpop.permute.xlu1 %3919  ;;  %4419 = vrot.lane.b32.xlu0 %v10916_v12, %s13524_s14 }
 0x84e   : > { %13574 = vst [vmem:[#allocation31_spill] sm:$0xff] %v11013_v39 }
 0x84f   : > { %4650 = vrot.lane.b32.xlu1 %v10664_v34, %s13077_s27  ;;  %v11019_v55 = vpop.permute.xlu0 %3672 }
 0x850   : > { %13575 = vst [vmem:[#allocation114_spill] sm:$0xff] %v11019_v55 }
 0x851   : > { %v11021_v4 = vpop.permute.xlu1 %3935  ;;  %4403 = vrot.lane.b32.xlu0 %v10908_v26, %s13524_s14 }
 0x852   : > { %13576 = vst [vmem:[#allocation146_spill] sm:$0xff] %v11021_v4 }
 0x853   : > { %4927 = vrot.lane.b32.xlu1 %v10680_v1, %s13078_s12  ;;  %v11027_v21 = vpop.permute.xlu0 %3688 }
 0x854   : > { %13577 = vst [vmem:[#allocation172_spill] sm:$0xff] %v11027_v21 }
 0x855   : > { %v11029_v57 = vpop.permute.xlu1 %3951  ;;  %4680 = vrot.lane.b32.xlu0 %v10873_v16, %s13077_s27 }
 0x856   : > { %13578 = vst [vmem:[#allocation183_spill] sm:$0xff] %v11029_v57 }
 0x857   : > { %4911 = vrot.lane.b32.xlu1 %v10672_v20, %s13078_s12  ;;  %v11035_v29 = vpop.permute.xlu0 %3704 }
 0x859   : > { %v11037_v22 = vpop.permute.xlu1 %4425  ;;  %4664 = vrot.lane.b32.xlu0 %v10916_v12, %s13077_s27 }
 0x85a   : > { %13579 = vst [vmem:[#allocation154_spill] sm:$0xff] %v11037_v22 }
 0x85b   : > { %4895 = vrot.lane.b32.xlu1 %v10664_v34, %s13078_s12  ;;  %v11043_v0 = vpop.permute.xlu0 %3917 }
 0x85c   : > { %13580 = vst [vmem:[#allocation182_spill] sm:$0xff] %v11043_v0 }
 0x85d   : > { %v11045_v54 = vpop.permute.xlu1 %4409  ;;  %4648 = vrot.lane.b32.xlu0 %v10908_v26, %s13077_s27 }
 0x85e   : > { %13581 = vst [vmem:[#allocation191_spill] sm:$0xff] %v11045_v54 }
 0x85f   : > { %5172 = vrot.lane.b32.xlu1 %v10680_v1, %s13553_s9  ;;  %v11051_v50 = vpop.permute.xlu0 %3933 }
 0x860   : > { %13582 = vst [vmem:[#allocation94_spill] sm:$0xff] %v11051_v50 }
 0x861   : > { %v11053_v63 = vpop.permute.xlu1 %4686  ;;  %4925 = vrot.lane.b32.xlu0 %v10873_v16, %s13078_s12 }
 0x862   : > { %13583 = vst [vmem:[#allocation103_spill] sm:$0xff] %v11053_v63 }
 0x863   : > { %4190 = vrot.lane.b32.xlu1 %v10873_v16, %s7904_s6  ;;  %v11059_v22 = vpop.permute.xlu0 %3949 }
 0x864   : > { %13584 = vst [vmem:[#allocation75_spill] sm:$0xff] %v11059_v22 }
 0x865   : > { %v11061_v0 = vpop.permute.xlu1 %4670  ;;  %4909 = vrot.lane.b32.xlu0 %v10916_v12, %s13078_s12 }
 0x866   : > { %13585 = vst [vmem:[#allocation104_spill] sm:$0xff] %v11061_v0 }
 0x867   : > { %4174 = vrot.lane.b32.xlu1 %v10916_v12, %s7904_s6  ;;  %v11067_v54 = vpop.permute.xlu0 %4423 }
 0x868   : > { %13586 = vst [vmem:[#allocation134_spill] sm:$0xff] %v11067_v54 }
 0x869   : > { %v11069_v39 = vpop.permute.xlu1 %4654  ;;  %4893 = vrot.lane.b32.xlu0 %v10908_v26, %s13078_s12 }
 0x86a   : > { %13587 = vst [vmem:[#allocation143_spill] sm:$0xff] %v11069_v39 }
 0x86b   : > { %4158 = vrot.lane.b32.xlu1 %v10908_v26, %s7904_s6  ;;  %v11075_v63 = vpop.permute.xlu0 %4407 }
 0x86c   : > { %13588 = vst [vmem:[#allocation113_spill] sm:$0xff] %v11075_v63 }
 0x86d   : > { %v11077_v59 = vpop.permute.xlu1 %4931  ;;  %5170 = vrot.lane.b32.xlu0 %v10873_v16, %s13553_s9 }
 0x86e   : > { %13589 = vst [vmem:[#allocation144_spill] sm:$0xff] %v11077_v59 }
 0x86f   : > { %4435 = vrot.lane.b32.xlu1 %v10873_v16, %s13524_s14  ;;  %v11083_v0 = vpop.permute.xlu0 %4684 }
 0x870   : > { %13590 = vst [vmem:[#allocation170_spill] sm:$0xff] %v11083_v0 }
 0x871   : > { %v11085_v54 = vpop.permute.xlu1 %4915  ;;  %3959 = vrot.lane.b32.xlu0 %v10770_v41, %s7903_s30 }
 0x872   : > { %13591 = vst [vmem:[#allocation181_spill] sm:$0xff] %v11085_v54 }
 0x873   : > { %3324 = vrot.lane.b32.xlu1 %v10756_v10, %s13522_s23  ;;  %v11091_v39 = vpop.permute.xlu0 %4668 }
 0x874   : > { %13592 = vst [vmem:[#allocation153_spill] sm:$0xff] %v11091_v39 }
 0x875   : > { %v11093_v63 = vpop.permute.xlu1 %4899  ;;  %4204 = vrot.lane.b32.xlu0 %v10770_v41, %s7904_s6 }
 0x876   : > { %13593 = vst [vmem:[#allocation180_spill] sm:$0xff] %v11093_v63 }
 0x877   : > { %3340 = vrot.lane.b32.xlu1 %v10762_v61, %s13522_s23  ;;  %v11099_v59 = vpop.permute.xlu0 %4652 }
 0x878   : > { %13594 = vst [vmem:[#allocation92_spill] sm:$0xff] %v11099_v59 }
 0x879   : > { %v11101_v0 = vpop.permute.xlu1 %5176  ;;  %4188 = vrot.lane.b32.xlu0 %v10762_v61, %s7904_s6 }
 0x87a   : > { %13595 = vst [vmem:[#allocation101_spill] sm:$0xff] %v11101_v0 }
 0x87b   : > { %3356 = vrot.lane.b32.xlu1 %v10770_v41, %s13522_s23  ;;  %v11107_v54 = vpop.permute.xlu0 %4929 }
 0x87c   : > { %13596 = vst [vmem:[#allocation96_spill] sm:$0xff] %v11107_v54 }
 0x87d   : > { %v11109_v39 = vpop.permute.xlu1 %4194  ;;  %4172 = vrot.lane.b32.xlu0 %v10756_v10, %s7904_s6 }
 0x87e   : > { %13597 = vst [vmem:[#allocation105_spill] sm:$0xff] %v11109_v39 }
 0x87f   : > { %3682 = vrot.lane.b32.xlu1 %v10756_v10, %s13523_s22  ;;  %v11115_v63 = vpop.permute.xlu0 %4913 }
 0x880   : > { %13598 = vst [vmem:[#allocation132_spill] sm:$0xff] %v11115_v63 }
 0x881   : > { %v11117_v59 = vpop.permute.xlu1 %4178  ;;  %4449 = vrot.lane.b32.xlu0 %v10770_v41, %s13524_s14 }
 0x882   : > { %13599 = vst [vmem:[#allocation141_spill] sm:$0xff] %v11117_v59 }
 0x883   : > { %3698 = vrot.lane.b32.xlu1 %v10762_v61, %s13523_s22  ;;  %v11123_v0 = vpop.permute.xlu0 %4897 }
 0x884   : > { %13600 = vst [vmem:[#allocation136_spill] sm:$0xff] %v11123_v0 }
 0x885   : > { %v11125_v54 = vpop.permute.xlu1 %4162  ;;  %4433 = vrot.lane.b32.xlu0 %v10762_v61, %s13524_s14 }
 0x886   : > { %13601 = vst [vmem:[#allocation145_spill] sm:$0xff] %v11125_v54 }
 0x887   : > { %3714 = vrot.lane.b32.xlu1 %v10770_v41, %s13523_s22  ;;  %v11131_v39 = vpop.permute.xlu0 %5174 }
 0x888   : > { %13602 = vst [vmem:[#allocation168_spill] sm:$0xff] %v11131_v39 }
 0x889   : > { %v11133_v63 = vpop.permute.xlu1 %4439  ;;  %3322 = vrot.lane.b32.xlu0 %v10927_v42, %s13522_s23 }
 0x88a   : > { %13603 = vst [vmem:[#allocation179_spill] sm:$0xff] %v11133_v63 }
 0x88b   : > { %3927 = vrot.lane.b32.xlu1 %v10756_v10, %s7903_s30  ;;  %v11139_v59 = vpop.permute.xlu0 %4192 }
 0x88c   : > { %13604 = vst [vmem:[#allocation56_spill] sm:$0xff] %v11139_v59 }
 0x88d   : > { %v11141_v0 = vpop.permute.xlu1 %3312  ;;  %3338 = vrot.lane.b32.xlu0 %v10884_v60, %s13522_s23 }
 0x88f   : > { %3943 = vrot.lane.b32.xlu1 %v10762_v61, %s7903_s30  ;;  %v11147_v54 = vpop.permute.xlu0 %4176 }
 0x890   : > { %13605 = vst [vmem:[#allocation53_spill] sm:$0xff] %v11147_v54 }
 0x891   : > { %v11149_v39 = vpop.permute.xlu1 %3328  ;;  %3354 = vrot.lane.b32.xlu0 %v10776_v30, %s13522_s23 }
 0x893   : > { %4417 = vrot.lane.b32.xlu1 %v10756_v10, %s13524_s14  ;;  %v11155_v63 = vpop.permute.xlu0 %4160 }
 0x894   : > { %13606 = vst [vmem:[#allocation72_spill] sm:$0xff] %v11155_v63 }
 0x895   : > { %v11157_v59 = vpop.permute.xlu1 %3344  ;;  %3680 = vrot.lane.b32.xlu0 %v10927_v42, %s13523_s22 }
 0x897   : > { %4694 = vrot.lane.b32.xlu1 %v10770_v41, %s13077_s27  ;;  %v11163_v23 = vpop.permute.xlu0 %4437 }
 0x898   : > { %13607 = vst [vmem:[#allocation69_spill] sm:$0xff] %v11163_v23 }
 0x899   : > { %v11165_v54 = vpop.permute.xlu1 %3670  ;;  %3696 = vrot.lane.b32.xlu0 %v10884_v60, %s13523_s22 }
 0x89a   : > { %13608 = vst [vmem:[#allocation90_spill] sm:$0xff] %v11165_v54 }
 0x89b   : > { %4678 = vrot.lane.b32.xlu1 %v10762_v61, %s13077_s27  ;;  %v11171_v50 = vpop.permute.xlu0 %3310 }
 0x89d   : > { %v11173_v63 = vpop.permute.xlu1 %3686  ;;  %3712 = vrot.lane.b32.xlu0 %v10776_v30, %s13523_s22 }
 0x89e   : > { %13609 = vst [vmem:[#allocation99_spill] sm:$0xff] %v11173_v63 }
 0x89f   : > { %4662 = vrot.lane.b32.xlu1 %v10756_v10, %s13077_s27  ;;  %v11179_v4 = vpop.permute.xlu0 %3326 }
 0x8a1   : > { %v11181_v23 = vpop.permute.xlu1 %3702  ;;  %3925 = vrot.lane.b32.xlu0 %v10927_v42, %s7903_s30 }
 0x8a3   : > { %4939 = vrot.lane.b32.xlu1 %v10770_v41, %s13078_s12  ;;  %v11194_v33 = vpop.permute.xlu0 %3342 }
 0x8a5   : > { %v11197_v15 = vpop.permute.xlu1 %3915  ;;  %3941 = vrot.lane.b32.xlu0 %v10884_v60, %s7903_s30 }
 0x8a6   : > { %13610 = vst [vmem:[#allocation24_spill] sm:$0xff] %v11197_v15  ;;  %v3270_v15 = vld [vmem:[%s13038_s2] sm:$0xff] }
 0x8a7   : > { %4923 = vrot.lane.b32.xlu1 %v10762_v61, %s13078_s12  ;;  %v11210_v2 = vpop.permute.xlu0 %3668  ;;  %7315 = vmatprep.mubr.f32.mxu1 %v3270_v15 }
 0x8a8   : > { %13611 = vst [vmem:[#allocation21_spill] sm:$0xff] %v11210_v2  ;;  %7316 = vmatmul.mubr.f32.vlgmr.msra.gmra.mxu1 %v3271_v3 }
 0x8a9   : > { %v11213_v19 = vpop.permute.xlu1 %3931  ;;  %4415 = vrot.lane.b32.xlu0 %v10927_v42, %s13524_s14 }
 0x8aa   : > { %13612 = vst [vmem:[#allocation130_spill] sm:$0xff] %v11213_v19 }
 0x8ab   : > { %4907 = vrot.lane.b32.xlu1 %v10756_v10, %s13078_s12  ;;  %v11225_v2 = vpop.permute.xlu0 %3684 }
 0x8ac   : > { %13613 = vst [vmem:[#allocation139_spill] sm:$0xff] %v11225_v2 }
 0x8ad   : > { %v11227_v37 = vpop.permute.xlu1 %3947  ;;  %4692 = vrot.lane.b32.xlu0 %v10776_v30, %s13077_s27 }
 0x8ae   : > { %13614 = vst [vmem:[#allocation40_spill] sm:$0xff] %v11227_v37 }
 0x8af   : > { %5184 = vrot.lane.b32.xlu1 %v10770_v41, %s13553_s9  ;;  %v11233_v19 = vpop.permute.xlu0 %3700 }
 0x8b1   : > { %v11235_v54 = vpop.permute.xlu1 %4421  ;;  %4676 = vrot.lane.b32.xlu0 %v10884_v60, %s13077_s27 }
 0x8b2   : > { %13615 = vst [vmem:[#allocation37_spill] sm:$0xff] %v11235_v54 }
 0x8b3   : > { %5168 = vrot.lane.b32.xlu1 %v10762_v61, %s13553_s9  ;;  %v11241_v15 = vpop.permute.xlu0 %3913 }
 0x8b4   : > { %13616 = vst [vmem:[#allocation54_spill] sm:$0xff] %v11241_v15 }
 0x8b5   : > { %v11243_v3 = vpop.permute.xlu1 %4405  ;;  %4660 = vrot.lane.b32.xlu0 %v10927_v42, %s13077_s27 }
 0x8b6   : > { %13617 = vst [vmem:[#allocation51_spill] sm:$0xff] %v11243_v3 }
 0x8b7   : > { %3957 = vrot.lane.b32.xlu1 %v10776_v30, %s7903_s30  ;;  %v11249_v37 = vpop.permute.xlu0 %3929 }
 0x8b8   : > { %13618 = vst [vmem:[#allocation159_spill] sm:$0xff] %v11249_v37 }
 0x8b9   : > { %v11251_v22 = vpop.permute.xlu1 %4682  ;;  %4937 = vrot.lane.b32.xlu0 %v10776_v30, %s13078_s12 }
 0x8ba   : > { %13619 = vst [vmem:[#allocation190_spill] sm:$0xff] %v11251_v22 }
 0x8bb   : > { %4202 = vrot.lane.b32.xlu1 %v10776_v30, %s7904_s6  ;;  %v11257_v54 = vpop.permute.xlu0 %3945 }
 0x8bc   : > { %13620 = vst [vmem:[#allocation70_spill] sm:$0xff] %v11257_v54 }
 0x8bd   : > { %v11259_v15 = vpop.permute.xlu1 %4666  ;;  %4921 = vrot.lane.b32.xlu0 %v10884_v60, %s13078_s12 }
 0x8be   : > { %13621 = vst [vmem:[#allocation67_spill] sm:$0xff] %v11259_v15 }
 0x8bf   : > { %4186 = vrot.lane.b32.xlu1 %v10884_v60, %s7904_s6  ;;  %v11265_v3 = vpop.permute.xlu0 %4419 }
 0x8c0   : > { %13622 = vst [vmem:[#allocation195_spill] sm:$0xff] %v11265_v3 }
 0x8c1   : > { %v11267_v37 = vpop.permute.xlu1 %4650  ;;  %4905 = vrot.lane.b32.xlu0 %v10927_v42, %s13078_s12 }
 0x8c2   : > { %13623 = vst [vmem:[#allocation22_spill] sm:$0xff] %v11267_v37 }
 0x8c3   : > { %4170 = vrot.lane.b32.xlu1 %v10927_v42, %s7904_s6  ;;  %v11273_v22 = vpop.permute.xlu0 %4403 }
 0x8c4   : > { %13624 = vst [vmem:[#allocation19_spill] sm:$0xff] %v11273_v22 }
 0x8c5   : > { %v11275_v54 = vpop.permute.xlu1 %4927  ;;  %5182 = vrot.lane.b32.xlu0 %v10776_v30, %s13553_s9 }
 0x8c6   : > { %13625 = vst [vmem:[#allocation80_spill] sm:$0xff] %v11275_v54 }
 0x8c7   : > { %4447 = vrot.lane.b32.xlu1 %v10776_v30, %s13524_s14  ;;  %v11281_v15 = vpop.permute.xlu0 %4680 }
 0x8c8   : > { %13626 = vst [vmem:[#allocation112_spill] sm:$0xff] %v11281_v15 }
 0x8c9   : > { %v11283_v3 = vpop.permute.xlu1 %4911  ;;  %5166 = vrot.lane.b32.xlu0 %v10884_v60, %s13553_s9 }
 0x8ca   : > { %13627 = vst [vmem:[#allocation38_spill] sm:$0xff] %v11283_v3 }
 0x8cb   : > { %4431 = vrot.lane.b32.xlu1 %v10884_v60, %s13524_s14  ;;  %v11289_v37 = vpop.permute.xlu0 %4664 }
 0x8cc   : > { %13628 = vst [vmem:[#allocation35_spill] sm:$0xff] %v11289_v37 }
 0x8cd   : > { %v11291_v22 = vpop.permute.xlu1 %4895  ;;  %3955 = vrot.lane.b32.xlu0 %v10850_v36, %s7903_s30 }
 0x8ce   : > { %13629 = vst [vmem:[#allocation118_spill] sm:$0xff] %v11291_v22 }
 0x8cf   : > { %3320 = vrot.lane.b32.xlu1 %v10836_v44, %s13522_s23  ;;  %v11297_v54 = vpop.permute.xlu0 %4648 }
 0x8d0   : > { %13630 = vst [vmem:[#allocation152_spill] sm:$0xff] %v11297_v54 }
 0x8d1   : > { %v11299_v15 = vpop.permute.xlu1 %5172  ;;  %4200 = vrot.lane.b32.xlu0 %v10850_v36, %s7904_s6 }
 0x8d2   : > { %13631 = vst [vmem:[#allocation174_spill] sm:$0xff] %v11299_v15 }
 0x8d3   : > { %3336 = vrot.lane.b32.xlu1 %v10842_v25, %s13522_s23  ;;  %v11305_v3 = vpop.permute.xlu0 %4925 }
 0x8d4   : > { %13632 = vst [vmem:[#allocation185_spill] sm:$0xff] %v11305_v3 }
 0x8d5   : > { %v11307_v37 = vpop.permute.xlu1 %4190  ;;  %4184 = vrot.lane.b32.xlu0 %v10842_v25, %s7904_s6 }
 0x8d6   : > { %13633 = vst [vmem:[#allocation158_spill] sm:$0xff] %v11307_v37 }
 0x8d7   : > { %3352 = vrot.lane.b32.xlu1 %v10850_v36, %s13522_s23  ;;  %v11313_v22 = vpop.permute.xlu0 %4909 }
 0x8d8   : > { %13634 = vst [vmem:[#allocation188_spill] sm:$0xff] %v11313_v22 }
 0x8d9   : > { %v11315_v54 = vpop.permute.xlu1 %4174  ;;  %4168 = vrot.lane.b32.xlu0 %v10836_v44, %s7904_s6 }
 0x8da   : > { %13635 = vst [vmem:[#allocation194_spill] sm:$0xff] %v11315_v54 }
 0x8db   : > { %3678 = vrot.lane.b32.xlu1 %v10836_v44, %s13523_s22  ;;  %v11321_v15 = vpop.permute.xlu0 %4893 }
 0x8dc   : > { %13636 = vst [vmem:[#allocation98_spill] sm:$0xff] %v11321_v15 }
 0x8dd   : > { %v11323_v3 = vpop.permute.xlu1 %4158  ;;  %4445 = vrot.lane.b32.xlu0 %v10850_v36, %s13524_s14 }
 0x8de   : > { %13637 = vst [vmem:[#allocation107_spill] sm:$0xff] %v11323_v3 }
 0x8df   : > { %3694 = vrot.lane.b32.xlu1 %v10842_v25, %s13523_s22  ;;  %v11329_v37 = vpop.permute.xlu0 %5170 }
 0x8e0   : > { %13638 = vst [vmem:[#allocation78_spill] sm:$0xff] %v11329_v37 }
 0x8e1   : > { %v11331_v22 = vpop.permute.xlu1 %4435  ;;  %4429 = vrot.lane.b32.xlu0 %v10842_v25, %s13524_s14 }
 0x8e2   : > { %13639 = vst [vmem:[#allocation110_spill] sm:$0xff] %v11331_v22 }
 0x8e3   : > { %3710 = vrot.lane.b32.xlu1 %v10850_v36, %s13523_s22  ;;  %v11337_v54 = vpop.permute.xlu0 %3959 }
 0x8e5   : > { %v11339_v15 = vpop.permute.xlu1 %3324  ;;  %3318 = vrot.lane.b32.xlu0 %v10937_v35, %s13522_s23 }
 0x8e7   : > { %3923 = vrot.lane.b32.xlu1 %v10836_v44, %s7903_s30  ;;  %v11345_v3 = vpop.permute.xlu0 %4204 }
 0x8e8   : > { %13640 = vst [vmem:[#allocation138_spill] sm:$0xff] %v11345_v3 }
 0x8e9   : > { %v11347_v37 = vpop.permute.xlu1 %3340  ;;  %3334 = vrot.lane.b32.xlu0 %v10894_v62, %s13522_s23 }
 0x8eb   : > { %3939 = vrot.lane.b32.xlu1 %v10842_v25, %s7903_s30  ;;  %v11353_v22 = vpop.permute.xlu0 %4188 }
 0x8ec   : > { %13641 = vst [vmem:[#allocation147_spill] sm:$0xff] %v11353_v22 }
 0x8ed   : > { %v3357_v57 = vpop.permute.xlu1 %3356  ;;  %3350 = vrot.lane.b32.xlu0 %v10856_v45, %s13522_s23 }
 0x8ef   : > { %4413 = vrot.lane.b32.xlu1 %v10836_v44, %s13524_s14  ;;  %v11359_v55 = vpop.permute.xlu0 %4172 }
 0x8f0   : > { %13642 = vst [vmem:[#allocation116_spill] sm:$0xff] %v11359_v55 }
 0x8f1   : > { %v11361_v3 = vpop.permute.xlu1 %3682  ;;  %4885 = vrot.lane.b32.xlu0 %v10588_v31, %s13078_s12 }
 0x8f2   : > { %13643 = vst [vmem:[#allocation150_spill] sm:$0xff] %v11361_v3 }
 0x8f3   : > { %4690 = vrot.lane.b32.xlu1 %v10850_v36, %s13077_s27  ;;  %v11367_v52 = vpop.permute.xlu0 %4449 }
 0x8f4   : > { %13644 = vst [vmem:[#allocation176_spill] sm:$0xff] %v11367_v52 }
 0x8f5   : > { %v11369_v22 = vpop.permute.xlu1 %3698  ;;  %4881 = vrot.lane.b32.xlu0 %v10484_v24, %s13078_s12  ;;  %v5978_v24 = vld [vmem:[%s13038_s2 + $0x60] sm:$0xff] }
 0x8f6   : > { %7265 = vmatprep.mubr.f32.mxu0 %v5978_v24 }
 0x8f7   : > { %4674 = vrot.lane.b32.xlu1 %v10842_v25, %s13077_s27  ;;  %v11375_v2 = vpop.permute.xlu0 %4433 }
 0x8f8   : > { %13645 = vst [vmem:[#allocation187_spill] sm:$0xff] %v11375_v2 }
 0x8f9   : > { %v11377_v55 = vpop.permute.xlu1 %3714  ;;  %5158 = vrot.lane.b32.xlu0 %v10704_v40, %s13553_s9 }
 0x8fb   : > { %4658 = vrot.lane.b32.xlu1 %v10836_v44, %s13077_s27  ;;  %v11383_v3 = vpop.permute.xlu0 %3322 }
 0x8fd   : > { %v11385_v52 = vpop.permute.xlu1 %3927  ;;  %4877 = vrot.lane.b32.xlu0 %v10516_v6, %s13078_s12 }
 0x8fe   : > { %13646 = vst [vmem:[#allocation156_spill] sm:$0xff] %v11385_v52 }
 0x8ff   : > { %4935 = vrot.lane.b32.xlu1 %v10850_v36, %s13078_s12  ;;  %v11394_v2 = vpop.permute.xlu0 %3338 }
 0x901   : > { %v11396_v63 = vpop.permute.xlu1 %3943  ;;  %3676 = vrot.lane.b32.xlu0 %v10937_v35, %s13523_s22 }
 0x902   : > { %13647 = vst [vmem:[#allocation186_spill] sm:$0xff] %v11396_v63 }
 0x903   : > { %4919 = vrot.lane.b32.xlu1 %v10842_v25, %s13078_s12  ;;  %v3355_v52 = vpop.permute.xlu0 %3354 }
 0x904   : > { %v3373_v21 = vsel %vm597_vm10, %v3355_v52, %v3357_v57 }
 0x905   : > { %v11402_v6 = vpop.permute.xlu1 %4417  ;;  %3692 = vrot.lane.b32.xlu0 %v10894_v62, %s13523_s22  ;;  %7233 = vmatprep.subr.mxu0 %v3373_v21 }
 0x906   : > { %13648 = vst [vmem:[#allocation193_spill] sm:$0xff] %v11402_v6  ;;  %7234 = vmatpush3.msra.mxu0 %v3373_v21 }
 0x907   : > { %4903 = vrot.lane.b32.xlu1 %v10836_v44, %s13078_s12  ;;  %v11409_v24 = vpop.permute.xlu0 %3680 }
 0x908   : > { %13649 = vst [vmem:[#allocation100_spill] sm:$0xff] %v11409_v24 }
 0x909   : > { %v11411_v63 = vpop.permute.xlu1 %4694  ;;  %3708 = vrot.lane.b32.xlu0 %v10856_v45, %s13523_s22 }
 0x90a   : > { %13650 = vst [vmem:[#allocation109_spill] sm:$0xff] %v11411_v63 }
 0x90b   : > { %5180 = vrot.lane.b32.xlu1 %v10850_v36, %s13553_s9  ;;  %v11417_v6 = vpop.permute.xlu0 %3696 }
 0x90c   : > { %13651 = vst [vmem:[#allocation77_spill] sm:$0xff] %v11417_v6  ;;  %v3280_v6 = vld [vmem:[%s13038_s2 + $0x50] sm:$0xff] }
 0x90d   : > { %v11419_v57 = vpop.permute.xlu1 %4678  ;;  %3921 = vrot.lane.b32.xlu0 %v10937_v35, %s7903_s30 }
 0x90e   : > { %13652 = vst [vmem:[#allocation108_spill] sm:$0xff] %v11419_v57  ;;  %v3272_v57 = vld [vmem:[%s13038_s2 + $0x10] sm:$0xff] }
 0x90f   : > { %4887 = vrot.lane.b32.xlu1 %v10594_v51, %s13078_s12  ;;  %v11425_v52 = vpop.permute.xlu0 %3712  ;;  %7318 = vmatprep.mubr.f32.mxu1 %v3272_v57  ;;  %v3273_v51 = vld [vmem:[%s13038_s2 + $0x18] sm:$0xff]  ;;  %v3274_v57 = vld [vmem:[%s13038_s2 + $0x20] sm:$0xff] }
 0x910   : > { %7319 = vmatmul.mubr.f32.gmra.mxu1 %v3273_v51 }
 0x911   : > { %v11427_v21 = vpop.permute.xlu1 %4662  ;;  %3937 = vrot.lane.b32.xlu0 %v10894_v62, %s7903_s30  ;;  %7321 = vmatprep.mubr.f32.mxu1 %v3274_v57 }
 0x912   : > { %13653 = vst [vmem:[#allocation140_spill] sm:$0xff] %v11427_v21  ;;  %v11445_v21 = vld [vmem:[#allocation2 + $0x18] sm:$0xff] }
 0x913   : > { %5164 = vrot.lane.b32.xlu1 %v10842_v25, %s13553_s9  ;;  %v11433_v63 = vpop.permute.xlu0 %3925 }
 0x914   : > { %13654 = vst [vmem:[#allocation149_spill] sm:$0xff] %v11433_v63  ;;  %7322 = vmatmul.mubr.f32.gmra.mxu1 %v3275_v58 }
 0x915   : > { %v11435_v24 = vpop.permute.xlu1 %4939  ;;  %5154 = vrot.lane.b32.xlu0 %v10916_v12, %s13553_s9 }
 0x916   : > { %13655 = vst [vmem:[#allocation115_spill] sm:$0xff] %v11435_v24 }
 0x917   : > { %4883 = vrot.lane.b32.xlu1 %v11445_v21, %s13078_s12  ;;  %v11449_v63 = vpop.permute.xlu0 %3941 }
 0x918   : > { %13656 = vst [vmem:[#allocation148_spill] sm:$0xff] %v11449_v63 }
 0x919   : > { %v11451_v24 = vpop.permute.xlu1 %4923  ;;  %5150 = vrot.lane.b32.xlu0 %v10927_v42, %s13553_s9 }
 0x91a   : > { %13657 = vst [vmem:[#allocation178_spill] sm:$0xff] %v11451_v24  ;;  %v3276_v24 = vld [vmem:[%s13038_s2 + $0x30] sm:$0xff] }
 0x91b   : > { %5160 = vrot.lane.b32.xlu1 %v10602_v49, %s13553_s9  ;;  %v11463_v51 = vpop.permute.xlu0 %4415  ;;  %7324 = vmatprep.mubr.f32.mxu1 %v3276_v24  ;;  %v3278_v24 = vld [vmem:[%s13038_s2 + $0x40] sm:$0xff] }
 0x91c   : > { %13658 = vst [vmem:[#allocation189_spill] sm:$0xff] %v11463_v51  ;;  %v3277_v51 = vld [vmem:[%s13038_s2 + $0x38] sm:$0xff] }
 0x91d   : > { %v11465_v63 = vpop.permute.xlu1 %4907  ;;  %5427 = vrot.lane.b32.xlu0 %v10776_v30, %s13660_s10  ;;  %7325 = vmatmul.mubr.f32.gmra.mxu1 %v3277_v51  ;;  %v11483_v30 = vld [vmem:[#allocation2 + $0x8] sm:$0xff] }
 0x91e   : > { %13659 = vst [vmem:[#allocation57_spill] sm:$0xff] %v11465_v63  ;;  %7327 = vmatprep.mubr.f32.mxu1 %v3278_v24  ;;  %v3279_v51 = vld [vmem:[%s13038_s2 + $0x48] sm:$0xff] }
 0x91f   : > { %3953 = vrot.lane.b32.xlu1 %v10856_v45, %s7903_s30  ;;  %v11474_v57 = vpop.permute.xlu0 %4692 }
 0x920   : > { %13661 = vst [vmem:[#allocation43_spill] sm:$0xff] %v11474_v57 }
 0x921   : > { %v11479_v58 = vpop.permute.xlu1 %5184  ;;  %5142 = vrot.lane.b32.xlu0 %v10692_v7, %s13553_s9  ;;  %7328 = vmatmul.mubr.f32.gmra.mxu1 %v3279_v51 }
 0x922   : > { %13662 = vst [vmem:[#allocation73_spill] sm:$0xff] %v11479_v58  ;;  %7330 = vmatprep.mubr.f32.mxu1 %v3280_v6  ;;  %v11527_v6 = vld [vmem:[#allocation2 + $0x30] sm:$0xff] }
 0x923   : > { %4879 = vrot.lane.b32.xlu1 %v11483_v30, %s13078_s12  ;;  %v11487_v63 = vpop.permute.xlu0 %4676 }
 0x924   : > { %13663 = vst [vmem:[#allocation59_spill] sm:$0xff] %v11487_v63 }
 0x925   : > { %v11492_v57 = vpop.permute.xlu1 %5168  ;;  %5419 = vrot.lane.b32.xlu0 %v10716_v48, %s13660_s10  ;;  %v3281_v48 = vld [vmem:[%s13038_s2 + $0x58] sm:$0xff] }
 0x926   : > { %13664 = vst [vmem:[#allocation7_spill] sm:$0xff] %v11492_v57  ;;  %7331 = vmatmul.mubr.f32.gmra.mxu1 %v3281_v48 }
 0x927   : > { %5156 = vrot.lane.b32.xlu1 %v10672_v20, %s13553_s9  ;;  %v11501_v58 = vpop.permute.xlu0 %4660 }
 0x928   : > { %13665 = vst [vmem:[#allocation8_spill] sm:$0xff] %v11501_v58  ;;  %v11572_v58 = vld [vmem:[#allocation2] sm:$0xff] }
 0x929   : > { %v3958_v63 = vpop.permute.xlu1 %3957  ;;  %5138 = vrot.lane.b32.xlu0 %v10908_v26, %s13553_s9  ;;  %13678 = vst [vmem:[#allocation55_spill] sm:$0xff] %v11572_v58 }
 0x92a   : > { %v3976_v24 = vsel %vm1204_vm11, %v3958_v63, %v11337_v54 }
 0x92b   : > { %5152 = vrot.lane.b32.xlu1 %v10756_v10, %s13553_s9  ;;  %7383 = vmatprep.subr.mxu1 %v3976_v24  ;;  %v11515_v51 = vpop.permute.xlu0 %4937 }
 0x92c   : > { %13666 = vst [vmem:[#allocation102_spill] sm:$0xff] %v11515_v51  ;;  %7384 = vmatpush3.msra.mxu1 %v3976_v24 }
 0x92d   : > { %v11517_v57 = vpop.permute.xlu1 %4202  ;;  %5415 = vrot.lane.b32.xlu0 %v10873_v16, %s13660_s10  ;;  %v6002_v16 = vld [vmem:[%s13038_s2 + $0x120] sm:$0xff] }
 0x92e   : > { %13667 = vst [vmem:[#allocation111_spill] sm:$0xff] %v11517_v57  ;;  %7415 = vmatprep.mubr.f32.mxu1 %v6002_v16 }
 0x92f   : > { %4198 = vrot.lane.b32.xlu1 %v10856_v45, %s7904_s6  ;;  %v11523_v54 = vpop.permute.xlu0 %4921 }
 0x930   : > { %13668 = vst [vmem:[#allocation25_spill] sm:$0xff] %v11523_v54 }
 0x931   : > { %v11525_v63 = vpop.permute.xlu1 %4186  ;;  %5134 = vrot.lane.b32.xlu0 %v11527_v6, %s13553_s9 }
 0x932   : > { %13669 = vst [vmem:[#allocation11_spill] sm:$0xff] %v11525_v63 }
 0x933   : > { %5429 = vrot.lane.b32.xlu1 %v10770_v41, %s13660_s10  ;;  %v11533_v24 = vpop.permute.xlu0 %4905 }
 0x934   : > { %13670 = vst [vmem:[#allocation9_spill] sm:$0xff] %v11533_v24  ;;  %v11556_v24 = vld [vmem:[#allocation2 + $0x10] sm:$0xff] }
 0x935   : > { %v11535_v48 = vpop.permute.xlu1 %4170  ;;  %5411 = vrot.lane.b32.xlu0 %v10884_v60, %s13660_s10  ;;  %13676 = vst [vmem:[#allocation27_spill] sm:$0xff] %v11556_v24 }
 0x936   : > { %13671 = vst [vmem:[#allocation10_spill] sm:$0xff] %v11535_v48 }
 0x937   : > { %4182 = vrot.lane.b32.xlu1 %v10894_v62, %s7904_s6  ;;  %v11544_v54 = vpop.permute.xlu0 %5182 }
 0x938   : > { %13672 = vst [vmem:[#allocation142_spill] sm:$0xff] %v11544_v54 }
 0x939   : > { %v11546_v51 = vpop.permute.xlu1 %4447  ;;  %5130 = vrot.lane.b32.xlu0 %v10588_v31, %s13553_s9 }
 0x93a   : > { %13673 = vst [vmem:[#allocation151_spill] sm:$0xff] %v11546_v51 }
 0x93b   : > { %4166 = vrot.lane.b32.xlu1 %v10937_v35, %s7904_s6  ;;  %v11552_v41 = vpop.permute.xlu0 %5166 }
 0x93c   : > { %13674 = vst [vmem:[#allocation6_spill] sm:$0xff] %v11552_v41 }
 0x93d   : > { %v11554_v60 = vpop.permute.xlu1 %4431  ;;  %5126 = vrot.lane.b32.xlu0 %v11556_v24, %s13553_s9 }
 0x93e   : > { %13675 = vst [vmem:[#allocation41_spill] sm:$0xff] %v11554_v60 }
 0x93f   : > { %4443 = vrot.lane.b32.xlu1 %v10856_v45, %s13524_s14  ;;  %v11562_v16 = vpop.permute.xlu0 %3955 }
 0x941   : > { %v11564_v54 = vpop.permute.xlu1 %3320  ;;  %5403 = vrot.lane.b32.xlu0 %v10704_v40, %s13660_s10 }
 0x943   : > { %5148 = vrot.lane.b32.xlu1 %v10836_v44, %s13553_s9  ;;  %v11570_v31 = vpop.permute.xlu0 %4200 }
 0x944   : > { %13677 = vst [vmem:[#allocation58_spill] sm:$0xff] %v11570_v31 }
 0x945   : > { %v3337_v41 = vpop.permute.xlu1 %3336  ;;  %5122 = vrot.lane.b32.xlu0 %v11572_v58, %s13553_s9 }
 0x947   : > { %4427 = vrot.lane.b32.xlu1 %v10894_v62, %s13524_s14  ;;  %v11578_v60 = vpop.permute.xlu0 %4184 }
 0x948   : > { %13679 = vst [vmem:[#allocation74_spill] sm:$0xff] %v11578_v60 }
 0x949   : > { %v3353_v51 = vpop.permute.xlu1 %3352  ;;  %4411 = vrot.lane.b32.xlu0 %v10937_v35, %s13524_s14  ;;  %s6126_s14 = sshll.u32 %s7958_s19, 12  ;;  %s7909_s19 = smov [#allocation3]  }
 0x94a   : > { %s12946_s29 = scalar_lea.hbm %s13039_s3, %s6126_s14 }
 0x94b   : > { %5425 = vrot.lane.b32.xlu1 %v10850_v36, %s13660_s10  ;;  %v11584_v40 = vpop.permute.xlu0 %4168 }
 0x94c   : > { %13680 = vst [vmem:[#allocation71_spill] sm:$0xff] %v11584_v40 }
 0x94d   : > { %v11586_v48 = vpop.permute.xlu1 %3678  ;;  %4688 = vrot.lane.b32.xlu0 %v10856_v45, %s13077_s27 }
 0x94f   : > { %5144 = vrot.lane.b32.xlu1 %v10596_v46, %s13553_s9  ;;  %v11592_v63 = vpop.permute.xlu0 %4445 }
 0x950   : > { %13681 = vst [vmem:[#allocation26_spill] sm:$0xff] %v11592_v63 }
 0x951   : > { %v11594_v60 = vpop.permute.xlu1 %3694  ;;  %5399 = vrot.lane.b32.xlu0 %v10916_v12, %s13660_s10 }
 0x953   : > { %5421 = vrot.lane.b32.xlu1 %v10608_v11, %s13660_s10  ;;  %v11600_v36 = vpop.permute.xlu0 %4429 }
 0x954   : > { %13682 = vst [vmem:[#allocation23_spill] sm:$0xff] %v11600_v36  ;;  %v11618_v36 = vld [vmem:[#allocation2 + $0x38] sm:$0xff] }
 0x955   : > { %v11602_v40 = vpop.permute.xlu1 %3710  ;;  %4672 = vrot.lane.b32.xlu0 %v10894_v62, %s13077_s27 }
 0x957   : > { %5140 = vrot.lane.b32.xlu1 %v10664_v34, %s13553_s9  ;;  %v3319_v31 = vpop.permute.xlu0 %3318 }
 0x959   : > { %v11608_v63 = vpop.permute.xlu1 %3923  ;;  %4656 = vrot.lane.b32.xlu0 %v10937_v35, %s13077_s27 }
 0x95a   : > { %13683 = vst [vmem:[#allocation42_spill] sm:$0xff] %v11608_v63 }
 0x95b   : > { %5417 = vrot.lane.b32.xlu1 %v10680_v1, %s13660_s10  ;;  %v3335_v11 = vpop.permute.xlu0 %3334  ;;  %v3371_v1 = vsel %vm597_vm10, %v11011_v9, %v10981_v53  ;;  %v3369_v9 = vsel %vm597_vm10, %v11394_v2, %v11347_v37  ;;  %v3367_v2 = vsel %vm597_vm10, %v11003_v28, %v10970_v43  ;;  %v3365_v43 = vsel %vm597_vm10, %v11383_v3, %v11339_v15 }
 0x95d   : > { %v11614_v12 = vpop.permute.xlu1 %3939  ;;  %4933 = vrot.lane.b32.xlu0 %v10856_v45, %s13078_s12 }
 0x95e   : > { %13684 = vst [vmem:[#allocation39_spill] sm:$0xff] %v11614_v12 }
 0x95f   : > { %5136 = vrot.lane.b32.xlu1 %v11618_v36, %s13553_s9  ;;  %v3351_v57 = vpop.permute.xlu0 %3350 }
 0x960   : > { %v3372_v63 = vsel %vm597_vm10, %v3351_v57, %v3353_v51  ;;  %v3370_v57 = vsel %vm597_vm10, %v11194_v33, %v11157_v59  ;;  %v3368_v59 = vsel %vm597_vm10, %v3335_v11, %v3337_v41  ;;  %v3366_v51 = vsel %vm597_vm10, %v11179_v4, %v11149_v39  ;;  %v13686_v41 = vld [vmem:[#allocation34_spill] sm:$0xff] }
 0x961   : > { %v11622_v58 = vpop.permute.xlu1 %4413  ;;  %5395 = vrot.lane.b32.xlu0 %v10927_v42, %s13660_s10  ;;  %7235 = vmatprep.subr.mxu0 %v3372_v63  ;;  %v3364_v4 = vsel %vm597_vm10, %v3319_v31, %v11564_v54  ;;  %v3363_v39 = vsel %vm597_vm10, %v10995_v8, %v10958_v18  ;;  %v3362_v54 = vsel %vm597_vm10, %v11171_v50, %v11141_v0  ;;  %v13687_v31 = vld [vmem:[#allocation172_spill] sm:$0xff] }
 0x962   : > { %7236 = vmatpush3.msra.mxu0 %v3372_v63  ;;  %v3360_v0 = vsel %vm597_vm10, %v10848_v47, %v10865_v17  ;;  %v3358_v47 = vsel %vm597_vm10, %v10686_v38, %v10688_v56  ;;  %v5979_v17 = vld [vmem:[%s13038_s2 + $0x68] sm:$0xff]  ;;  %v5981_v56 = vld [vmem:[%s13038_s2 + $0x78] sm:$0xff] }
 0x963   : > { %5413 = vrot.lane.b32.xlu1 %v10762_v61, %s13660_s10  ;;  %v11632_v12 = vpop.permute.xlu0 %4885  ;;  %7237 = vmatprep.subr.mxu0 %v3371_v1  ;;  %v11641_v61 = vld [vmem:[#allocation2 + $0x28] sm:$0xff] }
 0x964   : > { %7238 = vmatpush3.msra.mxu0 %v3371_v1  ;;  %v13689_v1 = vld [vmem:[#allocation139_spill] sm:$0xff] }
 0x965   : > { %v11634_v24 = vpop.permute.xlu1 %4690  ;;  %4917 = vrot.lane.b32.xlu0 %v10894_v62, %s13078_s12  ;;  %7239 = vmatprep.subr.mxu0 %v3370_v57 }
 0x966   : > { %7240 = vmatpush3.msra.mxu0 %v3370_v57 }
 0x967   : > { %5132 = vrot.lane.b32.xlu1 %v11641_v61, %s13553_s9  ;;  %v11648_v53 = vpop.permute.xlu0 %4881  ;;  %7241 = vmatprep.subr.mxu0 %v3369_v9 }
 0x968   : > { %7242 = vmatpush3.msra.mxu0 %v3369_v9  ;;  %v5988_v9 = vld [vmem:[%s13038_s2 + $0xb0] sm:$0xff] }
 0x969   : > { %v11650_v42 = vpop.permute.xlu1 %4674  ;;  %4901 = vrot.lane.b32.xlu0 %v10937_v35, %s13078_s12  ;;  %7243 = vmatprep.subr.mxu0 %v3368_v59 }
 0x96a   : > { %7244 = vmatpush3.msra.mxu0 %v3368_v59  ;;  %v13690_v59 = vld [vmem:[#allocation150_spill] sm:$0xff] }
 0x96b   : > { %5409 = vrot.lane.b32.xlu1 %v10842_v25, %s13660_s10  ;;  %v11660_v33 = vpop.permute.xlu0 %5158  ;;  %7245 = vmatprep.subr.mxu0 %v3367_v2 }
 0x96c   : > { %7246 = vmatpush3.msra.mxu0 %v3367_v2  ;;  %v13691_v2 = vld [vmem:[#allocation100_spill] sm:$0xff] }
 0x96d   : > { %v11662_v37 = vpop.permute.xlu1 %4658  ;;  %5178 = vrot.lane.b32.xlu0 %v10856_v45, %s13553_s9  ;;  %7247 = vmatprep.subr.mxu0 %v3366_v51 }
 0x96e   : > { %7248 = vmatpush3.msra.mxu0 %v3366_v51  ;;  %v3723_v51 = vsel %vm957_vm12, %v13691_v2, %v13690_v59  ;;  %v13711_v59 = vld [vmem:[#allocation146_spill] sm:$0xff] }
 0x96f   : > { %5128 = vrot.lane.b32.xlu1 %v11445_v21, %s13553_s9  ;;  %v11674_v25 = vpop.permute.xlu0 %4877  ;;  %7249 = vmatprep.subr.mxu0 %v3365_v43  ;;  %v13712_v2 = vld [vmem:[#allocation94_spill] sm:$0xff] }
 0x970   : > { %7250 = vmatpush3.msra.mxu0 %v3365_v43 }
 0x971   : > { %v11676_v28 = vpop.permute.xlu1 %4935  ;;  %5387 = vrot.lane.b32.xlu0 %v10692_v7, %s13660_s10  ;;  %7251 = vmatprep.subr.mxu0 %v3364_v4 }
 0x972   : > { %7252 = vmatpush3.msra.mxu0 %v3364_v4 }
 0x973   : > { %5405 = vrot.lane.b32.xlu1 %v10602_v49, %s13660_s10  ;;  %v11687_v15 = vpop.permute.xlu0 %3676  ;;  %7253 = vmatprep.subr.mxu0 %v3363_v39  ;;  %v3361_v49 = vsel %vm597_vm10, %v10768_v13, %v10784_v27  ;;  %v3359_v13 = vsel %vm597_vm10, %v10614_v14, %v10616_v5  ;;  %v5980_v14 = vld [vmem:[%s13038_s2 + $0x70] sm:$0xff]  ;;  %v3731_v5 = vsel %vm957_vm12, %v11425_v52, %v11377_v55  ;;  %v5982_v55 = vld [vmem:[%s13038_s2 + $0x80] sm:$0xff]  ;;  %vm13756_vm10 = vmmov %vm13719_vm1 }
 0x974   : > { %7254 = vmatpush3.msra.mxu0 %v3363_v39  ;;  %v7829_v39 = vld [vmem:[#allocation2 + $0x20] sm:$0xff] }
 0x975   : > { %v11689_v3 = vpop.permute.xlu1 %4919  ;;  %5162 = vrot.lane.b32.xlu0 %v10894_v62, %s13553_s9  ;;  %7255 = vmatprep.subr.mxu0 %v3362_v54 }
 0x976   : > { %7256 = vmatpush3.msra.mxu0 %v3362_v54  ;;  %v13692_v54 = vld [vmem:[#allocation106_spill] sm:$0xff] }
 0x977   : > { %5124 = vrot.lane.b32.xlu1 %v11483_v30, %s13553_s9  ;;  %v3693_v7 = vpop.permute.xlu0 %3692  ;;  %7257 = vmatprep.subr.mxu0 %v3361_v49 }
 0x978   : > { %7258 = vmatpush3.msra.mxu0 %v3361_v49  ;;  %v13693_v49 = vld [vmem:[#allocation114_spill] sm:$0xff] }
 0x979   : > { %v11701_v18 = vpop.permute.xlu1 %4903  ;;  %5146 = vrot.lane.b32.xlu0 %v10937_v35, %s13553_s9  ;;  %7259 = vmatprep.subr.mxu0 %v3360_v0  ;;  %s5751_s9 = sshll.u32 %s8062_s20, 4  ;;  %s12948_s9 = int_to_ptr.vmem [resolvable:$true] %s5751_s9 }
 0x97a   : > { %7260 = vmatpush3.msra.mxu0 %v3360_v0  ;;  %s7832_s22 = scalar_lea.vmem %s12948_s9, 4096 }
 0x97b   : > { %5401 = vrot.lane.b32.xlu1 %v10672_v20, %s13660_s10  ;;  %v3709_v27 = vpop.permute.xlu0 %3708  ;;  %7261 = vmatprep.subr.mxu0 %v3359_v13  ;;  %p7833_p11 = scmp.ne.s32.totalorder %s12948_s9, %s7832_s22 }
 0x97c   : > { %7262 = vmatpush3.msra.mxu0 %v3359_v13 }
 0x97d   : > { %v11713_v50 = vpop.permute.xlu1 %5180  ;;  %5423 = vrot.lane.b32.xlu0 %v10856_v45, %s13660_s10  ;;  %7263 = vmatprep.subr.mxu0 %v3358_v47  ;;  %v3730_v45 = vsel %vm957_vm12, %v3709_v27, %v11602_v40  ;;  %p7834_p12 = pnand %p7833_p11, %p7975_p5 }
 0x97e   : > { %7264 = vmatpush3.msra.mxu0 %v3358_v47  ;;  %v13698_v47 = vld [vmem:[#allocation21_spill] sm:$0xff] }
 0x97f   : > { %5397 = vrot.lane.b32.xlu1 %v10756_v10, %s13660_s10  ;;  %v11731_v20 = vpop.permute.xlu0 %3921  ;;  %7333 = vmatprep.subr.mxu0 %v3731_v5  ;;  %v3729_v10 = vsel %vm957_vm12, %v11035_v29, %v11005_v32  ;;  %v5984_v29 = vld [vmem:[%s13038_s2 + $0x90] sm:$0xff]  ;;  %v13685_v32 = vld [vmem:[#allocation77_spill] sm:$0xff]  ;;  %p7835_p13 = pneg %p7834_p12 }
 0x980   : > { %7266 = vmatmul.mubr.f32.vlgmr.msra.gmra.mxu0 %v5979_v17 }
 0x981   : > { %7334 = vmatpush3.msra.mxu0 %v3731_v5  ;;  %v11733_v38 = vpop.permute.xlu1 %4887  ;;  %7268 = vmatprep.mubr.f32.mxu0 %v5980_v14  ;;  %v13699_v14 = vld [vmem:[#allocation40_spill] sm:$0xff]  ;;  %v13700_v5 = vld [vmem:[#allocation70_spill] sm:$0xff] }
 0x982   : > { %5383 = vrot.lane.b32.xlu0 %v10908_v26, %s13660_s10  ;;  %7335 = vmatprep.subr.mxu0 %v3730_v45  ;;  %v3728_v26 = vsel %vm957_vm12, %v11233_v19, %v11181_v23  ;;  %v3727_v23 = vsel %vm957_vm12, %v13685_v32, %v11369_v22  ;;  %v5986_v22 = vld [vmem:[%s13038_s2 + $0xa0] sm:$0xff]  ;;  %v13704_v32 = vld [vmem:[#allocation148_spill] sm:$0xff] }
 0x983   : > { %5393 = vrot.lane.b32.xlu1 %v10836_v44, %s13660_s10  ;;  %7336 = vmatpush3.msra.mxu0 %v3730_v45  ;;  %v11750_v8 = vpop.permute.xlu0 %3937  ;;  %v5983_v44 = vld [vmem:[%s13038_s2 + $0x88] sm:$0xff]  ;;  %v3973_v45 = vsel %vm1204_vm11, %v13700_v5, %v13699_v14  ;;  %v13722_v5 = vld [vmem:[#allocation58_spill] sm:$0xff] }
 0x984   : > { %7337 = vmatprep.subr.mxu0 %v3729_v10  ;;  %7269 = vmatmul.mubr.f32.gmra.mxu0 %v5981_v56 }
 0x985   : > { %7338 = vmatpush3.msra.mxu0 %v3729_v10  ;;  %v11752_v52 = vpop.permute.xlu1 %5164  ;;  %7271 = vmatprep.mubr.f32.mxu0 %v5982_v55  ;;  %v13701_v55 = vld [vmem:[#allocation167_spill] sm:$0xff]  ;;  %v13702_v10 = vld [vmem:[#allocation133_spill] sm:$0xff] }
 0x986   : > { %5407 = vrot.lane.b32.xlu0 %v10894_v62, %s13660_s10  ;;  %7339 = vmatprep.subr.mxu0 %v3728_v26  ;;  %v3726_v62 = vsel %vm957_vm12, %v3693_v7, %v11594_v60  ;;  %v3725_v60 = vsel %vm957_vm12, %v13687_v31, %v13686_v41  ;;  %v3721_v7 = vsel %vm957_vm12, %v13693_v49, %v13692_v54  ;;  %v5989_v41 = vld [vmem:[%s13038_s2 + $0xb8] sm:$0xff]  ;;  %v13715_v49 = vld [vmem:[#allocation130_spill] sm:$0xff] }
 0x987   : > { %5389 = vrot.lane.b32.xlu1 %v10596_v46, %s13660_s10  ;;  %7340 = vmatpush3.msra.mxu0 %v3728_v26  ;;  %v11770_v19 = vpop.permute.xlu0 %5154  ;;  %v5985_v46 = vld [vmem:[%s13038_s2 + $0x98] sm:$0xff]  ;;  %v3719_v26 = vsel %vm957_vm12, %v13702_v10, %v13701_v55 }
 0x988   : > { %7341 = vmatprep.subr.mxu0 %v3727_v23  ;;  %7272 = vmatmul.mubr.f32.gmra.mxu0 %v5983_v44  ;;  %v5993_v10 = vld [vmem:[%s13038_s2 + $0xd8] sm:$0xff] }
 0x989   : > { %7342 = vmatpush3.msra.mxu0 %v3727_v23  ;;  %v11772_v63 = vpop.permute.xlu1 %4883  ;;  %7274 = vmatprep.mubr.f32.mxu0 %v5984_v29  ;;  %v13703_v29 = vld [vmem:[#allocation186_spill] sm:$0xff]  ;;  %v13705_v23 = vld [vmem:[#allocation55_spill] sm:$0xff] }
 0x98a   : > { %5379 = vrot.lane.b32.xlu0 %v11527_v6, %s13660_s10  ;;  %7343 = vmatprep.subr.mxu0 %v3726_v62  ;;  %v13688_v6 = vld [vmem:[#allocation99_spill] sm:$0xff] }
 0x98b   : > { %5385 = vrot.lane.b32.xlu1 %v10664_v34, %s13660_s10  ;;  %7344 = vmatpush3.msra.mxu0 %v3726_v62  ;;  %v11789_v40 = vpop.permute.xlu0 %5150  ;;  %v3724_v57 = vsel %vm957_vm12, %v13689_v1, %v13688_v6  ;;  %v5987_v34 = vld [vmem:[%s13038_s2 + $0xa8] sm:$0xff]  ;;  %v13706_v62 = vld [vmem:[#allocation33_spill] sm:$0xff] }
 0x98c   : > { %7345 = vmatprep.subr.mxu0 %v3725_v60  ;;  %7275 = vmatmul.mubr.f32.gmra.mxu0 %v5985_v46  ;;  %v13707_v46 = vld [vmem:[#allocation127_spill] sm:$0xff] }
 0x98d   : > { %7346 = vmatpush3.msra.mxu0 %v3725_v60  ;;  %v11791_v11 = vpop.permute.xlu1 %5160  ;;  %7277 = vmatprep.mubr.f32.mxu0 %v5986_v22  ;;  %v3718_v22 = vsel %vm957_vm12, %v13707_v46, %v13706_v62  ;;  %v13708_v60 = vld [vmem:[#allocation39_spill] sm:$0xff]  ;;  %v13726_v62 = vld [vmem:[#allocation182_spill] sm:$0xff] }
 0x98e   : > { %5391 = vrot.lane.b32.xlu0 %v10937_v35, %s13660_s10  ;;  %7347 = vmatprep.subr.mxu0 %v3724_v57  ;;  %v3722_v35 = vsel %vm957_vm12, %v11687_v15, %v11586_v48  ;;  %v13694_v48 = vld [vmem:[#allocation183_spill] sm:$0xff]  ;;  %v3971_v6 = vsel %vm1204_vm11, %v11750_v8, %v13708_v60  ;;  %v13713_v8 = vld [vmem:[#allocation169_spill] sm:$0xff] }
 0x98f   : > { %5381 = vrot.lane.b32.xlu1 %v11618_v36, %s13660_s10  ;;  %7348 = vmatpush3.msra.mxu0 %v3724_v57  ;;  %v11809_v43 = vpop.permute.xlu0 %5427  ;;  %v13695_v15 = vld [vmem:[#allocation75_spill] sm:$0xff]  ;;  %v13728_v60 = vld [vmem:[#allocation105_spill] sm:$0xff] }
 0x990   : > { %7349 = vmatprep.subr.mxu0 %v3723_v51  ;;  %7278 = vmatmul.mubr.f32.gmra.mxu0 %v5987_v34  ;;  %v3974_v13 = vsel %vm1204_vm11, %v13695_v15, %v13694_v48  ;;  %v13709_v57 = vld [vmem:[#allocation175_spill] sm:$0xff]  ;;  %v13710_v34 = vld [vmem:[#allocation165_spill] sm:$0xff]  ;;  %v13717_v15 = vld [vmem:[#allocation138_spill] sm:$0xff] }
 0x991   : > { %7350 = vmatpush3.msra.mxu0 %v3723_v51  ;;  %v3954_v4 = vpop.permute.xlu1 %3953  ;;  %7280 = vmatprep.mubr.f32.mxu0 %v5988_v9  ;;  %v3717_v9 = vsel %vm957_vm12, %v13710_v34, %v13709_v57  ;;  %v3970_v51 = vsel %vm1204_vm11, %v13712_v2, %v13711_v59  ;;  %v5995_v57 = vld [vmem:[%s13038_s2 + $0xe8] sm:$0xff]  ;;  %v13730_v34 = vld [vmem:[#allocation24_spill] sm:$0xff] }
 0x992   : > { %5375 = vrot.lane.b32.xlu0 %v7829_v39, %s13660_s10  ;;  %7351 = vmatprep.subr.mxu0 %v3722_v35  ;;  %v3975_v36 = vsel %vm1204_vm11, %v3954_v4, %v11562_v16  ;;  %v13696_v16 = vld [vmem:[#allocation27_spill] sm:$0xff]  ;;  %v13714_v4 = vld [vmem:[#allocation162_spill] sm:$0xff]  ;;  %v13732_v2 = vld [vmem:[#allocation56_spill] sm:$0xff] }
 0x993   : > { %5377 = vrot.lane.b32.xlu1 %v11641_v61, %s13660_s10  ;;  %7352 = vmatpush3.msra.mxu0 %v3722_v35  ;;  %v11822_v0 = vpop.permute.xlu0 %5142  ;;  %v13697_v61 = vld [vmem:[#allocation90_spill] sm:$0xff]  ;;  %v3716_v35 = vsel %vm957_vm12, %v13714_v4, %v13713_v8  ;;  %v13735_v4 = vld [vmem:[#allocation49_spill] sm:$0xff] }
 0x994   : > { %7385 = vmatprep.subr.mxu1 %v3975_v36  ;;  %7353 = vmatprep.subr.mxu0 %v3721_v7  ;;  %v3720_v17 = vsel %vm957_vm12, %v13698_v47, %v13697_v61  ;;  %v5992_v61 = vld [vmem:[%s13038_s2 + $0xd0] sm:$0xff] }
 0x995   : > { %7386 = vmatpush3.msra.mxu1 %v3975_v36  ;;  %7354 = vmatpush3.msra.mxu0 %v3721_v7  ;;  %v11827_v27 = vpop.permute.xlu1 %4879  ;;  %v5991_v36 = vld [vmem:[%s13038_s2 + $0xc8] sm:$0xff]  ;;  %v13720_v47 = vld [vmem:[#allocation156_spill] sm:$0xff] }
 0x996   : > { %7387 = vmatprep.subr.mxu1 %v3974_v13  ;;  %5371 = vrot.lane.b32.xlu0 %v13696_v16, %s13660_s10  ;;  %v13716_v7 = vld [vmem:[#allocation159_spill] sm:$0xff] }
 0x997   : > { %7355 = vmatprep.subr.mxu0 %v3720_v17  ;;  %7388 = vmatpush3.msra.mxu1 %v3974_v13  ;;  %v11839_v56 = vpop.permute.xlu0 %5419  ;;  %v3969_v48 = vsel %vm1204_vm11, %v13716_v7, %v13715_v49  ;;  %v13718_v13 = vld [vmem:[#allocation111_spill] sm:$0xff] }
 0x998   : > { %5373 = vrot.lane.b32.xlu1 %v11445_v21, %s13660_s10  ;;  %7356 = vmatpush3.msra.mxu0 %v3720_v17  ;;  %v3972_v21 = vsel %vm1204_vm11, %v13704_v32, %v13703_v29  ;;  %v4221_v16 = vsel %vm13719_vm1, %v13718_v13, %v13717_v15  ;;  %v13721_v17 = vld [vmem:[#allocation149_spill] sm:$0xff]  ;;  %v13724_v29 = vld [vmem:[#allocation42_spill] sm:$0xff]  ;;  %v13737_v7 = vld [vmem:[#allocation147_spill] sm:$0xff] }
 0x999   : > { %7389 = vmatprep.subr.mxu1 %v3973_v45  ;;  %7357 = vmatprep.subr.mxu0 %v3719_v26  ;;  %v11844_v44 = vpop.permute.xlu1 %5156  ;;  %v3968_v14 = vsel %vm1204_vm11, %v13721_v17, %v13720_v47  ;;  %v3967_v32 = vsel %vm1204_vm11, %v11731_v20, %v13724_v29  ;;  %v13727_v20 = vld [vmem:[#allocation192_spill] sm:$0xff]  ;;  %v13740_v13 = vld [vmem:[#allocation74_spill] sm:$0xff]  ;;  %v13742_v47 = vld [vmem:[#allocation47_spill] sm:$0xff] }
 0x99a   : > { %7390 = vmatpush3.msra.mxu1 %v3973_v45  ;;  %7358 = vmatpush3.msra.mxu0 %v3719_v26  ;;  %v13743_v17 = vld [vmem:[#allocation36_spill] sm:$0xff] }
 0x99b   : > { %7391 = vmatprep.subr.mxu1 %v3972_v21  ;;  %5367 = vrot.lane.b32.xlu0 %v13705_v23, %s13660_s10  ;;  %v11857_v31 = vpop.permute.xlu0 %5138  ;;  %v13725_v23 = vld [vmem:[#allocation31_spill] sm:$0xff] }
 0x99c   : > { %7359 = vmatprep.subr.mxu0 %v3718_v22  ;;  %7392 = vmatpush3.msra.mxu1 %v3972_v21  ;;  %v3966_v46 = vsel %vm1204_vm11, %v13726_v62, %v13725_v23  ;;  %v13746_v23 = vld [vmem:[#allocation18_spill] sm:$0xff]  ;;  %v13747_v62 = vld [vmem:[#allocation141_spill] sm:$0xff] }
 0x99d   : > { %5369 = vrot.lane.b32.xlu1 %v11483_v30, %s13660_s10  ;;  %7360 = vmatpush3.msra.mxu0 %v3718_v22  ;;  %v11864_v1 = vpop.permute.xlu1 %5152  ;;  %v5990_v30 = vld [vmem:[%s13038_s2 + $0xc0] sm:$0xff]  ;;  %s13960_s10 = sand.u32 1, %s7884_s16  }
 0x99e   : > { %7393 = vmatprep.subr.mxu1 %v3971_v6  ;;  %7281 = vmatmul.mubr.f32.gmra.mxu0 %v5989_v41  ;;  %v5994_v22 = vld [vmem:[%s13038_s2 + $0xe0] sm:$0xff]  ;;  %s12952_s23 = scalar_lea.sflag [#allocation4], %s13960_s10 }
 0x99f   : > { %7361 = vmatprep.subr.mxu0 %v3717_v9  ;;  %7394 = vmatpush3.msra.mxu1 %v3971_v6  ;;  %v11878_v39 = vpop.permute.xlu0 %5415 }
 0x9a0   : > { %7362 = vmatpush3.msra.mxu0 %v3717_v9  ;;  %7395 = vmatprep.subr.mxu1 %v3970_v51  ;;  %v13731_v9 = vld [vmem:[#allocation54_spill] sm:$0xff] }
 0x9a1   : > { %7363 = vmatprep.subr.mxu0 %v3716_v35  ;;  %7396 = vmatpush3.msra.mxu1 %v3970_v51  ;;  %v4199_v54 = vpop.permute.xlu1 %4198  ;;  %v3965_v59 = vsel %vm1204_vm11, %v13731_v9, %v13730_v34  ;;  %v13733_v51 = vld [vmem:[#allocation158_spill] sm:$0xff] }
 0x9a2   : > { %7364 = vmatpush3.msra.mxu0 %v3716_v35  ;;  %7365 = vmatprep.mubr.f32.mxu0 %v5990_v30  ;;  %v4220_v45 = vsel %vm13723_vm2, %v4199_v54, %v13722_v5  ;;  %v4218_v30 = vsel %vm13734_vm4, %v13733_v51, %v13732_v2  ;;  %v13736_v35 = vld [vmem:[#allocation161_spill] sm:$0xff]  ;;  %v5996_v54 = vld [vmem:[%s13038_s2 + $0xf0] sm:$0xff]  ;;  %v13752_v34 = vld [vmem:[#allocation194_spill] sm:$0xff] }
 0x9a3   : > { %7397 = vmatprep.subr.mxu1 %v3969_v48  ;;  %7366 = vmatmul.mubr.f32.vlgmr.msra.gmra.mxu0 %v5991_v36  ;;  %v11897_v55 = vpop.permute.xlu0 %5134  ;;  %v3964_v36 = vsel %vm1204_vm11, %v13736_v35, %v13735_v4  ;;  %v13754_v51 = vld [vmem:[#allocation116_spill] sm:$0xff]  ;;  %vm13765_vm2 = vmmov %vm13719_vm1 }
 0x9a4   : > { %7398 = vmatpush3.msra.mxu1 %v3969_v48  ;;  %7433 = vmatprep.subr.mxu0 %v4221_v16  ;;  %v13738_v48 = vld [vmem:[#allocation11_spill] sm:$0xff]  ;;  %v13757_v35 = vld [vmem:[#allocation176_spill] sm:$0xff]  ;;  %vm13771_vm4 = vmmov %vm13719_vm1 }
 0x9a5   : > { %7399 = vmatprep.subr.mxu1 %v3968_v14  ;;  %7434 = vmatpush3.msra.mxu0 %v4221_v16  ;;  %v5430_v26 = vpop.permute.xlu1 %5429  ;;  %v4217_v15 = vsel %vm13739_vm5, %v13738_v48, %v13737_v7  ;;  %v6000_v7 = vld [vmem:[%s13038_s2 + $0x110] sm:$0xff] }
 0x9a6   : > { %7400 = vmatpush3.msra.mxu1 %v3968_v14  ;;  %7368 = vmatprep.mubr.f32.mxu0 %v5992_v61  ;;  %v11907_v21 = vsel %vm2686_vm14, %v11809_v43, %v5430_v26  ;;  %v4219_v43 = vsel %vm13729_vm3, %v13728_v60, %v13727_v20  ;;  %v5997_v61 = vld [vmem:[%s13038_s2 + $0xf8] sm:$0xff]  ;;  %v3963_v14 = vsel %vm1204_vm11, %v13743_v17, %v13742_v47  ;;  %v13745_v26 = vld [vmem:[#allocation84_spill] sm:$0xff]  ;;  %v13762_v47 = vld [vmem:[#allocation71_spill] sm:$0xff] }
 0x9a7   : > { %7401 = vmatprep.subr.mxu1 %v3967_v32  ;;  %7435 = vmatprep.subr.mxu0 %v4220_v45  ;;  %v11915_v41 = vpop.permute.xlu0 %5411  ;;  %v13749_v60 = vld [vmem:[#allocation173_spill] sm:$0xff] }
 0x9a8   : > { %7369 = vmatmul.mubr.f32.gmra.mxu0 %v5993_v10  ;;  %7402 = vmatpush3.msra.mxu1 %v3967_v32  ;;  %v13744_v10 = vld [vmem:[#allocation91_spill] sm:$0xff]  ;;  %v5998_v32 = vld [vmem:[%s13038_s2 + $0x100] sm:$0xff] }
 0x9a9   : > { %7436 = vmatpush3.msra.mxu0 %v4220_v45  ;;  %7403 = vmatprep.subr.mxu1 %v3966_v46  ;;  %v4183_v6 = vpop.permute.xlu1 %4182  ;;  %v3962_v29 = vsel %vm1204_vm11, %v13745_v26, %v13744_v10  ;;  %v13763_v26 = vld [vmem:[#allocation15_spill] sm:$0xff] }
 0x9aa   : > { %7437 = vmatprep.subr.mxu0 %v4219_v43  ;;  %7404 = vmatpush3.msra.mxu1 %v3966_v46  ;;  %v4216_v16 = vsel %vm13741_vm6, %v4183_v6, %v13740_v13  ;;  %v4215_v46 = vsel %vm13748_vm7, %v13747_v62, %v13746_v23  ;;  %v13766_v23 = vld [vmem:[#allocation76_spill] sm:$0xff]  ;;  %v13767_v62 = vld [vmem:[#allocation179_spill] sm:$0xff]  ;;  %vm13777_vm6 = vmmov %vm13719_vm1 }
 0x9ab   : > { %7438 = vmatpush3.msra.mxu0 %v4219_v43  ;;  %7371 = vmatprep.mubr.f32.mxu0 %v5994_v22  ;;  %v11929_v8 = vpop.permute.xlu0 %5130  ;;  %v5999_v22 = vld [vmem:[%s13038_s2 + $0x108] sm:$0xff]  ;;  %v13750_v43 = vld [vmem:[#allocation164_spill] sm:$0xff] }
 0x9ac   : > { %7405 = vmatprep.subr.mxu1 %v3965_v59  ;;  %7439 = vmatprep.subr.mxu0 %v4218_v30  ;;  %v3961_v6 = vsel %vm1204_vm11, %v13750_v43, %v13749_v60  ;;  %vm13759_vm11 = vcmask 883712   ;;  %v13769_v60 = vld [vmem:[#allocation72_spill] sm:$0xff]  ;;  %v13770_v43 = vld [vmem:[#allocation107_spill] sm:$0xff] }
 0x9ad   : > { %7372 = vmatmul.mubr.f32.gmra.mxu0 %v5995_v57  ;;  %7406 = vmatpush3.msra.mxu1 %v3965_v59  ;;  %v4167_v49 = vpop.permute.xlu1 %4166  ;;  %v13751_v57 = vld [vmem:[#allocation53_spill] sm:$0xff]  ;;  %v6003_v59 = vld [vmem:[%s13038_s2 + $0x128] sm:$0xff]  ;;  %vm13761_vm12 = vmmov %vm13759_vm11 }
 0x9ae   : > { %7440 = vmatpush3.msra.mxu0 %v4218_v30  ;;  %7407 = vmatprep.subr.mxu1 %v3964_v36  ;;  %v4214_v9 = vsel %vm13753_vm9, %v13752_v34, %v13751_v57  ;;  %v13755_v30 = vld [vmem:[#allocation10_spill] sm:$0xff]  ;;  %v4212_v17 = vsel %vm13719_vm1, %v4167_v49, %v13762_v47  ;;  %vm13768_vm3 = vmmov %vm13759_vm11  ;;  %v13772_v57 = vld [vmem:[#allocation69_spill] sm:$0xff] }
 0x9af   : > { %7441 = vmatprep.subr.mxu0 %v4217_v15  ;;  %7408 = vmatpush3.msra.mxu1 %v3964_v36  ;;  %v11948_v5 = vpop.permute.xlu0 %5126  ;;  %v4213_v4 = vsel %vm13756_vm10, %v13755_v30, %v13754_v51  ;;  %v13758_v36 = vld [vmem:[#allocation151_spill] sm:$0xff]  ;;  %v13773_v34 = vld [vmem:[#allocation110_spill] sm:$0xff]  ;;  %vm13774_vm5 = vmmov %vm13768_vm3 }
 0x9b0   : > { %7442 = vmatpush3.msra.mxu0 %v4217_v15  ;;  %7374 = vmatprep.mubr.f32.mxu0 %v5996_v54  ;;  %v4466_v54 = vsel %vm13759_vm11, %v13758_v36, %v13757_v35  ;;  %v13760_v15 = vld [vmem:[#allocation26_spill] sm:$0xff]  ;;  %v6007_v51 = vld [vmem:[%s13038_s2 + $0x148] sm:$0xff]  ;;  %v13776_v35 = vld [vmem:[#allocation125_spill] sm:$0xff] }
 0x9b1   : > { %7409 = vmatprep.subr.mxu1 %v3963_v14  ;;  %7443 = vmatprep.subr.mxu0 %v4216_v16  ;;  %v4444_v45 = vpop.permute.xlu1 %4443  ;;  %vm13780_vm7 = vmmov %vm13768_vm3  ;;  %v6008_v47 = vld [vmem:[%s13038_s2 + $0x150] sm:$0xff] }
 0x9b2   : > { %7375 = vmatmul.mubr.f32.gmra.mxu0 %v5997_v61  ;;  %7410 = vmatpush3.msra.mxu1 %v3963_v14  ;;  %v4465_v13 = vsel %vm13761_vm12, %v4444_v45, %v13760_v15  ;;  %v6004_v14 = vld [vmem:[%s13038_s2 + $0x130] sm:$0xff]  ;;  %v6005_v45 = vld [vmem:[%s13038_s2 + $0x138] sm:$0xff]  ;;  %vm13782_vm9 = vmmov %vm13768_vm3 }
 0x9b3   : > { %7444 = vmatpush3.msra.mxu0 %v4216_v16  ;;  %7411 = vmatprep.subr.mxu1 %v3962_v29  ;;  %v11962_v20 = vpop.permute.xlu0 %5403  ;;  %v6001_v16 = vld [vmem:[%s13038_s2 + $0x118] sm:$0xff]  ;;  %vm13785_vm10 = vmmov %vm13719_vm1 }
 0x9b4   : > { %7445 = vmatprep.subr.mxu0 %v4215_v46  ;;  %7412 = vmatpush3.msra.mxu1 %v3962_v29  ;;  %v13764_v29 = vld [vmem:[#allocation145_spill] sm:$0xff]  ;;  %vm13788_vm11 = vmmov %vm13719_vm1 }
 0x9b5   : > { %7446 = vmatpush3.msra.mxu0 %v4215_v46  ;;  %7377 = vmatprep.mubr.f32.mxu0 %v5998_v32  ;;  %v11973_v2 = vpop.permute.xlu1 %5148  ;;  %v4211_v49 = vsel %vm13765_vm2, %v13764_v29, %v13763_v26  ;;  %v4464_v46 = vsel %vm13768_vm3, %v13767_v62, %v13766_v23  ;;  %v6009_v26 = vld [vmem:[%s13038_s2 + $0x158] sm:$0xff]  ;;  %vm13791_vm12 = vmmov %vm13768_vm3 }
 0x9b6   : > { %7413 = vmatprep.subr.mxu1 %v3961_v6  ;;  %7447 = vmatprep.subr.mxu0 %v4214_v9  ;;  %vm13796_vm2 = vmmov %vm13768_vm3 }
 0x9b7   : > { %7378 = vmatmul.mubr.f32.gmra.mxu0 %v5999_v22  ;;  %7414 = vmatpush3.msra.mxu1 %v3961_v6  ;;  %v11984_v48 = vpop.permute.xlu0 %5122  ;;  %v6006_v22 = vld [vmem:[%s13038_s2 + $0x140] sm:$0xff]  ;;  %v4210_v6 = vsel %vm13771_vm4, %v13770_v43, %v13769_v60  ;;  %vm13799_vm3 = vmmov %vm13796_vm2 }
 0x9b8   : > { %7448 = vmatpush3.msra.mxu0 %v4214_v9  ;;  %7416 = vmatmul.mubr.f32.vlgmr.msra.gmra.mxu1 %v6003_v59  ;;  %v4463_v9 = vsel %vm13774_vm5, %v13773_v34, %v13772_v57  ;;  %v6010_v43 = vld [vmem:[%s13038_s2 + $0x160] sm:$0xff]  ;;  %v13793_v57 = vld [vmem:[#allocation83_spill] sm:$0xff]  ;;  %vm13802_vm4 = vmmov %vm13796_vm2 }
 0x9b9   : > { %7449 = vmatprep.subr.mxu0 %v4213_v4  ;;  %7483 = vmatprep.subr.mxu1 %v4466_v54  ;;  %v4428_v61 = vpop.permute.xlu1 %4427  ;;  %vm13805_vm5 = vmmov %vm13796_vm2 }
 0x9ba   : > { %7450 = vmatpush3.msra.mxu0 %v4213_v4  ;;  %7484 = vmatpush3.msra.mxu1 %v4466_v54  ;;  %v13775_v4 = vld [vmem:[#allocation20_spill] sm:$0xff]  ;;  %v13778_v54 = vld [vmem:[#allocation187_spill] sm:$0xff] }
 0x9bb   : > { %7380 = vmatprep.mubr.f32.mxu0 %v6000_v7  ;;  %7451 = vmatprep.subr.mxu0 %v4212_v17  ;;  %v11999_v10 = vpop.permute.xlu0 %4411  ;;  %v4209_v36 = vsel %vm13777_vm6, %v13776_v35, %v13775_v4  ;;  %v13779_v7 = vld [vmem:[#allocation41_spill] sm:$0xff]  ;;  %v6014_v35 = vld [vmem:[%s13038_s2 + $0x180] sm:$0xff]  ;;  %vm13810_vm6 = vmmov %vm13796_vm2 }
 0x9bc   : > { %7485 = vmatprep.subr.mxu1 %v4465_v13  ;;  %7381 = vmatmul.mubr.f32.gmra.mxu0 %v6001_v16  ;;  %v4462_v15 = vsel %vm13780_vm7, %v13779_v7, %v13778_v54  ;;  %v6015_v54 = vld [vmem:[%s13038_s2 + $0x188] sm:$0xff]  ;;  %vm13815_vm7 = vmmov %vm13796_vm2 }
 0x9bd   : > { %7418 = vmatprep.mubr.f32.mxu1 %v6004_v14  ;;  %7452 = vmatpush3.msra.mxu0 %v4212_v17  ;;  %v12004_v32 = vpop.permute.xlu1 %5425  ;;  %v13783_v17 = vld [vmem:[#allocation66_spill] sm:$0xff]  ;;  %v13784_v14 = vld [vmem:[#allocation121_spill] sm:$0xff] }
 0x9be   : > { %7486 = vmatpush3.msra.mxu1 %v4465_v13  ;;  %7453 = vmatprep.subr.mxu0 %v4211_v49  ;;  %v13781_v13 = vld [vmem:[#allocation23_spill] sm:$0xff] }
 0x9bf   : > { %7419 = vmatmul.mubr.f32.gmra.mxu1 %v6005_v45  ;;  %7487 = vmatprep.subr.mxu1 %v4464_v46  ;;  %v4689_v59 = vpop.permute.xlu0 %4688  ;;  %v4461_v16 = vsel %vm13782_vm9, %v4428_v61, %v13781_v13  ;;  %v4208_v45 = vsel %vm13785_vm10, %v13784_v14, %v13783_v17  ;;  %v13786_v61 = vld [vmem:[#allocation95_spill] sm:$0xff]  ;;  %v12070_v13 = vpop.f32.mrf.mxu1  ;;  %v13800_v14 = vld [vmem:[#allocation109_spill] sm:$0xff]  ;;  %vm13820_vm9 = vmmov %vm13796_vm2 }
 0x9c0   : > { %7454 = vmatpush3.msra.mxu0 %v4211_v49  ;;  %7488 = vmatpush3.msra.mxu1 %v4464_v46  ;;  %v13787_v49 = vld [vmem:[#allocation86_spill] sm:$0xff]  ;;  %6099 = vst [vmem:[%s8062_s20 + $0xe8] sm:$0xff] %v12070_v13  ;;  %vm13823_vm10 = vmmov %vm13796_vm2 }
 0x9c1   : > { %7455 = vmatprep.subr.mxu0 %v4210_v6  ;;  %7489 = vmatprep.subr.mxu1 %v4463_v9  ;;  %v12021_v30 = vpop.permute.xlu1 %5144  ;;  %v4207_v23 = vsel %vm13788_vm11, %v13787_v49, %v13786_v61  ;;  %v13789_v46 = vld [vmem:[#allocation154_spill] sm:$0xff]  ;;  %v4710_v61 = vsel %vm1945_vm13, %v4689_v59, %v11634_v24  ;;  %v6012_v49 = vld [vmem:[%s13038_s2 + $0x170] sm:$0xff]  ;;  %v4457_v24 = vsel %vm13802_vm4, %v11999_v10, %v11622_v58  ;;  %v6013_v59 = vld [vmem:[%s13038_s2 + $0x178] sm:$0xff] }
 0x9c2   : > { %7421 = vmatprep.mubr.f32.mxu1 %v6006_v22  ;;  %7456 = vmatpush3.msra.mxu0 %v4210_v6  ;;  %v13790_v22 = vld [vmem:[#allocation134_spill] sm:$0xff]  ;;  %v13792_v6 = vld [vmem:[#allocation89_spill] sm:$0xff]  ;;  %vm13828_vm11 = vmmov %vm13796_vm2 }
 0x9c3   : > { %7490 = vmatpush3.msra.mxu1 %v4463_v9  ;;  %7457 = vmatprep.subr.mxu0 %v4209_v36  ;;  %v12040_v29 = vpop.permute.xlu0 %5399  ;;  %v4460_v60 = vsel %vm13791_vm12, %v13790_v22, %v13789_v46  ;;  %v4206_v34 = vsel %vm13719_vm1, %v13793_v57, %v13792_v6  ;;  %v13794_v9 = vld [vmem:[#allocation37_spill] sm:$0xff]  ;;  %v12088_v46 = vpop.f32.mrf.mxu1  ;;  %v13803_v6 = vld [vmem:[#allocation191_spill] sm:$0xff]  ;;  %vm13835_vm12 = vcmask 818176  }
 0x9c4   : > { %7422 = vmatmul.mubr.f32.gmra.mxu1 %v6007_v51  ;;  %7491 = vmatprep.subr.mxu1 %v4462_v15  ;;  %v13795_v51 = vld [vmem:[#allocation195_spill] sm:$0xff]  ;;  %6098 = vst [vmem:[%s8062_s20 + $0xe0] sm:$0xff] %v12088_v46  ;;  %v6017_v22 = vld [vmem:[%s13038_s2 + $0x198] sm:$0xff]  ;;  %vm13836_vm1 = vmmov %vm13835_vm12 }
 0x9c5   : > { %7458 = vmatpush3.msra.mxu0 %v4209_v36  ;;  %7492 = vmatpush3.msra.mxu1 %v4462_v15  ;;  %v12045_v62 = vpop.permute.xlu1 %5421  ;;  %v4459_v4 = vsel %vm13796_vm2, %v13795_v51, %v13794_v9  ;;  %v6011_v36 = vld [vmem:[%s13038_s2 + $0x168] sm:$0xff]  ;;  %v13804_v57 = vld [vmem:[#allocation113_spill] sm:$0xff]  ;;  %v13807_v51 = vld [vmem:[#allocation170_spill] sm:$0xff] }
 0x9c6   : > { %7459 = vmatprep.subr.mxu0 %v4208_v45  ;;  %7493 = vmatprep.subr.mxu1 %v4461_v16  ;;  %v13806_v9 = vld [vmem:[#allocation103_spill] sm:$0xff]  ;;  %vm13841_vm2 = vmmov %vm13836_vm1 }
 0x9c7   : > { %7424 = vmatprep.mubr.f32.mxu1 %v6008_v47  ;;  %7460 = vmatpush3.msra.mxu0 %v4208_v45  ;;  %v4673_v7 = vpop.permute.xlu0 %4672  ;;  %v13798_v47 = vld [vmem:[#allocation189_spill] sm:$0xff]  ;;  %v13801_v45 = vld [vmem:[#allocation43_spill] sm:$0xff]  ;;  %vm13851_vm4 = vmmov %vm13836_vm1 }
 0x9c8   : > { %7494 = vmatpush3.msra.mxu1 %v4461_v16  ;;  %7461 = vmatprep.subr.mxu0 %v4207_v23  ;;  %v13797_v16 = vld [vmem:[#allocation193_spill] sm:$0xff] }
 0x9c9   : > { %7425 = vmatmul.mubr.f32.gmra.mxu1 %v6009_v26  ;;  %7495 = vmatprep.subr.mxu1 %v4460_v60  ;;  %v12068_v15 = vpop.permute.xlu1 %5140  ;;  %v4458_v17 = vsel %vm13799_vm3, %v13798_v47, %v13797_v16  ;;  %v4711_v26 = vsel %vm1945_vm13, %v13801_v45, %v13800_v14  ;;  %v13811_v47 = vld [vmem:[#allocation190_spill] sm:$0xff]  ;;  %v6019_v45 = vld [vmem:[%s13038_s2 + $0x1a8] sm:$0xff]  ;;  %vm13846_vm3 = vmmov %vm13836_vm1 }
 0x9ca   : > { %7462 = vmatpush3.msra.mxu0 %v4207_v23  ;;  %7496 = vmatpush3.msra.mxu1 %v4460_v60  ;;  %v6016_v23 = vld [vmem:[%s13038_s2 + $0x190] sm:$0xff]  ;;  %v12101_v60 = vpop.f32.mrf.mxu1 }
 0x9cb   : > { %7463 = vmatprep.subr.mxu0 %v4206_v34  ;;  %7497 = vmatprep.subr.mxu1 %v4459_v4  ;;  %6101 = vst [vmem:[%s8062_s20 + $0xf8] sm:$0xff] %v12101_v60 }
 0x9cc   : > { %7427 = vmatprep.mubr.f32.mxu1 %v6010_v43  ;;  %7464 = vmatpush3.msra.mxu0 %v4206_v34  ;;  %v12103_v43 = vpop.permute.xlu0 %4656  ;;  %v12109_v10 = vpop.f32.mrf.mxu1  ;;  %v4456_v34 = vsel %vm13805_vm5, %v13804_v57, %v13803_v6  ;;  %vm13852_vm5 = vmmov %vm13836_vm1 }
 0x9cd   : > { %7465 = vmatprep.mubr.f32.mxu0 %v6014_v35  ;;  %7498 = vmatpush3.msra.mxu1 %v4459_v4  ;;  %v12107_v58 = vpop.permute.xlu1 %5417  ;;  %v4709_v4 = vsel %vm1945_vm13, %v13807_v51, %v13806_v9  ;;  %6100 = vst [vmem:[%s8062_s20 + $0xf0] sm:$0xff] %v12109_v10  ;;  %v6018_v35 = vld [vmem:[%s13038_s2 + $0x1a0] sm:$0xff]  ;;  %v13818_v9 = vld [vmem:[#allocation184_spill] sm:$0xff] }
 0x9ce   : > { %7428 = vmatmul.mubr.f32.gmra.mxu1 %v6011_v36  ;;  %7466 = vmatmul.mubr.f32.vlgmr.msra.gmra.mxu0 %v6015_v54  ;;  %v13808_v36 = vld [vmem:[#allocation51_spill] sm:$0xff]  ;;  %v13819_v51 = vld [vmem:[#allocation50_spill] sm:$0xff] }
 0x9cf   : > { %7499 = vmatprep.subr.mxu1 %v4458_v17  ;;  %7533 = vmatprep.subr.mxu0 %v4711_v26  ;;  %v13809_v54 = vld [vmem:[#allocation19_spill] sm:$0xff] }
 0x9d0   : > { %7500 = vmatpush3.msra.mxu1 %v4458_v17  ;;  %7534 = vmatpush3.msra.mxu0 %v4711_v26  ;;  %v4455_v16 = vsel %vm13810_vm6, %v13809_v54, %v13808_v36  ;;  %v13812_v17 = vld [vmem:[#allocation112_spill] sm:$0xff]  ;;  %v13813_v26 = vld [vmem:[#allocation65_spill] sm:$0xff]  ;;  %v4934_v6 = vpop.permute.xlu0 %4933  ;;  %vm13859_vm6 = vmmov %vm13836_vm1 }
 0x9d1   : > { %7501 = vmatprep.subr.mxu1 %v4457_v24  ;;  %7535 = vmatprep.subr.mxu0 %v4710_v61  ;;  %v4708_v14 = vsel %vm1945_vm13, %v13812_v17, %v13811_v47  ;;  %v12139_v57 = vpop.permute.xlu1 %5136  ;;  %v13824_v54 = vld [vmem:[#allocation104_spill] sm:$0xff]  ;;  %v6022_v17 = vld [vmem:[%s13038_s2 + $0x1c0] sm:$0xff] }
 0x9d2   : > { %7430 = vmatprep.mubr.f32.mxu1 %v6012_v49  ;;  %7468 = vmatprep.mubr.f32.mxu0 %v6016_v23  ;;  %v13816_v23 = vld [vmem:[#allocation108_spill] sm:$0xff] }
 0x9d3   : > { %7502 = vmatpush3.msra.mxu1 %v4457_v24  ;;  %7536 = vmatpush3.msra.mxu0 %v4710_v61  ;;  %v13814_v61 = vld [vmem:[#allocation52_spill] sm:$0xff]  ;;  %v13817_v24 = vld [vmem:[#allocation59_spill] sm:$0xff] }
 0x9d4   : > { %7431 = vmatmul.mubr.f32.gmra.mxu1 %v6013_v59  ;;  %7469 = vmatmul.mubr.f32.gmra.mxu0 %v6017_v22  ;;  %v4454_v49 = vsel %vm13815_vm7, %v13814_v61, %v13813_v26  ;;  %v4707_v59 = vsel %vm1945_vm13, %v13817_v24, %v13816_v23  ;;  %v4706_v22 = vsel %vm1945_vm13, %v4673_v7, %v11650_v42  ;;  %v6021_v42 = vld [vmem:[%s13038_s2 + $0x1b8] sm:$0xff]  ;;  %v13821_v7 = vld [vmem:[#allocation131_spill] sm:$0xff]  ;;  %vm13864_vm7 = vmmov %vm13836_vm1 }
 0x9d5   : > { %7503 = vmatprep.subr.mxu1 %v4456_v34  ;;  %7537 = vmatprep.subr.mxu0 %v4709_v4  ;;  %v13826_v26 = vld [vmem:[#allocation93_spill] sm:$0xff]  ;;  %v13829_v23 = vld [vmem:[#allocation67_spill] sm:$0xff] }
 0x9d6   : > { %7504 = vmatpush3.msra.mxu1 %v4456_v34  ;;  %7538 = vmatpush3.msra.mxu0 %v4709_v4  ;;  %v6020_v34 = vld [vmem:[%s13038_s2 + $0x1b0] sm:$0xff]  ;;  %v4453_v4 = vsel %vm13820_vm9, %v13819_v51, %v13818_v9  ;;  %v13827_v61 = vld [vmem:[#allocation85_spill] sm:$0xff]  ;;  %v13830_v24 = vld [vmem:[#allocation35_spill] sm:$0xff] }
 0x9d7   : > { %7505 = vmatprep.subr.mxu1 %v4455_v16  ;;  %7539 = vmatprep.subr.mxu0 %v4708_v14  ;;  %v6027_v9 = vld [vmem:[%s13038_s2 + $0x1e8] sm:$0xff]  ;;  %v13831_v51 = vld [vmem:[#allocation140_spill] sm:$0xff]  ;;  %vm13870_vm9 = vmmov %vm13836_vm1 }
 0x9d8   : > { %7471 = vmatprep.mubr.f32.mxu0 %v6018_v35  ;;  %7506 = vmatpush3.msra.mxu1 %v4455_v16  ;;  %v13822_v35 = vld [vmem:[#allocation124_spill] sm:$0xff]  ;;  %v13825_v16 = vld [vmem:[#allocation153_spill] sm:$0xff] }
 0x9d9   : > { %7540 = vmatpush3.msra.mxu0 %v4708_v14  ;;  %7507 = vmatprep.subr.mxu1 %v4454_v49  ;;  %v4452_v36 = vsel %vm13823_vm10, %v13822_v35, %v13821_v7  ;;  %v4705_v47 = vsel %vm1945_vm13, %v13825_v16, %v13824_v54  ;;  %v12159_v14 = vpop.permute.xlu0 %5395  ;;  %v13833_v7 = vld [vmem:[#allocation115_spill] sm:$0xff]  ;;  %v13834_v35 = vld [vmem:[#allocation102_spill] sm:$0xff]  ;;  %v4955_v54 = vsel %vm13836_vm1, %v4934_v6, %v11676_v28  ;;  %v6024_v16 = vld [vmem:[%s13038_s2 + $0x1d0] sm:$0xff] }
 0x9da   : > { %7472 = vmatmul.mubr.f32.gmra.mxu0 %v6019_v45  ;;  %7541 = vmatprep.subr.mxu0 %v4707_v59  ;;  %v12161_v45 = vpop.permute.xlu1 %5413  ;;  %v6025_v28 = vld [vmem:[%s13038_s2 + $0x1d8] sm:$0xff]  ;;  %vm13873_vm10 = vmmov %vm13836_vm1 }
 0x9db   : > { %7508 = vmatpush3.msra.mxu1 %v4454_v49  ;;  %7542 = vmatpush3.msra.mxu0 %v4707_v59  ;;  %v4451_v49 = vsel %vm13828_vm11, %v13827_v61, %v13826_v26  ;;  %v4704_v59 = vsel %vm1945_vm13, %v13830_v24, %v13829_v23  ;;  %v4702_v61 = vsel %vm1945_vm13, %v12103_v43, %v11662_v37  ;;  %v6029_v6 = vld [vmem:[%s13038_s2 + $0x1f8] sm:$0xff]  ;;  %v13838_v23 = vld [vmem:[#allocation92_spill] sm:$0xff]  ;;  %vm13878_vm11 = vmmov %vm13836_vm1 }
 0x9dc   : > { %7509 = vmatprep.subr.mxu1 %v4453_v4  ;;  %7543 = vmatprep.subr.mxu0 %v4706_v22  ;;  %v13839_v43 = vld [vmem:[#allocation144_spill] sm:$0xff] }
 0x9dd   : > { %7474 = vmatprep.mubr.f32.mxu0 %v6020_v34  ;;  %7510 = vmatpush3.msra.mxu1 %v4453_v4  ;;  %v6023_v34 = vld [vmem:[%s13038_s2 + $0x1c8] sm:$0xff]  ;;  %v13832_v4 = vld [vmem:[#allocation8_spill] sm:$0xff] }
 0x9de   : > { %7544 = vmatpush3.msra.mxu0 %v4706_v22  ;;  %7511 = vmatprep.subr.mxu1 %v4452_v36  ;;  %v6026_v22 = vld [vmem:[%s13038_s2 + $0x1e0] sm:$0xff]  ;;  %v12192_v26 = vpop.permute.xlu1 %5132  ;;  %v13840_v24 = vld [vmem:[#allocation96_spill] sm:$0xff] }
 0x9df   : > { %7475 = vmatmul.mubr.f32.gmra.mxu0 %v6021_v42  ;;  %7545 = vmatprep.subr.mxu0 %v4705_v47  ;;  %v4703_v42 = vsel %vm1945_vm13, %v13832_v4, %v13831_v51  ;;  %v13842_v51 = vld [vmem:[#allocation22_spill] sm:$0xff]  ;;  %v13843_v4 = vld [vmem:[#allocation152_spill] sm:$0xff] }
 0x9e0   : > { %7512 = vmatpush3.msra.mxu1 %v4452_v36  ;;  %7546 = vmatpush3.msra.mxu0 %v4705_v47  ;;  %v4956_v36 = vsel %vm13835_vm12, %v13834_v35, %v13833_v7  ;;  %v6028_v47 = vld [vmem:[%s13038_s2 + $0x1f0] sm:$0xff]  ;;  %v13845_v35 = vld [vmem:[#allocation185_spill] sm:$0xff]  ;;  %vm13883_vm12 = vmmov %vm13836_vm1 }
 0x9e1   : > { %7513 = vmatprep.subr.mxu1 %v4451_v49  ;;  %7547 = vmatprep.subr.mxu0 %v4704_v59  ;;  %v13844_v7 = vld [vmem:[#allocation80_spill] sm:$0xff] }
 0x9e2   : > { %7477 = vmatprep.mubr.f32.mxu0 %v6022_v17  ;;  %7514 = vmatpush3.msra.mxu1 %v4451_v49  ;;  %v4918_v17 = vpop.permute.xlu0 %4917  ;;  %v13837_v49 = vld [vmem:[#allocation143_spill] sm:$0xff] }
 0x9e3   : > { %7515 = vmatprep.mubr.f32.mxu1 %v6026_v22  ;;  %7548 = vmatpush3.msra.mxu0 %v4704_v59  ;;  %v4701_v37 = vsel %vm1945_vm13, %v13838_v23, %v13837_v49  ;;  %v4954_v59 = vsel %vm13841_vm2, %v13840_v24, %v13839_v43  ;;  %v6030_v22 = vld [vmem:[%s13038_s2 + $0x200] sm:$0xff]  ;;  %v4951_v23 = vsel %vm13852_vm5, %v4918_v17, %v11689_v3  ;;  %v13853_v43 = vld [vmem:[#allocation63_spill] sm:$0xff]  ;;  %v6033_v3 = vld [vmem:[%s13038_s2 + $0x218] sm:$0xff] }
 0x9e4   : > { %7478 = vmatmul.mubr.f32.gmra.mxu0 %v6023_v34  ;;  %7516 = vmatmul.mubr.f32.vlgmr.msra.gmra.mxu1 %v6027_v9  ;;  %v12214_v9 = vpop.permute.xlu1 %5409  ;;  %v13854_v24 = vld [vmem:[#allocation155_spill] sm:$0xff]  ;;  %vm13886_vm2 = vmmov %vm13836_vm1 }
 0x9e5   : > { %7549 = vmatprep.subr.mxu0 %v4703_v42  ;;  %7583 = vmatprep.subr.mxu1 %v4956_v36  ;;  %v13855_v17 = vld [vmem:[#allocation135_spill] sm:$0xff] }
 0x9e6   : > { %7550 = vmatpush3.msra.mxu0 %v4703_v42  ;;  %7584 = vmatpush3.msra.mxu1 %v4956_v36  ;;  %v12212_v34 = vpop.permute.xlu0 %4901  ;;  %v4700_v42 = vsel %vm1945_vm13, %v13843_v4, %v13842_v51  ;;  %v4953_v36 = vsel %vm13846_vm3, %v13845_v35, %v13844_v7  ;;  %v13856_v4 = vld [vmem:[#allocation126_spill] sm:$0xff]  ;;  %v13857_v7 = vld [vmem:[#allocation181_spill] sm:$0xff]  ;;  %v13858_v35 = vld [vmem:[#allocation132_spill] sm:$0xff] }
 0x9e7   : > { %7551 = vmatprep.subr.mxu0 %v4702_v61  ;;  %7585 = vmatprep.subr.mxu1 %v4955_v54  ;;  %vm13887_vm3 = vmmov %vm13836_vm1 }
 0x9e8   : > { %7480 = vmatprep.mubr.f32.mxu0 %v6024_v16  ;;  %7518 = vmatprep.mubr.f32.mxu1 %v6028_v47  ;;  %v13847_v16 = vld [vmem:[#allocation87_spill] sm:$0xff]  ;;  %v13848_v47 = vld [vmem:[#allocation68_spill] sm:$0xff]  ;;  %v12239_v51 = vpop.permute.xlu1 %5128 }
 0x9e9   : > { %7552 = vmatpush3.msra.mxu0 %v4702_v61  ;;  %7586 = vmatpush3.msra.mxu1 %v4955_v54  ;;  %v6031_v54 = vld [vmem:[%s13038_s2 + $0x208] sm:$0xff]  ;;  %v4699_v61 = vsel %vm1945_vm13, %v13848_v47, %v13847_v16  ;;  %v13860_v16 = vld [vmem:[#allocation129_spill] sm:$0xff]  ;;  %v13861_v47 = vld [vmem:[#allocation122_spill] sm:$0xff] }
 0x9ea   : > { %7481 = vmatmul.mubr.f32.gmra.mxu0 %v6025_v28  ;;  %7519 = vmatmul.mubr.f32.gmra.mxu1 %v6029_v6  ;;  %v13849_v28 = vld [vmem:[#allocation178_spill] sm:$0xff]  ;;  %v13850_v6 = vld [vmem:[#allocation25_spill] sm:$0xff] }
 0x9eb   : > { %7553 = vmatprep.subr.mxu0 %v4701_v37  ;;  %7587 = vmatprep.subr.mxu1 %v4954_v59  ;;  %v4952_v49 = vsel %vm13851_vm4, %v13850_v6, %v13849_v28  ;;  %v13862_v28 = vld [vmem:[#allocation38_spill] sm:$0xff]  ;;  %v13863_v6 = vld [vmem:[#allocation188_spill] sm:$0xff] }
 0x9ec   : > { %7554 = vmatpush3.msra.mxu0 %v4701_v37  ;;  %7588 = vmatpush3.msra.mxu1 %v4954_v59  ;;  %v6032_v37 = vld [vmem:[%s13038_s2 + $0x210] sm:$0xff]  ;;  %v4698_v59 = vsel %vm1945_vm13, %v13854_v24, %v13853_v43  ;;  %v6039_v43 = vld [vmem:[%s13038_s2 + $0x248] sm:$0xff] }
 0x9ed   : > { %7555 = vmatprep.subr.mxu0 %v4700_v42  ;;  %7589 = vmatprep.subr.mxu1 %v4953_v36 }
 0x9ee   : > { %7521 = vmatprep.mubr.f32.mxu1 %v6030_v22  ;;  %7556 = vmatpush3.msra.mxu0 %v4700_v42  ;;  %v5179_v22 = vpop.permute.xlu0 %5178  ;;  %v4697_v42 = vsel %vm1945_vm13, %v13856_v4, %v13855_v17  ;;  %v13866_v17 = vld [vmem:[#allocation9_spill] sm:$0xff] }
 0x9ef   : > { %7590 = vmatpush3.msra.mxu1 %v4953_v36  ;;  %7557 = vmatprep.subr.mxu0 %v4699_v61  ;;  %v4950_v36 = vsel %vm13859_vm6, %v13858_v35, %v13857_v7  ;;  %v13869_v7 = vld [vmem:[#allocation142_spill] sm:$0xff] }
 0x9f0   : > { %7522 = vmatmul.mubr.f32.gmra.mxu1 %v6031_v54  ;;  %7591 = vmatprep.subr.mxu1 %v4952_v49  ;;  %v6034_v54 = vld [vmem:[%s13038_s2 + $0x220] sm:$0xff] }
 0x9f1   : > { %7558 = vmatpush3.msra.mxu0 %v4699_v61  ;;  %7592 = vmatpush3.msra.mxu1 %v4952_v49  ;;  %v4696_v61 = vsel %vm1945_vm13, %v13861_v47, %v13860_v16  ;;  %v4949_v49 = vsel %vm13864_vm7, %v13863_v6, %v13862_v28  ;;  %vm13867_vm13 = vmmov %vm13836_vm1  ;;  %v6040_v16 = vld [vmem:[%s13038_s2 + $0x250] sm:$0xff]  ;;  %v4947_v47 = vsel %vm13870_vm9, %v12212_v34, %v11701_v18 }
 0x9f2   : > { %7559 = vmatprep.subr.mxu0 %v4698_v59  ;;  %7593 = vmatprep.subr.mxu1 %v4951_v23  ;;  %v12268_v24 = vpop.permute.xlu0 %5387  ;;  %v13871_v18 = vld [vmem:[#allocation180_spill] sm:$0xff] }
 0x9f3   : > { %7524 = vmatprep.mubr.f32.mxu1 %v6032_v37  ;;  %7560 = vmatpush3.msra.mxu0 %v4698_v59  ;;  %v6035_v37 = vld [vmem:[%s13038_s2 + $0x228] sm:$0xff]  ;;  %v12270_v59 = vpop.permute.xlu1 %5405  ;;  %v13872_v34 = vld [vmem:[#allocation136_spill] sm:$0xff] }
 0x9f4   : > { %7594 = vmatpush3.msra.mxu1 %v4951_v23  ;;  %7561 = vmatprep.subr.mxu0 %v4697_v42  ;;  %v6038_v23 = vld [vmem:[%s13038_s2 + $0x240] sm:$0xff]  ;;  %v4946_v6 = vsel %vm13873_vm10, %v13872_v34, %v13871_v18  ;;  %v13884_v18 = vld [vmem:[#allocation7_spill] sm:$0xff] }
 0x9f5   : > { %7525 = vmatmul.mubr.f32.gmra.mxu1 %v6033_v3  ;;  %7595 = vmatprep.subr.mxu1 %v4950_v36  ;;  %v13865_v3 = vld [vmem:[#allocation57_spill] sm:$0xff]  ;;  %v13885_v34 = vld [vmem:[#allocation6_spill] sm:$0xff] }
 0x9f6   : > { %7562 = vmatpush3.msra.mxu0 %v4697_v42  ;;  %7596 = vmatpush3.msra.mxu1 %v4950_v36  ;;  %v4948_v4 = vsel %vm13867_vm13, %v13866_v17, %v13865_v3  ;;  %v13868_v42 = vld [vmem:[#allocation73_spill] sm:$0xff]  ;;  %v5200_v36 = vsel %vm2439_vm15, %v5179_v22, %v11713_v50  ;;  %v13876_v3 = vld [vmem:[#allocation118_spill] sm:$0xff] }
 0x9f7   : > { %7563 = vmatprep.subr.mxu0 %v4696_v61  ;;  %7597 = vmatprep.subr.mxu1 %v4949_v49  ;;  %v5201_v35 = vsel %vm2439_vm15, %v13869_v7, %v13868_v42  ;;  %v6037_v50 = vld [vmem:[%s13038_s2 + $0x238] sm:$0xff]  ;;  %v12295_v28 = vpop.permute.xlu1 %5124  ;;  %v13877_v17 = vld [vmem:[#allocation98_spill] sm:$0xff] }
 0x9f8   : > { %7527 = vmatprep.mubr.f32.mxu1 %v6034_v54  ;;  %7564 = vmatpush3.msra.mxu0 %v4696_v61  ;;  %v6036_v54 = vld [vmem:[%s13038_s2 + $0x230] sm:$0xff]  ;;  %v6041_v22 = vld [vmem:[%s13038_s2 + $0x258] sm:$0xff]  ;;  %v5163_v61 = vpop.permute.xlu0 %5162  ;;  %v13879_v42 = vld [vmem:[#allocation174_spill] sm:$0xff] }
 0x9f9   : > { %7565 = vmatprep.mubr.f32.mxu0 %v6038_v23  ;;  %7598 = vmatpush3.msra.mxu1 %v4949_v49  ;;  %v13874_v49 = vld [vmem:[#allocation101_spill] sm:$0xff]  ;;  %v13875_v23 = vld [vmem:[#allocation168_spill] sm:$0xff]  ;;  %v13880_v7 = vld [vmem:[#allocation78_spill] sm:$0xff] }
 0x9fa   : > { %7528 = vmatmul.mubr.f32.gmra.mxu1 %v6035_v37  ;;  %7566 = vmatmul.mubr.f32.vlgmr.msra.gmra.mxu0 %v6039_v43  ;;  %v5199_v37 = vsel %vm2439_vm15, %v13875_v23, %v13874_v49  ;;  %v6042_v43 = vld [vmem:[%s13038_s2 + $0x260] sm:$0xff]  ;;  %v5196_v49 = vsel %vm2439_vm15, %v5163_v61, %v11752_v52  ;;  %v6044_v23 = vld [vmem:[%s13038_s2 + $0x270] sm:$0xff]  ;;  %v4942_v52 = vsel %vm13886_vm2, %v11648_v53, %v11772_v63 }
 0x9fb   : > { %7599 = vmatprep.subr.mxu1 %v4948_v4  ;;  %7633 = vmatprep.subr.mxu0 %v5201_v35  ;;  %v4941_v53 = vsel %vm13887_vm3, %v11674_v25, %v11827_v27  ;;  %v5194_v63 = vsel %vm2439_vm15, %v11770_v19, %v11844_v44  ;;  %v5193_v44 = vsel %vm2439_vm15, %v11789_v40, %v11864_v1  ;;  %v6049_v40 = vld [vmem:[%s13038_s2 + $0x298] sm:$0xff] }
 0x9fc   : > { %7600 = vmatpush3.msra.mxu1 %v4948_v4  ;;  %7634 = vmatpush3.msra.mxu0 %v5201_v35  ;;  %v4945_v4 = vsel %vm13878_vm11, %v13877_v17, %v13876_v3  ;;  %v5198_v35 = vsel %vm2439_vm15, %v13880_v7, %v13879_v42  ;;  %v6051_v17 = vld [vmem:[%s13038_s2 + $0x2a8] sm:$0xff]  ;;  %v6052_v42 = vld [vmem:[%s13038_s2 + $0x2b0] sm:$0xff]  ;;  %v6053_v1 = vld [vmem:[%s13038_s2 + $0x2b8] sm:$0xff] }
 0x9fd   : > { %7601 = vmatprep.subr.mxu1 %v4947_v47  ;;  %7635 = vmatprep.subr.mxu0 %v5200_v36 }
 0x9fe   : > { %7530 = vmatprep.mubr.f32.mxu1 %v6036_v54  ;;  %7568 = vmatprep.mubr.f32.mxu0 %v6040_v16  ;;  %v5147_v54 = vpop.permute.xlu0 %5146  ;;  %v12315_v16 = vpop.permute.xlu1 %5401 }
 0x9ff   : > { %7602 = vmatpush3.msra.mxu1 %v4947_v47  ;;  %7636 = vmatpush3.msra.mxu0 %v5200_v36  ;;  %v6043_v36 = vld [vmem:[%s13038_s2 + $0x268] sm:$0xff]  ;;  %v13881_v47 = vld [vmem:[#allocation17_spill] sm:$0xff] }
 0xa00   : > { %7531 = vmatmul.mubr.f32.gmra.mxu1 %v6037_v50  ;;  %7569 = vmatmul.mubr.f32.gmra.mxu0 %v6041_v22  ;;  %v13882_v50 = vld [vmem:[#allocation82_spill] sm:$0xff] }
 0xa01   : > { %7603 = vmatprep.subr.mxu1 %v4946_v6  ;;  %7637 = vmatprep.subr.mxu0 %v5199_v37  ;;  %v4944_v22 = vsel %vm13883_vm12, %v13882_v50, %v13881_v47  ;;  %v12406_v47 = vsel %vm2686_vm14, %v11878_v39, %v12107_v58  ;;  %v5189_v39 = vsel %vm2439_vm15, %v11897_v55, %v12139_v57  ;;  %v6056_v55 = vld [vmem:[%s13038_s2 + $0x2d0] sm:$0xff]  ;;  %v6057_v58 = vld [vmem:[%s13038_s2 + $0x2d8] sm:$0xff] }
 0xa02   : > { %7604 = vmatpush3.msra.mxu1 %v4946_v6  ;;  %7638 = vmatpush3.msra.mxu0 %v5199_v37  ;;  %v5197_v6 = vsel %vm2439_vm15, %v13885_v34, %v13884_v18  ;;  %v4943_v37 = vsel %vm13836_vm1, %v11632_v12, %v11733_v38  ;;  %v5424_v61 = vpop.permute.xlu0 %5423  ;;  %v12337_v3 = vpop.permute.xlu1 %5397  ;;  %v5195_v12 = vsel %vm2439_vm15, %v11660_v33, %v11791_v11  ;;  %v6046_v38 = vld [vmem:[%s13038_s2 + $0x280] sm:$0xff]  ;;  %v6047_v11 = vld [vmem:[%s13038_s2 + $0x288] sm:$0xff]  ;;  %v6060_v50 = vld [vmem:[%s13038_s2 + $0x2f0] sm:$0xff] }
 0xa03   : > { %7605 = vmatprep.subr.mxu1 %v4945_v4  ;;  %7639 = vmatprep.subr.mxu0 %v5198_v35  ;;  %v6050_v33 = vld [vmem:[%s13038_s2 + $0x2a0] sm:$0xff]  ;;  %v12366_v27 = vsel %vm2686_vm14, %v5424_v61, %v12004_v32  ;;  %v5192_v32 = vsel %vm2439_vm15, %v5147_v54, %v11973_v2  ;;  %v12394_v2 = vsel %vm2686_vm14, %v11839_v56, %v12045_v62  ;;  %v6061_v18 = vld [vmem:[%s13038_s2 + $0x2f8] sm:$0xff] }
 0xa04   : > { %7571 = vmatprep.mubr.f32.mxu0 %v6042_v43  ;;  %7606 = vmatpush3.msra.mxu1 %v4945_v4  ;;  %v6045_v43 = vld [vmem:[%s13038_s2 + $0x278] sm:$0xff]  ;;  %v6048_v4 = vld [vmem:[%s13038_s2 + $0x290] sm:$0xff]  ;;  %v6054_v54 = vld [vmem:[%s13038_s2 + $0x2c0] sm:$0xff]  ;;  %v5190_v56 = vsel %vm2439_vm15, %v11857_v31, %v12068_v15  ;;  %v5187_v57 = vsel %vm2439_vm15, %v11948_v5, %v12239_v51  ;;  %v12461_v5 = vsel %vm2686_vm14, %v12040_v29, %v12315_v16 }
 0xa05   : > { %7640 = vmatpush3.msra.mxu0 %v5198_v35  ;;  %7607 = vmatprep.subr.mxu1 %v4944_v22  ;;  %v6062_v51 = vld [vmem:[%s13038_s2 + $0x300] sm:$0xff]  ;;  %v6063_v29 = vld [vmem:[%s13038_s2 + $0x308] sm:$0xff]  ;;  %v6065_v34 = vld [vmem:[%s13038_s2 + $0x318] sm:$0xff] }
 0xa06   : > { %7572 = vmatmul.mubr.f32.gmra.mxu0 %v6043_v36  ;;  %7641 = vmatprep.subr.mxu0 %v5197_v6  ;;  %v12360_v25 = vpop.permute.xlu0 %5383  ;;  %v12362_v19 = vpop.permute.xlu1 %5393  ;;  %v5191_v36 = vsel %vm2439_vm15, %v11822_v0, %v12021_v30  ;;  %v6055_v0 = vld [vmem:[%s13038_s2 + $0x2c8] sm:$0xff]  ;;  %v12422_v30 = vsel %vm2686_vm14, %v11915_v41, %v12161_v45  ;;  %v5188_v41 = vsel %vm2439_vm15, %v11929_v8, %v12192_v26  ;;  %v6058_v26 = vld [vmem:[%s13038_s2 + $0x2e0] sm:$0xff] }
 0xa07   : > { %7608 = vmatpush3.msra.mxu1 %v4944_v22  ;;  %7642 = vmatpush3.msra.mxu0 %v5197_v6  ;;  %v12451_v45 = vsel %vm2686_vm14, %v11962_v20, %v12270_v59  ;;  %v5186_v20 = vsel %vm2439_vm15, %v11984_v48, %v12295_v28  ;;  %v6059_v59 = vld [vmem:[%s13038_s2 + $0x2e8] sm:$0xff]  ;;  %v12481_v48 = vsel %vm2686_vm14, %v12159_v14, %v12337_v3  ;;  %v6064_v14 = vld [vmem:[%s13038_s2 + $0x310] sm:$0xff] }
 0xa08   : > { %7609 = vmatprep.subr.mxu1 %v4943_v37  ;;  %7643 = vmatprep.subr.mxu0 %v5196_v49 }
 0xa09   : > { %7574 = vmatprep.mubr.f32.mxu0 %v6044_v23  ;;  %7610 = vmatpush3.msra.mxu1 %v4943_v37 }
 0xa0a   : > { %7644 = vmatpush3.msra.mxu0 %v5196_v49  ;;  %7611 = vmatprep.subr.mxu1 %v4942_v52  ;;  %v5408_v7 = vpop.permute.xlu0 %5407  ;;  %v12389_v35 = vpop.permute.xlu1 %5389  ;;  %v6066_v49 = vld [vmem:[%s13038_s2 + $0x320] sm:$0xff] }
 0xa0b   : > { %7575 = vmatmul.mubr.f32.gmra.mxu0 %v6045_v43  ;;  %7645 = vmatprep.subr.mxu0 %v5195_v12  ;;  %v12426_v31 = vsel %vm2686_vm14, %v5408_v7, %v12214_v9  ;;  %v6080_v7 = vld [vmem:[%s13038_s2 + $0x390] sm:$0xff] }
 0xa0c   : > { %7612 = vmatpush3.msra.mxu1 %v4942_v52  ;;  %7646 = vmatpush3.msra.mxu0 %v5195_v12  ;;  %v6068_v52 = vld [vmem:[%s13038_s2 + $0x330] sm:$0xff]  ;;  %v6069_v12 = vld [vmem:[%s13038_s2 + $0x338] sm:$0xff] }
 0xa0d   : > { %7613 = vmatprep.subr.mxu1 %v4941_v53  ;;  %7647 = vmatprep.subr.mxu0 %v5194_v63 }
 0xa0e   : > { %7577 = vmatprep.mubr.f32.mxu0 %v6046_v38  ;;  %7614 = vmatpush3.msra.mxu1 %v4941_v53  ;;  %v12429_v62 = vpop.permute.xlu0 %5379  ;;  %v12431_v15 = vpop.permute.xlu1 %5385 }
 0xa0f   : > { %7615 = vmatprep.mubr.f32.mxu1 %v6050_v33  ;;  %7648 = vmatpush3.msra.mxu0 %v5194_v63  ;;  %v12520_v37 = vsel %vm2686_vm14, %v12360_v25, %v12431_v15  ;;  %v12550_v53 = vpop.f32.mrf.mxu1  ;;  %v5662_v15 = vmul.f32 %v12070_v13, %v12070_v13 }
 0xa10   : > { %7578 = vmatmul.mubr.f32.gmra.mxu0 %v6047_v11  ;;  %7616 = vmatmul.mubr.f32.vlgmr.msra.gmra.mxu1 %v6051_v17  ;;  %v6070_v11 = vld [vmem:[%s13038_s2 + $0x340] sm:$0xff]  ;;  %v6076_v17 = vld [vmem:[%s13038_s2 + $0x370] sm:$0xff] }
 0xa11   : > { %7649 = vmatprep.subr.mxu0 %v5193_v44  ;;  %7733 = vmatprep.subr.mxu1 %v11907_v21  ;;  %v12570_v25 = vpop.f32.mrf.mxu1 }
 0xa12   : > { %7650 = vmatpush3.msra.mxu0 %v5193_v44  ;;  %7749 = vmatpush3.msra.mxu1 %v11907_v21  ;;  %v5392_v8 = vpop.permute.xlu0 %5391  ;;  %v5382_v9 = vpop.permute.xlu1 %5381 }
 0xa13   : > { %7651 = vmatprep.subr.mxu0 %v5192_v32  ;;  %7734 = vmatprep.subr.mxu1 %v12366_v27  ;;  %v12485_v28 = vsel %vm2686_vm14, %v5392_v8, %v12362_v19  ;;  %v12532_v43 = vsel %vm2686_vm14, %v12429_v62, %v5382_v9  ;;  %v6071_v19 = vld [vmem:[%s13038_s2 + $0x348] sm:$0xff]  ;;  %v12581_v44 = vpop.f32.mrf.mxu1  ;;  %v6084_v62 = vld [vmem:[%s13038_s2 + $0x3b0] sm:$0xff] }
 0xa14   : > { %7580 = vmatprep.mubr.f32.mxu0 %v6048_v4  ;;  %7618 = vmatprep.mubr.f32.mxu1 %v6052_v42  ;;  %v6072_v4 = vld [vmem:[%s13038_s2 + $0x350] sm:$0xff]  ;;  %v6078_v42 = vld [vmem:[%s13038_s2 + $0x380] sm:$0xff] }
 0xa15   : > { %7652 = vmatpush3.msra.mxu0 %v5192_v32  ;;  %7750 = vmatpush3.msra.mxu1 %v12366_v27  ;;  %v6073_v32 = vld [vmem:[%s13038_s2 + $0x358] sm:$0xff] }
 0xa16   : > { %7581 = vmatmul.mubr.f32.gmra.mxu0 %v6049_v40  ;;  %7619 = vmatmul.mubr.f32.gmra.mxu1 %v6053_v1  ;;  %v5376_v16 = vpop.permute.xlu0 %5375  ;;  %v5378_v22 = vpop.permute.xlu1 %5377  ;;  %v6079_v40 = vld [vmem:[%s13038_s2 + $0x388] sm:$0xff] }
 0xa17   : > { %7653 = vmatprep.subr.mxu0 %v5191_v36  ;;  %7735 = vmatprep.subr.mxu1 %v12394_v2  ;;  %v12541_v61 = vsel %vm2686_vm14, %v5376_v16, %v5378_v22  ;;  %v12599_v1 = vpop.f32.mrf.mxu1 }
 0xa18   : > { %7654 = vmatpush3.msra.mxu0 %v5191_v36  ;;  %7751 = vmatpush3.msra.mxu1 %v12394_v2  ;;  %v6081_v36 = vld [vmem:[%s13038_s2 + $0x398] sm:$0xff] }
 0xa19   : > { %7655 = vmatprep.subr.mxu0 %v5190_v56  ;;  %7736 = vmatprep.subr.mxu1 %v12406_v47 }
 0xa1a   : > { %7621 = vmatprep.mubr.f32.mxu1 %v6054_v54  ;;  %7656 = vmatpush3.msra.mxu0 %v5190_v56  ;;  %v5372_v6 = vpop.permute.xlu0 %5371  ;;  %v5374_v23 = vpop.permute.xlu1 %5373  ;;  %v6082_v56 = vld [vmem:[%s13038_s2 + $0x3a0] sm:$0xff] }
 0xa1b   : > { %7752 = vmatpush3.msra.mxu1 %v12406_v47  ;;  %7657 = vmatprep.subr.mxu0 %v5189_v39  ;;  %v12554_v63 = vsel %vm2686_vm14, %v5372_v6, %v5374_v23 }
 0xa1c   : > { %7622 = vmatmul.mubr.f32.gmra.mxu1 %v6055_v0  ;;  %7737 = vmatprep.subr.mxu1 %v12422_v30 }
 0xa1d   : > { %7658 = vmatpush3.msra.mxu0 %v5189_v39  ;;  %7753 = vmatpush3.msra.mxu1 %v12422_v30  ;;  %v6083_v39 = vld [vmem:[%s13038_s2 + $0x3a8] sm:$0xff] }
 0xa1e   : > { %7659 = vmatprep.subr.mxu0 %v5188_v41  ;;  %7738 = vmatprep.subr.mxu1 %v12426_v31  ;;  %v5368_v3 = vpop.permute.xlu0 %5367  ;;  %v5370_v38 = vpop.permute.xlu1 %5369 }
 0xa1f   : > { %7624 = vmatprep.mubr.f32.mxu1 %v6056_v55  ;;  %7660 = vmatpush3.msra.mxu0 %v5188_v41  ;;  %v12558_v33 = vsel %vm2686_vm14, %v5368_v3, %v5370_v38  ;;  %v6075_v41 = vld [vmem:[%s13038_s2 + $0x368] sm:$0xff] }
 0xa20   : > { %7754 = vmatpush3.msra.mxu1 %v12426_v31  ;;  %7661 = vmatprep.subr.mxu0 %v5187_v57 }
 0xa21   : > { %7625 = vmatmul.mubr.f32.gmra.mxu1 %v6057_v58  ;;  %7739 = vmatprep.subr.mxu1 %v12451_v45  ;;  %v6085_v58 = vld [vmem:[%s13038_s2 + $0x3b8] sm:$0xff] }
 0xa22   : > { %7662 = vmatpush3.msra.mxu0 %v5187_v57  ;;  %7755 = vmatpush3.msra.mxu1 %v12451_v45 }
 0xa23   : > { %7663 = vmatprep.subr.mxu0 %v5186_v20  ;;  %7740 = vmatprep.subr.mxu1 %v12461_v5 }
 0xa24   : > { %7627 = vmatprep.mubr.f32.mxu1 %v6058_v26  ;;  %7664 = vmatpush3.msra.mxu0 %v5186_v20 }
 0xa25   : > { %7665 = vmatprep.mubr.f32.mxu0 %v6062_v51  ;;  %7756 = vmatpush3.msra.mxu1 %v12461_v5 }
 0xa26   : > { %7628 = vmatmul.mubr.f32.gmra.mxu1 %v6059_v59  ;;  %7666 = vmatmul.mubr.f32.vlgmr.msra.gmra.mxu0 %v6063_v29 }
 0xa27   : > { %7683 = vmatprep.subr.mxu0 %v11907_v21  ;;  %7741 = vmatprep.subr.mxu1 %v12481_v48 }
 0xa28   : > { %7684 = vmatpush3.msra.mxu0 %v11907_v21  ;;  %7757 = vmatpush3.msra.mxu1 %v12481_v48  ;;  %v12510_v21 = vsel %vm2686_vm14, %v12268_v24, %v12389_v35  ;;  %v6067_v24 = vld [vmem:[%s13038_s2 + $0x328] sm:$0xff]  ;;  %v6074_v35 = vld [vmem:[%s13038_s2 + $0x360] sm:$0xff] }
 0xa29   : > { %7685 = vmatprep.subr.mxu0 %v12366_v27  ;;  %7742 = vmatprep.subr.mxu1 %v12485_v28 }
 0xa2a   : > { %7630 = vmatprep.mubr.f32.mxu1 %v6060_v50  ;;  %7668 = vmatprep.mubr.f32.mxu0 %v6064_v14 }
 0xa2b   : > { %7686 = vmatpush3.msra.mxu0 %v12366_v27  ;;  %7758 = vmatpush3.msra.mxu1 %v12485_v28  ;;  %v6077_v27 = vld [vmem:[%s13038_s2 + $0x378] sm:$0xff] }
 0xa2c   : > { %7631 = vmatmul.mubr.f32.gmra.mxu1 %v6061_v18  ;;  %7669 = vmatmul.mubr.f32.gmra.mxu0 %v6065_v34 }
 0xa2d   : > { %7687 = vmatprep.subr.mxu0 %v12394_v2  ;;  %7743 = vmatprep.subr.mxu1 %v12510_v21 }
 0xa2e   : > { %7688 = vmatpush3.msra.mxu0 %v12394_v2  ;;  %7759 = vmatpush3.msra.mxu1 %v12510_v21 }
 0xa2f   : > { %7689 = vmatprep.subr.mxu0 %v12406_v47  ;;  %7744 = vmatprep.subr.mxu1 %v12520_v37 }
 0xa30   : > { %7671 = vmatprep.mubr.f32.mxu0 %v6066_v49  ;;  %7690 = vmatpush3.msra.mxu0 %v12406_v47  ;;  %v12614_v47 = vpop.f32.mrf.mxu1 }
 0xa31   : > { %7760 = vmatpush3.msra.mxu1 %v12520_v37  ;;  %7672 = vmatmul.mubr.f32.gmra.mxu0 %v6067_v24 }
 0xa32   : > { %7691 = vmatprep.subr.mxu0 %v12422_v30  ;;  %7745 = vmatprep.subr.mxu1 %v12532_v43 }
 0xa33   : > { %7692 = vmatpush3.msra.mxu0 %v12422_v30  ;;  %7761 = vmatpush3.msra.mxu1 %v12532_v43 }
 0xa34   : > { %7693 = vmatprep.subr.mxu0 %v12426_v31  ;;  %7746 = vmatprep.subr.mxu1 %v12541_v61 }
 0xa35   : > { %7674 = vmatprep.mubr.f32.mxu0 %v6068_v52  ;;  %7694 = vmatpush3.msra.mxu0 %v12426_v31  ;;  %v12631_v31 = vpop.f32.mrf.mxu1 }
 0xa36   : > { %7762 = vmatpush3.msra.mxu1 %v12541_v61  ;;  %7675 = vmatmul.mubr.f32.gmra.mxu0 %v6069_v12 }
 0xa37   : > { %7695 = vmatprep.subr.mxu0 %v12451_v45  ;;  %7747 = vmatprep.subr.mxu1 %v12554_v63 }
 0xa38   : > { %7696 = vmatpush3.msra.mxu0 %v12451_v45  ;;  %7763 = vmatpush3.msra.mxu1 %v12554_v63 }
 0xa39   : > { %7697 = vmatprep.subr.mxu0 %v12461_v5  ;;  %7748 = vmatprep.subr.mxu1 %v12558_v33 }
 0xa3a   : > { %7677 = vmatprep.mubr.f32.mxu0 %v6070_v11  ;;  %7698 = vmatpush3.msra.mxu0 %v12461_v5 }
 0xa3b   : > { %7764 = vmatpush3.msra.mxu1 %v12558_v33  ;;  %7718 = vmatprep.mubr.f32.mxu1 %v6076_v17 }
 0xa3c   : > { %7678 = vmatmul.mubr.f32.gmra.mxu0 %v6071_v19  ;;  %7699 = vmatprep.subr.mxu0 %v12481_v48 }
 0xa3d   : > { %7719 = vmatmul.mubr.f32.vlgmr.msra.gmra.mxu1 %v6077_v27  ;;  %7700 = vmatpush3.msra.mxu0 %v12481_v48 }
 0xa3e   : > { %7701 = vmatprep.subr.mxu0 %v12485_v28  ;;  %7680 = vmatprep.mubr.f32.mxu0 %v6072_v4 }
 0xa3f   : > { %7702 = vmatpush3.msra.mxu0 %v12485_v28  ;;  %7721 = vmatprep.mubr.f32.mxu1 %v6078_v42 }
 0xa40   : > { %7681 = vmatmul.mubr.f32.gmra.mxu0 %v6073_v32  ;;  %7703 = vmatprep.subr.mxu0 %v12510_v21  ;;  %v7267_v2 = vpop.f32.mrf.mxu0 }
 0xa41   : > { %7722 = vmatmul.mubr.f32.gmra.mxu1 %v6079_v40  ;;  %7704 = vmatpush3.msra.mxu0 %v12510_v21  ;;  %v3587_v28 = vadd.f32 %v12550_v53, %v7267_v2 }
 0xa42   : > { %7705 = vmatprep.subr.mxu0 %v12520_v37  ;;  %7724 = vmatprep.mubr.f32.mxu1 %v6080_v7  ;;  %v3456_v54 = vpop.f32.mrf.mxu0 }
 0xa43   : > { %7706 = vmatpush3.msra.mxu0 %v12520_v37  ;;  %7715 = vmatprep.mubr.f32.mxu0 %v6074_v35  ;;  %v3582_v50 = vadd.f32 %v12570_v25, %v3456_v54 }
 0xa44   : > { %7707 = vmatprep.subr.mxu0 %v12532_v43  ;;  %5643 = vadd.xlane.f32.xlu0 %v12070_v13  ;;  %v12622_v0 = vpop.f32.mrf.mxu0  ;;  %v12654_v13 = vpop.f32.mrf.mxu1 }
 0xa45   : > { %7725 = vmatmul.mubr.f32.gmra.mxu1 %v6081_v36  ;;  %7708 = vmatpush3.msra.mxu0 %v12532_v43 }
 0xa46   : > { %7709 = vmatprep.subr.mxu0 %v12541_v61  ;;  %7727 = vmatprep.mubr.f32.mxu1 %v6082_v56  ;;  %v12629_v30 = vpop.f32.mrf.mxu0  ;;  %v12662_v8 = vpop.f32.mrf.mxu1 }
 0xa47   : > { %7710 = vmatpush3.msra.mxu0 %v12541_v61  ;;  %5641 = vadd.xlane.f32.xlu1 %v12088_v46 }
 0xa48   : > { %7711 = vmatprep.subr.mxu0 %v12554_v63  ;;  %5647 = vadd.xlane.f32.xlu0 %v12101_v60  ;;  %v12642_v55 = vpop.f32.mrf.mxu0  ;;  %v5661_v60 = vmul.f32 %v12088_v46, %v12088_v46  ;;  %v12666_v9 = vpop.f32.mrf.mxu1 }
 0xa49   : > { %7728 = vmatmul.mubr.f32.gmra.mxu1 %v6083_v39  ;;  %7712 = vmatpush3.msra.mxu0 %v12554_v63 }
 0xa4a   : > { %7713 = vmatprep.subr.mxu0 %v12558_v33  ;;  %7730 = vmatprep.mubr.f32.mxu1 %v6084_v62  ;;  %v12652_v57 = vpop.f32.mrf.mxu0  ;;  %v12670_v20 = vpop.f32.mrf.mxu1 }
 0xa4b   : > { %7714 = vmatpush3.msra.mxu0 %v12558_v33  ;;  %5645 = vadd.xlane.f32.xlu1 %v12109_v10 }
 0xa4c   : > { %7716 = vmatmul.mubr.f32.vlgmr.msra.gmra.mxu0 %v6075_v41  ;;  %5691 = vadd.xlane.f32.xlu0 %v5662_v15  ;;  %v12660_v45 = vpop.f32.mrf.mxu0  ;;  %v12674_v46 = vpop.f32.mrf.mxu1 }
 0xa4d   : > { %7731 = vmatmul.mubr.f32.gmra.mxu1 %v6085_v58 }
 0xa4e   : > { %v12664_v26 = vpop.f32.mrf.mxu0  ;;  %v3631_v59 = vpop.f32.mrf.mxu1 }
 0xa4f   : > { %5689 = vadd.xlane.f32.xlu1 %v5661_v60 }
 0xa50   : > { %v12668_v5 = vpop.f32.mrf.mxu0 }
 0xa52   : > { %v12672_v51 = vpop.f32.mrf.mxu0 }
 0xa5e   : > { %v12676_v10 = vpop.f32.mrf.mxu0 }
 0xa60   : > { %v3506_v29 = vpop.f32.mrf.mxu0 }
 0xa61   : > { %v12678_v48 = vadd.f32 %v3631_v59, %v3506_v29 }
 0xa63   : > { %v7367_v16 = vpop.f32.mrf.mxu0 }
 0xa64   : > { %v3874_v14 = vadd.f32 %v7367_v16, %v3587_v28 }
 0xa65   : > { %v3814_v22 = vpop.f32.mrf.mxu0 }
 0xa66   : > { %v3873_v18 = vadd.f32 %v3814_v22, %v3582_v50 }
 0xa68   : > { %v12682_v34 = vpop.f32.mrf.mxu0 }
 0xa6a   : > { %v12684_v21 = vpop.f32.mrf.mxu0 }
 0xa6d   : > { %v12686_v6 = vpop.f32.mrf.mxu0 }
 0xa6f   : > { %v12688_v49 = vpop.f32.mrf.mxu0 }
 0xa72   : > { %v12690_v23 = vpop.f32.mrf.mxu0 }
 0xa74   : > { %v12696_v61 = vpop.f32.mrf.mxu0 }
 0xa77   : > { %v12700_v12 = vpop.f32.mrf.mxu0 }
 0xa78   : > { %v7417_v37 = vpop.f32.mrf.mxu1 }
 0xa79   : > { %v12692_v24 = vadd.f32 %v7417_v37, %v3874_v14  ;;  %v12704_v53 = vpop.f32.mrf.mxu0 }
 0xa7a   : > { %v4059_v43 = vpop.f32.mrf.mxu1 }
 0xa7b   : > { %v12694_v52 = vadd.f32 %v4059_v43, %v3873_v18 }
 0xa7c   : > { %v12708_v33 = vpop.f32.mrf.mxu0 }
 0xa7d   : > { %13888 = vst [vmem:[#allocation119_spill] sm:$0xff] %v12694_v52 }
 0xa7e   : > { %v12712_v17 = vpop.f32.mrf.mxu0 }
 0xa7f   : > { %v12698_v3 = vpop.f32.mrf.mxu1 }
 0xa81   : > { %v12702_v38 = vpop.f32.mrf.mxu1 }
 0xa84   : > { %v12706_v63 = vpop.f32.mrf.mxu1 }
 0xa86   : > { %v12710_v11 = vpop.f32.mrf.mxu1 }
 0xa89   : > { %v12714_v25 = vpop.f32.mrf.mxu1 }
 0xa8b   : > { %v12720_v4 = vpop.f32.mrf.mxu1 }
 0xa8e   : > { %v12716_v19 = vpop.f32.mrf.mxu0  ;;  %v12724_v32 = vpop.f32.mrf.mxu1 }
 0xa90   : > { %v12718_v27 = vpop.f32.mrf.mxu0  ;;  %v12728_v7 = vpop.f32.mrf.mxu1 }
 0xa91   : > { %13889 = vst [vmem:[#allocation123_spill] sm:$0xff] %v12718_v27  ;;  %13890 = vst [vmem:[#allocation48_spill] sm:$0xff] %v12728_v7 }
 0xa94   : > { %v12722_v42 = vpop.f32.mrf.mxu0  ;;  %v12732_v2 = vpop.f32.mrf.mxu1 }
 0xa95   : > { %13891 = vst [vmem:[#allocation79_spill] sm:$0xff] %v12732_v2 }
 0xa96   : > { %v12726_v40 = vpop.f32.mrf.mxu0  ;;  %v12736_v54 = vpop.f32.mrf.mxu1 }
 0xa97   : > { %13892 = vst [vmem:[#allocation16_spill] sm:$0xff] %v12736_v54 }
 0xa9a   : > { %v12730_v35 = vpop.f32.mrf.mxu0 }
 0xa9c   : > { %v12734_v36 = vpop.f32.mrf.mxu0 }
 0xa9f   : > { %v12738_v56 = vpop.f32.mrf.mxu0 }
 0xaa1   : > { %v12744_v15 = vpop.f32.mrf.mxu0 }
 0xaa2   : > { %13895 = vst [vmem:[#allocation160_spill] sm:$0xff] %v12744_v15 }
 0xaa4   : > { %v12740_v39 = vpop.f32.mrf.mxu1  ;;  %v12748_v58 = vpop.f32.mrf.mxu0 }
 0xaa5   : > { %13893 = vst [vmem:[#allocation14_spill] sm:$0xff] %v12740_v39  ;;  %13896 = vst [vmem:[#allocation45_spill] sm:$0xff] %v12748_v58 }
 0xaa6   : > { %v12742_v62 = vpop.f32.mrf.mxu1  ;;  %v12752_v59 = vpop.f32.mrf.mxu0 }
 0xaa7   : > { %13894 = vst [vmem:[#allocation12_spill] sm:$0xff] %v12742_v62  ;;  %13897 = vst [vmem:[#allocation13_spill] sm:$0xff] %v12752_v59 }
 0xaaa   : > { %v12746_v41 = vpop.f32.mrf.mxu1  ;;  %v12756_v28 = vpop.f32.mrf.mxu0 }
 0xaab   : > { %13898 = vst [vmem:[#allocation117_spill] sm:$0xff] %v12756_v28 }
 0xaac   : > { %v12750_v60 = vpop.f32.mrf.mxu1  ;;  %v12760_v50 = vpop.f32.mrf.mxu0 }
 0xaad   : > { %13899 = vst [vmem:[#allocation88_spill] sm:$0xff] %v12760_v50 }
 0xab0   : > { %v12754_v29 = vpop.f32.mrf.mxu1 }
 0xab2   : > { %v12758_v16 = vpop.f32.mrf.mxu1 }
 0xab5   : > { %v12762_v14 = vpop.f32.mrf.mxu1 }
 0xab6   : > { %13900 = vst [vmem:[#allocation30_spill] sm:$0xff] %v12762_v14 }
 0xab7   : > { %v12768_v37 = vpop.f32.mrf.mxu1 }
 0xab8   : > { %13903 = vst [vmem:[#allocation32_spill] sm:$0xff] %v12768_v37 }
 0xaba   : > { %v12764_v22 = vpop.f32.mrf.mxu0  ;;  %v12772_v62 = vpop.f32.mrf.mxu1 }
 0xabb   : > { %13901 = vst [vmem:[#allocation61_spill] sm:$0xff] %v12764_v22  ;;  %13904 = vst [vmem:[#allocation97_spill] sm:$0xff] %v12772_v62 }
 0xabc   : > { %v12766_v18 = vpop.f32.mrf.mxu0  ;;  %v12776_v54 = vpop.f32.mrf.mxu1 }
 0xabd   : > { %13902 = vst [vmem:[#allocation81_spill] sm:$0xff] %v12766_v18  ;;  %13905 = vst [vmem:[#allocation157_spill] sm:$0xff] %v12776_v54 }
 0xac0   : > { %v12770_v43 = vpop.f32.mrf.mxu0  ;;  %v12780_v50 = vpop.f32.mrf.mxu1 }
 0xac1   : > { %13906 = vst [vmem:[#allocation120_spill] sm:$0xff] %v12780_v50 }
 0xac2   : > { %v12774_v39 = vpop.f32.mrf.mxu0  ;;  %v12784_v2 = vpop.f32.mrf.mxu1 }
 0xac3   : > { %13908 = vst [vmem:[#allocation137_spill] sm:$0xff] %v12784_v2 }
 0xac6   : > { %v12778_v28 = vpop.f32.mrf.mxu0 }
 0xac8   : > { %v12782_v59 = vpop.f32.mrf.mxu0 }
 0xac9   : > { %13907 = vst [vmem:[#allocation166_spill] sm:$0xff] %v12782_v59 }
 0xacb   : > { %v12786_v18 = vpop.f32.mrf.mxu0 }
 0xacc   : > { %13909 = vst [vmem:[#allocation28_spill] sm:$0xff] %v12786_v18 }
 0xacd   : > { %v5644_v22 = vpop.xlane.xlu0 %5643  ;;  %v12794_v54 = vpop.f32.mrf.mxu0 }
 0xace   : > { %13913 = vst [vmem:[#allocation128_spill] sm:$0xff] %v12794_v54 }
 0xad0   : > { %v12788_v37 = vpop.f32.mrf.mxu1  ;;  %v5642_v62 = vpop.xlane.xlu1 %5641 }
 0xad1   : > { %13910 = vst [vmem:[#allocation64_spill] sm:$0xff] %v12788_v37  ;;  %v12790_v58 = vpop.xlane.xlu0 %5647  ;;  %v12801_v2 = vpop.f32.mrf.mxu0 }
 0xad2   : > { %13911 = vst [vmem:[#allocation29_spill] sm:$0xff] %v12790_v58  ;;  %v12792_v27 = vpop.f32.mrf.mxu1  ;;  %13915 = vst [vmem:[#allocation62_spill] sm:$0xff] %v12801_v2 }
 0xad3   : > { %13912 = vst [vmem:[#allocation46_spill] sm:$0xff] %v12792_v27  ;;  %v12806_v58 = vpop.f32.mrf.mxu0 }
 0xad4   : > { %v12796_v52 = vpop.xlane.xlu1 %5645  ;;  %13916 = vst [vmem:[#allocation163_spill] sm:$0xff] %v12806_v58 }
 0xad5   : > { %13914 = vst [vmem:[#allocation177_spill] sm:$0xff] %v12796_v52  ;;  %v5692_v50 = vpop.xlane.xlu0 %5691 }
 0xad6   : > { %v5710_v7 = vsel %vm220_vm0, %v5644_v22, %v5692_v50  ;;  %v7620_v59 = vpop.f32.mrf.mxu1  ;;  %v12810_v54 = vpop.f32.mrf.mxu0 }
 0xad7   : > { %6115 = vst.msk [vmem:[%s8152_s11 + $0xe8] sm:$0xff] %vm2968_vm8, %v5710_v7  ;;  %13918 = vst [vmem:[#allocation171_spill] sm:$0xff] %v12810_v54  ;;  %v3592_v54 = vadd.f32 %v12599_v1, %v12629_v30 }
 0xad8   : > { %v5690_v18 = vpop.xlane.xlu1 %5689  ;;  %v5049_v14 = vpop.f32.mrf.mxu1 }
 0xad9   : > { %v5709_v37 = vsel %vm220_vm0, %v5642_v62, %v5690_v18  ;;  %v12814_v50 = vpop.f32.mrf.mxu0 }
 0xada   : > { %6114 = vst.msk [vmem:[%s8152_s11 + $0xe0] sm:$0xff] %vm2968_vm8, %v5709_v37  ;;  %13920 = vst [vmem:[#allocation77_spill] sm:$0xff] %v12814_v50  ;;  %v3597_v37 = vadd.f32 %v12581_v44, %v12622_v0  ;;  %v3602_v44 = vadd.f32 %v12631_v31, %v12652_v57 }
 0xadc   : > { %v12808_v27 = vpop.f32.mrf.mxu1  ;;  %v3876_v50 = vadd.f32 %v12682_v34, %v3597_v37  ;;  %v3877_v34 = vadd.f32 %v12688_v49, %v3602_v44  ;;  %v13932_v44 = vld [vmem:[#allocation45_spill] sm:$0xff] }
 0xadd   : > { %13917 = vst [vmem:[#allocation44_spill] sm:$0xff] %v12808_v27 }
 0xade   : > { %v12812_v52 = vpop.f32.mrf.mxu1 }
 0xadf   : > { %13919 = vst [vmem:[#allocation60_spill] sm:$0xff] %v12812_v52 }
 0xae1   : > { %v12818_v7 = vpop.f32.mrf.mxu1 }
 0xae2   : > { %13922 = vst [vmem:[#allocation172_spill] sm:$0xff] %v12818_v7 }
 0xae3   : > { %v12822_v62 = vpop.f32.mrf.mxu1 }
 0xae4   : > { %13924 = vst [vmem:[#allocation139_spill] sm:$0xff] %v12822_v62  ;;  %v4121_v62 = vadd.f32 %v12698_v3, %v3876_v50 }
 0xae6   : > { %v12816_v22 = vpop.f32.mrf.mxu0  ;;  %v12826_v27 = vpop.f32.mrf.mxu1  ;;  %v4366_v30 = vadd.f32 %v12722_v42, %v4121_v62 }
 0xae7   : > { %13921 = vst [vmem:[#allocation34_spill] sm:$0xff] %v12816_v22  ;;  %v3607_v22 = vadd.f32 %v12614_v47, %v12642_v55  ;;  %v3617_v47 = vadd.f32 %v12654_v13, %v12660_v45  ;;  %v3612_v55 = vadd.f32 %v12662_v8, %v12664_v26  ;;  %v3637_v13 = vadd.f32 %v12674_v46, %v12676_v10 }
 0xae8   : > { %v12820_v2 = vpop.f32.mrf.mxu0  ;;  %v12835_v7 = vpop.f32.mrf.mxu1  ;;  %v4611_v31 = vadd.f32 %v12746_v41, %v4366_v30  ;;  %v4122_v26 = vadd.f32 %v12710_v11, %v3877_v34  ;;  %v13934_v30 = vld [vmem:[#allocation28_spill] sm:$0xff] }
 0xae9   : > { %13923 = vst [vmem:[#allocation99_spill] sm:$0xff] %v12820_v2  ;;  %v3875_v2 = vadd.f32 %v12684_v21, %v3592_v54  ;;  %v3878_v0 = vadd.f32 %v12686_v6, %v3607_v22  ;;  %v3627_v6 = vadd.f32 %v12666_v9, %v12668_v5  ;;  %v3880_v45 = vadd.f32 %v12690_v23, %v3617_v47 }
 0xaea   : > { %v4856_v42 = vadd.f32 %v12770_v43, %v4611_v31  ;;  %v3879_v9 = vadd.f32 %v12696_v61, %v3612_v55  ;;  %v4367_v46 = vadd.f32 %v12734_v36, %v4122_v26  ;;  %v13928_v43 = vld [vmem:[#allocation44_spill] sm:$0xff] }
 0xaeb   : > { %v4120_v1 = vadd.f32 %v12702_v38, %v3875_v2  ;;  %v4123_v21 = vadd.f32 %v12706_v63, %v3878_v0  ;;  %v3622_v38 = vadd.f32 %v12670_v20, %v12672_v51  ;;  %v3882_v5 = vadd.f32 %v12700_v12, %v3627_v6  ;;  %v13935_v55 = vld [vmem:[#allocation60_spill] sm:$0xff]  ;;  %v13937_v6 = vld [vmem:[#allocation13_spill] sm:$0xff] }
 0xaec   : > { %v7670_v18 = vpop.f32.mrf.mxu0  ;;  %v12861_v8 = vpop.f32.mrf.mxu1  ;;  %v4125_v51 = vadd.f32 %v12714_v25, %v3880_v45  ;;  %v5101_v11 = vadd.f32 %v7620_v59, %v4856_v42  ;;  %v3883_v2 = vadd.f32 %v12712_v17, %v12678_v48  ;;  %v4124_v61 = vadd.f32 %v12720_v4, %v3879_v9  ;;  %v13926_v48 = vld [vmem:[#allocation30_spill] sm:$0xff]  ;;  %v13939_v26 = vld [vmem:[#allocation128_spill] sm:$0xff] }
 0xaed   : > { %v4365_v3 = vadd.f32 %v12726_v40, %v4120_v1  ;;  %v4368_v49 = vadd.f32 %v12730_v35, %v4123_v21  ;;  %v3881_v20 = vadd.f32 %v12704_v53, %v3622_v38  ;;  %v3884_v35 = vadd.f32 %v12708_v33, %v3637_v13  ;;  %v13938_v13 = vld [vmem:[#allocation97_spill] sm:$0xff]  ;;  %v13940_v42 = vld [vmem:[#allocation172_spill] sm:$0xff] }
 0xaee   : > { %v5294_v58 = vpop.f32.mrf.mxu0  ;;  %v4370_v12 = vadd.f32 %v12738_v56, %v4125_v51  ;;  %v12879_v53 = vpop.f32.mrf.mxu1  ;;  %v4612_v25 = vadd.f32 %v12758_v16, %v4367_v46  ;;  %v5346_v41 = vadd.f32 %v7670_v18, %v5101_v11  ;;  %v4364_v33 = vadd.f32 %v12716_v19, %v12692_v24  ;;  %v13927_v56 = vld [vmem:[#allocation166_spill] sm:$0xff]  ;;  %v13930_v18 = vld [vmem:[#allocation119_spill] sm:$0xff]  ;;  %v13933_v19 = vld [vmem:[#allocation32_spill] sm:$0xff] }
 0xaef   : > { %v4610_v63 = vadd.f32 %v12750_v60, %v4365_v3  ;;  %v4613_v10 = vadd.f32 %v12754_v29, %v4368_v49  ;;  %v13925_v60 = vld [vmem:[#allocation160_spill] sm:$0xff]  ;;  %v13936_v3 = vld [vmem:[#allocation79_spill] sm:$0xff] }
 0xaf0   : > { %v4369_v59 = vadd.f32 %v13925_v60, %v4124_v61  ;;  %v4615_v17 = vadd.f32 %v13926_v48, %v4370_v12  ;;  %v4857_v29 = vadd.f32 %v13927_v56, %v4612_v25  ;;  %v4129_v31 = vadd.f32 %v13936_v3, %v3884_v35  ;;  %v13941_v46 = vld [vmem:[#allocation16_spill] sm:$0xff]  ;;  %v13943_v35 = vld [vmem:[#allocation157_spill] sm:$0xff]  ;;  %v13944_v12 = vld [vmem:[#allocation62_spill] sm:$0xff] }
 0xaf1   : > { %v7673_v52 = vpop.f32.mrf.mxu0  ;;  %v4855_v23 = vadd.f32 %v12774_v39, %v4610_v63  ;;  %v4858_v36 = vadd.f32 %v12778_v28, %v4613_v10  ;;  %v4127_v39 = vadd.f32 %v12724_v32, %v3882_v5  ;;  %v13931_v32 = vld [vmem:[#allocation123_spill] sm:$0xff]  ;;  %v4128_v10 = vadd.f32 %v13941_v46, %v3883_v2  ;;  %v13946_v60 = vld [vmem:[#allocation14_spill] sm:$0xff]  ;;  %v13947_v48 = vld [vmem:[#allocation88_spill] sm:$0xff] }
 0xaf2   : > { %v4363_v37 = vadd.f32 %v13931_v32, %v13930_v18  ;;  %v4614_v0 = vadd.f32 %v13933_v19, %v4369_v59  ;;  %v4860_v47 = vadd.f32 %v13934_v30, %v4615_v17  ;;  %v5102_v34 = vadd.f32 %v13935_v55, %v4857_v29  ;;  %v13948_v17 = vld [vmem:[#allocation120_spill] sm:$0xff]  ;;  %v13949_v56 = vld [vmem:[#allocation163_spill] sm:$0xff] }
 0xaf3   : > { %v12837_v15 = vpop.f32.mrf.mxu0  ;;  %v5100_v54 = vadd.f32 %v5049_v14, %v4855_v23  ;;  %v5103_v50 = vadd.f32 %v13928_v43, %v4858_v36  ;;  %v13929_v14 = vld [vmem:[#allocation48_spill] sm:$0xff]  ;;  %v4372_v24 = vadd.f32 %v13932_v44, %v4127_v39  ;;  %v13942_v23 = vld [vmem:[#allocation117_spill] sm:$0xff]  ;;  %v4609_v59 = vadd.f32 %v13946_v60, %v4364_v33 }
 0xaf4   : > { %v4126_v62 = vadd.f32 %v13929_v14, %v3881_v20  ;;  %v4859_v49 = vadd.f32 %v13939_v26, %v4614_v0  ;;  %v5105_v9 = vadd.f32 %v13940_v42, %v4860_v47  ;;  %v5347_v5 = vadd.f32 %v12837_v15, %v5102_v34  ;;  %v13950_v18 = vld [vmem:[#allocation12_spill] sm:$0xff]  ;;  %v13951_v44 = vld [vmem:[#allocation61_spill] sm:$0xff]  ;;  %v13953_v0 = vld [vmem:[#allocation171_spill] sm:$0xff] }
 0xaf5   : > { %v5345_v16 = vadd.f32 %v5294_v58, %v5100_v54  ;;  %v5348_v21 = vadd.f32 %v7673_v52, %v5103_v50  ;;  %v4617_v45 = vadd.f32 %v13938_v13, %v4372_v24  ;;  %v4374_v11 = vadd.f32 %v13942_v23, %v4129_v31  ;;  %v13945_v54 = vld [vmem:[#allocation139_spill] sm:$0xff]  ;;  %v13952_v33 = vld [vmem:[#allocation137_spill] sm:$0xff]  ;;  %v13955_v34 = vld [vmem:[#allocation64_spill] sm:$0xff] }
 0xaf6   : > { %v12852_v57 = vpop.f32.mrf.mxu0  ;;  %v4371_v38 = vadd.f32 %v13937_v6, %v4126_v62  ;;  %v4373_v2 = vadd.f32 %v13947_v48, %v4128_v10  ;;  %v4608_v32 = vadd.f32 %v13950_v18, %v4363_v37  ;;  %v4854_v24 = vadd.f32 %v13951_v44, %v4609_v59  ;;  %v13958_v26 = vld [vmem:[#allocation34_spill] sm:$0xff]  ;;  %v7830_v59 = vld [vmem:[%s8062_s20 + $0xf0] sm:$0xff] }
 0xaf7   : > { %v4862_v25 = vadd.f32 %v13944_v12, %v4617_v45  ;;  %v5350_v39 = vadd.f32 %v12852_v57, %v5105_v9  ;;  %v5663_v48 = vmul.f32 %v7830_v59, %v7830_v59 }
 0xaf8   : > { %v5314_v40 = vpop.f32.mrf.mxu0  ;;  %v4616_v61 = vadd.f32 %v13943_v35, %v4371_v38  ;;  %v4618_v19 = vadd.f32 %v13952_v33, %v4373_v2  ;;  %v5099_v37 = vadd.f32 %v13955_v34, %v4854_v24 }
 0xaf9   : > { %v5107_v50 = vadd.f32 %v12826_v27, %v4862_v25 }
 0xafa   : > { %v4861_v29 = vadd.f32 %v13949_v56, %v4616_v61 }
 0xafc   : > { %v7679_v22 = vpop.f32.mrf.mxu0  ;;  %v5106_v47 = vadd.f32 %v12835_v7, %v4861_v29 }
 0xafd   : > { %v7720_v4 = vpop.f32.mrf.mxu1  ;;  %v5352_v55 = vadd.f32 %v7679_v22, %v5107_v50  ;;  %v13957_v22 = vld [vmem:[#allocation46_spill] sm:$0xff] }
 0xafe   : > { %v5591_v28 = vadd.f32 %v7720_v4, %v5346_v41  ;;  %v5324_v20 = vpop.f32.mrf.mxu0  ;;  %v5104_v41 = vadd.f32 %v13945_v54, %v4859_v49  ;;  %v4619_v4 = vadd.f32 %v13948_v17, %v4374_v11  ;;  %v5344_v49 = vadd.f32 %v13958_v26, %v5099_v37  ;;  %v7831_v17 = vld [vmem:[%s8062_s20 + $0xf8] sm:$0xff] }
 0xaff   : > { %v5539_v1 = vpop.f32.mrf.mxu1  ;;  %v5351_v6 = vadd.f32 %v5324_v20, %v5106_v47  ;;  %v13959_v20 = vld [vmem:[#allocation99_spill] sm:$0xff] }
 0xb00   : > { %6089 = vst [vmem:[%s8062_s20 + $0x98] sm:$0xff] %v5591_v28  ;;  %v5590_v58 = vadd.f32 %v5539_v1, %v5345_v16  ;;  %5623 = vadd.xlane.f32.xlu0 %v5591_v28  ;;  %v5349_v16 = vadd.f32 %v5314_v40, %v5104_v41  ;;  %v7682_v14 = vpop.f32.mrf.mxu0  ;;  %v5652_v62 = vmul.f32 %v5591_v28, %v5591_v28  ;;  %v13954_v40 = vld [vmem:[#allocation81_spill] sm:$0xff] }
 0xb01   : > { %v7723_v63 = vpop.f32.mrf.mxu1  ;;  %v4864_v1 = vadd.f32 %v13953_v0, %v4619_v4  ;;  %v4853_v28 = vadd.f32 %v13954_v40, %v4608_v32  ;;  %v5664_v4 = vmul.f32 %v7831_v17, %v7831_v17 }
 0xb02   : > { %6088 = vst [vmem:[%s8062_s20 + $0x90] sm:$0xff] %v5590_v58  ;;  %v5593_v52 = vadd.f32 %v7723_v63, %v5348_v21  ;;  %v5651_v51 = vmul.f32 %v5590_v58, %v5590_v58  ;;  %v13956_v21 = vld [vmem:[#allocation77_spill] sm:$0xff]  ;;  %v5334_v38 = vpop.f32.mrf.mxu0 }
 0xb03   : > { %v5549_v36 = vpop.f32.mrf.mxu1  ;;  %v5109_v31 = vadd.f32 %v12861_v8, %v4864_v1  ;;  %v5098_v45 = vadd.f32 %v13957_v22, %v4853_v28 }
 0xb04   : > { %6091 = vst [vmem:[%s8062_s20 + $0xa8] sm:$0xff] %v5593_v52  ;;  %v5592_v15 = vadd.f32 %v5549_v36, %v5347_v5  ;;  %5621 = vadd.xlane.f32.xlu0 %v5590_v58  ;;  %5669 = vadd.xlane.f32.xlu1 %v5651_v51  ;;  %v4863_v58 = vadd.f32 %v13956_v21, %v4618_v19 }
 0xb05   : > { %v7726_v43 = vpop.f32.mrf.mxu1  ;;  %v5354_v9 = vadd.f32 %v7682_v14, %v5109_v31  ;;  %v5343_v51 = vadd.f32 %v13959_v20, %v5098_v45  ;;  %v5654_v61 = vmul.f32 %v5593_v52, %v5593_v52 }
 0xb06   : > { %6090 = vst [vmem:[%s8062_s20 + $0xa0] sm:$0xff] %v5592_v15  ;;  %v5595_v57 = vadd.f32 %v7726_v43, %v5350_v39  ;;  %v5653_v7 = vmul.f32 %v5592_v15, %v5592_v15  ;;  %v5108_v42 = vadd.f32 %v12879_v53, %v4863_v58 }
 0xb07   : > { %v5559_v30 = vpop.f32.mrf.mxu1 }
 0xb08   : > { %6093 = vst [vmem:[%s8062_s20 + $0xb8] sm:$0xff] %v5595_v57  ;;  %v5594_v27 = vadd.f32 %v5559_v30, %v5349_v16  ;;  %5671 = vadd.xlane.f32.xlu0 %v5652_v62  ;;  %5625 = vadd.xlane.f32.xlu1 %v5592_v15  ;;  %v5353_v23 = vadd.f32 %v5334_v38, %v5108_v42 }
 0xb09   : > { %v7729_v3 = vpop.f32.mrf.mxu1  ;;  %v5656_v54 = vmul.f32 %v5595_v57, %v5595_v57 }
 0xb0a   : > { %6092 = vst [vmem:[%s8062_s20 + $0xb0] sm:$0xff] %v5594_v27  ;;  %v5597_v13 = vadd.f32 %v7729_v3, %v5352_v55  ;;  %v5655_v36 = vmul.f32 %v5594_v27, %v5594_v27 }
 0xb0b   : > { %v5569_v63 = vpop.f32.mrf.mxu1 }
 0xb0c   : > { %6095 = vst [vmem:[%s8062_s20 + $0xc8] sm:$0xff] %v5597_v13  ;;  %v5596_v5 = vadd.f32 %v5569_v63, %v5351_v6  ;;  %5627 = vadd.xlane.f32.xlu0 %v5593_v52  ;;  %5673 = vadd.xlane.f32.xlu1 %v5653_v7  ;;  %v7717_v8 = vpop.f32.mrf.mxu0  ;;  %v5658_v52 = vmul.f32 %v5597_v13, %v5597_v13 }
 0xb0d   : > { %v5589_v46 = vadd.f32 %v7717_v8, %v5344_v49  ;;  %v7732_v10 = vpop.f32.mrf.mxu1 }
 0xb0e   : > { %6094 = vst [vmem:[%s8062_s20 + $0xc0] sm:$0xff] %v5596_v5  ;;  %v5599_v11 = vadd.f32 %v7732_v10, %v5354_v9  ;;  %v5529_v35 = vpop.f32.mrf.mxu0  ;;  %v5657_v41 = vmul.f32 %v5596_v5, %v5596_v5 }
 0xb0f   : > { %6087 = vst [vmem:[%s8062_s20 + $0x88] sm:$0xff] %v5589_v46  ;;  %v5588_v53 = vadd.f32 %v5529_v35, %v5343_v51  ;;  %v5579_v12 = vpop.f32.mrf.mxu1  ;;  %v5650_v2 = vmul.f32 %v5589_v46, %v5589_v46 }
 0xb10   : > { %6097 = vst [vmem:[%s8062_s20 + $0xd8] sm:$0xff] %v5599_v11  ;;  %v5598_v25 = vadd.f32 %v5579_v12, %v5353_v23  ;;  %5675 = vadd.xlane.f32.xlu0 %v5654_v61  ;;  %5629 = vadd.xlane.f32.xlu1 %v5594_v27  ;;  %v5660_v15 = vmul.f32 %v5599_v11, %v5599_v11 }
 0xb11   : > { %6086 = vst [vmem:[%s8062_s20 + $0x80] sm:$0xff] %v5588_v53  ;;  %v5649_v60 = vmul.f32 %v5588_v53, %v5588_v53 }
 0xb12   : > { %6096 = vst [vmem:[%s8062_s20 + $0xd0] sm:$0xff] %v5598_v25  ;;  %v5659_v39 = vmul.f32 %v5598_v25, %v5598_v25  ;;  %s7836_s20 = sshll.u32 %s7909_s19, 4  ;;  %s7837_s20 = int_to_ptr.vmem [resolvable:$false] %s7836_s20 }
 0xb13   : > { %s7838_s7 = scalar_lea.vmem %s7837_s20, 8192  ;;  %p7839_p0 = scmp.lt.s32.totalorder %s12948_s9, %s7837_s20 }
 0xb14   : > { %5631 = vadd.xlane.f32.xlu0 %v5595_v57  ;;  %5677 = vadd.xlane.f32.xlu1 %v5655_v36  ;;  %p7840_p1 = scmp.lt.s32.totalorder %s7838_s7, %s7832_s22 }
 0xb16   : > { %p7841_p2 = por %p7840_p1, %p7839_p0 }
 0xb18   : > { %5679 = vadd.xlane.f32.xlu0 %v5656_v54  ;;  %5633 = vadd.xlane.f32.xlu1 %v5596_v5  ;;  %p7842_p3 = pnand %p7841_p2, %p7835_p13 }
 0xb1c   : > { %5635 = vadd.xlane.f32.xlu0 %v5597_v13  ;;  %5681 = vadd.xlane.f32.xlu1 %v5657_v41 }
 0xb20   : > { %5683 = vadd.xlane.f32.xlu0 %v5658_v52  ;;  %5637 = vadd.xlane.f32.xlu1 %v5598_v25 }
 0xb24   : > { %5639 = vadd.xlane.f32.xlu0 %v5599_v11  ;;  %5685 = vadd.xlane.f32.xlu1 %v5659_v39 }
 0xb28   : > { %5687 = vadd.xlane.f32.xlu0 %v5660_v15  ;;  %5619 = vadd.xlane.f32.xlu1 %v5589_v46 }
 0xb2c   : > { %5617 = vadd.xlane.f32.xlu0 %v5588_v53  ;;  %5665 = vadd.xlane.f32.xlu1 %v5649_v60 }
 0xb30   : > { %5667 = vadd.xlane.f32.xlu0 %v5650_v2  ;;  %5693 = vadd.xlane.f32.xlu1 %v5663_v48 }
 0xb34   : > { %5695 = vadd.xlane.f32.xlu0 %v5664_v4 }
 0xb35   : > { %7845 = shalt.err (!%p7842_p3)
}
 0xb36   : > { %s7846_s5 = scalar_lea.hbm %s12946_s29, 4096  ;;  %s7850_s6 = scalar_lea.hbm %s13039_s3, 8192 }
 0xb37   : > { %p7847_p4 = scmp.ne.s32.totalorder %s12946_s29, %s7846_s5  ;;  %p7851_p9 = scmp.lt.s32.totalorder %s12946_s29, %s13039_s3 }
 0xb38   : > { %p7852_p10 = scmp.lt.s32.totalorder %s7850_s6, %s7846_s5 }
 0xb39   : > { %p7848_p7 = pnand %p7847_p4, %p7975_p5 }
 0xb3a   : > { %p7853_p11 = por %p7852_p10, %p7851_p9 }
 0xb3b   : > { %p7849_p8 = pneg %p7848_p7 }
 0xb3d   : > { %p7854_p12 = pnand %p7853_p11, %p7849_p8 }
 0xb3f   : > { %7857 = shalt.err (!%p7854_p12)
}
 0xb40   : > { %s7910_s14 = smov 128   ;;  %s7911_s8 = smov 8   ;;  %v13961_v42 = vld [vmem:[#allocation177_spill] sm:$0xff] }
 0xb41   : > { %7765 = dma.vmem_to_hbm [thread:$0]  (%p7975_p5), %s12948_s9, 4096, %s12946_s29, %s12952_s23, %s7910_s14, %s7910_s14, %s7911_s8   ;;  %v13962_v8 = vld [vmem:[#allocation29_spill] sm:$0xff] }
 0xb89   : > { %v5624_v56 = vpop.xlane.xlu0 %5623 }
 0xb8d   : > { %v5622_v29 = vpop.xlane.xlu0 %5621  ;;  %v5670_v43 = vpop.xlane.xlu1 %5669 }
 0xb8e   : > { %v5699_v50 = vsel %vm220_vm0, %v5622_v29, %v5670_v43 }
 0xb8f   : > { %6104 = vst.msk [vmem:[%s8152_s11 + $0x90] sm:$0xff] %vm2968_vm8, %v5699_v50 }
 0xb91   : > { %v5672_v16 = vpop.xlane.xlu0 %5671  ;;  %v5626_v14 = vpop.xlane.xlu1 %5625 }
 0xb92   : > { %v5700_v57 = vsel %vm220_vm0, %v5624_v56, %v5672_v16 }
 0xb93   : > { %6105 = vst.msk [vmem:[%s8152_s11 + $0x98] sm:$0xff] %vm2968_vm8, %v5700_v57 }
 0xb95   : > { %v5628_v62 = vpop.xlane.xlu0 %5627  ;;  %v5674_v18 = vpop.xlane.xlu1 %5673 }
 0xb96   : > { %v5701_v32 = vsel %vm220_vm0, %v5626_v14, %v5674_v18 }
 0xb97   : > { %6106 = vst.msk [vmem:[%s8152_s11 + $0xa0] sm:$0xff] %vm2968_vm8, %v5701_v32 }
 0xb99   : > { %v5676_v44 = vpop.xlane.xlu0 %5675  ;;  %v5630_v24 = vpop.xlane.xlu1 %5629 }
 0xb9a   : > { %v5702_v33 = vsel %vm220_vm0, %v5628_v62, %v5676_v44 }
 0xb9b   : > { %6107 = vst.msk [vmem:[%s8152_s11 + $0xa8] sm:$0xff] %vm2968_vm8, %v5702_v33 }
 0xb9d   : > { %v5632_v19 = vpop.xlane.xlu0 %5631  ;;  %v5678_v0 = vpop.xlane.xlu1 %5677 }
 0xb9e   : > { %v5703_v1 = vsel %vm220_vm0, %v5630_v24, %v5678_v0 }
 0xb9f   : > { %6108 = vst.msk [vmem:[%s8152_s11 + $0xb0] sm:$0xff] %vm2968_vm8, %v5703_v1 }
 0xba1   : > { %v5680_v30 = vpop.xlane.xlu0 %5679  ;;  %v5634_v47 = vpop.xlane.xlu1 %5633 }
 0xba2   : > { %v5704_v55 = vsel %vm220_vm0, %v5632_v19, %v5680_v30 }
 0xba3   : > { %6109 = vst.msk [vmem:[%s8152_s11 + $0xb8] sm:$0xff] %vm2968_vm8, %v5704_v55 }
 0xba5   : > { %v5636_v27 = vpop.xlane.xlu0 %5635  ;;  %v5682_v40 = vpop.xlane.xlu1 %5681 }
 0xba6   : > { %v5705_v28 = vsel %vm220_vm0, %v5634_v47, %v5682_v40 }
 0xba7   : > { %6110 = vst.msk [vmem:[%s8152_s11 + $0xc0] sm:$0xff] %vm2968_vm8, %v5705_v28 }
 0xba9   : > { %v5684_v34 = vpop.xlane.xlu0 %5683  ;;  %v5638_v37 = vpop.xlane.xlu1 %5637 }
 0xbaa   : > { %v5706_v21 = vsel %vm220_vm0, %v5636_v27, %v5684_v34 }
 0xbab   : > { %6111 = vst.msk [vmem:[%s8152_s11 + $0xc8] sm:$0xff] %vm2968_vm8, %v5706_v21 }
 0xbad   : > { %v5640_v58 = vpop.xlane.xlu0 %5639  ;;  %v5686_v3 = vpop.xlane.xlu1 %5685 }
 0xbae   : > { %v5707_v31 = vsel %vm220_vm0, %v5638_v37, %v5686_v3 }
 0xbaf   : > { %6112 = vst.msk [vmem:[%s8152_s11 + $0xd0] sm:$0xff] %vm2968_vm8, %v5707_v31 }
 0xbb1   : > { %v5688_v6 = vpop.xlane.xlu0 %5687  ;;  %v5620_v38 = vpop.xlane.xlu1 %5619 }
 0xbb2   : > { %v5708_v13 = vsel %vm220_vm0, %v5640_v58, %v5688_v6 }
 0xbb3   : > { %6113 = vst.msk [vmem:[%s8152_s11 + $0xd8] sm:$0xff] %vm2968_vm8, %v5708_v13 }
 0xbb5   : > { %v5618_v7 = vpop.xlane.xlu0 %5617  ;;  %v5666_v22 = vpop.xlane.xlu1 %5665 }
 0xbb6   : > { %v5697_v45 = vsel %vm220_vm0, %v5618_v7, %v5666_v22 }
 0xbb7   : > { %6102 = vst.msk [vmem:[%s8152_s11 + $0x80] sm:$0xff] %vm2968_vm8, %v5697_v45 }
 0xbb9   : > { %v5668_v26 = vpop.xlane.xlu0 %5667  ;;  %v5694_v49 = vpop.xlane.xlu1 %5693 }
 0xbba   : > { %v5698_v63 = vsel %vm220_vm0, %v5620_v38, %v5668_v26  ;;  %v5711_v9 = vsel %vm220_vm0, %v13961_v42, %v5694_v49 }
 0xbbb   : > { %6103 = vst.msk [vmem:[%s8152_s11 + $0x88] sm:$0xff] %vm2968_vm8, %v5698_v63  ;;  %6116 = vst.msk [vmem:[%s8152_s11 + $0xf0] sm:$0xff] %vm2968_vm8, %v5711_v9 }
 0xbbd   : > { %v5696_v5 = vpop.xlane.xlu0 %5695 }
 0xbbe   : > { %v5712_v20 = vsel %vm220_vm0, %v13962_v8, %v5696_v5 }
 0xbbf   : > { %6117 = vst.msk [vmem:[%s8152_s11 + $0xf8] sm:$0xff] %vm2968_vm8, %v5712_v20 }
 0xbc0 PF: > { %p7771_p5 = scmp.ge.s32.totalorder %s7892_s18, 2  ;;  %s5770_s25 = sand.u32 1, %s7880_s15  }
 0xbc1   : > { %s5771_s9 = scalar_lea.sflag [#allocation4], %s5770_s25 }
 0xbc2   : > { %p7768_p13 = pnand %p7771_p5, %p7979_p6 }
 0xbc4   : > { %p7769_p0 = pneg %p7768_p13 }
 0xbc6   : > { %7875 = dma.done.wait (%p7769_p0), %s5771_s9, 4096  }
 0xbc7   : > { %7877 = vsyncadd (%p7769_p0), %s5771_s9, 4294963200  ;;  %p15_p1 = scmp.ge.s32.totalorder %s7962_s21, 4   ;;  %s13963_s15 = smov %s7884_s16 }
 0xbc8   : > { %s13964_s16 = smov %s7888_s17  ;;  %s13965_s17 = smov %s7973_s24 }
 0xbc9   : > { %s13966_s18 = smov %s7962_s21  ;;  %17 = sbr.rel (!%p15_p1) target bundleno = 3 (0x3), region = 91 }
 0xbce   :  { %5785 = vsyncpa [#allocation4], 1 }
 0xbcf   :  { %5787 = vsyncpa [#allocation4 + $0x1], 1 }

</bundles_post_ra>
